<compile_context>
chip_gen: v7x
topology: tpu7x:2x2x1
jax: 0.10.0
libtpu: 0.0.40
codegen_flags: <defaults>
</compile_context>

<pallas_src>
import math

import jax
import jax.numpy as jnp
from jax.experimental import pallas as pl
from jax.experimental.pallas import tpu as pltpu

# ---- module hyper-parameters (PyTorch defaults) -----------------------------
OBS_LEN = 20
DIM_INPUT = OBS_LEN * 2          # 40
NUM_OUTPUTS = 3                  # multimodality (PMA seeds)
PRED_LEN = 30
DIM_OUTPUT = PRED_LEN * 2        # 60
NUM_INDS = 8                     # ISAB inducing points
DIM_HIDDEN = 64
NUM_HEADS = 4
DIM_HEAD = DIM_HIDDEN // NUM_HEADS   # 16

# ---- static slab layout ------------------------------------------------------
# MABs in execution order: ISAB0.mab0, ISAB0.mab1, ISAB1.mab0, ISAB1.mab1, PMA, SAB
NUM_MABS = 6
MAB_DQ = (DIM_HIDDEN, DIM_INPUT, DIM_HIDDEN, DIM_HIDDEN, DIM_HIDDEN, DIM_HIDDEN)
MAB_DK = (DIM_INPUT, DIM_HIDDEN, DIM_HIDDEN, DIM_HIDDEN, DIM_HIDDEN, DIM_HIDDEN)


def _prefix_offsets(sizes):
    offs, cur = [], 0
    for s in sizes:
        offs.append(cur)
        cur += s
    return offs, cur


KV_OFFS, _KV_TOTAL = _prefix_offsets(MAB_DK)            # [0,40,104,168,232,296]
WOUT_OFF = _KV_TOTAL                                    # 360
W128_ROWS = WOUT_OFF + DIM_HIDDEN                       # 424
Q_OFFS, _Q_TOTAL = _prefix_offsets(MAB_DQ)              # [0,64,104,168,232,296]
O_OFFS = [_Q_TOTAL + DIM_HIDDEN * i for i in range(NUM_MABS)]
I0_OFF = _Q_TOTAL + DIM_HIDDEN * NUM_MABS               # 744
I1_OFF = I0_OFF + NUM_INDS                              # 752
S_OFF = I1_OFF + NUM_INDS                               # 760
W64_ROWS = S_OFF + 8                                    # 768 (seeds padded to 8 rows)
BIAS_ROWS = 16
BOUT_ROW = 2 * NUM_MABS                                 # 12
CONF_LANE = DIM_OUTPUT                                  # 60


# ---- shared small math --------------------------------------------------------
def _softmax_last(x):
    m = jnp.max(x, axis=-1, keepdims=True)
    e = jnp.exp(x - m)
    return e / jnp.sum(e, axis=-1, keepdims=True)


# ---- Pallas kernel -------------------------------------------------------------
def _traj_kernel(x_ref, w128_ref, w64_ref, bias_ref, out_ref):
    X = x_ref[...]                                       # (G, N, DIM_INPUT)
    G = X.shape[0]

    def project(x3, w, b):
        """(G, n, d) @ (d, f) + b -> (G, n, f).
        Uses one big flat 2-D matmul when the row count is sublane-aligned,
        otherwise a group-batched dot (tiny n, e.g. the 3 PMA seeds)."""
        g, n, d = x3.shape
        f = w.shape[-1]
        if n % 8 == 0:
            y = jnp.dot(x3.reshape(g * n, d), w,
                        preferred_element_type=jnp.float32) + b
            return y.reshape(g, n, f)
        wb = jnp.broadcast_to(w, (g,) + w.shape)
        y = jax.lax.dot_general(x3, wb, (((2,), (1,)), ((0,), (0,))),
                                preferred_element_type=jnp.float32)
        return y + b

    def mab(i, Q, K):
        """Set-Transformer MAB, batched over the group axis.
        Q: (nq, dq) shared across groups, or (G, nq, dq).  K: (G, nk, dk)."""
        dq, dk = MAB_DQ[i], MAB_DK[i]
        # point-of-use weight loads from the packed slabs (static offsets)
        wq = w64_ref[pl.ds(Q_OFFS[i], dq), :]
        wo = w64_ref[pl.ds(O_OFFS[i], DIM_HIDDEN), :]
        wkv = w128_ref[pl.ds(KV_OFFS[i], dk), :]                       # [Wk | Wv]
        bq = bias_ref[pl.ds(i, 1), pl.ds(0, DIM_HIDDEN)]               # (1, 64)
        bo = bias_ref[pl.ds(i, 1), pl.ds(DIM_HIDDEN, DIM_HIDDEN)]      # (1, 64)
        bkv = bias_ref[pl.ds(NUM_MABS + i, 1), :]                      # (1, 128)

        KV = project(K, wkv, bkv)                        # (G, nk, 128) fused K/V proj
        Kp = KV[..., :DIM_HIDDEN]
        Vp = KV[..., DIM_HIDDEN:]

        if Q.ndim == 2:                                  # shared inducing points / seeds
            nq = Q.shape[0]
            Qp = jnp.dot(Q, wq, preferred_element_type=jnp.float32) + bq
            Qp = jnp.broadcast_to(Qp, (G, nq, DIM_HIDDEN))
        else:
            Qp = project(Q, wq, bq)                      # (G, nq, 64)

        scale = 1.0 / math.sqrt(DIM_HIDDEN)              # original repo scales by sqrt(dim_V)
        heads = []
        for h in range(NUM_HEADS):
            sl = slice(h * DIM_HEAD, (h + 1) * DIM_HEAD)
            Qh, Kh, Vh = Qp[..., sl], Kp[..., sl], Vp[..., sl]
            s = jax.lax.dot_general(Qh, Kh, (((2,), (2,)), ((0,), (0,))),
                                    preferred_element_type=jnp.float32) * scale
            A = _softmax_last(s)
            heads.append(Qh + jax.lax.dot_general(A, Vh, (((2,), (1,)), ((0,), (0,))),
                                                  preferred_element_type=jnp.float32))
        O = jnp.concatenate(heads, axis=-1)              # (G, nq, 64)
        ff = project(O, wo, bo)
        return O + jnp.maximum(ff, 0.0)

    I0 = w64_ref[pl.ds(I0_OFF, NUM_INDS), :]
    I1 = w64_ref[pl.ds(I1_OFF, NUM_INDS), :]
    S = w64_ref[pl.ds(S_OFF, NUM_OUTPUTS), :]

    # encoder: ISAB(DIM_INPUT->DIM_HIDDEN), ISAB(DIM_HIDDEN->DIM_HIDDEN)
    H = mab(0, I0, X)                                    # (G, 8, 64)
    X1 = mab(1, X, H)                                    # (G, N, 64)
    H2 = mab(2, I1, X1)                                  # (G, 8, 64)
    X2 = mab(3, X1, H2)                                  # (G, N, 64)
    # decoder: PMA (seeds attend to agents), SAB over the seeds
    P = mab(4, S, X2)                                    # (G, 3, 64)
    P2 = mab(5, P, P)                                    # (G, 3, 64)

    # fused regressor + confidence head: lanes [0:60]=coords, lane 60=confidence logit
    w_out = w128_ref[pl.ds(WOUT_OFF, DIM_HIDDEN), :]     # (64, 128)
    b_out = bias_ref[pl.ds(BOUT_ROW, 1), :]              # (1, 128)
    head = project(P2, w_out, b_out)                     # (G, 3, 128)

    logits = head[:, :, CONF_LANE:CONF_LANE + 1]         # (G, 3, 1)
    m = jnp.max(logits, axis=1, keepdims=True)
    e = jnp.exp(logits - m)
    conf = e / jnp.sum(e, axis=1, keepdims=True)         # softmax over the 3 modes
    lane = jax.lax.broadcasted_iota(jnp.int32, head.shape, 2)
    out_ref[...] = jnp.where(lane == CONF_LANE, conf, head)   # single lane-dense store


# ---- host-side parameter packing ----------------------------------------------
def pack_params(params):
    p = list(params)
    I0, mab00, mab01 = p[0], p[1:9], p[9:17]
    I1, mab10, mab11 = p[17], p[18:26], p[26:34]
    S, pma, sab = p[34], p[35:43], p[43:51]
    Wr, br, Wc, bc = p[51], p[52], p[53], p[54]
    mabs = [mab00, mab01, mab10, mab11, pma, sab]        # [Wq,bq,Wk,bk,Wv,bv,Wo,bo]

    # 128-wide slab: fused [Wk|Wv] per MAB, then fused output head [Wr | Wc | 0]
    kv_blocks = [jnp.concatenate([m[2], m[4]], axis=1) for m in mabs]
    w_out = jnp.zeros((DIM_HIDDEN, 128), jnp.float32)
    w_out = w_out.at[:, :DIM_OUTPUT].set(Wr)
    w_out = w_out.at[:, CONF_LANE].set(Wc[:, 0])
    w128 = jnp.concatenate(kv_blocks + [w_out], axis=0).astype(jnp.float32)

    # 64-wide slab: Wq blocks, Wo blocks, inducing points, seeds (padded to 8 rows)
    seeds_pad = jnp.zeros((8, DIM_HIDDEN), jnp.float32).at[:NUM_OUTPUTS].set(S)
    w64 = jnp.concatenate([m[0] for m in mabs] + [m[6] for m in mabs]
                          + [I0, I1, seeds_pad], axis=0).astype(jnp.float32)

    # bias slab (16, 128)
    bias = jnp.zeros((BIAS_ROWS, 128), jnp.float32)
    for i, m in enumerate(mabs):
        bias = bias.at[i, :DIM_HIDDEN].set(m[1][0])                  # bq
        bias = bias.at[i, DIM_HIDDEN:2 * DIM_HIDDEN].set(m[7][0])    # bo
        bias = bias.at[NUM_MABS + i, :DIM_HIDDEN].set(m[3][0])       # bk
        bias = bias.at[NUM_MABS + i, DIM_HIDDEN:2 * DIM_HIDDEN].set(m[5][0])  # bv
    bias = bias.at[BOUT_ROW, :DIM_OUTPUT].set(br[0])
    bias = bias.at[BOUT_ROW, CONF_LANE].set(bc[0, 0])

    assert w128.shape == (W128_ROWS, 128)
    assert w64.shape == (W64_ROWS, DIM_HIDDEN)
    return w128, w64, bias


# ---- wrapper --------------------------------------------------------------------
def trajectory_generator_forward(seq_list_rel, seq_start_end, params,
                                 groups_per_block=None):
    """seq_list_rel: (obs_len, total_agents, 2); seq_start_end: list of (start, end).
    Requires contiguous, equal-size groups (static shapes for the grid)."""
    B = len(seq_start_end)
    N = seq_start_end[0][1] - seq_start_end[0][0]
    for idx, (s, e) in enumerate(seq_start_end):
        assert e - s == N and s == idx * N, "contiguous equal-size groups required"
    assert seq_list_rel.shape[1] == B * N

    # single transpose+reshape (no per-group python loop)
    X = jnp.transpose(seq_list_rel, (1, 0, 2)).reshape(B, N, DIM_INPUT)
    X = X.astype(jnp.float32)

    G = groups_per_block or min(B, max(1, 512 // max(N, 1)))
    G = max(1, min(G, B))
    B_pad = ((B + G - 1) // G) * G
    if B_pad != B:
        X = jnp.concatenate(
            [X, jnp.zeros((B_pad - B, N, DIM_INPUT), jnp.float32)], axis=0)

    w128, w64, bias = pack_params(params)

    out = pl.pallas_call(
        _traj_kernel,
        grid=(B_pad // G,),
        in_specs=[
            pl.BlockSpec((G, N, DIM_INPUT), lambda b: (b, 0, 0)),
            pl.BlockSpec((W128_ROWS, 128), lambda b: (0, 0)),
            pl.BlockSpec((W64_ROWS, DIM_HIDDEN), lambda b: (0, 0)),
            pl.BlockSpec((BIAS_ROWS, 128), lambda b: (0, 0)),
        ],
        out_specs=pl.BlockSpec((G, NUM_OUTPUTS, 128), lambda b: (b, 0, 0)),
        out_shape=jax.ShapeDtypeStruct((B_pad, NUM_OUTPUTS, 128), jnp.float32),
        compiler_params=pltpu.CompilerParams(dimension_semantics=("parallel",)),
    )(X, w128, w64, bias)

    coords = out[:B, :, :DIM_OUTPUT].reshape(B, NUM_OUTPUTS, PRED_LEN, 2)
    confidences = out[:B, :, CONF_LANE]
    return coords, confidences


# ---- deterministic parameter init (synthetic; matches nn module shapes) ---------
def init_params(key):
    def lin(k, din, dout):
        k1, k2 = jax.random.split(k)
        W = jax.random.normal(k1, (din, dout), jnp.float32) * (1.0 / math.sqrt(din))
        b = jax.random.normal(k2, (1, dout), jnp.float32) * 0.01
        return [W, b]

    def mab_p(k, dq, dk, dv):
        ks = jax.random.split(k, 4)
        return (lin(ks[0], dq, dv) + lin(ks[1], dk, dv)
                + lin(ks[2], dk, dv) + lin(ks[3], dv, dv))

    keys = jax.random.split(key, 11)
    params = []
    params.append(jax.random.normal(keys[0], (NUM_INDS, DIM_HIDDEN), jnp.float32) * 0.1)
    params += mab_p(keys[1], DIM_HIDDEN, DIM_INPUT, DIM_HIDDEN)   # ISAB0.mab0
    params += mab_p(keys[2], DIM_INPUT, DIM_HIDDEN, DIM_HIDDEN)   # ISAB0.mab1
    params.append(jax.random.normal(keys[3], (NUM_INDS, DIM_HIDDEN), jnp.float32) * 0.1)
    params += mab_p(keys[4], DIM_HIDDEN, DIM_HIDDEN, DIM_HIDDEN)  # ISAB1.mab0
    params += mab_p(keys[5], DIM_HIDDEN, DIM_HIDDEN, DIM_HIDDEN)  # ISAB1.mab1
    params.append(jax.random.normal(keys[6], (NUM_OUTPUTS, DIM_HIDDEN), jnp.float32) * 0.1)
    params += mab_p(keys[7], DIM_HIDDEN, DIM_HIDDEN, DIM_HIDDEN)  # PMA
    params += mab_p(keys[8], DIM_HIDDEN, DIM_HIDDEN, DIM_HIDDEN)  # SAB
    params += lin(keys[9], DIM_HIDDEN, DIM_OUTPUT)                # regressor
    params += lin(keys[10], DIM_HIDDEN, 1)                        # mode confidences
    return params


# ---- pure-JAX reference (unpacked params, per-group, no Pallas) ------------------
def _mab_ref(Q, K, p):
    Wq, bq, Wk, bk, Wv, bv, Wo, bo = p
    Qp = jnp.dot(Q, Wq) + bq
    Kp = jnp.dot(K, Wk) + bk
    Vp = jnp.dot(K, Wv) + bv
    scale = 1.0 / math.sqrt(DIM_HIDDEN)
    outs = []
    for h in range(NUM_HEADS):
        sl = slice(h * DIM_HEAD, (h + 1) * DIM_HEAD)
        Qh, Kh, Vh = Qp[:, sl], Kp[:, sl], Vp[:, sl]
        A = _softmax_last(jnp.dot(Qh, Kh.T) * scale)
        outs.append(Qh + jnp.dot(A, Vh))
    O = jnp.concatenate(outs, axis=-1)
    return O + jnp.maximum(jnp.dot(O, Wo) + bo, 0.0)


def _forward_body_ref(X, P):
    idx = [0]

    def take(n):
        out = P[idx[0]:idx[0] + n]
        idx[0] += n
        return out

    (I0,) = take(1)
    m00, m01 = take(8), take(8)
    H = _mab_ref(I0, X, m00)
    X = _mab_ref(X, H, m01)
    (I1,) = take(1)
    m10, m11 = take(8), take(8)
    H = _mab_ref(I1, X, m10)
    X = _mab_ref(X, H, m11)
    (S,) = take(1)
    X = _mab_ref(S, X, take(8))
    X = _mab_ref(X, X, take(8))
    Wr, br, Wc, bc = take(4)
    coords = jnp.dot(X, Wr) + br
    logits = jnp.dot(X, Wc) + bc
    m = jnp.max(logits, axis=0, keepdims=True)
    e = jnp.exp(logits - m)
    conf = e / jnp.sum(e, axis=0, keepdims=True)
    return coords, conf


def reference_forward(seq_list_rel, seq_start_end, params):
    coords_all, conf_all = [], []
    for (s, e) in seq_start_end:
        Y = jnp.transpose(seq_list_rel[:, s:e, :], (1, 0, 2)).reshape(e - s, DIM_INPUT)
        c, p = _forward_body_ref(Y.astype(jnp.float32), params)
        coords_all.append(c)
        conf_all.append(p[:, 0])
    B = len(seq_start_end)
    coords = jnp.stack(coords_all, 0).reshape(B, NUM_OUTPUTS, PRED_LEN, 2)
    confidences = jnp.stack(conf_all, 0)
    return coords, confidences


if __name__ == "__main__":
    key = jax.random.PRNGKey(0)
    k_data, k_param = jax.random.split(key)

    B = 6            # groups (batch elements)
    N_AGENTS = 8     # agents per group
    total_agents = B * N_AGENTS

    seq_list_rel = jax.random.normal(k_data, (OBS_LEN, total_agents, 2), jnp.float32)
    seq_start_end = [(i * N_AGENTS, (i + 1) * N_AGENTS) for i in range(B)]
    params = init_params(k_param)

    coords, confidences = trajectory_generator_forward(
        seq_list_rel, seq_start_end, params, groups_per_block=4)   # grid=(2,), padded
    coords, confidences = jax.block_until_ready((coords, confidences))

    assert coords.shape == (B, NUM_OUTPUTS, PRED_LEN, 2)
    assert confidences.shape == (B, NUM_OUTPUTS)

    ref_coords, ref_conf = reference_forward(seq_list_rel, seq_start_end, params)
    assert bool(jnp.allclose(coords, ref_coords, atol=1e-3, rtol=1e-3))
    assert bool(jnp.allclose(confidences, ref_conf, atol=1e-4, rtol=1e-3))
    assert bool(jnp.all(jnp.isfinite(coords))) and bool(jnp.all(jnp.isfinite(confidences)))
    assert bool(jnp.allclose(jnp.sum(confidences, axis=1), 1.0, atol=1e-4))

    print("KERNEL_OK")
</pallas_src>

<mosaic_0001>
module attributes {stable_mosaic.version = 11 : i64} {
  func.func @_traj_kernel(%arg0: i32, %arg1: memref<4x8x40xf32, #tpu.memory_space<vmem>>, %arg2: memref<424x128xf32, #tpu.memory_space<vmem>>, %arg3: memref<768x64xf32, #tpu.memory_space<vmem>>, %arg4: memref<16x128xf32, #tpu.memory_space<vmem>>, %arg5: memref<4x3x128xf32, #tpu.memory_space<vmem>>) attributes {dimension_semantics = [#tpu.dimension_semantics<parallel>], iteration_bounds = array<i64: 2>, scalar_prefetch = 0 : i64, scratch_operands = 0 : i64, tpu.core_type = #tpu.core_type<tc>, window_params = [{transform_indices = @transform_0, window_bounds = array<i64: 4, 8, 40>}, {pipeline_mode = #tpu.pipeline_mode<synchronous>, transform_indices = @transform_1, window_bounds = array<i64: 424, 128>}, {pipeline_mode = #tpu.pipeline_mode<synchronous>, transform_indices = @transform_2, window_bounds = array<i64: 768, 64>}, {pipeline_mode = #tpu.pipeline_mode<synchronous>, transform_indices = @transform_3, window_bounds = array<i64: 16, 128>}, {transform_indices = @transform_4, window_bounds = array<i64: 4, 3, 128>}]} {
    %c0 = arith.constant 0 : index
    %c0_0 = arith.constant 0 : index
    %c0_1 = arith.constant 0 : index
    %0 = vector.load %arg1[%c0, %c0_0, %c0_1] : memref<4x8x40xf32, #tpu.memory_space<vmem>>, vector<4x8x40xf32>
    %c744 = arith.constant 744 : index
    %c0_2 = arith.constant 0 : index
    %1 = vector.load %arg3[%c744, %c0_2] : memref<768x64xf32, #tpu.memory_space<vmem>>, vector<8x64xf32>
    %c752 = arith.constant 752 : index
    %c0_3 = arith.constant 0 : index
    %2 = vector.load %arg3[%c752, %c0_3] : memref<768x64xf32, #tpu.memory_space<vmem>>, vector<8x64xf32>
    %c760 = arith.constant 760 : index
    %c0_4 = arith.constant 0 : index
    %3 = vector.load %arg3[%c760, %c0_4] : memref<768x64xf32, #tpu.memory_space<vmem>>, vector<3x64xf32>
    %c0_5 = arith.constant 0 : index
    %c0_6 = arith.constant 0 : index
    %4 = vector.load %arg3[%c0_5, %c0_6] : memref<768x64xf32, #tpu.memory_space<vmem>>, vector<64x64xf32>
    %c360 = arith.constant 360 : index
    %c0_7 = arith.constant 0 : index
    %5 = vector.load %arg3[%c360, %c0_7] : memref<768x64xf32, #tpu.memory_space<vmem>>, vector<64x64xf32>
    %c0_8 = arith.constant 0 : index
    %c0_9 = arith.constant 0 : index
    %6 = vector.load %arg2[%c0_8, %c0_9] : memref<424x128xf32, #tpu.memory_space<vmem>>, vector<40x128xf32>
    %c0_10 = arith.constant 0 : index
    %c0_11 = arith.constant 0 : index
    %7 = vector.load %arg4[%c0_10, %c0_11] : memref<16x128xf32, #tpu.memory_space<vmem>>, vector<1x64xf32>
    %c0_12 = arith.constant 0 : index
    %c64 = arith.constant 64 : index
    %8 = vector.load %arg4[%c0_12, %c64] : memref<16x128xf32, #tpu.memory_space<vmem>>, vector<1x64xf32>
    %c6 = arith.constant 6 : index
    %c0_13 = arith.constant 0 : index
    %9 = vector.load %arg4[%c6, %c0_13] : memref<16x128xf32, #tpu.memory_space<vmem>>, vector<1x128xf32>
    %10 = vector.shape_cast %0 : vector<4x8x40xf32> to vector<32x40xf32>
    %cst = arith.constant dense<0.000000e+00> : vector<32x128xf32>
    %11 = tpu.matmul %10, %6, %cst {dimension_numbers = #tpu.dot_dimension_numbers<[1], [0], [0], [1], [0, 0, 1, 1], [], []>} : vector<32x40xf32>, vector<40x128xf32>, vector<32x128xf32> -> vector<32x128xf32>
    %12 = vector.broadcast %9 : vector<1x128xf32> to vector<32x128xf32>
    %13 = arith.addf %11, %12 : vector<32x128xf32>
    %14 = vector.shape_cast %13 : vector<32x128xf32> to vector<4x8x128xf32>
    %15 = vector.extract_strided_slice %14 {offsets = [0, 0, 0], sizes = [4, 8, 64], strides = [1, 1, 1]} : vector<4x8x128xf32> to vector<4x8x64xf32>
    %16 = vector.extract_strided_slice %14 {offsets = [0, 0, 64], sizes = [4, 8, 64], strides = [1, 1, 1]} : vector<4x8x128xf32> to vector<4x8x64xf32>
    %cst_14 = arith.constant dense<0.000000e+00> : vector<8x64xf32>
    %17 = tpu.matmul %1, %4, %cst_14 {dimension_numbers = #tpu.dot_dimension_numbers<[1], [0], [0], [1], [0, 0, 1, 1], [], []>} : vector<8x64xf32>, vector<64x64xf32>, vector<8x64xf32> -> vector<8x64xf32>
    %18 = vector.broadcast %7 : vector<1x64xf32> to vector<8x64xf32>
    %19 = arith.addf %17, %18 : vector<8x64xf32>
    %20 = vector.shape_cast %19 : vector<8x64xf32> to vector<1x8x64xf32>
    %21 = vector.broadcast %20 : vector<1x8x64xf32> to vector<4x8x64xf32>
    %22 = vector.extract_strided_slice %21 {offsets = [0, 0, 0], sizes = [4, 8, 16], strides = [1, 1, 1]} : vector<4x8x64xf32> to vector<4x8x16xf32>
    %23 = vector.extract_strided_slice %15 {offsets = [0, 0, 0], sizes = [4, 8, 16], strides = [1, 1, 1]} : vector<4x8x64xf32> to vector<4x8x16xf32>
    %24 = vector.extract_strided_slice %16 {offsets = [0, 0, 0], sizes = [4, 8, 16], strides = [1, 1, 1]} : vector<4x8x64xf32> to vector<4x8x16xf32>
    %cst_15 = arith.constant dense<0.000000e+00> : vector<4x8x8xf32>
    %25 = tpu.matmul %22, %23, %cst_15 {dimension_numbers = #tpu.dot_dimension_numbers<[2], [2], [1], [1], [0, 0, 0, 1, 1, 1], [0], [0]>} : vector<4x8x16xf32>, vector<4x8x16xf32>, vector<4x8x8xf32> -> vector<4x8x8xf32>
    %cst_16 = arith.constant 1.250000e-01 : f32
    %26 = vector.broadcast %cst_16 : f32 to vector<4x8x8xf32>
    %27 = arith.mulf %25, %26 : vector<4x8x8xf32>
    %cst_17 = arith.constant dense<0xFF800000> : vector<4x8xf32>
    %28 = vector.multi_reduction <maximumf>, %27, %cst_17 [2] : vector<4x8x8xf32> to vector<4x8xf32>
    %29 = vector.shape_cast %28 : vector<4x8xf32> to vector<4x8x1xf32>
    %30 = vector.broadcast %29 : vector<4x8x1xf32> to vector<4x8x8xf32>
    %31 = arith.subf %27, %30 : vector<4x8x8xf32>
    %32 = math.exp %31 : vector<4x8x8xf32>
    %cst_18 = arith.constant dense<0.000000e+00> : vector<4x8xf32>
    %33 = vector.multi_reduction <add>, %32, %cst_18 [2] : vector<4x8x8xf32> to vector<4x8xf32>
    %34 = vector.shape_cast %33 : vector<4x8xf32> to vector<4x8x1xf32>
    %35 = vector.broadcast %34 : vector<4x8x1xf32> to vector<4x8x8xf32>
    %36 = arith.divf %32, %35 : vector<4x8x8xf32>
    %cst_19 = arith.constant dense<0.000000e+00> : vector<4x8x16xf32>
    %37 = tpu.matmul %36, %24, %cst_19 {dimension_numbers = #tpu.dot_dimension_numbers<[2], [1], [1], [2], [0, 0, 0, 1, 1, 2], [0], [0]>} : vector<4x8x8xf32>, vector<4x8x16xf32>, vector<4x8x16xf32> -> vector<4x8x16xf32>
    %38 = arith.addf %22, %37 : vector<4x8x16xf32>
    %39 = vector.extract_strided_slice %21 {offsets = [0, 0, 16], sizes = [4, 8, 16], strides = [1, 1, 1]} : vector<4x8x64xf32> to vector<4x8x16xf32>
    %40 = vector.extract_strided_slice %15 {offsets = [0, 0, 16], sizes = [4, 8, 16], strides = [1, 1, 1]} : vector<4x8x64xf32> to vector<4x8x16xf32>
    %41 = vector.extract_strided_slice %16 {offsets = [0, 0, 16], sizes = [4, 8, 16], strides = [1, 1, 1]} : vector<4x8x64xf32> to vector<4x8x16xf32>
    %cst_20 = arith.constant dense<0.000000e+00> : vector<4x8x8xf32>
    %42 = tpu.matmul %39, %40, %cst_20 {dimension_numbers = #tpu.dot_dimension_numbers<[2], [2], [1], [1], [0, 0, 0, 1, 1, 1], [0], [0]>} : vector<4x8x16xf32>, vector<4x8x16xf32>, vector<4x8x8xf32> -> vector<4x8x8xf32>
    %cst_21 = arith.constant 1.250000e-01 : f32
    %43 = vector.broadcast %cst_21 : f32 to vector<4x8x8xf32>
    %44 = arith.mulf %42, %43 : vector<4x8x8xf32>
    %cst_22 = arith.constant dense<0xFF800000> : vector<4x8xf32>
    %45 = vector.multi_reduction <maximumf>, %44, %cst_22 [2] : vector<4x8x8xf32> to vector<4x8xf32>
    %46 = vector.shape_cast %45 : vector<4x8xf32> to vector<4x8x1xf32>
    %47 = vector.broadcast %46 : vector<4x8x1xf32> to vector<4x8x8xf32>
    %48 = arith.subf %44, %47 : vector<4x8x8xf32>
    %49 = math.exp %48 : vector<4x8x8xf32>
    %cst_23 = arith.constant dense<0.000000e+00> : vector<4x8xf32>
    %50 = vector.multi_reduction <add>, %49, %cst_23 [2] : vector<4x8x8xf32> to vector<4x8xf32>
    %51 = vector.shape_cast %50 : vector<4x8xf32> to vector<4x8x1xf32>
    %52 = vector.broadcast %51 : vector<4x8x1xf32> to vector<4x8x8xf32>
    %53 = arith.divf %49, %52 : vector<4x8x8xf32>
    %cst_24 = arith.constant dense<0.000000e+00> : vector<4x8x16xf32>
    %54 = tpu.matmul %53, %41, %cst_24 {dimension_numbers = #tpu.dot_dimension_numbers<[2], [1], [1], [2], [0, 0, 0, 1, 1, 2], [0], [0]>} : vector<4x8x8xf32>, vector<4x8x16xf32>, vector<4x8x16xf32> -> vector<4x8x16xf32>
    %55 = arith.addf %39, %54 : vector<4x8x16xf32>
    %56 = vector.extract_strided_slice %21 {offsets = [0, 0, 32], sizes = [4, 8, 16], strides = [1, 1, 1]} : vector<4x8x64xf32> to vector<4x8x16xf32>
    %57 = vector.extract_strided_slice %15 {offsets = [0, 0, 32], sizes = [4, 8, 16], strides = [1, 1, 1]} : vector<4x8x64xf32> to vector<4x8x16xf32>
    %58 = vector.extract_strided_slice %16 {offsets = [0, 0, 32], sizes = [4, 8, 16], strides = [1, 1, 1]} : vector<4x8x64xf32> to vector<4x8x16xf32>
    %cst_25 = arith.constant dense<0.000000e+00> : vector<4x8x8xf32>
    %59 = tpu.matmul %56, %57, %cst_25 {dimension_numbers = #tpu.dot_dimension_numbers<[2], [2], [1], [1], [0, 0, 0, 1, 1, 1], [0], [0]>} : vector<4x8x16xf32>, vector<4x8x16xf32>, vector<4x8x8xf32> -> vector<4x8x8xf32>
    %cst_26 = arith.constant 1.250000e-01 : f32
    %60 = vector.broadcast %cst_26 : f32 to vector<4x8x8xf32>
    %61 = arith.mulf %59, %60 : vector<4x8x8xf32>
    %cst_27 = arith.constant dense<0xFF800000> : vector<4x8xf32>
    %62 = vector.multi_reduction <maximumf>, %61, %cst_27 [2] : vector<4x8x8xf32> to vector<4x8xf32>
    %63 = vector.shape_cast %62 : vector<4x8xf32> to vector<4x8x1xf32>
    %64 = vector.broadcast %63 : vector<4x8x1xf32> to vector<4x8x8xf32>
    %65 = arith.subf %61, %64 : vector<4x8x8xf32>
    %66 = math.exp %65 : vector<4x8x8xf32>
    %cst_28 = arith.constant dense<0.000000e+00> : vector<4x8xf32>
    %67 = vector.multi_reduction <add>, %66, %cst_28 [2] : vector<4x8x8xf32> to vector<4x8xf32>
    %68 = vector.shape_cast %67 : vector<4x8xf32> to vector<4x8x1xf32>
    %69 = vector.broadcast %68 : vector<4x8x1xf32> to vector<4x8x8xf32>
    %70 = arith.divf %66, %69 : vector<4x8x8xf32>
    %cst_29 = arith.constant dense<0.000000e+00> : vector<4x8x16xf32>
    %71 = tpu.matmul %70, %58, %cst_29 {dimension_numbers = #tpu.dot_dimension_numbers<[2], [1], [1], [2], [0, 0, 0, 1, 1, 2], [0], [0]>} : vector<4x8x8xf32>, vector<4x8x16xf32>, vector<4x8x16xf32> -> vector<4x8x16xf32>
    %72 = arith.addf %56, %71 : vector<4x8x16xf32>
    %73 = vector.extract_strided_slice %21 {offsets = [0, 0, 48], sizes = [4, 8, 16], strides = [1, 1, 1]} : vector<4x8x64xf32> to vector<4x8x16xf32>
    %74 = vector.extract_strided_slice %15 {offsets = [0, 0, 48], sizes = [4, 8, 16], strides = [1, 1, 1]} : vector<4x8x64xf32> to vector<4x8x16xf32>
    %75 = vector.extract_strided_slice %16 {offsets = [0, 0, 48], sizes = [4, 8, 16], strides = [1, 1, 1]} : vector<4x8x64xf32> to vector<4x8x16xf32>
    %cst_30 = arith.constant dense<0.000000e+00> : vector<4x8x8xf32>
    %76 = tpu.matmul %73, %74, %cst_30 {dimension_numbers = #tpu.dot_dimension_numbers<[2], [2], [1], [1], [0, 0, 0, 1, 1, 1], [0], [0]>} : vector<4x8x16xf32>, vector<4x8x16xf32>, vector<4x8x8xf32> -> vector<4x8x8xf32>
    %cst_31 = arith.constant 1.250000e-01 : f32
    %77 = vector.broadcast %cst_31 : f32 to vector<4x8x8xf32>
    %78 = arith.mulf %76, %77 : vector<4x8x8xf32>
    %cst_32 = arith.constant dense<0xFF800000> : vector<4x8xf32>
    %79 = vector.multi_reduction <maximumf>, %78, %cst_32 [2] : vector<4x8x8xf32> to vector<4x8xf32>
    %80 = vector.shape_cast %79 : vector<4x8xf32> to vector<4x8x1xf32>
    %81 = vector.broadcast %80 : vector<4x8x1xf32> to vector<4x8x8xf32>
    %82 = arith.subf %78, %81 : vector<4x8x8xf32>
    %83 = math.exp %82 : vector<4x8x8xf32>
    %cst_33 = arith.constant dense<0.000000e+00> : vector<4x8xf32>
    %84 = vector.multi_reduction <add>, %83, %cst_33 [2] : vector<4x8x8xf32> to vector<4x8xf32>
    %85 = vector.shape_cast %84 : vector<4x8xf32> to vector<4x8x1xf32>
    %86 = vector.broadcast %85 : vector<4x8x1xf32> to vector<4x8x8xf32>
    %87 = arith.divf %83, %86 : vector<4x8x8xf32>
    %cst_34 = arith.constant dense<0.000000e+00> : vector<4x8x16xf32>
    %88 = tpu.matmul %87, %75, %cst_34 {dimension_numbers = #tpu.dot_dimension_numbers<[2], [1], [1], [2], [0, 0, 0, 1, 1, 2], [0], [0]>} : vector<4x8x8xf32>, vector<4x8x16xf32>, vector<4x8x16xf32> -> vector<4x8x16xf32>
    %89 = arith.addf %73, %88 : vector<4x8x16xf32>
    %90 = tpu.concatenate %38, %55, %72, %89 in 2 : vector<4x8x16xf32>, vector<4x8x16xf32>, vector<4x8x16xf32>, vector<4x8x16xf32> -> vector<4x8x64xf32>
    %91 = vector.shape_cast %90 : vector<4x8x64xf32> to vector<32x64xf32>
    %cst_35 = arith.constant dense<0.000000e+00> : vector<32x64xf32>
    %92 = tpu.matmul %91, %5, %cst_35 {dimension_numbers = #tpu.dot_dimension_numbers<[1], [0], [0], [1], [0, 0, 1, 1], [], []>} : vector<32x64xf32>, vector<64x64xf32>, vector<32x64xf32> -> vector<32x64xf32>
    %93 = vector.broadcast %8 : vector<1x64xf32> to vector<32x64xf32>
    %94 = arith.addf %92, %93 : vector<32x64xf32>
    %95 = vector.shape_cast %94 : vector<32x64xf32> to vector<4x8x64xf32>
    %cst_36 = arith.constant 0.000000e+00 : f32
    %96 = vector.broadcast %cst_36 : f32 to vector<4x8x64xf32>
    %97 = arith.maximumf %95, %96 : vector<4x8x64xf32>
    %98 = arith.addf %90, %97 : vector<4x8x64xf32>
    %c64_37 = arith.constant 64 : index
    %c0_38 = arith.constant 0 : index
    %99 = vector.load %arg3[%c64_37, %c0_38] : memref<768x64xf32, #tpu.memory_space<vmem>>, vector<40x64xf32>
    %c424 = arith.constant 424 : index
    %c0_39 = arith.constant 0 : index
    %100 = vector.load %arg3[%c424, %c0_39] : memref<768x64xf32, #tpu.memory_space<vmem>>, vector<64x64xf32>
    %c40 = arith.constant 40 : index
    %c0_40 = arith.constant 0 : index
    %101 = vector.load %arg2[%c40, %c0_40] : memref<424x128xf32, #tpu.memory_space<vmem>>, vector<64x128xf32>
    %c1 = arith.constant 1 : index
    %c0_41 = arith.constant 0 : index
    %102 = vector.load %arg4[%c1, %c0_41] : memref<16x128xf32, #tpu.memory_space<vmem>>, vector<1x64xf32>
    %c1_42 = arith.constant 1 : index
    %c64_43 = arith.constant 64 : index
    %103 = vector.load %arg4[%c1_42, %c64_43] : memref<16x128xf32, #tpu.memory_space<vmem>>, vector<1x64xf32>
    %c7 = arith.constant 7 : index
    %c0_44 = arith.constant 0 : index
    %104 = vector.load %arg4[%c7, %c0_44] : memref<16x128xf32, #tpu.memory_space<vmem>>, vector<1x128xf32>
    %105 = vector.shape_cast %98 : vector<4x8x64xf32> to vector<32x64xf32>
    %cst_45 = arith.constant dense<0.000000e+00> : vector<32x128xf32>
    %106 = tpu.matmul %105, %101, %cst_45 {dimension_numbers = #tpu.dot_dimension_numbers<[1], [0], [0], [1], [0, 0, 1, 1], [], []>} : vector<32x64xf32>, vector<64x128xf32>, vector<32x128xf32> -> vector<32x128xf32>
    %107 = vector.broadcast %104 : vector<1x128xf32> to vector<32x128xf32>
    %108 = arith.addf %106, %107 : vector<32x128xf32>
    %109 = vector.shape_cast %108 : vector<32x128xf32> to vector<4x8x128xf32>
    %110 = vector.extract_strided_slice %109 {offsets = [0, 0, 0], sizes = [4, 8, 64], strides = [1, 1, 1]} : vector<4x8x128xf32> to vector<4x8x64xf32>
    %111 = vector.extract_strided_slice %109 {offsets = [0, 0, 64], sizes = [4, 8, 64], strides = [1, 1, 1]} : vector<4x8x128xf32> to vector<4x8x64xf32>
    %112 = vector.shape_cast %0 : vector<4x8x40xf32> to vector<32x40xf32>
    %cst_46 = arith.constant dense<0.000000e+00> : vector<32x64xf32>
    %113 = tpu.matmul %112, %99, %cst_46 {dimension_numbers = #tpu.dot_dimension_numbers<[1], [0], [0], [1], [0, 0, 1, 1], [], []>} : vector<32x40xf32>, vector<40x64xf32>, vector<32x64xf32> -> vector<32x64xf32>
    %114 = vector.broadcast %102 : vector<1x64xf32> to vector<32x64xf32>
    %115 = arith.addf %113, %114 : vector<32x64xf32>
    %116 = vector.shape_cast %115 : vector<32x64xf32> to vector<4x8x64xf32>
    %117 = vector.extract_strided_slice %116 {offsets = [0, 0, 0], sizes = [4, 8, 16], strides = [1, 1, 1]} : vector<4x8x64xf32> to vector<4x8x16xf32>
    %118 = vector.extract_strided_slice %110 {offsets = [0, 0, 0], sizes = [4, 8, 16], strides = [1, 1, 1]} : vector<4x8x64xf32> to vector<4x8x16xf32>
    %119 = vector.extract_strided_slice %111 {offsets = [0, 0, 0], sizes = [4, 8, 16], strides = [1, 1, 1]} : vector<4x8x64xf32> to vector<4x8x16xf32>
    %cst_47 = arith.constant dense<0.000000e+00> : vector<4x8x8xf32>
    %120 = tpu.matmul %117, %118, %cst_47 {dimension_numbers = #tpu.dot_dimension_numbers<[2], [2], [1], [1], [0, 0, 0, 1, 1, 1], [0], [0]>} : vector<4x8x16xf32>, vector<4x8x16xf32>, vector<4x8x8xf32> -> vector<4x8x8xf32>
    %cst_48 = arith.constant 1.250000e-01 : f32
    %121 = vector.broadcast %cst_48 : f32 to vector<4x8x8xf32>
    %122 = arith.mulf %120, %121 : vector<4x8x8xf32>
    %cst_49 = arith.constant dense<0xFF800000> : vector<4x8xf32>
    %123 = vector.multi_reduction <maximumf>, %122, %cst_49 [2] : vector<4x8x8xf32> to vector<4x8xf32>
    %124 = vector.shape_cast %123 : vector<4x8xf32> to vector<4x8x1xf32>
    %125 = vector.broadcast %124 : vector<4x8x1xf32> to vector<4x8x8xf32>
    %126 = arith.subf %122, %125 : vector<4x8x8xf32>
    %127 = math.exp %126 : vector<4x8x8xf32>
    %cst_50 = arith.constant dense<0.000000e+00> : vector<4x8xf32>
    %128 = vector.multi_reduction <add>, %127, %cst_50 [2] : vector<4x8x8xf32> to vector<4x8xf32>
    %129 = vector.shape_cast %128 : vector<4x8xf32> to vector<4x8x1xf32>
    %130 = vector.broadcast %129 : vector<4x8x1xf32> to vector<4x8x8xf32>
    %131 = arith.divf %127, %130 : vector<4x8x8xf32>
    %cst_51 = arith.constant dense<0.000000e+00> : vector<4x8x16xf32>
    %132 = tpu.matmul %131, %119, %cst_51 {dimension_numbers = #tpu.dot_dimension_numbers<[2], [1], [1], [2], [0, 0, 0, 1, 1, 2], [0], [0]>} : vector<4x8x8xf32>, vector<4x8x16xf32>, vector<4x8x16xf32> -> vector<4x8x16xf32>
    %133 = arith.addf %117, %132 : vector<4x8x16xf32>
    %134 = vector.extract_strided_slice %116 {offsets = [0, 0, 16], sizes = [4, 8, 16], strides = [1, 1, 1]} : vector<4x8x64xf32> to vector<4x8x16xf32>
    %135 = vector.extract_strided_slice %110 {offsets = [0, 0, 16], sizes = [4, 8, 16], strides = [1, 1, 1]} : vector<4x8x64xf32> to vector<4x8x16xf32>
    %136 = vector.extract_strided_slice %111 {offsets = [0, 0, 16], sizes = [4, 8, 16], strides = [1, 1, 1]} : vector<4x8x64xf32> to vector<4x8x16xf32>
    %cst_52 = arith.constant dense<0.000000e+00> : vector<4x8x8xf32>
    %137 = tpu.matmul %134, %135, %cst_52 {dimension_numbers = #tpu.dot_dimension_numbers<[2], [2], [1], [1], [0, 0, 0, 1, 1, 1], [0], [0]>} : vector<4x8x16xf32>, vector<4x8x16xf32>, vector<4x8x8xf32> -> vector<4x8x8xf32>
    %cst_53 = arith.constant 1.250000e-01 : f32
    %138 = vector.broadcast %cst_53 : f32 to vector<4x8x8xf32>
    %139 = arith.mulf %137, %138 : vector<4x8x8xf32>
    %cst_54 = arith.constant dense<0xFF800000> : vector<4x8xf32>
    %140 = vector.multi_reduction <maximumf>, %139, %cst_54 [2] : vector<4x8x8xf32> to vector<4x8xf32>
    %141 = vector.shape_cast %140 : vector<4x8xf32> to vector<4x8x1xf32>
    %142 = vector.broadcast %141 : vector<4x8x1xf32> to vector<4x8x8xf32>
    %143 = arith.subf %139, %142 : vector<4x8x8xf32>
    %144 = math.exp %143 : vector<4x8x8xf32>
    %cst_55 = arith.constant dense<0.000000e+00> : vector<4x8xf32>
    %145 = vector.multi_reduction <add>, %144, %cst_55 [2] : vector<4x8x8xf32> to vector<4x8xf32>
    %146 = vector.shape_cast %145 : vector<4x8xf32> to vector<4x8x1xf32>
    %147 = vector.broadcast %146 : vector<4x8x1xf32> to vector<4x8x8xf32>
    %148 = arith.divf %144, %147 : vector<4x8x8xf32>
    %cst_56 = arith.constant dense<0.000000e+00> : vector<4x8x16xf32>
    %149 = tpu.matmul %148, %136, %cst_56 {dimension_numbers = #tpu.dot_dimension_numbers<[2], [1], [1], [2], [0, 0, 0, 1, 1, 2], [0], [0]>} : vector<4x8x8xf32>, vector<4x8x16xf32>, vector<4x8x16xf32> -> vector<4x8x16xf32>
    %150 = arith.addf %134, %149 : vector<4x8x16xf32>
    %151 = vector.extract_strided_slice %116 {offsets = [0, 0, 32], sizes = [4, 8, 16], strides = [1, 1, 1]} : vector<4x8x64xf32> to vector<4x8x16xf32>
    %152 = vector.extract_strided_slice %110 {offsets = [0, 0, 32], sizes = [4, 8, 16], strides = [1, 1, 1]} : vector<4x8x64xf32> to vector<4x8x16xf32>
    %153 = vector.extract_strided_slice %111 {offsets = [0, 0, 32], sizes = [4, 8, 16], strides = [1, 1, 1]} : vector<4x8x64xf32> to vector<4x8x16xf32>
    %cst_57 = arith.constant dense<0.000000e+00> : vector<4x8x8xf32>
    %154 = tpu.matmul %151, %152, %cst_57 {dimension_numbers = #tpu.dot_dimension_numbers<[2], [2], [1], [1], [0, 0, 0, 1, 1, 1], [0], [0]>} : vector<4x8x16xf32>, vector<4x8x16xf32>, vector<4x8x8xf32> -> vector<4x8x8xf32>
    %cst_58 = arith.constant 1.250000e-01 : f32
    %155 = vector.broadcast %cst_58 : f32 to vector<4x8x8xf32>
    %156 = arith.mulf %154, %155 : vector<4x8x8xf32>
    %cst_59 = arith.constant dense<0xFF800000> : vector<4x8xf32>
    %157 = vector.multi_reduction <maximumf>, %156, %cst_59 [2] : vector<4x8x8xf32> to vector<4x8xf32>
    %158 = vector.shape_cast %157 : vector<4x8xf32> to vector<4x8x1xf32>
    %159 = vector.broadcast %158 : vector<4x8x1xf32> to vector<4x8x8xf32>
    %160 = arith.subf %156, %159 : vector<4x8x8xf32>
    %161 = math.exp %160 : vector<4x8x8xf32>
    %cst_60 = arith.constant dense<0.000000e+00> : vector<4x8xf32>
    %162 = vector.multi_reduction <add>, %161, %cst_60 [2] : vector<4x8x8xf32> to vector<4x8xf32>
    %163 = vector.shape_cast %162 : vector<4x8xf32> to vector<4x8x1xf32>
    %164 = vector.broadcast %163 : vector<4x8x1xf32> to vector<4x8x8xf32>
    %165 = arith.divf %161, %164 : vector<4x8x8xf32>
    %cst_61 = arith.constant dense<0.000000e+00> : vector<4x8x16xf32>
    %166 = tpu.matmul %165, %153, %cst_61 {dimension_numbers = #tpu.dot_dimension_numbers<[2], [1], [1], [2], [0, 0, 0, 1, 1, 2], [0], [0]>} : vector<4x8x8xf32>, vector<4x8x16xf32>, vector<4x8x16xf32> -> vector<4x8x16xf32>
    %167 = arith.addf %151, %166 : vector<4x8x16xf32>
    %168 = vector.extract_strided_slice %116 {offsets = [0, 0, 48], sizes = [4, 8, 16], strides = [1, 1, 1]} : vector<4x8x64xf32> to vector<4x8x16xf32>
    %169 = vector.extract_strided_slice %110 {offsets = [0, 0, 48], sizes = [4, 8, 16], strides = [1, 1, 1]} : vector<4x8x64xf32> to vector<4x8x16xf32>
    %170 = vector.extract_strided_slice %111 {offsets = [0, 0, 48], sizes = [4, 8, 16], strides = [1, 1, 1]} : vector<4x8x64xf32> to vector<4x8x16xf32>
    %cst_62 = arith.constant dense<0.000000e+00> : vector<4x8x8xf32>
    %171 = tpu.matmul %168, %169, %cst_62 {dimension_numbers = #tpu.dot_dimension_numbers<[2], [2], [1], [1], [0, 0, 0, 1, 1, 1], [0], [0]>} : vector<4x8x16xf32>, vector<4x8x16xf32>, vector<4x8x8xf32> -> vector<4x8x8xf32>
    %cst_63 = arith.constant 1.250000e-01 : f32
    %172 = vector.broadcast %cst_63 : f32 to vector<4x8x8xf32>
    %173 = arith.mulf %171, %172 : vector<4x8x8xf32>
    %cst_64 = arith.constant dense<0xFF800000> : vector<4x8xf32>
    %174 = vector.multi_reduction <maximumf>, %173, %cst_64 [2] : vector<4x8x8xf32> to vector<4x8xf32>
    %175 = vector.shape_cast %174 : vector<4x8xf32> to vector<4x8x1xf32>
    %176 = vector.broadcast %175 : vector<4x8x1xf32> to vector<4x8x8xf32>
    %177 = arith.subf %173, %176 : vector<4x8x8xf32>
    %178 = math.exp %177 : vector<4x8x8xf32>
    %cst_65 = arith.constant dense<0.000000e+00> : vector<4x8xf32>
    %179 = vector.multi_reduction <add>, %178, %cst_65 [2] : vector<4x8x8xf32> to vector<4x8xf32>
    %180 = vector.shape_cast %179 : vector<4x8xf32> to vector<4x8x1xf32>
    %181 = vector.broadcast %180 : vector<4x8x1xf32> to vector<4x8x8xf32>
    %182 = arith.divf %178, %181 : vector<4x8x8xf32>
    %cst_66 = arith.constant dense<0.000000e+00> : vector<4x8x16xf32>
    %183 = tpu.matmul %182, %170, %cst_66 {dimension_numbers = #tpu.dot_dimension_numbers<[2], [1], [1], [2], [0, 0, 0, 1, 1, 2], [0], [0]>} : vector<4x8x8xf32>, vector<4x8x16xf32>, vector<4x8x16xf32> -> vector<4x8x16xf32>
    %184 = arith.addf %168, %183 : vector<4x8x16xf32>
    %185 = tpu.concatenate %133, %150, %167, %184 in 2 : vector<4x8x16xf32>, vector<4x8x16xf32>, vector<4x8x16xf32>, vector<4x8x16xf32> -> vector<4x8x64xf32>
    %186 = vector.shape_cast %185 : vector<4x8x64xf32> to vector<32x64xf32>
    %cst_67 = arith.constant dense<0.000000e+00> : vector<32x64xf32>
    %187 = tpu.matmul %186, %100, %cst_67 {dimension_numbers = #tpu.dot_dimension_numbers<[1], [0], [0], [1], [0, 0, 1, 1], [], []>} : vector<32x64xf32>, vector<64x64xf32>, vector<32x64xf32> -> vector<32x64xf32>
    %188 = vector.broadcast %103 : vector<1x64xf32> to vector<32x64xf32>
    %189 = arith.addf %187, %188 : vector<32x64xf32>
    %190 = vector.shape_cast %189 : vector<32x64xf32> to vector<4x8x64xf32>
    %cst_68 = arith.constant 0.000000e+00 : f32
    %191 = vector.broadcast %cst_68 : f32 to vector<4x8x64xf32>
    %192 = arith.maximumf %190, %191 : vector<4x8x64xf32>
    %193 = arith.addf %185, %192 : vector<4x8x64xf32>
    %c104 = arith.constant 104 : index
    %c0_69 = arith.constant 0 : index
    %194 = vector.load %arg3[%c104, %c0_69] : memref<768x64xf32, #tpu.memory_space<vmem>>, vector<64x64xf32>
    %c488 = arith.constant 488 : index
    %c0_70 = arith.constant 0 : index
    %195 = vector.load %arg3[%c488, %c0_70] : memref<768x64xf32, #tpu.memory_space<vmem>>, vector<64x64xf32>
    %c104_71 = arith.constant 104 : index
    %c0_72 = arith.constant 0 : index
    %196 = vector.load %arg2[%c104_71, %c0_72] : memref<424x128xf32, #tpu.memory_space<vmem>>, vector<64x128xf32>
    %c2 = arith.constant 2 : index
    %c0_73 = arith.constant 0 : index
    %197 = vector.load %arg4[%c2, %c0_73] : memref<16x128xf32, #tpu.memory_space<vmem>>, vector<1x64xf32>
    %c2_74 = arith.constant 2 : index
    %c64_75 = arith.constant 64 : index
    %198 = vector.load %arg4[%c2_74, %c64_75] : memref<16x128xf32, #tpu.memory_space<vmem>>, vector<1x64xf32>
    %c8 = arith.constant 8 : index
    %c0_76 = arith.constant 0 : index
    %199 = vector.load %arg4[%c8, %c0_76] : memref<16x128xf32, #tpu.memory_space<vmem>>, vector<1x128xf32>
    %200 = vector.shape_cast %193 : vector<4x8x64xf32> to vector<32x64xf32>
    %cst_77 = arith.constant dense<0.000000e+00> : vector<32x128xf32>
    %201 = tpu.matmul %200, %196, %cst_77 {dimension_numbers = #tpu.dot_dimension_numbers<[1], [0], [0], [1], [0, 0, 1, 1], [], []>} : vector<32x64xf32>, vector<64x128xf32>, vector<32x128xf32> -> vector<32x128xf32>
    %202 = vector.broadcast %199 : vector<1x128xf32> to vector<32x128xf32>
    %203 = arith.addf %201, %202 : vector<32x128xf32>
    %204 = vector.shape_cast %203 : vector<32x128xf32> to vector<4x8x128xf32>
    %205 = vector.extract_strided_slice %204 {offsets = [0, 0, 0], sizes = [4, 8, 64], strides = [1, 1, 1]} : vector<4x8x128xf32> to vector<4x8x64xf32>
    %206 = vector.extract_strided_slice %204 {offsets = [0, 0, 64], sizes = [4, 8, 64], strides = [1, 1, 1]} : vector<4x8x128xf32> to vector<4x8x64xf32>
    %cst_78 = arith.constant dense<0.000000e+00> : vector<8x64xf32>
    %207 = tpu.matmul %2, %194, %cst_78 {dimension_numbers = #tpu.dot_dimension_numbers<[1], [0], [0], [1], [0, 0, 1, 1], [], []>} : vector<8x64xf32>, vector<64x64xf32>, vector<8x64xf32> -> vector<8x64xf32>
    %208 = vector.broadcast %197 : vector<1x64xf32> to vector<8x64xf32>
    %209 = arith.addf %207, %208 : vector<8x64xf32>
    %210 = vector.shape_cast %209 : vector<8x64xf32> to vector<1x8x64xf32>
    %211 = vector.broadcast %210 : vector<1x8x64xf32> to vector<4x8x64xf32>
    %212 = vector.extract_strided_slice %211 {offsets = [0, 0, 0], sizes = [4, 8, 16], strides = [1, 1, 1]} : vector<4x8x64xf32> to vector<4x8x16xf32>
    %213 = vector.extract_strided_slice %205 {offsets = [0, 0, 0], sizes = [4, 8, 16], strides = [1, 1, 1]} : vector<4x8x64xf32> to vector<4x8x16xf32>
    %214 = vector.extract_strided_slice %206 {offsets = [0, 0, 0], sizes = [4, 8, 16], strides = [1, 1, 1]} : vector<4x8x64xf32> to vector<4x8x16xf32>
    %cst_79 = arith.constant dense<0.000000e+00> : vector<4x8x8xf32>
    %215 = tpu.matmul %212, %213, %cst_79 {dimension_numbers = #tpu.dot_dimension_numbers<[2], [2], [1], [1], [0, 0, 0, 1, 1, 1], [0], [0]>} : vector<4x8x16xf32>, vector<4x8x16xf32>, vector<4x8x8xf32> -> vector<4x8x8xf32>
    %cst_80 = arith.constant 1.250000e-01 : f32
    %216 = vector.broadcast %cst_80 : f32 to vector<4x8x8xf32>
    %217 = arith.mulf %215, %216 : vector<4x8x8xf32>
    %cst_81 = arith.constant dense<0xFF800000> : vector<4x8xf32>
    %218 = vector.multi_reduction <maximumf>, %217, %cst_81 [2] : vector<4x8x8xf32> to vector<4x8xf32>
    %219 = vector.shape_cast %218 : vector<4x8xf32> to vector<4x8x1xf32>
    %220 = vector.broadcast %219 : vector<4x8x1xf32> to vector<4x8x8xf32>
    %221 = arith.subf %217, %220 : vector<4x8x8xf32>
    %222 = math.exp %221 : vector<4x8x8xf32>
    %cst_82 = arith.constant dense<0.000000e+00> : vector<4x8xf32>
    %223 = vector.multi_reduction <add>, %222, %cst_82 [2] : vector<4x8x8xf32> to vector<4x8xf32>
    %224 = vector.shape_cast %223 : vector<4x8xf32> to vector<4x8x1xf32>
    %225 = vector.broadcast %224 : vector<4x8x1xf32> to vector<4x8x8xf32>
    %226 = arith.divf %222, %225 : vector<4x8x8xf32>
    %cst_83 = arith.constant dense<0.000000e+00> : vector<4x8x16xf32>
    %227 = tpu.matmul %226, %214, %cst_83 {dimension_numbers = #tpu.dot_dimension_numbers<[2], [1], [1], [2], [0, 0, 0, 1, 1, 2], [0], [0]>} : vector<4x8x8xf32>, vector<4x8x16xf32>, vector<4x8x16xf32> -> vector<4x8x16xf32>
    %228 = arith.addf %212, %227 : vector<4x8x16xf32>
    %229 = vector.extract_strided_slice %211 {offsets = [0, 0, 16], sizes = [4, 8, 16], strides = [1, 1, 1]} : vector<4x8x64xf32> to vector<4x8x16xf32>
    %230 = vector.extract_strided_slice %205 {offsets = [0, 0, 16], sizes = [4, 8, 16], strides = [1, 1, 1]} : vector<4x8x64xf32> to vector<4x8x16xf32>
    %231 = vector.extract_strided_slice %206 {offsets = [0, 0, 16], sizes = [4, 8, 16], strides = [1, 1, 1]} : vector<4x8x64xf32> to vector<4x8x16xf32>
    %cst_84 = arith.constant dense<0.000000e+00> : vector<4x8x8xf32>
    %232 = tpu.matmul %229, %230, %cst_84 {dimension_numbers = #tpu.dot_dimension_numbers<[2], [2], [1], [1], [0, 0, 0, 1, 1, 1], [0], [0]>} : vector<4x8x16xf32>, vector<4x8x16xf32>, vector<4x8x8xf32> -> vector<4x8x8xf32>
    %cst_85 = arith.constant 1.250000e-01 : f32
    %233 = vector.broadcast %cst_85 : f32 to vector<4x8x8xf32>
    %234 = arith.mulf %232, %233 : vector<4x8x8xf32>
    %cst_86 = arith.constant dense<0xFF800000> : vector<4x8xf32>
    %235 = vector.multi_reduction <maximumf>, %234, %cst_86 [2] : vector<4x8x8xf32> to vector<4x8xf32>
    %236 = vector.shape_cast %235 : vector<4x8xf32> to vector<4x8x1xf32>
    %237 = vector.broadcast %236 : vector<4x8x1xf32> to vector<4x8x8xf32>
    %238 = arith.subf %234, %237 : vector<4x8x8xf32>
    %239 = math.exp %238 : vector<4x8x8xf32>
    %cst_87 = arith.constant dense<0.000000e+00> : vector<4x8xf32>
    %240 = vector.multi_reduction <add>, %239, %cst_87 [2] : vector<4x8x8xf32> to vector<4x8xf32>
    %241 = vector.shape_cast %240 : vector<4x8xf32> to vector<4x8x1xf32>
    %242 = vector.broadcast %241 : vector<4x8x1xf32> to vector<4x8x8xf32>
    %243 = arith.divf %239, %242 : vector<4x8x8xf32>
    %cst_88 = arith.constant dense<0.000000e+00> : vector<4x8x16xf32>
    %244 = tpu.matmul %243, %231, %cst_88 {dimension_numbers = #tpu.dot_dimension_numbers<[2], [1], [1], [2], [0, 0, 0, 1, 1, 2], [0], [0]>} : vector<4x8x8xf32>, vector<4x8x16xf32>, vector<4x8x16xf32> -> vector<4x8x16xf32>
    %245 = arith.addf %229, %244 : vector<4x8x16xf32>
    %246 = vector.extract_strided_slice %211 {offsets = [0, 0, 32], sizes = [4, 8, 16], strides = [1, 1, 1]} : vector<4x8x64xf32> to vector<4x8x16xf32>
    %247 = vector.extract_strided_slice %205 {offsets = [0, 0, 32], sizes = [4, 8, 16], strides = [1, 1, 1]} : vector<4x8x64xf32> to vector<4x8x16xf32>
    %248 = vector.extract_strided_slice %206 {offsets = [0, 0, 32], sizes = [4, 8, 16], strides = [1, 1, 1]} : vector<4x8x64xf32> to vector<4x8x16xf32>
    %cst_89 = arith.constant dense<0.000000e+00> : vector<4x8x8xf32>
    %249 = tpu.matmul %246, %247, %cst_89 {dimension_numbers = #tpu.dot_dimension_numbers<[2], [2], [1], [1], [0, 0, 0, 1, 1, 1], [0], [0]>} : vector<4x8x16xf32>, vector<4x8x16xf32>, vector<4x8x8xf32> -> vector<4x8x8xf32>
    %cst_90 = arith.constant 1.250000e-01 : f32
    %250 = vector.broadcast %cst_90 : f32 to vector<4x8x8xf32>
    %251 = arith.mulf %249, %250 : vector<4x8x8xf32>
    %cst_91 = arith.constant dense<0xFF800000> : vector<4x8xf32>
    %252 = vector.multi_reduction <maximumf>, %251, %cst_91 [2] : vector<4x8x8xf32> to vector<4x8xf32>
    %253 = vector.shape_cast %252 : vector<4x8xf32> to vector<4x8x1xf32>
    %254 = vector.broadcast %253 : vector<4x8x1xf32> to vector<4x8x8xf32>
    %255 = arith.subf %251, %254 : vector<4x8x8xf32>
    %256 = math.exp %255 : vector<4x8x8xf32>
    %cst_92 = arith.constant dense<0.000000e+00> : vector<4x8xf32>
    %257 = vector.multi_reduction <add>, %256, %cst_92 [2] : vector<4x8x8xf32> to vector<4x8xf32>
    %258 = vector.shape_cast %257 : vector<4x8xf32> to vector<4x8x1xf32>
    %259 = vector.broadcast %258 : vector<4x8x1xf32> to vector<4x8x8xf32>
    %260 = arith.divf %256, %259 : vector<4x8x8xf32>
    %cst_93 = arith.constant dense<0.000000e+00> : vector<4x8x16xf32>
    %261 = tpu.matmul %260, %248, %cst_93 {dimension_numbers = #tpu.dot_dimension_numbers<[2], [1], [1], [2], [0, 0, 0, 1, 1, 2], [0], [0]>} : vector<4x8x8xf32>, vector<4x8x16xf32>, vector<4x8x16xf32> -> vector<4x8x16xf32>
    %262 = arith.addf %246, %261 : vector<4x8x16xf32>
    %263 = vector.extract_strided_slice %211 {offsets = [0, 0, 48], sizes = [4, 8, 16], strides = [1, 1, 1]} : vector<4x8x64xf32> to vector<4x8x16xf32>
    %264 = vector.extract_strided_slice %205 {offsets = [0, 0, 48], sizes = [4, 8, 16], strides = [1, 1, 1]} : vector<4x8x64xf32> to vector<4x8x16xf32>
    %265 = vector.extract_strided_slice %206 {offsets = [0, 0, 48], sizes = [4, 8, 16], strides = [1, 1, 1]} : vector<4x8x64xf32> to vector<4x8x16xf32>
    %cst_94 = arith.constant dense<0.000000e+00> : vector<4x8x8xf32>
    %266 = tpu.matmul %263, %264, %cst_94 {dimension_numbers = #tpu.dot_dimension_numbers<[2], [2], [1], [1], [0, 0, 0, 1, 1, 1], [0], [0]>} : vector<4x8x16xf32>, vector<4x8x16xf32>, vector<4x8x8xf32> -> vector<4x8x8xf32>
    %cst_95 = arith.constant 1.250000e-01 : f32
    %267 = vector.broadcast %cst_95 : f32 to vector<4x8x8xf32>
    %268 = arith.mulf %266, %267 : vector<4x8x8xf32>
    %cst_96 = arith.constant dense<0xFF800000> : vector<4x8xf32>
    %269 = vector.multi_reduction <maximumf>, %268, %cst_96 [2] : vector<4x8x8xf32> to vector<4x8xf32>
    %270 = vector.shape_cast %269 : vector<4x8xf32> to vector<4x8x1xf32>
    %271 = vector.broadcast %270 : vector<4x8x1xf32> to vector<4x8x8xf32>
    %272 = arith.subf %268, %271 : vector<4x8x8xf32>
    %273 = math.exp %272 : vector<4x8x8xf32>
    %cst_97 = arith.constant dense<0.000000e+00> : vector<4x8xf32>
    %274 = vector.multi_reduction <add>, %273, %cst_97 [2] : vector<4x8x8xf32> to vector<4x8xf32>
    %275 = vector.shape_cast %274 : vector<4x8xf32> to vector<4x8x1xf32>
    %276 = vector.broadcast %275 : vector<4x8x1xf32> to vector<4x8x8xf32>
    %277 = arith.divf %273, %276 : vector<4x8x8xf32>
    %cst_98 = arith.constant dense<0.000000e+00> : vector<4x8x16xf32>
    %278 = tpu.matmul %277, %265, %cst_98 {dimension_numbers = #tpu.dot_dimension_numbers<[2], [1], [1], [2], [0, 0, 0, 1, 1, 2], [0], [0]>} : vector<4x8x8xf32>, vector<4x8x16xf32>, vector<4x8x16xf32> -> vector<4x8x16xf32>
    %279 = arith.addf %263, %278 : vector<4x8x16xf32>
    %280 = tpu.concatenate %228, %245, %262, %279 in 2 : vector<4x8x16xf32>, vector<4x8x16xf32>, vector<4x8x16xf32>, vector<4x8x16xf32> -> vector<4x8x64xf32>
    %281 = vector.shape_cast %280 : vector<4x8x64xf32> to vector<32x64xf32>
    %cst_99 = arith.constant dense<0.000000e+00> : vector<32x64xf32>
    %282 = tpu.matmul %281, %195, %cst_99 {dimension_numbers = #tpu.dot_dimension_numbers<[1], [0], [0], [1], [0, 0, 1, 1], [], []>} : vector<32x64xf32>, vector<64x64xf32>, vector<32x64xf32> -> vector<32x64xf32>
    %283 = vector.broadcast %198 : vector<1x64xf32> to vector<32x64xf32>
    %284 = arith.addf %282, %283 : vector<32x64xf32>
    %285 = vector.shape_cast %284 : vector<32x64xf32> to vector<4x8x64xf32>
    %cst_100 = arith.constant 0.000000e+00 : f32
    %286 = vector.broadcast %cst_100 : f32 to vector<4x8x64xf32>
    %287 = arith.maximumf %285, %286 : vector<4x8x64xf32>
    %288 = arith.addf %280, %287 : vector<4x8x64xf32>
    %c168 = arith.constant 168 : index
    %c0_101 = arith.constant 0 : index
    %289 = vector.load %arg3[%c168, %c0_101] : memref<768x64xf32, #tpu.memory_space<vmem>>, vector<64x64xf32>
    %c552 = arith.constant 552 : index
    %c0_102 = arith.constant 0 : index
    %290 = vector.load %arg3[%c552, %c0_102] : memref<768x64xf32, #tpu.memory_space<vmem>>, vector<64x64xf32>
    %c168_103 = arith.constant 168 : index
    %c0_104 = arith.constant 0 : index
    %291 = vector.load %arg2[%c168_103, %c0_104] : memref<424x128xf32, #tpu.memory_space<vmem>>, vector<64x128xf32>
    %c3 = arith.constant 3 : index
    %c0_105 = arith.constant 0 : index
    %292 = vector.load %arg4[%c3, %c0_105] : memref<16x128xf32, #tpu.memory_space<vmem>>, vector<1x64xf32>
    %c3_106 = arith.constant 3 : index
    %c64_107 = arith.constant 64 : index
    %293 = vector.load %arg4[%c3_106, %c64_107] : memref<16x128xf32, #tpu.memory_space<vmem>>, vector<1x64xf32>
    %c9 = arith.constant 9 : index
    %c0_108 = arith.constant 0 : index
    %294 = vector.load %arg4[%c9, %c0_108] : memref<16x128xf32, #tpu.memory_space<vmem>>, vector<1x128xf32>
    %295 = vector.shape_cast %288 : vector<4x8x64xf32> to vector<32x64xf32>
    %cst_109 = arith.constant dense<0.000000e+00> : vector<32x128xf32>
    %296 = tpu.matmul %295, %291, %cst_109 {dimension_numbers = #tpu.dot_dimension_numbers<[1], [0], [0], [1], [0, 0, 1, 1], [], []>} : vector<32x64xf32>, vector<64x128xf32>, vector<32x128xf32> -> vector<32x128xf32>
    %297 = vector.broadcast %294 : vector<1x128xf32> to vector<32x128xf32>
    %298 = arith.addf %296, %297 : vector<32x128xf32>
    %299 = vector.shape_cast %298 : vector<32x128xf32> to vector<4x8x128xf32>
    %300 = vector.extract_strided_slice %299 {offsets = [0, 0, 0], sizes = [4, 8, 64], strides = [1, 1, 1]} : vector<4x8x128xf32> to vector<4x8x64xf32>
    %301 = vector.extract_strided_slice %299 {offsets = [0, 0, 64], sizes = [4, 8, 64], strides = [1, 1, 1]} : vector<4x8x128xf32> to vector<4x8x64xf32>
    %302 = vector.shape_cast %193 : vector<4x8x64xf32> to vector<32x64xf32>
    %cst_110 = arith.constant dense<0.000000e+00> : vector<32x64xf32>
    %303 = tpu.matmul %302, %289, %cst_110 {dimension_numbers = #tpu.dot_dimension_numbers<[1], [0], [0], [1], [0, 0, 1, 1], [], []>} : vector<32x64xf32>, vector<64x64xf32>, vector<32x64xf32> -> vector<32x64xf32>
    %304 = vector.broadcast %292 : vector<1x64xf32> to vector<32x64xf32>
    %305 = arith.addf %303, %304 : vector<32x64xf32>
    %306 = vector.shape_cast %305 : vector<32x64xf32> to vector<4x8x64xf32>
    %307 = vector.extract_strided_slice %306 {offsets = [0, 0, 0], sizes = [4, 8, 16], strides = [1, 1, 1]} : vector<4x8x64xf32> to vector<4x8x16xf32>
    %308 = vector.extract_strided_slice %300 {offsets = [0, 0, 0], sizes = [4, 8, 16], strides = [1, 1, 1]} : vector<4x8x64xf32> to vector<4x8x16xf32>
    %309 = vector.extract_strided_slice %301 {offsets = [0, 0, 0], sizes = [4, 8, 16], strides = [1, 1, 1]} : vector<4x8x64xf32> to vector<4x8x16xf32>
    %cst_111 = arith.constant dense<0.000000e+00> : vector<4x8x8xf32>
    %310 = tpu.matmul %307, %308, %cst_111 {dimension_numbers = #tpu.dot_dimension_numbers<[2], [2], [1], [1], [0, 0, 0, 1, 1, 1], [0], [0]>} : vector<4x8x16xf32>, vector<4x8x16xf32>, vector<4x8x8xf32> -> vector<4x8x8xf32>
    %cst_112 = arith.constant 1.250000e-01 : f32
    %311 = vector.broadcast %cst_112 : f32 to vector<4x8x8xf32>
    %312 = arith.mulf %310, %311 : vector<4x8x8xf32>
    %cst_113 = arith.constant dense<0xFF800000> : vector<4x8xf32>
    %313 = vector.multi_reduction <maximumf>, %312, %cst_113 [2] : vector<4x8x8xf32> to vector<4x8xf32>
    %314 = vector.shape_cast %313 : vector<4x8xf32> to vector<4x8x1xf32>
    %315 = vector.broadcast %314 : vector<4x8x1xf32> to vector<4x8x8xf32>
    %316 = arith.subf %312, %315 : vector<4x8x8xf32>
    %317 = math.exp %316 : vector<4x8x8xf32>
    %cst_114 = arith.constant dense<0.000000e+00> : vector<4x8xf32>
    %318 = vector.multi_reduction <add>, %317, %cst_114 [2] : vector<4x8x8xf32> to vector<4x8xf32>
    %319 = vector.shape_cast %318 : vector<4x8xf32> to vector<4x8x1xf32>
    %320 = vector.broadcast %319 : vector<4x8x1xf32> to vector<4x8x8xf32>
    %321 = arith.divf %317, %320 : vector<4x8x8xf32>
    %cst_115 = arith.constant dense<0.000000e+00> : vector<4x8x16xf32>
    %322 = tpu.matmul %321, %309, %cst_115 {dimension_numbers = #tpu.dot_dimension_numbers<[2], [1], [1], [2], [0, 0, 0, 1, 1, 2], [0], [0]>} : vector<4x8x8xf32>, vector<4x8x16xf32>, vector<4x8x16xf32> -> vector<4x8x16xf32>
    %323 = arith.addf %307, %322 : vector<4x8x16xf32>
    %324 = vector.extract_strided_slice %306 {offsets = [0, 0, 16], sizes = [4, 8, 16], strides = [1, 1, 1]} : vector<4x8x64xf32> to vector<4x8x16xf32>
    %325 = vector.extract_strided_slice %300 {offsets = [0, 0, 16], sizes = [4, 8, 16], strides = [1, 1, 1]} : vector<4x8x64xf32> to vector<4x8x16xf32>
    %326 = vector.extract_strided_slice %301 {offsets = [0, 0, 16], sizes = [4, 8, 16], strides = [1, 1, 1]} : vector<4x8x64xf32> to vector<4x8x16xf32>
    %cst_116 = arith.constant dense<0.000000e+00> : vector<4x8x8xf32>
    %327 = tpu.matmul %324, %325, %cst_116 {dimension_numbers = #tpu.dot_dimension_numbers<[2], [2], [1], [1], [0, 0, 0, 1, 1, 1], [0], [0]>} : vector<4x8x16xf32>, vector<4x8x16xf32>, vector<4x8x8xf32> -> vector<4x8x8xf32>
    %cst_117 = arith.constant 1.250000e-01 : f32
    %328 = vector.broadcast %cst_117 : f32 to vector<4x8x8xf32>
    %329 = arith.mulf %327, %328 : vector<4x8x8xf32>
    %cst_118 = arith.constant dense<0xFF800000> : vector<4x8xf32>
    %330 = vector.multi_reduction <maximumf>, %329, %cst_118 [2] : vector<4x8x8xf32> to vector<4x8xf32>
    %331 = vector.shape_cast %330 : vector<4x8xf32> to vector<4x8x1xf32>
    %332 = vector.broadcast %331 : vector<4x8x1xf32> to vector<4x8x8xf32>
    %333 = arith.subf %329, %332 : vector<4x8x8xf32>
    %334 = math.exp %333 : vector<4x8x8xf32>
    %cst_119 = arith.constant dense<0.000000e+00> : vector<4x8xf32>
    %335 = vector.multi_reduction <add>, %334, %cst_119 [2] : vector<4x8x8xf32> to vector<4x8xf32>
    %336 = vector.shape_cast %335 : vector<4x8xf32> to vector<4x8x1xf32>
    %337 = vector.broadcast %336 : vector<4x8x1xf32> to vector<4x8x8xf32>
    %338 = arith.divf %334, %337 : vector<4x8x8xf32>
    %cst_120 = arith.constant dense<0.000000e+00> : vector<4x8x16xf32>
    %339 = tpu.matmul %338, %326, %cst_120 {dimension_numbers = #tpu.dot_dimension_numbers<[2], [1], [1], [2], [0, 0, 0, 1, 1, 2], [0], [0]>} : vector<4x8x8xf32>, vector<4x8x16xf32>, vector<4x8x16xf32> -> vector<4x8x16xf32>
    %340 = arith.addf %324, %339 : vector<4x8x16xf32>
    %341 = vector.extract_strided_slice %306 {offsets = [0, 0, 32], sizes = [4, 8, 16], strides = [1, 1, 1]} : vector<4x8x64xf32> to vector<4x8x16xf32>
    %342 = vector.extract_strided_slice %300 {offsets = [0, 0, 32], sizes = [4, 8, 16], strides = [1, 1, 1]} : vector<4x8x64xf32> to vector<4x8x16xf32>
    %343 = vector.extract_strided_slice %301 {offsets = [0, 0, 32], sizes = [4, 8, 16], strides = [1, 1, 1]} : vector<4x8x64xf32> to vector<4x8x16xf32>
    %cst_121 = arith.constant dense<0.000000e+00> : vector<4x8x8xf32>
    %344 = tpu.matmul %341, %342, %cst_121 {dimension_numbers = #tpu.dot_dimension_numbers<[2], [2], [1], [1], [0, 0, 0, 1, 1, 1], [0], [0]>} : vector<4x8x16xf32>, vector<4x8x16xf32>, vector<4x8x8xf32> -> vector<4x8x8xf32>
    %cst_122 = arith.constant 1.250000e-01 : f32
    %345 = vector.broadcast %cst_122 : f32 to vector<4x8x8xf32>
    %346 = arith.mulf %344, %345 : vector<4x8x8xf32>
    %cst_123 = arith.constant dense<0xFF800000> : vector<4x8xf32>
    %347 = vector.multi_reduction <maximumf>, %346, %cst_123 [2] : vector<4x8x8xf32> to vector<4x8xf32>
    %348 = vector.shape_cast %347 : vector<4x8xf32> to vector<4x8x1xf32>
    %349 = vector.broadcast %348 : vector<4x8x1xf32> to vector<4x8x8xf32>
    %350 = arith.subf %346, %349 : vector<4x8x8xf32>
    %351 = math.exp %350 : vector<4x8x8xf32>
    %cst_124 = arith.constant dense<0.000000e+00> : vector<4x8xf32>
    %352 = vector.multi_reduction <add>, %351, %cst_124 [2] : vector<4x8x8xf32> to vector<4x8xf32>
    %353 = vector.shape_cast %352 : vector<4x8xf32> to vector<4x8x1xf32>
    %354 = vector.broadcast %353 : vector<4x8x1xf32> to vector<4x8x8xf32>
    %355 = arith.divf %351, %354 : vector<4x8x8xf32>
    %cst_125 = arith.constant dense<0.000000e+00> : vector<4x8x16xf32>
    %356 = tpu.matmul %355, %343, %cst_125 {dimension_numbers = #tpu.dot_dimension_numbers<[2], [1], [1], [2], [0, 0, 0, 1, 1, 2], [0], [0]>} : vector<4x8x8xf32>, vector<4x8x16xf32>, vector<4x8x16xf32> -> vector<4x8x16xf32>
    %357 = arith.addf %341, %356 : vector<4x8x16xf32>
    %358 = vector.extract_strided_slice %306 {offsets = [0, 0, 48], sizes = [4, 8, 16], strides = [1, 1, 1]} : vector<4x8x64xf32> to vector<4x8x16xf32>
    %359 = vector.extract_strided_slice %300 {offsets = [0, 0, 48], sizes = [4, 8, 16], strides = [1, 1, 1]} : vector<4x8x64xf32> to vector<4x8x16xf32>
    %360 = vector.extract_strided_slice %301 {offsets = [0, 0, 48], sizes = [4, 8, 16], strides = [1, 1, 1]} : vector<4x8x64xf32> to vector<4x8x16xf32>
    %cst_126 = arith.constant dense<0.000000e+00> : vector<4x8x8xf32>
    %361 = tpu.matmul %358, %359, %cst_126 {dimension_numbers = #tpu.dot_dimension_numbers<[2], [2], [1], [1], [0, 0, 0, 1, 1, 1], [0], [0]>} : vector<4x8x16xf32>, vector<4x8x16xf32>, vector<4x8x8xf32> -> vector<4x8x8xf32>
    %cst_127 = arith.constant 1.250000e-01 : f32
    %362 = vector.broadcast %cst_127 : f32 to vector<4x8x8xf32>
    %363 = arith.mulf %361, %362 : vector<4x8x8xf32>
    %cst_128 = arith.constant dense<0xFF800000> : vector<4x8xf32>
    %364 = vector.multi_reduction <maximumf>, %363, %cst_128 [2] : vector<4x8x8xf32> to vector<4x8xf32>
    %365 = vector.shape_cast %364 : vector<4x8xf32> to vector<4x8x1xf32>
    %366 = vector.broadcast %365 : vector<4x8x1xf32> to vector<4x8x8xf32>
    %367 = arith.subf %363, %366 : vector<4x8x8xf32>
    %368 = math.exp %367 : vector<4x8x8xf32>
    %cst_129 = arith.constant dense<0.000000e+00> : vector<4x8xf32>
    %369 = vector.multi_reduction <add>, %368, %cst_129 [2] : vector<4x8x8xf32> to vector<4x8xf32>
    %370 = vector.shape_cast %369 : vector<4x8xf32> to vector<4x8x1xf32>
    %371 = vector.broadcast %370 : vector<4x8x1xf32> to vector<4x8x8xf32>
    %372 = arith.divf %368, %371 : vector<4x8x8xf32>
    %cst_130 = arith.constant dense<0.000000e+00> : vector<4x8x16xf32>
    %373 = tpu.matmul %372, %360, %cst_130 {dimension_numbers = #tpu.dot_dimension_numbers<[2], [1], [1], [2], [0, 0, 0, 1, 1, 2], [0], [0]>} : vector<4x8x8xf32>, vector<4x8x16xf32>, vector<4x8x16xf32> -> vector<4x8x16xf32>
    %374 = arith.addf %358, %373 : vector<4x8x16xf32>
    %375 = tpu.concatenate %323, %340, %357, %374 in 2 : vector<4x8x16xf32>, vector<4x8x16xf32>, vector<4x8x16xf32>, vector<4x8x16xf32> -> vector<4x8x64xf32>
    %376 = vector.shape_cast %375 : vector<4x8x64xf32> to vector<32x64xf32>
    %cst_131 = arith.constant dense<0.000000e+00> : vector<32x64xf32>
    %377 = tpu.matmul %376, %290, %cst_131 {dimension_numbers = #tpu.dot_dimension_numbers<[1], [0], [0], [1], [0, 0, 1, 1], [], []>} : vector<32x64xf32>, vector<64x64xf32>, vector<32x64xf32> -> vector<32x64xf32>
    %378 = vector.broadcast %293 : vector<1x64xf32> to vector<32x64xf32>
    %379 = arith.addf %377, %378 : vector<32x64xf32>
    %380 = vector.shape_cast %379 : vector<32x64xf32> to vector<4x8x64xf32>
    %cst_132 = arith.constant 0.000000e+00 : f32
    %381 = vector.broadcast %cst_132 : f32 to vector<4x8x64xf32>
    %382 = arith.maximumf %380, %381 : vector<4x8x64xf32>
    %383 = arith.addf %375, %382 : vector<4x8x64xf32>
    %c232 = arith.constant 232 : index
    %c0_133 = arith.constant 0 : index
    %384 = vector.load %arg3[%c232, %c0_133] : memref<768x64xf32, #tpu.memory_space<vmem>>, vector<64x64xf32>
    %c616 = arith.constant 616 : index
    %c0_134 = arith.constant 0 : index
    %385 = vector.load %arg3[%c616, %c0_134] : memref<768x64xf32, #tpu.memory_space<vmem>>, vector<64x64xf32>
    %c232_135 = arith.constant 232 : index
    %c0_136 = arith.constant 0 : index
    %386 = vector.load %arg2[%c232_135, %c0_136] : memref<424x128xf32, #tpu.memory_space<vmem>>, vector<64x128xf32>
    %c4 = arith.constant 4 : index
    %c0_137 = arith.constant 0 : index
    %387 = vector.load %arg4[%c4, %c0_137] : memref<16x128xf32, #tpu.memory_space<vmem>>, vector<1x64xf32>
    %c4_138 = arith.constant 4 : index
    %c64_139 = arith.constant 64 : index
    %388 = vector.load %arg4[%c4_138, %c64_139] : memref<16x128xf32, #tpu.memory_space<vmem>>, vector<1x64xf32>
    %c10 = arith.constant 10 : index
    %c0_140 = arith.constant 0 : index
    %389 = vector.load %arg4[%c10, %c0_140] : memref<16x128xf32, #tpu.memory_space<vmem>>, vector<1x128xf32>
    %390 = vector.shape_cast %383 : vector<4x8x64xf32> to vector<32x64xf32>
    %cst_141 = arith.constant dense<0.000000e+00> : vector<32x128xf32>
    %391 = tpu.matmul %390, %386, %cst_141 {dimension_numbers = #tpu.dot_dimension_numbers<[1], [0], [0], [1], [0, 0, 1, 1], [], []>} : vector<32x64xf32>, vector<64x128xf32>, vector<32x128xf32> -> vector<32x128xf32>
    %392 = vector.broadcast %389 : vector<1x128xf32> to vector<32x128xf32>
    %393 = arith.addf %391, %392 : vector<32x128xf32>
    %394 = vector.shape_cast %393 : vector<32x128xf32> to vector<4x8x128xf32>
    %395 = vector.extract_strided_slice %394 {offsets = [0, 0, 0], sizes = [4, 8, 64], strides = [1, 1, 1]} : vector<4x8x128xf32> to vector<4x8x64xf32>
    %396 = vector.extract_strided_slice %394 {offsets = [0, 0, 64], sizes = [4, 8, 64], strides = [1, 1, 1]} : vector<4x8x128xf32> to vector<4x8x64xf32>
    %cst_142 = arith.constant dense<0.000000e+00> : vector<3x64xf32>
    %397 = tpu.matmul %3, %384, %cst_142 {dimension_numbers = #tpu.dot_dimension_numbers<[1], [0], [0], [1], [0, 0, 1, 1], [], []>} : vector<3x64xf32>, vector<64x64xf32>, vector<3x64xf32> -> vector<3x64xf32>
    %398 = vector.broadcast %387 : vector<1x64xf32> to vector<3x64xf32>
    %399 = arith.addf %397, %398 : vector<3x64xf32>
    %400 = vector.shape_cast %399 : vector<3x64xf32> to vector<1x3x64xf32>
    %401 = vector.broadcast %400 : vector<1x3x64xf32> to vector<4x3x64xf32>
    %402 = vector.extract_strided_slice %401 {offsets = [0, 0, 0], sizes = [4, 3, 16], strides = [1, 1, 1]} : vector<4x3x64xf32> to vector<4x3x16xf32>
    %403 = vector.extract_strided_slice %395 {offsets = [0, 0, 0], sizes = [4, 8, 16], strides = [1, 1, 1]} : vector<4x8x64xf32> to vector<4x8x16xf32>
    %404 = vector.extract_strided_slice %396 {offsets = [0, 0, 0], sizes = [4, 8, 16], strides = [1, 1, 1]} : vector<4x8x64xf32> to vector<4x8x16xf32>
    %cst_143 = arith.constant dense<0.000000e+00> : vector<4x3x8xf32>
    %405 = tpu.matmul %402, %403, %cst_143 {dimension_numbers = #tpu.dot_dimension_numbers<[2], [2], [1], [1], [0, 0, 0, 1, 1, 1], [0], [0]>} : vector<4x3x16xf32>, vector<4x8x16xf32>, vector<4x3x8xf32> -> vector<4x3x8xf32>
    %cst_144 = arith.constant 1.250000e-01 : f32
    %406 = vector.broadcast %cst_144 : f32 to vector<4x3x8xf32>
    %407 = arith.mulf %405, %406 : vector<4x3x8xf32>
    %cst_145 = arith.constant dense<0xFF800000> : vector<4x3xf32>
    %408 = vector.multi_reduction <maximumf>, %407, %cst_145 [2] : vector<4x3x8xf32> to vector<4x3xf32>
    %409 = vector.shape_cast %408 : vector<4x3xf32> to vector<4x3x1xf32>
    %410 = vector.broadcast %409 : vector<4x3x1xf32> to vector<4x3x8xf32>
    %411 = arith.subf %407, %410 : vector<4x3x8xf32>
    %412 = math.exp %411 : vector<4x3x8xf32>
    %cst_146 = arith.constant dense<0.000000e+00> : vector<4x3xf32>
    %413 = vector.multi_reduction <add>, %412, %cst_146 [2] : vector<4x3x8xf32> to vector<4x3xf32>
    %414 = vector.shape_cast %413 : vector<4x3xf32> to vector<4x3x1xf32>
    %415 = vector.broadcast %414 : vector<4x3x1xf32> to vector<4x3x8xf32>
    %416 = arith.divf %412, %415 : vector<4x3x8xf32>
    %cst_147 = arith.constant dense<0.000000e+00> : vector<4x3x16xf32>
    %417 = tpu.matmul %416, %404, %cst_147 {dimension_numbers = #tpu.dot_dimension_numbers<[2], [1], [1], [2], [0, 0, 0, 1, 1, 2], [0], [0]>} : vector<4x3x8xf32>, vector<4x8x16xf32>, vector<4x3x16xf32> -> vector<4x3x16xf32>
    %418 = arith.addf %402, %417 : vector<4x3x16xf32>
    %419 = vector.extract_strided_slice %401 {offsets = [0, 0, 16], sizes = [4, 3, 16], strides = [1, 1, 1]} : vector<4x3x64xf32> to vector<4x3x16xf32>
    %420 = vector.extract_strided_slice %395 {offsets = [0, 0, 16], sizes = [4, 8, 16], strides = [1, 1, 1]} : vector<4x8x64xf32> to vector<4x8x16xf32>
    %421 = vector.extract_strided_slice %396 {offsets = [0, 0, 16], sizes = [4, 8, 16], strides = [1, 1, 1]} : vector<4x8x64xf32> to vector<4x8x16xf32>
    %cst_148 = arith.constant dense<0.000000e+00> : vector<4x3x8xf32>
    %422 = tpu.matmul %419, %420, %cst_148 {dimension_numbers = #tpu.dot_dimension_numbers<[2], [2], [1], [1], [0, 0, 0, 1, 1, 1], [0], [0]>} : vector<4x3x16xf32>, vector<4x8x16xf32>, vector<4x3x8xf32> -> vector<4x3x8xf32>
    %cst_149 = arith.constant 1.250000e-01 : f32
    %423 = vector.broadcast %cst_149 : f32 to vector<4x3x8xf32>
    %424 = arith.mulf %422, %423 : vector<4x3x8xf32>
    %cst_150 = arith.constant dense<0xFF800000> : vector<4x3xf32>
    %425 = vector.multi_reduction <maximumf>, %424, %cst_150 [2] : vector<4x3x8xf32> to vector<4x3xf32>
    %426 = vector.shape_cast %425 : vector<4x3xf32> to vector<4x3x1xf32>
    %427 = vector.broadcast %426 : vector<4x3x1xf32> to vector<4x3x8xf32>
    %428 = arith.subf %424, %427 : vector<4x3x8xf32>
    %429 = math.exp %428 : vector<4x3x8xf32>
    %cst_151 = arith.constant dense<0.000000e+00> : vector<4x3xf32>
    %430 = vector.multi_reduction <add>, %429, %cst_151 [2] : vector<4x3x8xf32> to vector<4x3xf32>
    %431 = vector.shape_cast %430 : vector<4x3xf32> to vector<4x3x1xf32>
    %432 = vector.broadcast %431 : vector<4x3x1xf32> to vector<4x3x8xf32>
    %433 = arith.divf %429, %432 : vector<4x3x8xf32>
    %cst_152 = arith.constant dense<0.000000e+00> : vector<4x3x16xf32>
    %434 = tpu.matmul %433, %421, %cst_152 {dimension_numbers = #tpu.dot_dimension_numbers<[2], [1], [1], [2], [0, 0, 0, 1, 1, 2], [0], [0]>} : vector<4x3x8xf32>, vector<4x8x16xf32>, vector<4x3x16xf32> -> vector<4x3x16xf32>
    %435 = arith.addf %419, %434 : vector<4x3x16xf32>
    %436 = vector.extract_strided_slice %401 {offsets = [0, 0, 32], sizes = [4, 3, 16], strides = [1, 1, 1]} : vector<4x3x64xf32> to vector<4x3x16xf32>
    %437 = vector.extract_strided_slice %395 {offsets = [0, 0, 32], sizes = [4, 8, 16], strides = [1, 1, 1]} : vector<4x8x64xf32> to vector<4x8x16xf32>
    %438 = vector.extract_strided_slice %396 {offsets = [0, 0, 32], sizes = [4, 8, 16], strides = [1, 1, 1]} : vector<4x8x64xf32> to vector<4x8x16xf32>
    %cst_153 = arith.constant dense<0.000000e+00> : vector<4x3x8xf32>
    %439 = tpu.matmul %436, %437, %cst_153 {dimension_numbers = #tpu.dot_dimension_numbers<[2], [2], [1], [1], [0, 0, 0, 1, 1, 1], [0], [0]>} : vector<4x3x16xf32>, vector<4x8x16xf32>, vector<4x3x8xf32> -> vector<4x3x8xf32>
    %cst_154 = arith.constant 1.250000e-01 : f32
    %440 = vector.broadcast %cst_154 : f32 to vector<4x3x8xf32>
    %441 = arith.mulf %439, %440 : vector<4x3x8xf32>
    %cst_155 = arith.constant dense<0xFF800000> : vector<4x3xf32>
    %442 = vector.multi_reduction <maximumf>, %441, %cst_155 [2] : vector<4x3x8xf32> to vector<4x3xf32>
    %443 = vector.shape_cast %442 : vector<4x3xf32> to vector<4x3x1xf32>
    %444 = vector.broadcast %443 : vector<4x3x1xf32> to vector<4x3x8xf32>
    %445 = arith.subf %441, %444 : vector<4x3x8xf32>
    %446 = math.exp %445 : vector<4x3x8xf32>
    %cst_156 = arith.constant dense<0.000000e+00> : vector<4x3xf32>
    %447 = vector.multi_reduction <add>, %446, %cst_156 [2] : vector<4x3x8xf32> to vector<4x3xf32>
    %448 = vector.shape_cast %447 : vector<4x3xf32> to vector<4x3x1xf32>
    %449 = vector.broadcast %448 : vector<4x3x1xf32> to vector<4x3x8xf32>
    %450 = arith.divf %446, %449 : vector<4x3x8xf32>
    %cst_157 = arith.constant dense<0.000000e+00> : vector<4x3x16xf32>
    %451 = tpu.matmul %450, %438, %cst_157 {dimension_numbers = #tpu.dot_dimension_numbers<[2], [1], [1], [2], [0, 0, 0, 1, 1, 2], [0], [0]>} : vector<4x3x8xf32>, vector<4x8x16xf32>, vector<4x3x16xf32> -> vector<4x3x16xf32>
    %452 = arith.addf %436, %451 : vector<4x3x16xf32>
    %453 = vector.extract_strided_slice %401 {offsets = [0, 0, 48], sizes = [4, 3, 16], strides = [1, 1, 1]} : vector<4x3x64xf32> to vector<4x3x16xf32>
    %454 = vector.extract_strided_slice %395 {offsets = [0, 0, 48], sizes = [4, 8, 16], strides = [1, 1, 1]} : vector<4x8x64xf32> to vector<4x8x16xf32>
    %455 = vector.extract_strided_slice %396 {offsets = [0, 0, 48], sizes = [4, 8, 16], strides = [1, 1, 1]} : vector<4x8x64xf32> to vector<4x8x16xf32>
    %cst_158 = arith.constant dense<0.000000e+00> : vector<4x3x8xf32>
    %456 = tpu.matmul %453, %454, %cst_158 {dimension_numbers = #tpu.dot_dimension_numbers<[2], [2], [1], [1], [0, 0, 0, 1, 1, 1], [0], [0]>} : vector<4x3x16xf32>, vector<4x8x16xf32>, vector<4x3x8xf32> -> vector<4x3x8xf32>
    %cst_159 = arith.constant 1.250000e-01 : f32
    %457 = vector.broadcast %cst_159 : f32 to vector<4x3x8xf32>
    %458 = arith.mulf %456, %457 : vector<4x3x8xf32>
    %cst_160 = arith.constant dense<0xFF800000> : vector<4x3xf32>
    %459 = vector.multi_reduction <maximumf>, %458, %cst_160 [2] : vector<4x3x8xf32> to vector<4x3xf32>
    %460 = vector.shape_cast %459 : vector<4x3xf32> to vector<4x3x1xf32>
    %461 = vector.broadcast %460 : vector<4x3x1xf32> to vector<4x3x8xf32>
    %462 = arith.subf %458, %461 : vector<4x3x8xf32>
    %463 = math.exp %462 : vector<4x3x8xf32>
    %cst_161 = arith.constant dense<0.000000e+00> : vector<4x3xf32>
    %464 = vector.multi_reduction <add>, %463, %cst_161 [2] : vector<4x3x8xf32> to vector<4x3xf32>
    %465 = vector.shape_cast %464 : vector<4x3xf32> to vector<4x3x1xf32>
    %466 = vector.broadcast %465 : vector<4x3x1xf32> to vector<4x3x8xf32>
    %467 = arith.divf %463, %466 : vector<4x3x8xf32>
    %cst_162 = arith.constant dense<0.000000e+00> : vector<4x3x16xf32>
    %468 = tpu.matmul %467, %455, %cst_162 {dimension_numbers = #tpu.dot_dimension_numbers<[2], [1], [1], [2], [0, 0, 0, 1, 1, 2], [0], [0]>} : vector<4x3x8xf32>, vector<4x8x16xf32>, vector<4x3x16xf32> -> vector<4x3x16xf32>
    %469 = arith.addf %453, %468 : vector<4x3x16xf32>
    %470 = tpu.concatenate %418, %435, %452, %469 in 2 : vector<4x3x16xf32>, vector<4x3x16xf32>, vector<4x3x16xf32>, vector<4x3x16xf32> -> vector<4x3x64xf32>
    %471 = vector.shape_cast %385 : vector<64x64xf32> to vector<1x64x64xf32>
    %472 = vector.broadcast %471 : vector<1x64x64xf32> to vector<4x64x64xf32>
    %cst_163 = arith.constant dense<0.000000e+00> : vector<4x3x64xf32>
    %473 = tpu.matmul %470, %472, %cst_163 {dimension_numbers = #tpu.dot_dimension_numbers<[2], [1], [1], [2], [0, 0, 0, 1, 1, 2], [0], [0]>} : vector<4x3x64xf32>, vector<4x64x64xf32>, vector<4x3x64xf32> -> vector<4x3x64xf32>
    %474 = vector.shape_cast %388 : vector<1x64xf32> to vector<1x1x64xf32>
    %475 = vector.broadcast %474 : vector<1x1x64xf32> to vector<4x3x64xf32>
    %476 = arith.addf %473, %475 : vector<4x3x64xf32>
    %cst_164 = arith.constant 0.000000e+00 : f32
    %477 = vector.broadcast %cst_164 : f32 to vector<4x3x64xf32>
    %478 = arith.maximumf %476, %477 : vector<4x3x64xf32>
    %479 = arith.addf %470, %478 : vector<4x3x64xf32>
    %c296 = arith.constant 296 : index
    %c0_165 = arith.constant 0 : index
    %480 = vector.load %arg3[%c296, %c0_165] : memref<768x64xf32, #tpu.memory_space<vmem>>, vector<64x64xf32>
    %c680 = arith.constant 680 : index
    %c0_166 = arith.constant 0 : index
    %481 = vector.load %arg3[%c680, %c0_166] : memref<768x64xf32, #tpu.memory_space<vmem>>, vector<64x64xf32>
    %c296_167 = arith.constant 296 : index
    %c0_168 = arith.constant 0 : index
    %482 = vector.load %arg2[%c296_167, %c0_168] : memref<424x128xf32, #tpu.memory_space<vmem>>, vector<64x128xf32>
    %c5 = arith.constant 5 : index
    %c0_169 = arith.constant 0 : index
    %483 = vector.load %arg4[%c5, %c0_169] : memref<16x128xf32, #tpu.memory_space<vmem>>, vector<1x64xf32>
    %c5_170 = arith.constant 5 : index
    %c64_171 = arith.constant 64 : index
    %484 = vector.load %arg4[%c5_170, %c64_171] : memref<16x128xf32, #tpu.memory_space<vmem>>, vector<1x64xf32>
    %c11 = arith.constant 11 : index
    %c0_172 = arith.constant 0 : index
    %485 = vector.load %arg4[%c11, %c0_172] : memref<16x128xf32, #tpu.memory_space<vmem>>, vector<1x128xf32>
    %486 = vector.shape_cast %482 : vector<64x128xf32> to vector<1x64x128xf32>
    %487 = vector.broadcast %486 : vector<1x64x128xf32> to vector<4x64x128xf32>
    %cst_173 = arith.constant dense<0.000000e+00> : vector<4x3x128xf32>
    %488 = tpu.matmul %479, %487, %cst_173 {dimension_numbers = #tpu.dot_dimension_numbers<[2], [1], [1], [2], [0, 0, 0, 1, 1, 2], [0], [0]>} : vector<4x3x64xf32>, vector<4x64x128xf32>, vector<4x3x128xf32> -> vector<4x3x128xf32>
    %489 = vector.shape_cast %485 : vector<1x128xf32> to vector<1x1x128xf32>
    %490 = vector.broadcast %489 : vector<1x1x128xf32> to vector<4x3x128xf32>
    %491 = arith.addf %488, %490 : vector<4x3x128xf32>
    %492 = vector.extract_strided_slice %491 {offsets = [0, 0, 0], sizes = [4, 3, 64], strides = [1, 1, 1]} : vector<4x3x128xf32> to vector<4x3x64xf32>
    %493 = vector.extract_strided_slice %491 {offsets = [0, 0, 64], sizes = [4, 3, 64], strides = [1, 1, 1]} : vector<4x3x128xf32> to vector<4x3x64xf32>
    %494 = vector.shape_cast %480 : vector<64x64xf32> to vector<1x64x64xf32>
    %495 = vector.broadcast %494 : vector<1x64x64xf32> to vector<4x64x64xf32>
    %cst_174 = arith.constant dense<0.000000e+00> : vector<4x3x64xf32>
    %496 = tpu.matmul %479, %495, %cst_174 {dimension_numbers = #tpu.dot_dimension_numbers<[2], [1], [1], [2], [0, 0, 0, 1, 1, 2], [0], [0]>} : vector<4x3x64xf32>, vector<4x64x64xf32>, vector<4x3x64xf32> -> vector<4x3x64xf32>
    %497 = vector.shape_cast %483 : vector<1x64xf32> to vector<1x1x64xf32>
    %498 = vector.broadcast %497 : vector<1x1x64xf32> to vector<4x3x64xf32>
    %499 = arith.addf %496, %498 : vector<4x3x64xf32>
    %500 = vector.extract_strided_slice %499 {offsets = [0, 0, 0], sizes = [4, 3, 16], strides = [1, 1, 1]} : vector<4x3x64xf32> to vector<4x3x16xf32>
    %501 = vector.extract_strided_slice %492 {offsets = [0, 0, 0], sizes = [4, 3, 16], strides = [1, 1, 1]} : vector<4x3x64xf32> to vector<4x3x16xf32>
    %502 = vector.extract_strided_slice %493 {offsets = [0, 0, 0], sizes = [4, 3, 16], strides = [1, 1, 1]} : vector<4x3x64xf32> to vector<4x3x16xf32>
    %cst_175 = arith.constant dense<0.000000e+00> : vector<4x3x3xf32>
    %503 = tpu.matmul %500, %501, %cst_175 {dimension_numbers = #tpu.dot_dimension_numbers<[2], [2], [1], [1], [0, 0, 0, 1, 1, 1], [0], [0]>} : vector<4x3x16xf32>, vector<4x3x16xf32>, vector<4x3x3xf32> -> vector<4x3x3xf32>
    %cst_176 = arith.constant 1.250000e-01 : f32
    %504 = vector.broadcast %cst_176 : f32 to vector<4x3x3xf32>
    %505 = arith.mulf %503, %504 : vector<4x3x3xf32>
    %cst_177 = arith.constant dense<0xFF800000> : vector<4x3xf32>
    %506 = vector.multi_reduction <maximumf>, %505, %cst_177 [2] : vector<4x3x3xf32> to vector<4x3xf32>
    %507 = vector.shape_cast %506 : vector<4x3xf32> to vector<4x3x1xf32>
    %508 = vector.broadcast %507 : vector<4x3x1xf32> to vector<4x3x3xf32>
    %509 = arith.subf %505, %508 : vector<4x3x3xf32>
    %510 = math.exp %509 : vector<4x3x3xf32>
    %cst_178 = arith.constant dense<0.000000e+00> : vector<4x3xf32>
    %511 = vector.multi_reduction <add>, %510, %cst_178 [2] : vector<4x3x3xf32> to vector<4x3xf32>
    %512 = vector.shape_cast %511 : vector<4x3xf32> to vector<4x3x1xf32>
    %513 = vector.broadcast %512 : vector<4x3x1xf32> to vector<4x3x3xf32>
    %514 = arith.divf %510, %513 : vector<4x3x3xf32>
    %cst_179 = arith.constant dense<0.000000e+00> : vector<4x3x16xf32>
    %515 = tpu.matmul %514, %502, %cst_179 {dimension_numbers = #tpu.dot_dimension_numbers<[2], [1], [1], [2], [0, 0, 0, 1, 1, 2], [0], [0]>} : vector<4x3x3xf32>, vector<4x3x16xf32>, vector<4x3x16xf32> -> vector<4x3x16xf32>
    %516 = arith.addf %500, %515 : vector<4x3x16xf32>
    %517 = vector.extract_strided_slice %499 {offsets = [0, 0, 16], sizes = [4, 3, 16], strides = [1, 1, 1]} : vector<4x3x64xf32> to vector<4x3x16xf32>
    %518 = vector.extract_strided_slice %492 {offsets = [0, 0, 16], sizes = [4, 3, 16], strides = [1, 1, 1]} : vector<4x3x64xf32> to vector<4x3x16xf32>
    %519 = vector.extract_strided_slice %493 {offsets = [0, 0, 16], sizes = [4, 3, 16], strides = [1, 1, 1]} : vector<4x3x64xf32> to vector<4x3x16xf32>
    %cst_180 = arith.constant dense<0.000000e+00> : vector<4x3x3xf32>
    %520 = tpu.matmul %517, %518, %cst_180 {dimension_numbers = #tpu.dot_dimension_numbers<[2], [2], [1], [1], [0, 0, 0, 1, 1, 1], [0], [0]>} : vector<4x3x16xf32>, vector<4x3x16xf32>, vector<4x3x3xf32> -> vector<4x3x3xf32>
    %cst_181 = arith.constant 1.250000e-01 : f32
    %521 = vector.broadcast %cst_181 : f32 to vector<4x3x3xf32>
    %522 = arith.mulf %520, %521 : vector<4x3x3xf32>
    %cst_182 = arith.constant dense<0xFF800000> : vector<4x3xf32>
    %523 = vector.multi_reduction <maximumf>, %522, %cst_182 [2] : vector<4x3x3xf32> to vector<4x3xf32>
    %524 = vector.shape_cast %523 : vector<4x3xf32> to vector<4x3x1xf32>
    %525 = vector.broadcast %524 : vector<4x3x1xf32> to vector<4x3x3xf32>
    %526 = arith.subf %522, %525 : vector<4x3x3xf32>
    %527 = math.exp %526 : vector<4x3x3xf32>
    %cst_183 = arith.constant dense<0.000000e+00> : vector<4x3xf32>
    %528 = vector.multi_reduction <add>, %527, %cst_183 [2] : vector<4x3x3xf32> to vector<4x3xf32>
    %529 = vector.shape_cast %528 : vector<4x3xf32> to vector<4x3x1xf32>
    %530 = vector.broadcast %529 : vector<4x3x1xf32> to vector<4x3x3xf32>
    %531 = arith.divf %527, %530 : vector<4x3x3xf32>
    %cst_184 = arith.constant dense<0.000000e+00> : vector<4x3x16xf32>
    %532 = tpu.matmul %531, %519, %cst_184 {dimension_numbers = #tpu.dot_dimension_numbers<[2], [1], [1], [2], [0, 0, 0, 1, 1, 2], [0], [0]>} : vector<4x3x3xf32>, vector<4x3x16xf32>, vector<4x3x16xf32> -> vector<4x3x16xf32>
    %533 = arith.addf %517, %532 : vector<4x3x16xf32>
    %534 = vector.extract_strided_slice %499 {offsets = [0, 0, 32], sizes = [4, 3, 16], strides = [1, 1, 1]} : vector<4x3x64xf32> to vector<4x3x16xf32>
    %535 = vector.extract_strided_slice %492 {offsets = [0, 0, 32], sizes = [4, 3, 16], strides = [1, 1, 1]} : vector<4x3x64xf32> to vector<4x3x16xf32>
    %536 = vector.extract_strided_slice %493 {offsets = [0, 0, 32], sizes = [4, 3, 16], strides = [1, 1, 1]} : vector<4x3x64xf32> to vector<4x3x16xf32>
    %cst_185 = arith.constant dense<0.000000e+00> : vector<4x3x3xf32>
    %537 = tpu.matmul %534, %535, %cst_185 {dimension_numbers = #tpu.dot_dimension_numbers<[2], [2], [1], [1], [0, 0, 0, 1, 1, 1], [0], [0]>} : vector<4x3x16xf32>, vector<4x3x16xf32>, vector<4x3x3xf32> -> vector<4x3x3xf32>
    %cst_186 = arith.constant 1.250000e-01 : f32
    %538 = vector.broadcast %cst_186 : f32 to vector<4x3x3xf32>
    %539 = arith.mulf %537, %538 : vector<4x3x3xf32>
    %cst_187 = arith.constant dense<0xFF800000> : vector<4x3xf32>
    %540 = vector.multi_reduction <maximumf>, %539, %cst_187 [2] : vector<4x3x3xf32> to vector<4x3xf32>
    %541 = vector.shape_cast %540 : vector<4x3xf32> to vector<4x3x1xf32>
    %542 = vector.broadcast %541 : vector<4x3x1xf32> to vector<4x3x3xf32>
    %543 = arith.subf %539, %542 : vector<4x3x3xf32>
    %544 = math.exp %543 : vector<4x3x3xf32>
    %cst_188 = arith.constant dense<0.000000e+00> : vector<4x3xf32>
    %545 = vector.multi_reduction <add>, %544, %cst_188 [2] : vector<4x3x3xf32> to vector<4x3xf32>
    %546 = vector.shape_cast %545 : vector<4x3xf32> to vector<4x3x1xf32>
    %547 = vector.broadcast %546 : vector<4x3x1xf32> to vector<4x3x3xf32>
    %548 = arith.divf %544, %547 : vector<4x3x3xf32>
    %cst_189 = arith.constant dense<0.000000e+00> : vector<4x3x16xf32>
    %549 = tpu.matmul %548, %536, %cst_189 {dimension_numbers = #tpu.dot_dimension_numbers<[2], [1], [1], [2], [0, 0, 0, 1, 1, 2], [0], [0]>} : vector<4x3x3xf32>, vector<4x3x16xf32>, vector<4x3x16xf32> -> vector<4x3x16xf32>
    %550 = arith.addf %534, %549 : vector<4x3x16xf32>
    %551 = vector.extract_strided_slice %499 {offsets = [0, 0, 48], sizes = [4, 3, 16], strides = [1, 1, 1]} : vector<4x3x64xf32> to vector<4x3x16xf32>
    %552 = vector.extract_strided_slice %492 {offsets = [0, 0, 48], sizes = [4, 3, 16], strides = [1, 1, 1]} : vector<4x3x64xf32> to vector<4x3x16xf32>
    %553 = vector.extract_strided_slice %493 {offsets = [0, 0, 48], sizes = [4, 3, 16], strides = [1, 1, 1]} : vector<4x3x64xf32> to vector<4x3x16xf32>
    %cst_190 = arith.constant dense<0.000000e+00> : vector<4x3x3xf32>
    %554 = tpu.matmul %551, %552, %cst_190 {dimension_numbers = #tpu.dot_dimension_numbers<[2], [2], [1], [1], [0, 0, 0, 1, 1, 1], [0], [0]>} : vector<4x3x16xf32>, vector<4x3x16xf32>, vector<4x3x3xf32> -> vector<4x3x3xf32>
    %cst_191 = arith.constant 1.250000e-01 : f32
    %555 = vector.broadcast %cst_191 : f32 to vector<4x3x3xf32>
    %556 = arith.mulf %554, %555 : vector<4x3x3xf32>
    %cst_192 = arith.constant dense<0xFF800000> : vector<4x3xf32>
    %557 = vector.multi_reduction <maximumf>, %556, %cst_192 [2] : vector<4x3x3xf32> to vector<4x3xf32>
    %558 = vector.shape_cast %557 : vector<4x3xf32> to vector<4x3x1xf32>
    %559 = vector.broadcast %558 : vector<4x3x1xf32> to vector<4x3x3xf32>
    %560 = arith.subf %556, %559 : vector<4x3x3xf32>
    %561 = math.exp %560 : vector<4x3x3xf32>
    %cst_193 = arith.constant dense<0.000000e+00> : vector<4x3xf32>
    %562 = vector.multi_reduction <add>, %561, %cst_193 [2] : vector<4x3x3xf32> to vector<4x3xf32>
    %563 = vector.shape_cast %562 : vector<4x3xf32> to vector<4x3x1xf32>
    %564 = vector.broadcast %563 : vector<4x3x1xf32> to vector<4x3x3xf32>
    %565 = arith.divf %561, %564 : vector<4x3x3xf32>
    %cst_194 = arith.constant dense<0.000000e+00> : vector<4x3x16xf32>
    %566 = tpu.matmul %565, %553, %cst_194 {dimension_numbers = #tpu.dot_dimension_numbers<[2], [1], [1], [2], [0, 0, 0, 1, 1, 2], [0], [0]>} : vector<4x3x3xf32>, vector<4x3x16xf32>, vector<4x3x16xf32> -> vector<4x3x16xf32>
    %567 = arith.addf %551, %566 : vector<4x3x16xf32>
    %568 = tpu.concatenate %516, %533, %550, %567 in 2 : vector<4x3x16xf32>, vector<4x3x16xf32>, vector<4x3x16xf32>, vector<4x3x16xf32> -> vector<4x3x64xf32>
    %569 = vector.shape_cast %481 : vector<64x64xf32> to vector<1x64x64xf32>
    %570 = vector.broadcast %569 : vector<1x64x64xf32> to vector<4x64x64xf32>
    %cst_195 = arith.constant dense<0.000000e+00> : vector<4x3x64xf32>
    %571 = tpu.matmul %568, %570, %cst_195 {dimension_numbers = #tpu.dot_dimension_numbers<[2], [1], [1], [2], [0, 0, 0, 1, 1, 2], [0], [0]>} : vector<4x3x64xf32>, vector<4x64x64xf32>, vector<4x3x64xf32> -> vector<4x3x64xf32>
    %572 = vector.shape_cast %484 : vector<1x64xf32> to vector<1x1x64xf32>
    %573 = vector.broadcast %572 : vector<1x1x64xf32> to vector<4x3x64xf32>
    %574 = arith.addf %571, %573 : vector<4x3x64xf32>
    %cst_196 = arith.constant 0.000000e+00 : f32
    %575 = vector.broadcast %cst_196 : f32 to vector<4x3x64xf32>
    %576 = arith.maximumf %574, %575 : vector<4x3x64xf32>
    %577 = arith.addf %568, %576 : vector<4x3x64xf32>
    %c360_197 = arith.constant 360 : index
    %c0_198 = arith.constant 0 : index
    %578 = vector.load %arg2[%c360_197, %c0_198] : memref<424x128xf32, #tpu.memory_space<vmem>>, vector<64x128xf32>
    %c12 = arith.constant 12 : index
    %c0_199 = arith.constant 0 : index
    %579 = vector.load %arg4[%c12, %c0_199] : memref<16x128xf32, #tpu.memory_space<vmem>>, vector<1x128xf32>
    %580 = vector.shape_cast %578 : vector<64x128xf32> to vector<1x64x128xf32>
    %581 = vector.broadcast %580 : vector<1x64x128xf32> to vector<4x64x128xf32>
    %cst_200 = arith.constant dense<0.000000e+00> : vector<4x3x128xf32>
    %582 = tpu.matmul %577, %581, %cst_200 {dimension_numbers = #tpu.dot_dimension_numbers<[2], [1], [1], [2], [0, 0, 0, 1, 1, 2], [0], [0]>} : vector<4x3x64xf32>, vector<4x64x128xf32>, vector<4x3x128xf32> -> vector<4x3x128xf32>
    %583 = vector.shape_cast %579 : vector<1x128xf32> to vector<1x1x128xf32>
    %584 = vector.broadcast %583 : vector<1x1x128xf32> to vector<4x3x128xf32>
    %585 = arith.addf %582, %584 : vector<4x3x128xf32>
    %586 = vector.extract_strided_slice %585 {offsets = [0, 0, 60], sizes = [4, 3, 1], strides = [1, 1, 1]} : vector<4x3x128xf32> to vector<4x3x1xf32>
    %cst_201 = arith.constant dense<0xFF800000> : vector<4x1xf32>
    %587 = vector.multi_reduction <maximumf>, %586, %cst_201 [1] : vector<4x3x1xf32> to vector<4x1xf32>
    %588 = vector.shape_cast %587 : vector<4x1xf32> to vector<4x1x1xf32>
    %589 = vector.broadcast %588 : vector<4x1x1xf32> to vector<4x3x1xf32>
    %590 = arith.subf %586, %589 : vector<4x3x1xf32>
    %591 = math.exp %590 : vector<4x3x1xf32>
    %cst_202 = arith.constant dense<0.000000e+00> : vector<4x1xf32>
    %592 = vector.multi_reduction <add>, %591, %cst_202 [1] : vector<4x3x1xf32> to vector<4x1xf32>
    %593 = vector.shape_cast %592 : vector<4x1xf32> to vector<4x1x1xf32>
    %594 = vector.broadcast %593 : vector<4x1x1xf32> to vector<4x3x1xf32>
    %595 = arith.divf %591, %594 : vector<4x3x1xf32>
    %596 = tpu.iota {dimensions = array<i32: 2>} : vector<4x3x128xi32>
    %c60_i32 = arith.constant 60 : i32
    %597 = vector.broadcast %c60_i32 : i32 to vector<4x3x128xi32>
    %598 = arith.cmpi eq, %596, %597 : vector<4x3x128xi32>
    %599 = vector.shape_cast %595 : vector<4x3x1xf32> to vector<4x3x1xf32>
    %600 = vector.broadcast %599 : vector<4x3x1xf32> to vector<4x3x128xf32>
    %601 = arith.select %598, %600, %585 : vector<4x3x128xi1>, vector<4x3x128xf32>
    %c0_203 = arith.constant 0 : index
    %c0_204 = arith.constant 0 : index
    %c0_205 = arith.constant 0 : index
    %602 = vector.load %arg5[%c0_203, %c0_204, %c0_205] : memref<4x3x128xf32, #tpu.memory_space<vmem>>, vector<4x3x128xf32>
    tpu.vector_store %arg5[%c0_203, %c0_204, %c0_205], %601 {strides = array<i32>} : memref<4x3x128xf32, #tpu.memory_space<vmem>>, vector<4x3x128xf32>,
    return
  }
  func.func @transform_0(%arg0: i32) -> (i32, i32, i32) {
    %c0_i32 = arith.constant 0 : i32
    %c0_i32_0 = arith.constant 0 : i32
    %c0_i32_1 = arith.constant 0 : i32
    return %arg0, %c0_i32, %c0_i32_0 : i32, i32, i32
  }
  func.func @transform_1(%arg0: i32) -> (i32, i32) {
    %c0_i32 = arith.constant 0 : i32
    %c0_i32_0 = arith.constant 0 : i32
    %c0_i32_1 = arith.constant 0 : i32
    return %c0_i32, %c0_i32_0 : i32, i32
  }
  func.func @transform_2(%arg0: i32) -> (i32, i32) {
    %c0_i32 = arith.constant 0 : i32
    %c0_i32_0 = arith.constant 0 : i32
    %c0_i32_1 = arith.constant 0 : i32
    return %c0_i32, %c0_i32_0 : i32, i32
  }
  func.func @transform_3(%arg0: i32) -> (i32, i32) {
    %c0_i32 = arith.constant 0 : i32
    %c0_i32_0 = arith.constant 0 : i32
    %c0_i32_1 = arith.constant 0 : i32
    return %c0_i32, %c0_i32_0 : i32, i32
  }
  func.func @transform_4(%arg0: i32) -> (i32, i32, i32) {
    %c0_i32 = arith.constant 0 : i32
    %c0_i32_0 = arith.constant 0 : i32
    %c0_i32_1 = arith.constant 0 : i32
    return %arg0, %c0_i32, %c0_i32_0 : i32, i32, i32
  }
}

</mosaic_0001>

<bundles_post_ra>
// kernel: tpu_custom_call.1
= control target key start
LH: loop header
LB: loop body
LE: loop exit
PB: predicated region body
PF: predicated region fallthrough
CT: control target
= control target key end

     0   :  { %s23250_s15 = smov 0   ;;  %s26228_s0 = inlined_call_operand.vmem [shape: f32[8,8,40], index: 0, kind: input, shape index: {}]   ;;  %s26229_s1 = inlined_call_operand.vmem [shape: f32[424,128], index: 1, kind: input, shape index: {}]   ;;  %s26230_s2 = inlined_call_operand.vmem [shape: f32[768,64], index: 2, kind: input, shape index: {}]   ;;  %s26231_s3 = inlined_call_operand.vmem [shape: f32[16,128], index: 3, kind: input, shape index: {}]   ;;  %s26232_s4 = inlined_call_operand.vmem [shape: f32[8,3,128], index: 4, kind: output, shape index: {}]  }
   0x1 LB: > { %s19600_s16 = sadd.s32 4294967295, %s23212_s15   ;;  %p19604_p0 = scmp.ge.s32.totalorder %s23212_s15, 1  ;;  %s23212_s15 = sphi %s23250_s15, %s14_s15  }
   0x2   : > { %p163_p1 = scmp.lt.s32.totalorder %s23212_s15, 3 }
   0x4   : > { %p164_p2 = pnand %p19604_p0, %p163_p1 }
   0x5   : > { %v224_v0 = vld [vmem:[%s26229_s1] sm:$0xff] (!%p164_p2)  ;;  %v225_v1 = vld [vmem:[%s26229_s1 + $0x8] sm:$0xff] (!%p164_p2)  ;;  %s19605_s23 = sshll.u32 (!%p164_p2), %s19600_s16, 2  ;;  %v23214_v3 = vmov (!%p164_p2), 0.0|0.0   ;;  %v226_v6 = vld [vmem:[%s26229_s1 + $0x10] sm:$0xff] (!%p164_p2)  ;;  %vm23215_vm0 = vmmov (!%p164_p2), 0  }
   0x6   : > { %167 = sbr.rel (%p164_p2) target bundleno = 18602 (0x48aa), region = 36  ;;  %v208_v2 = vld [vmem:[%s26230_s2] sm:$0xff] (!%p164_p2)  ;;  %22347 = vmatprep.subr.bf16.mxu1 (!%p164_p2), %v23214_v3  ;;  %v22339_v4 = vpack.c.bf16 (!%p164_p2), %v225_v1, %v224_v0  ;;  %v209_v5 = vld [vmem:[%s26230_s2 + $0x8] sm:$0xff] (!%p164_p2)  ;;  %v227_v7 = vld [vmem:[%s26229_s1 + $0x18] sm:$0xff] (!%p164_p2)  ;;  %p190_p3 = scmp.lt.s32.totalorder (!%p164_p2), %s19605_s23, 7  ;;  %v23216_v12 = vmov (!%p164_p2), 0.0  }
   0x7   : > { %v22348_v8 = vpack.c.bf16 (!%p164_p2), %v209_v5, %v208_v2  ;;  %v22343_v9 = vpack.c.bf16 (!%p164_p2), %v227_v7, %v226_v6  ;;  %v210_v10 = vld [vmem:[%s26230_s2 + $0x10] sm:$0xff] (!%p164_p2)  ;;  %v211_v11 = vld [vmem:[%s26230_s2 + $0x18] sm:$0xff] (!%p164_p2)  ;;  %20744 = vmatprep.mubr.msk.f32.mxu1 (!%p164_p2), %vm23215_vm0, %v23216_v12  ;;  %v212_v14 = vld [vmem:[%s26230_s2 + $0x20] sm:$0xff] (!%p164_p2)  ;;  %vm235_vm1 = vcmask (!%p164_p2), 326656   ;;  %vm337_vm2 = vcmask (!%p164_p2), 523264   ;;  %s23217_s30 = smov (!%p164_p2), 64  }
   0x8   : > { %22340 = vmatprep.subr.bf16.mxu0 (!%p164_p2), %v22339_v4  ;;  %v22351_v13 = vpack.c.bf16 (!%p164_p2), %v211_v11, %v210_v10  ;;  %v213_v15 = vld [vmem:[%s26230_s2 + $0x28] sm:$0xff] (!%p164_p2)  ;;  %v228_v16 = vld [vmem:[%s26229_s1 + $0x20] sm:$0xff] (!%p164_p2)  ;;  %v214_v19 = vld [vmem:[%s26230_s2 + $0x30] sm:$0xff] (!%p164_p2)  ;;  %vm411_vm3 = vcmask (!%p164_p2), 130048   ;;  %vm711_vm4 = vcmask (!%p164_p2), 64512   ;;  %s23218_s5 = smov (!%p164_p2), 112  }
   0x9   : > { %22349 = vmatpush3.bf16.msra.mxu1 (!%p164_p2), %v22348_v8  ;;  %22342 = vmatpush3.bf16.msra.mxu0 (!%p164_p2), %v22339_v4  ;;  %v22354_v18 = vpack.c.bf16 (!%p164_p2), %v213_v15, %v212_v14  ;;  %v215_v20 = vld [vmem:[%s26230_s2 + $0x38] sm:$0xff] (!%p164_p2)  ;;  %v205_v25 = vld [vmem:[%s26230_s2 + $0x2e8] sm:$0xff] (!%p164_p2)  ;;  %v19609_v26 = vld [vmem:[%s26231_s3 + $0x6] ss:$0 sm:$0xff] (!%p164_p2)  ;;  %s23219_s6 = smov (!%p164_p2), 48   ;;  %s23220_s7 = smov (!%p164_p2), 96  }
   0xa   : > { %22350 = vmatprep.subr.bf16.mxu1 (!%p164_p2), %v23214_v3  ;;  %22344 = vmatprep.subr.bf16.mxu0 (!%p164_p2), %v22343_v9  ;;  %v22357_v23 = vpack.c.bf16 (!%p164_p2), %v215_v20, %v214_v19  ;;  %v19614_v32 = vld [vmem:[%s26231_s3] ss:$0 sm:$0xff] (!%p164_p2)  ;;  %s23221_s8 = smov (!%p164_p2), 32   ;;  %s23222_s9 = smov (!%p164_p2), 80   ;;  %vm3084_vm5 = vcmask (!%p164_p2), 261120   ;;  %vm3089_vm6 = vcmask (!%p164_p2), 392192  }
   0xb   : > { %s23223_s10 = smov (!%p164_p2), 16   ;;  %vm12793_vm7 = vcmask (!%p164_p2), 59392   ;;  %vm16392_vm8 = vcmask (!%p164_p2), 18432   ;;  %vm16443_vm9 = vcmask (!%p164_p2), 1042432   ;;  %vm16439_vm10 = vcmask (!%p164_p2), 23552  }
   0xc   : > { %vm19436_vm11 = vcmask (!%p164_p2), 494048  }
   0xd   : > { %s26234_s23 = smov (!%p190_p3, %s19605_s23), 7  ;;  %22352 = vmatpush3.bf16.msra.mxu1 %v22351_v13  ;;  %22346 = vmatpush3.bf16.msra.mxu0 %v22343_v9 }
   0xe   : > { %s19606_s12 = sshll.u32 %s26234_s23, 3  ;;  %22353 = vmatprep.subr.bf16.mxu1 %v23214_v3  ;;  %20720 = vmatprep.subr.mxu0 %v228_v16  ;;  %s19608_s20 = sshll.u32 %s26234_s23, 2 }
   0xf   : > { %s23301_s18 = scalar_lea.vmem %s26228_s0, %s19606_s12  ;;  %s199_s24 = scalar_lea.vmem %s26232_s4, %s19608_s20 }
  0x10   : > { %v201_v17 = vld [vmem:[%s23301_s18] sm:$0xff]  ;;  %v202_v21 = vld [vmem:[%s23301_s18 + $0x8] sm:$0xff]  ;;  %v203_v22 = vld [vmem:[%s23301_s18 + $0x10] sm:$0xff] }
  0x11   : > { %20722 = vmatprep.mubr.msk.f32.mxu0 %vm235_vm1, %v201_v17  ;;  %22355 = vmatpush3.bf16.msra.mxu1 %v22354_v18  ;;  %v204_v24 = vld [vmem:[%s23301_s18 + $0x18] sm:$0xff] }
  0x12   : > { %20721 = vmatpush3.msra.mxu0 %v228_v16  ;;  %22356 = vmatprep.subr.bf16.mxu1 %v23214_v3 }
  0x13   : > { %20723 = vmatmul.mubr.msk.f32.vlgmr.msra.gmra.mrb[0].mxu0 %vm235_vm1, %v202_v21  ;;  %20747 = vmatprep.subr.mxu0 %v23216_v12 }
  0x14   : > { %20725 = vmatprep.mubr.msk.f32.mxu0 %vm235_vm1, %v203_v22 }
  0x15   : > { %22358 = vmatpush3.bf16.msra.mxu1 %v22357_v23 }
  0x16   : > { %20752 = vmatprep.subr.mxu1 %v23216_v12 }
  0x17   : > { %20726 = vmatmul.mubr.msk.f32.gmra.mrb[2].mxu0 %vm235_vm1, %v204_v24 }
  0x18   : > { %20749 = vmatprep.mubr.msk.f32.mxu0 %vm23215_vm0, %v23216_v12  ;;  %20745 = vmatmul.mubr.msk.f32.vlgmr.msra.gmra.mrb[0].mxu1 %vm337_vm2, %v205_v25 }
  0x19   : > { %20754 = vmatprep.mubr.msk.f32.mxu1 %vm23215_vm0, %v23216_v12 }
  0xe6   : > { %v20724_v27 = vpop.f32.mrb[0].mxu0 }
  0xe7   : > { %v23332_v28 = vadd.f32 %v20724_v27, %v19609_v26  ;;  %v314_v29 = vpop.f32.mrb[1].mxu0 }
  0xe8   : > { %v23334_v30 = vadd.f32 %v19609_v26, %v314_v29 }
  0xe9   : > { %20753 = vmatpush3.xpose.msk.msra.mxu1 %vm411_vm3, %v23332_v28 }
  0xea   : > { %20748 = vmatpush3.xpose.msk.msra.mxu0 %vm411_vm3, %v23334_v30  ;;  %v20727_v31 = vpop.f32.mrb[2].mxu0  ;;  %20762 = vmatprep.subr.mxu1 %v23216_v12 }
  0xeb   : > { %v324_v33 = vpop.f32.mrb[3].mxu0  ;;  %20757 = vmatprep.subr.mxu0 %v23216_v12  ;;  %v23345_v34 = vadd.f32 %v20727_v31, %v19609_v26  ;;  %v407_v35 = vpop.f32.mrb[0].mxu1 }
  0xec   : > { %v23347_v36 = vadd.f32 %v19609_v26, %v324_v33  ;;  %v23349_v37 = vadd.f32 %v19614_v32, %v407_v35  ;;  %v20746_v38 = vpop.f32.mrb[1].mxu1 }
  0xee   : > { %20750 = vmatmul.mubr.msk.f32.vlgmr.msra.gmra.mrb[4].mxu0 %vm411_vm3, %v23349_v37  ;;  %20755 = vmatmul.mubr.msk.f32.vlgmr.msra.gmra.mrb[2].mxu1 %vm411_vm3, %v23349_v37 }
  0xef   : > { %20758 = vmatpush3.xpose.msk.msra.mxu0 %vm411_vm3, %v23347_v36  ;;  %20763 = vmatpush3.xpose.msk.msra.mxu1 %vm411_vm3, %v23345_v34 }
  0xf0   : > { %20759 = vmatprep.mubr.msk.f32.mxu0 %vm23215_vm0, %v23216_v12  ;;  %20764 = vmatprep.mubr.msk.f32.mxu1 %vm23215_vm0, %v23216_v12 }
  0xf1   : > { %20767 = vmatprep.subr.mxu0 %v23216_v12  ;;  %20772 = vmatprep.subr.mxu1 %v23216_v12 }
  0xf2   : > { %20760 = vmatmul.mubr.msk.f32.vlgmr.msra.gmra.mrb[6].mxu0 %vm411_vm3, %v23349_v37  ;;  %20765 = vmatmul.mubr.msk.f32.vlgmr.msra.gmra.mrb[4].mxu1 %vm411_vm3, %v23349_v37 }
  0xf3   : > { %20769 = vmatprep.mubr.msk.f32.mxu0 %vm23215_vm0, %v23216_v12  ;;  %20774 = vmatprep.mubr.msk.f32.mxu1 %vm23215_vm0, %v23216_v12 }
 0x1c1   : > { %v484_v39 = vpop.f32.mrb[4].mxu0  ;;  %v557_v40 = vpop.f32.mrb[2].mxu1 }
 0x1c2   : > { %v707_v41 = vmul.f32 0.125, %v484_v39  ;;  %v20751_v42 = vpop.f32.mrb[5].mxu0  ;;  %v20756_v43 = vpop.f32.mrb[3].mxu1  ;;  %v708_v44 = vmul.f32 0.125, %v557_v40 }
 0x1c4   : > { %v712_v45 = vsel %vm711_vm4, %v707_v41, -inf  ;;  %v715_v52 = vsel %vm711_vm4, %v708_v44, -inf }
 0x1c5   : > { %v703_v46 = vpop.f32.mrb[4].mxu1  ;;  %713 = vmax.xlane.f32.xlu0 %v712_v45  ;;  %v630_v47 = vpop.f32.mrb[6].mxu0 }
 0x1c6   : > { %v709_v48 = vmul.f32 0.125, %v630_v47  ;;  %v20761_v49 = vpop.f32.mrb[7].mxu0  ;;  %v20766_v50 = vpop.f32.mrb[5].mxu1  ;;  %v710_v51 = vmul.f32 0.125, %v703_v46 }
 0x1c8   : > { %v718_v53 = vsel %vm711_vm4, %v709_v48, -inf  ;;  %v721_v54 = vsel %vm711_vm4, %v710_v51, -inf }
 0x1c9   : > { %716 = vmax.xlane.f32.xlu0 %v715_v52  ;;  %719 = vmax.xlane.f32.xlu1 %v718_v53 }
 0x1cd   : > { %722 = vmax.xlane.f32.xlu1 %v721_v54 }
 0x1de   : > { %832 = vrot.lane.b32.xlu1 %v23332_v28, %s23217_s30 }
 0x1df   : > { %756 = vrot.lane.b32.xlu0 %v23334_v30, %s23217_s30 }
 0x1e2   : > { %908 = vrot.lane.b32.xlu1 %v23347_v36, %s23217_s30 }
 0x1e6   : > { %984 = vrot.lane.b32.xlu1 %v23345_v34, %s23217_s30 }
 0x1ea   : > { %1142 = vrot.lane.b32.xlu1 %v23332_v28, %s23218_s5 }
 0x252   : > { %v714_v55 = vpop.xlane.xlu0 %713 }
 0x253   : > { %v724_v56 = vsub.f32 %v707_v41, %v714_v55 }
 0x255   : > { %v728_v57 = vmul.f32 1.442695, %v724_v56 }
 0x256   : > { %v717_v58 = vpop.xlane.xlu0 %716  ;;  %v720_v59 = vpop.xlane.xlu1 %719 }
 0x257   : > { %22796 = vpow2.f32 %v728_v57  ;;  %v725_v60 = vsub.f32 %v708_v44, %v717_v58  ;;  %v726_v10 = vsub.f32 %v709_v48, %v720_v59 }
 0x259   : > { %v730_v61 = vmul.f32 1.442695, %v725_v60  ;;  %v732_v11 = vmul.f32 1.442695, %v726_v10 }
 0x25a   : > { %v757_v62 = vpop.permute.xlu0 %756  ;;  %v723_v63 = vpop.xlane.xlu1 %722 }
 0x25b   : > { %22798 = vpow2.f32 %v730_v61  ;;  %v727_v0 = vsub.f32 %v710_v51, %v723_v63  ;;  %20768 = vmatpush3.msra.mxu0 %v757_v62 }
 0x25c   : > { %20777 = vmatprep.subr.mxu0 %v23216_v12 }
 0x25d   : > { %v734_v1 = vmul.f32 1.442695, %v727_v0 }
 0x25e   : > { %v833_v2 = vpop.permute.xlu1 %832 }
 0x25f   : > { %22800 = vpow2.f32 %v734_v1  ;;  %20773 = vmatpush3.msra.mxu1 %v833_v2 }
 0x260   : > { %20782 = vmatprep.subr.mxu1 %v23216_v12  ;;  %22802 = vpow2.f32 %v732_v11 }
 0x261   : > { %v22797_v4 = vpop.eup %22796 }
 0x262   : > { %v736_v5 = vsel %vm711_vm4, %v22797_v4, 0.0  ;;  %v909_v15 = vpop.permute.xlu1 %908 }
 0x263   : > { %737 = vadd.xlane.f32.xlu0 %v736_v5 }
 0x265   : > { %v22799_v6 = vpop.eup %22798 }
 0x266   : > { %v739_v7 = vsel %vm711_vm4, %v22799_v6, 0.0  ;;  %v985_v16 = vpop.permute.xlu1 %984 }
 0x267   : > { %740 = vadd.xlane.f32.xlu1 %v739_v7 }
 0x269   : > { %v22801_v8 = vpop.eup %22800 }
 0x26a   : > { %v745_v9 = vsel %vm711_vm4, %v22801_v8, 0.0  ;;  %v22803_v13 = vpop.eup %22802  ;;  %v1143_v17 = vpop.permute.xlu1 %1142 }
 0x26b   : > { %746 = vadd.xlane.f32.xlu1 %v745_v9  ;;  %v742_v14 = vsel %vm711_vm4, %v22803_v13, 0.0 }
 0x279   : > { %1066 = vrot.lane.b32.xlu0 %v23334_v30, %s23218_s5 }
 0x27c   : > { %1216 = vrot.lane.b32.xlu1 %v23347_v36, %s23218_s5 }
 0x298   : > { %743 = vadd.xlane.f32.xlu0 %v742_v14 }
 0x2ae   : > { %1064 = vrot.lane.b32.xlu0 %v23349_v37, %s23218_s5 }
 0x2b2   : > { %1290 = vrot.lane.b32.xlu0 %v23345_v34, %s23218_s5 }
 0x2f0   : > { %v738_v18 = vpop.xlane.xlu0 %737 }
 0x2f1   : > { %22804 = vrcp.f32 %v738_v18 }
 0x2f4   : > { %v741_v19 = vpop.xlane.xlu1 %740  ;;  %v1067_v27 = vpop.permute.xlu0 %1066 }
 0x2f5   : > { %22806 = vrcp.f32 %v741_v19 }
 0x2f8   : > { %v747_v20 = vpop.xlane.xlu1 %746 }
 0x2f9   : > { %22808 = vrcp.f32 %v747_v20 }
 0x2fb   : > { %v22805_v21 = vpop.eup %22804 }
 0x2fc   : > { %v749_v22 = vmul.f32 %v22805_v21, %v22797_v4  ;;  %v1217_v38 = vpop.permute.xlu1 %1216 }
 0x2fe   : > { %20770 = vmatmul.mubr.msk.f32.vlgmr.msra.gmra.mrb[8].mxu0 %vm711_vm4, %v749_v22 }
 0x2ff   : > { %v22807_v23 = vpop.eup %22806  ;;  %20778 = vmatpush3.msra.mxu0 %v909_v15  ;;  %20779 = vmatprep.mubr.msk.f32.mxu0 %vm23215_vm0, %v23216_v12 }
 0x300   : > { %v751_v24 = vmul.f32 %v22807_v23, %v22799_v6  ;;  %20787 = vmatprep.subr.mxu0 %v23216_v12 }
 0x302   : > { %20775 = vmatmul.mubr.msk.f32.vlgmr.msra.gmra.mrb[6].mxu1 %vm711_vm4, %v751_v24 }
 0x303   : > { %v22809_v25 = vpop.eup %22808  ;;  %20783 = vmatpush3.msra.mxu1 %v985_v16  ;;  %20784 = vmatprep.mubr.msk.f32.mxu1 %vm23215_vm0, %v23216_v12 }
 0x304   : > { %v755_v26 = vmul.f32 %v22809_v25, %v22801_v8  ;;  %20792 = vmatprep.subr.mxu1 %v23216_v12 }
 0x306   : > { %20785 = vmatmul.mubr.msk.f32.vlgmr.msra.gmra.mrb[8].mxu1 %vm711_vm4, %v755_v26 }
 0x307   : > { %20794 = vmatprep.mubr.msk.f32.mxu1 %vm23215_vm0, %v23216_v12 }
 0x30a   : > { %20793 = vmatpush3.xpose.msk.msra.mxu1 %vm411_vm3, %v1143_v17 }
 0x30b   : > { %20802 = vmatprep.subr.mxu1 %v23216_v12 }
 0x325   : > { %v744_v29 = vpop.xlane.xlu0 %743 }
 0x326   : > { %22810 = vrcp.f32 %v744_v29 }
 0x329   : > { %v1065_v31 = vpop.permute.xlu0 %1064 }
 0x32a   : > { %20795 = vmatmul.mubr.msk.f32.vlgmr.msra.gmra.mrb[10].mxu1 %vm411_vm3, %v1065_v31 }
 0x32b   : > { %20804 = vmatprep.mubr.msk.f32.mxu1 %vm23215_vm0, %v23216_v12 }
 0x32d   : > { %v1291_v32 = vpop.permute.xlu0 %1290 }
 0x32e   : > { %20803 = vmatpush3.xpose.msk.msra.mxu1 %vm411_vm3, %v1291_v32 }
 0x32f   : > { %20812 = vmatprep.subr.mxu1 %v23216_v12 }
 0x330   : > { %v22811_v33 = vpop.eup %22810 }
 0x331   : > { %20805 = vmatmul.mubr.msk.f32.vlgmr.msra.gmra.mrb[12].mxu1 %vm411_vm3, %v1065_v31  ;;  %v753_v35 = vmul.f32 %v22811_v33, %v22803_v13 }
 0x332   : > { %20814 = vmatprep.mubr.msk.f32.mxu1 %vm23215_vm0, %v23216_v12 }
 0x333   : > { %20780 = vmatmul.mubr.msk.f32.vlgmr.msra.gmra.mrb[10].mxu0 %vm711_vm4, %v753_v35 }
 0x334   : > { %20788 = vmatpush3.xpose.msk.msra.mxu0 %vm411_vm3, %v1067_v27  ;;  %20789 = vmatprep.mubr.msk.f32.mxu0 %vm23215_vm0, %v23216_v12 }
 0x335   : > { %20797 = vmatprep.subr.mxu0 %v23216_v12 }
 0x337   : > { %20790 = vmatmul.mubr.msk.f32.vlgmr.msra.gmra.mrb[12].mxu0 %vm411_vm3, %v1065_v31 }
 0x338   : > { %20798 = vmatpush3.xpose.msk.msra.mxu0 %vm411_vm3, %v1217_v38  ;;  %20799 = vmatprep.mubr.msk.f32.mxu0 %vm23215_vm0, %v23216_v12 }
 0x339   : > { %20807 = vmatprep.subr.mxu0 %v23216_v12 }
 0x33b   : > { %20800 = vmatmul.mubr.msk.f32.vlgmr.msra.gmra.mrb[14].mxu0 %vm411_vm3, %v1065_v31 }
 0x33c   : > { %20809 = vmatprep.mubr.msk.f32.mxu0 %vm23215_vm0, %v23216_v12 }
 0x3d1   : > { %v23435_v39 = vpop.f32.mrb[8].mxu0 }
 0x3d2   : > { %v20771_v40 = vpop.f32.mrb[9].mxu0 }
 0x3d5   : > { %v23437_v41 = vpop.f32.mrb[6].mxu1 }
 0x3d6   : > { %v20776_v42 = vpop.f32.mrb[7].mxu1 }
 0x3d9   : > { %v23439_v43 = vpop.f32.mrb[8].mxu1 }
 0x3da   : > { %v20786_v44 = vpop.f32.mrb[9].mxu1 }
 0x3fd   : > { %v1212_v45 = vpop.f32.mrb[10].mxu1 }
 0x3fe   : > { %v1365_v46 = vmul.f32 0.125, %v1212_v45  ;;  %v20796_v47 = vpop.f32.mrb[11].mxu1 }
 0x400   : > { %v1371_v48 = vsel %vm711_vm4, %v1365_v46, -inf }
 0x401   : > { %1372 = vmax.xlane.f32.xlu0 %v1371_v48 }
 0x404   : > { %v1360_v49 = vpop.f32.mrb[12].mxu1 }
 0x405   : > { %v20806_v50 = vpop.f32.mrb[13].mxu1  ;;  %v1367_v60 = vmul.f32 0.125, %v1360_v49 }
 0x406   : > { %v23442_v51 = vpop.f32.mrb[10].mxu0 }
 0x407   : > { %v20781_v52 = vpop.f32.mrb[11].mxu0  ;;  %v1377_v62 = vsel %vm711_vm4, %v1367_v60, -inf }
 0x40a   : > { %v1138_v53 = vpop.f32.mrb[12].mxu0 }
 0x40b   : > { %v1364_v54 = vmul.f32 0.125, %v1138_v53  ;;  %v20791_v55 = vpop.f32.mrb[13].mxu0 }
 0x40d   : > { %v1368_v56 = vsel %vm711_vm4, %v1364_v54, -inf }
 0x40e   : > { %1369 = vmax.xlane.f32.xlu1 %v1368_v56  ;;  %v1286_v57 = vpop.f32.mrb[14].mxu0 }
 0x40f   : > { %v1366_v58 = vmul.f32 0.125, %v1286_v57  ;;  %v20801_v59 = vpop.f32.mrb[15].mxu0 }
 0x411   : > { %v1374_v61 = vsel %vm711_vm4, %v1366_v58, -inf }
 0x412   : > { %1375 = vmax.xlane.f32.xlu0 %v1374_v61 }
 0x416   : > { %1378 = vmax.xlane.f32.xlu0 %v1377_v62 }
 0x41f   : > { %1412 = vrot.lane.b32.xlu1 %v23334_v30, %s23219_s6 }
 0x423   : > { %1564 = vrot.lane.b32.xlu1 %v23347_v36, %s23219_s6 }
 0x427   : > { %1640 = vrot.lane.b32.xlu1 %v23345_v34, %s23219_s6 }
 0x42b   : > { %1738 = vrot.lane.b32.xlu1 %v23334_v30, %s23220_s7 }
 0x42c   : > { %1488 = vrot.lane.b32.xlu0 %v23332_v28, %s23219_s6 }
 0x48e   : > { %v1373_v63 = vpop.xlane.xlu0 %1372 }
 0x48f   : > { %v1381_v0 = vsub.f32 %v1365_v46, %v1373_v63 }
 0x491   : > { %v1386_v1 = vmul.f32 1.442695, %v1381_v0 }
 0x493   : > { %22812 = vpow2.f32 %v1386_v1 }
 0x49b   : > { %v1370_v2 = vpop.xlane.xlu1 %1369 }
 0x49c   : > { %v1380_v4 = vsub.f32 %v1364_v54, %v1370_v2 }
 0x49d   : > { %v22813_v5 = vpop.eup %22812 }
 0x49e   : > { %v1384_v6 = vmul.f32 1.442695, %v1380_v4  ;;  %v1395_v7 = vsel %vm711_vm4, %v22813_v5, 0.0 }
 0x49f   : > { %v1413_v8 = vpop.permute.xlu1 %1412  ;;  %1396 = vadd.xlane.f32.xlu0 %v1395_v7  ;;  %v1376_v9 = vpop.xlane.xlu0 %1375 }
 0x4a0   : > { %22814 = vpow2.f32 %v1384_v6  ;;  %v1382_v10 = vsub.f32 %v1366_v58, %v1376_v9  ;;  %20808 = vmatpush3.msra.mxu0 %v1413_v8 }
 0x4a1   : > { %20817 = vmatprep.subr.mxu0 %v23216_v12 }
 0x4a2   : > { %v1388_v11 = vmul.f32 1.442695, %v1382_v10 }
 0x4a3   : > { %v1379_v13 = vpop.xlane.xlu0 %1378  ;;  %v1565_v23 = vpop.permute.xlu1 %1564 }
 0x4a4   : > { %22816 = vpow2.f32 %v1388_v11  ;;  %v1383_v14 = vsub.f32 %v1367_v60, %v1379_v13 }
 0x4a6   : > { %v1390_v15 = vmul.f32 1.442695, %v1383_v14 }
 0x4a7   : > { %v1489_v16 = vpop.permute.xlu0 %1488  ;;  %v1641_v25 = vpop.permute.xlu1 %1640 }
 0x4a8   : > { %22818 = vpow2.f32 %v1390_v15  ;;  %20813 = vmatpush3.msra.mxu1 %v1489_v16 }
 0x4a9   : > { %20822 = vmatprep.subr.mxu1 %v23216_v12 }
 0x4aa   : > { %v22815_v17 = vpop.eup %22814 }
 0x4ab   : > { %v1392_v18 = vsel %vm711_vm4, %v22815_v17, 0.0  ;;  %v1739_v26 = vpop.permute.xlu1 %1738 }
 0x4ac   : > { %1393 = vadd.xlane.f32.xlu1 %v1392_v18 }
 0x4ae   : > { %v22817_v19 = vpop.eup %22816 }
 0x4af   : > { %v1398_v20 = vsel %vm711_vm4, %v22817_v19, 0.0 }
 0x4b0   : > { %1399 = vadd.xlane.f32.xlu1 %v1398_v20 }
 0x4b2   : > { %v22819_v21 = vpop.eup %22818 }
 0x4b3   : > { %v1401_v22 = vsel %vm711_vm4, %v22819_v21, 0.0 }
 0x4b4   : > { %1402 = vadd.xlane.f32.xlu0 %v1401_v22 }
 0x4c1   : > { %1736 = vrot.lane.b32.xlu1 %v23349_v37, %s23220_s7 }
 0x4c5   : > { %1962 = vrot.lane.b32.xlu1 %v23345_v34, %s23220_s7 }
 0x4ca   : > { %1814 = vrot.lane.b32.xlu0 %v23332_v28, %s23220_s7 }
 0x4ce   : > { %1888 = vrot.lane.b32.xlu0 %v23347_v36, %s23220_s7 }
 0x52c   : > { %v1397_v24 = vpop.xlane.xlu0 %1396 }
 0x52d   : > { %22820 = vrcp.f32 %v1397_v24 }
 0x537   : > { %v22821_v27 = vpop.eup %22820 }
 0x538   : > { %v1407_v29 = vmul.f32 %v22821_v27, %v22813_v5 }
 0x539   : > { %v1394_v31 = vpop.xlane.xlu1 %1393 }
 0x53a   : > { %22822 = vrcp.f32 %v1394_v31  ;;  %20815 = vmatmul.mubr.msk.f32.vlgmr.msra.gmra.mrb[14].mxu1 %vm711_vm4, %v1407_v29 }
 0x53b   : > { %20823 = vmatpush3.msra.mxu1 %v1641_v25  ;;  %20824 = vmatprep.mubr.msk.f32.mxu1 %vm23215_vm0, %v23216_v12 }
 0x53c   : > { %20832 = vmatprep.subr.mxu1 %v23216_v12 }
 0x53d   : > { %v1400_v32 = vpop.xlane.xlu1 %1399 }
 0x53e   : > { %22824 = vrcp.f32 %v1400_v32 }
 0x541   : > { %v1403_v33 = vpop.xlane.xlu0 %1402  ;;  %v1737_v46 = vpop.permute.xlu1 %1736 }
 0x542   : > { %22826 = vrcp.f32 %v1403_v33 }
 0x544   : > { %v22823_v35 = vpop.eup %22822 }
 0x545   : > { %v1405_v38 = vmul.f32 %v22823_v35, %v22815_v17  ;;  %v1815_v45 = vpop.permute.xlu0 %1814  ;;  %v1963_v49 = vpop.permute.xlu1 %1962 }
 0x547   : > { %20810 = vmatmul.mubr.msk.f32.vlgmr.msra.gmra.mrb[16].mxu0 %vm711_vm4, %v1405_v38 }
 0x548   : > { %v22825_v40 = vpop.eup %22824  ;;  %20818 = vmatpush3.msra.mxu0 %v1565_v23  ;;  %20819 = vmatprep.mubr.msk.f32.mxu0 %vm23215_vm0, %v23216_v12 }
 0x549   : > { %v1409_v42 = vmul.f32 %v22825_v40, %v22817_v19  ;;  %20827 = vmatprep.subr.mxu0 %v23216_v12  ;;  %v1889_v48 = vpop.permute.xlu0 %1888 }
 0x54b   : > { %20820 = vmatmul.mubr.msk.f32.vlgmr.msra.gmra.mrb[18].mxu0 %vm711_vm4, %v1409_v42 }
 0x54c   : > { %v22827_v44 = vpop.eup %22826  ;;  %20829 = vmatprep.mubr.msk.f32.mxu0 %vm23215_vm0, %v23216_v12 }
 0x54d   : > { %v1411_v47 = vmul.f32 %v22827_v44, %v22819_v21 }
 0x54f   : > { %20828 = vmatpush3.xpose.msk.msra.mxu0 %vm411_vm3, %v1739_v26  ;;  %20825 = vmatmul.mubr.msk.f32.vlgmr.msra.gmra.mrb[16].mxu1 %vm711_vm4, %v1411_v47 }
 0x550   : > { %20833 = vmatpush3.xpose.msk.msra.mxu1 %vm411_vm3, %v1815_v45  ;;  %20837 = vmatprep.subr.mxu0 %v23216_v12 }
 0x551   : > { %20834 = vmatprep.mubr.msk.f32.mxu1 %vm23215_vm0, %v23216_v12  ;;  %20842 = vmatprep.subr.mxu1 %v23216_v12 }
 0x552   : > { %20830 = vmatmul.mubr.msk.f32.vlgmr.msra.gmra.mrb[20].mxu0 %vm411_vm3, %v1737_v46 }
 0x553   : > { %20838 = vmatpush3.xpose.msk.msra.mxu0 %vm411_vm3, %v1889_v48  ;;  %20835 = vmatmul.mubr.msk.f32.vlgmr.msra.gmra.mrb[18].mxu1 %vm411_vm3, %v1737_v46 }
 0x554   : > { %20843 = vmatpush3.xpose.msk.msra.mxu1 %vm411_vm3, %v1963_v49  ;;  %20839 = vmatprep.mubr.msk.f32.mxu0 %vm23215_vm0, %v23216_v12 }
 0x555   : > { %20844 = vmatprep.mubr.msk.f32.mxu1 %vm23215_vm0, %v23216_v12  ;;  %20852 = vmatprep.subr.mxu1 %v23216_v12 }
 0x556   : > { %20840 = vmatmul.mubr.msk.f32.vlgmr.msra.gmra.mrb[22].mxu0 %vm411_vm3, %v1737_v46  ;;  %20847 = vmatprep.subr.mxu0 %v23216_v12 }
 0x557   : > { %20845 = vmatmul.mubr.msk.f32.vlgmr.msra.gmra.mrb[20].mxu1 %vm411_vm3, %v1737_v46  ;;  %20849 = vmatprep.mubr.msk.f32.mxu0 %vm23215_vm0, %v23216_v12 }
 0x558   : > { %20854 = vmatprep.mubr.msk.f32.mxu1 %vm23215_vm0, %v23216_v12 }
 0x60d   : > { %v23505_v50 = vpop.f32.mrb[14].mxu1 }
 0x60e   : > { %v20816_v52 = vpop.f32.mrb[15].mxu1 }
 0x61a   : > { %v23507_v53 = vpop.f32.mrb[16].mxu0 }
 0x61b   : > { %v20811_v54 = vpop.f32.mrb[17].mxu0 }
 0x61e   : > { %v23509_v55 = vpop.f32.mrb[18].mxu0 }
 0x61f   : > { %v20821_v56 = vpop.f32.mrb[19].mxu0 }
 0x622   : > { %v23511_v57 = vpop.f32.mrb[16].mxu1 }
 0x623   : > { %v20826_v58 = vpop.f32.mrb[17].mxu1 }
 0x625   : > { %v1810_v59 = vpop.f32.mrb[20].mxu0 }
 0x626   : > { %v2036_v60 = vmul.f32 0.125, %v1810_v59  ;;  %v20831_v61 = vpop.f32.mrb[21].mxu0  ;;  %v1884_v62 = vpop.f32.mrb[18].mxu1 }
 0x627   : > { %v2037_v63 = vmul.f32 0.125, %v1884_v62  ;;  %v20836_v0 = vpop.f32.mrb[19].mxu1 }
 0x628   : > { %v2040_v1 = vsel %vm711_vm4, %v2036_v60, -inf }
 0x629   : > { %2041 = vmax.xlane.f32.xlu0 %v2040_v1  ;;  %v1958_v2 = vpop.f32.mrb[22].mxu0  ;;  %v2043_v4 = vsel %vm711_vm4, %v2037_v63, -inf }
 0x62a   : > { %v2038_v5 = vmul.f32 0.125, %v1958_v2  ;;  %v20841_v6 = vpop.f32.mrb[23].mxu0  ;;  %2044 = vmax.xlane.f32.xlu1 %v2043_v4  ;;  %v2032_v7 = vpop.f32.mrb[20].mxu1 }
 0x62b   : > { %v20846_v8 = vpop.f32.mrb[21].mxu1  ;;  %v2039_v9 = vmul.f32 0.125, %v2032_v7 }
 0x62c   : > { %v2046_v10 = vsel %vm711_vm4, %v2038_v5, -inf }
 0x62d   : > { %2047 = vmax.xlane.f32.xlu0 %v2046_v10  ;;  %v2049_v11 = vsel %vm711_vm4, %v2039_v9, -inf }
 0x631   : > { %2050 = vmax.xlane.f32.xlu0 %v2049_v11 }
 0x63b   : > { %2160 = vrot.lane.b32.xlu1 %v23332_v28, %s23221_s8 }
 0x63f   : > { %2236 = vrot.lane.b32.xlu1 %v23347_v36, %s23221_s8 }
 0x643   : > { %2312 = vrot.lane.b32.xlu1 %v23345_v34, %s23221_s8 }
 0x647   : > { %2084 = vrot.lane.b32.xlu0 %v23334_v30, %s23221_s8 }
 0x6b6   : > { %v2042_v13 = vpop.xlane.xlu0 %2041 }
 0x6b7   : > { %v2052_v14 = vsub.f32 %v2036_v60, %v2042_v13  ;;  %v2045_v15 = vpop.xlane.xlu1 %2044 }
 0x6b8   : > { %v2053_v16 = vsub.f32 %v2037_v63, %v2045_v15 }
 0x6b9   : > { %v2056_v17 = vmul.f32 1.442695, %v2052_v14 }
 0x6ba   : > { %v2058_v18 = vmul.f32 1.442695, %v2053_v16  ;;  %v2048_v19 = vpop.xlane.xlu0 %2047 }
 0x6bb   : > { %22828 = vpow2.f32 %v2056_v17  ;;  %v2161_v20 = vpop.permute.xlu1 %2160  ;;  %v2054_v27 = vsub.f32 %v2038_v5, %v2048_v19 }
 0x6bc   : > { %22830 = vpow2.f32 %v2058_v18  ;;  %20853 = vmatpush3.msra.mxu1 %v2161_v20 }
 0x6bd   : > { %20862 = vmatprep.subr.mxu1 %v23216_v12  ;;  %v2060_v31 = vmul.f32 1.442695, %v2054_v27 }
 0x6be   : > { %v2051_v21 = vpop.xlane.xlu0 %2050 }
 0x6bf   : > { %v2055_v29 = vsub.f32 %v2039_v9, %v2051_v21  ;;  %22832 = vpow2.f32 %v2060_v31  ;;  %v2237_v42 = vpop.permute.xlu1 %2236 }
 0x6c1   : > { %v2062_v32 = vmul.f32 1.442695, %v2055_v29 }
 0x6c2   : > { %v2085_v22 = vpop.permute.xlu0 %2084 }
 0x6c3   : > { %20848 = vmatpush3.msra.mxu0 %v2085_v22  ;;  %22834 = vpow2.f32 %v2062_v32  ;;  %v2313_v44 = vpop.permute.xlu1 %2312 }
 0x6c4   : > { %20857 = vmatprep.subr.mxu0 %v23216_v12 }
 0x6c5   : > { %v22829_v23 = vpop.eup %22828 }
 0x6c6   : > { %v22831_v24 = vpop.eup %22830  ;;  %v2064_v25 = vsel %vm711_vm4, %v22829_v23, 0.0 }
 0x6c7   : > { %2065 = vadd.xlane.f32.xlu0 %v2064_v25  ;;  %v2067_v26 = vsel %vm711_vm4, %v22831_v24, 0.0 }
 0x6c8   : > { %2068 = vadd.xlane.f32.xlu1 %v2067_v26 }
 0x6c9   : > { %v22833_v33 = vpop.eup %22832 }
 0x6ca   : > { %v2070_v38 = vsel %vm711_vm4, %v22833_v33, 0.0 }
 0x6cd   : > { %v22835_v35 = vpop.eup %22834 }
 0x6ce   : > { %v2073_v40 = vsel %vm711_vm4, %v22835_v35, 0.0 }
 0x6d9   : > { %2486 = vrot.lane.b32.xlu1 %v23332_v28, %s23222_s9 }
 0x6dd   : > { %2410 = vrot.lane.b32.xlu0 %v23334_v30, %s23222_s9 }
 0x6fc   : > { %2071 = vadd.xlane.f32.xlu0 %v2070_v38 }
 0x6fd   : > { %2074 = vadd.xlane.f32.xlu1 %v2073_v40 }
 0x70e   : > { %2560 = vrot.lane.b32.xlu1 %v23347_v36, %s23222_s9 }
 0x712   : > { %2408 = vrot.lane.b32.xlu0 %v23349_v37, %s23222_s9 }
 0x716   : > { %2634 = vrot.lane.b32.xlu0 %v23345_v34, %s23222_s9 }
 0x754   : > { %v2066_v45 = vpop.xlane.xlu0 %2065 }
 0x755   : > { %22836 = vrcp.f32 %v2066_v45  ;;  %v2069_v46 = vpop.xlane.xlu1 %2068 }
 0x756   : > { %22838 = vrcp.f32 %v2069_v46 }
 0x758   : > { %v2411_v54 = vpop.permute.xlu0 %2410 }
 0x759   : > { %v2487_v56 = vpop.permute.xlu1 %2486 }
 0x75f   : > { %v22837_v47 = vpop.eup %22836 }
 0x760   : > { %v22839_v48 = vpop.eup %22838  ;;  %v2077_v49 = vmul.f32 %v22837_v47, %v22829_v23 }
 0x761   : > { %v2079_v52 = vmul.f32 %v22839_v48, %v22831_v24 }
 0x762   : > { %20850 = vmatmul.mubr.msk.f32.vlgmr.msra.gmra.mrb[24].mxu0 %vm711_vm4, %v2077_v49 }
 0x763   : > { %20858 = vmatpush3.msra.mxu0 %v2237_v42  ;;  %20855 = vmatmul.mubr.msk.f32.vlgmr.msra.gmra.mrb[22].mxu1 %vm711_vm4, %v2079_v52 }
 0x764   : > { %20863 = vmatpush3.msra.mxu1 %v2313_v44  ;;  %20859 = vmatprep.mubr.msk.f32.mxu0 %vm23215_vm0, %v23216_v12 }
 0x765   : > { %20867 = vmatprep.subr.mxu0 %v23216_v12  ;;  %20864 = vmatprep.mubr.msk.f32.mxu1 %vm23215_vm0, %v23216_v12 }
 0x766   : > { %20872 = vmatprep.subr.mxu1 %v23216_v12 }
 0x789   : > { %v2072_v58 = vpop.xlane.xlu0 %2071 }
 0x78a   : > { %22840 = vrcp.f32 %v2072_v58  ;;  %v2075_v59 = vpop.xlane.xlu1 %2074 }
 0x78b   : > { %22842 = vrcp.f32 %v2075_v59 }
 0x78d   : > { %v2409_v63 = vpop.permute.xlu0 %2408 }
 0x78e   : > { %v2561_v1 = vpop.permute.xlu1 %2560 }
 0x791   : > { %v2635_v2 = vpop.permute.xlu0 %2634 }
 0x794   : > { %v22841_v60 = vpop.eup %22840 }
 0x795   : > { %v22843_v61 = vpop.eup %22842  ;;  %v2081_v62 = vmul.f32 %v22841_v60, %v22833_v33 }
 0x796   : > { %v2083_v0 = vmul.f32 %v22843_v61, %v22835_v35 }
 0x797   : > { %20860 = vmatmul.mubr.msk.f32.vlgmr.msra.gmra.mrb[26].mxu0 %vm711_vm4, %v2081_v62 }
 0x798   : > { %20868 = vmatpush3.xpose.msk.msra.mxu0 %vm411_vm3, %v2411_v54  ;;  %20865 = vmatmul.mubr.msk.f32.vlgmr.msra.gmra.mrb[24].mxu1 %vm711_vm4, %v2083_v0 }
 0x799   : > { %20873 = vmatpush3.xpose.msk.msra.mxu1 %vm411_vm3, %v2487_v56  ;;  %20869 = vmatprep.mubr.msk.f32.mxu0 %vm23215_vm0, %v23216_v12 }
 0x79a   : > { %20877 = vmatprep.subr.mxu0 %v23216_v12  ;;  %20874 = vmatprep.mubr.msk.f32.mxu1 %vm23215_vm0, %v23216_v12 }
 0x79b   : > { %20870 = vmatmul.mubr.msk.f32.vlgmr.msra.gmra.mrb[28].mxu0 %vm411_vm3, %v2409_v63  ;;  %20882 = vmatprep.subr.mxu1 %v23216_v12 }
 0x79c   : > { %20878 = vmatpush3.xpose.msk.msra.mxu0 %vm411_vm3, %v2561_v1  ;;  %20875 = vmatmul.mubr.msk.f32.vlgmr.msra.gmra.mrb[26].mxu1 %vm411_vm3, %v2409_v63 }
 0x79d   : > { %20883 = vmatpush3.xpose.msk.msra.mxu1 %vm411_vm3, %v2635_v2  ;;  %20879 = vmatprep.mubr.msk.f32.mxu0 %vm23215_vm0, %v23216_v12 }
 0x79e   : > { %20884 = vmatprep.mubr.msk.f32.mxu1 %vm23215_vm0, %v23216_v12  ;;  %20887 = vmatprep.subr.mxu0 %v23216_v12 }
 0x79f   : > { %20880 = vmatmul.mubr.msk.f32.vlgmr.msra.gmra.mrb[30].mxu0 %vm411_vm3, %v2409_v63  ;;  %20892 = vmatprep.subr.mxu1 %v23216_v12 }
 0x7a0   : > { %20885 = vmatmul.mubr.msk.f32.vlgmr.msra.gmra.mrb[28].mxu1 %vm411_vm3, %v2409_v63  ;;  %20889 = vmatprep.mubr.msk.f32.mxu0 %vm23215_vm0, %v23216_v12 }
 0x7a1   : > { %20894 = vmatprep.mubr.msk.f32.mxu1 %vm23215_vm0, %v23216_v12 }
 0x835   : > { %v23575_v4 = vpop.f32.mrb[24].mxu0 }
 0x836   : > { %v20851_v5 = vpop.f32.mrb[25].mxu0  ;;  %v23577_v6 = vpop.f32.mrb[22].mxu1 }
 0x837   : > { %v20856_v7 = vpop.f32.mrb[23].mxu1 }
 0x86a   : > { %v23579_v8 = vpop.f32.mrb[26].mxu0 }
 0x86b   : > { %v20861_v9 = vpop.f32.mrb[27].mxu0  ;;  %v23581_v10 = vpop.f32.mrb[24].mxu1 }
 0x86c   : > { %v20866_v11 = vpop.f32.mrb[25].mxu1 }
 0x86d   : > { %v216_v11 = vld [vmem:[%s26230_s2 + $0x168] sm:$0xff] }
 0x86e   : > { %v2482_v13 = vpop.f32.mrb[28].mxu0 }
 0x86f   : > { %v2708_v14 = vmul.f32 0.125, %v2482_v13  ;;  %v20871_v15 = vpop.f32.mrb[29].mxu0  ;;  %v2556_v16 = vpop.f32.mrb[26].mxu1  ;;  %v217_v13 = vld [vmem:[%s26230_s2 + $0x170] sm:$0xff] }
 0x870   : > { %v2709_v17 = vmul.f32 0.125, %v2556_v16  ;;  %v20876_v18 = vpop.f32.mrb[27].mxu1  ;;  %v22359_v15 = vpack.c.bf16 %v217_v13, %v216_v11  ;;  %v219_v16 = vld [vmem:[%s26230_s2 + $0x180] sm:$0xff] }
 0x871   : > { %v2712_v19 = vsel %vm711_vm4, %v2708_v14, -inf  ;;  %v220_v18 = vld [vmem:[%s26230_s2 + $0x188] sm:$0xff] }
 0x872   : > { %2713 = vmax.xlane.f32.xlu1 %v2712_v19  ;;  %v2630_v20 = vpop.f32.mrb[30].mxu0  ;;  %v2715_v21 = vsel %vm711_vm4, %v2709_v17, -inf  ;;  %v221_v19 = vld [vmem:[%s26230_s2 + $0x190] sm:$0xff] }
 0x873   : > { %v2710_v22 = vmul.f32 0.125, %v2630_v20  ;;  %v20881_v23 = vpop.f32.mrb[31].mxu0  ;;  %2716 = vmax.xlane.f32.xlu0 %v2715_v21  ;;  %v2704_v24 = vpop.f32.mrb[28].mxu1  ;;  %v22367_v20 = vpack.c.bf16 %v221_v19, %v220_v18  ;;  %v222_v21 = vld [vmem:[%s26230_s2 + $0x198] sm:$0xff]  ;;  %v23197_v18 = vld [vmem:[%s23301_s18] sm:$0xff]  ;;  %v3220_v19 = vld [vmem:[%s26229_s1 + $0x48] sm:$0xff] }
 0x874   : > { %v20886_v25 = vpop.f32.mrb[29].mxu1  ;;  %v2711_v26 = vmul.f32 0.125, %v2704_v24 }
 0x875   : > { %v2718_v27 = vsel %vm711_vm4, %v2710_v22, -inf }
 0x876   : > { %v2721_v29 = vsel %vm711_vm4, %v2711_v26, -inf }
 0x877   : > { %2719 = vmax.xlane.f32.xlu0 %v2718_v27 }
 0x87b   : > { %2722 = vmax.xlane.f32.xlu0 %v2721_v29  ;;  %v3216_v29 = vld [vmem:[%s26229_s1 + $0x28] sm:$0xff] }
 0x883   : > { %2756 = vrot.lane.b32.xlu1 %v23334_v30, %s23223_s10 }
 0x8ff   : > { %v2714_v31 = vpop.xlane.xlu1 %2713 }
 0x900   : > { %v2724_v32 = vsub.f32 %v2708_v14, %v2714_v31  ;;  %v2717_v33 = vpop.xlane.xlu0 %2716  ;;  %v218_v14 = vld [vmem:[%s26230_s2 + $0x178] sm:$0xff]  ;;  %v3217_v31 = vld [vmem:[%s26229_s1 + $0x30] sm:$0xff] }
 0x901   : > { %v2725_v35 = vsub.f32 %v2709_v17, %v2717_v33  ;;  %v22363_v17 = vpack.c.bf16 %v219_v16, %v218_v14 }
 0x902   : > { %v2728_v38 = vmul.f32 1.442695, %v2724_v32  ;;  %v3218_v32 = vld [vmem:[%s26229_s1 + $0x38] sm:$0xff] }
 0x903   : > { %v2730_v40 = vmul.f32 1.442695, %v2725_v35  ;;  %v2757_v42 = vpop.permute.xlu1 %2756  ;;  %v22375_v35 = vpack.c.bf16 %v3217_v31, %v3216_v29  ;;  %v3206_v29 = vld [vmem:[%s26230_s2 + $0x58] sm:$0xff] }
 0x904   : > { %22844 = vpow2.f32 %v2728_v38  ;;  %20888 = vmatpush3.msra.mxu0 %v2757_v42  ;;  %v2720_v44 = vpop.xlane.xlu0 %2719  ;;  %v3219_v38 = vld [vmem:[%s26229_s1 + $0x40] sm:$0xff] }
 0x905   : > { %22846 = vpow2.f32 %v2730_v40  ;;  %v2726_v45 = vsub.f32 %v2710_v22, %v2720_v44  ;;  %20897 = vmatprep.subr.mxu0 %v23216_v12  ;;  %v223_v22 = vld [vmem:[%s26230_s2 + $0x1a0] sm:$0xff]  ;;  %v22379_v42 = vpack.c.bf16 %v3219_v38, %v3218_v32  ;;  %v23200_v38 = vld [vmem:[%s23301_s18 + $0x18] sm:$0xff] }
 0x906   : > { %v22371_v23 = vpack.c.bf16 %v223_v22, %v222_v21  ;;  %v3204_v22 = vld [vmem:[%s26230_s2 + $0x48] sm:$0xff]  ;;  %v3207_v32 = vld [vmem:[%s26230_s2 + $0x60] sm:$0xff] }
 0x907   : > { %v2732_v46 = vmul.f32 1.442695, %v2726_v45 }
 0x908   : > { %v2723_v47 = vpop.xlane.xlu0 %2722 }
 0x909   : > { %22848 = vpow2.f32 %v2732_v46  ;;  %v2727_v48 = vsub.f32 %v2711_v26, %v2723_v47 }
 0x90b   : > { %v2734_v49 = vmul.f32 1.442695, %v2727_v48 }
 0x90d   : > { %22850 = vpow2.f32 %v2734_v49 }
 0x90e   : > { %v22845_v30 = vpop.eup %22844 }
 0x90f   : > { %v22847_v52 = vpop.eup %22846  ;;  %v2736_v54 = vsel %vm711_vm4, %v22845_v30, 0.0 }
 0x910   : > { %2737 = vadd.xlane.f32.xlu1 %v2736_v54  ;;  %v2739_v56 = vsel %vm711_vm4, %v22847_v52, 0.0  ;;  %v1061_v54 = vadd.f32 %v23437_v41, %v23349_v37 }
 0x911   : > { %2740 = vadd.xlane.f32.xlu0 %v2739_v56 }
 0x913   : > { %v22849_v58 = vpop.eup %22848 }
 0x914   : > { %v2742_v59 = vsel %vm711_vm4, %v22849_v58, 0.0 }
 0x915   : > { %2743 = vadd.xlane.f32.xlu1 %v2742_v59 }
 0x917   : > { %v22851_v60 = vpop.eup %22850 }
 0x918   : > { %v2745_v61 = vsel %vm711_vm4, %v22851_v60, 0.0 }
 0x919   : > { %2746 = vadd.xlane.f32.xlu0 %v2745_v61 }
 0x926   : > { %2908 = vrot.lane.b32.xlu1 %v23347_v36, %s23223_s10 }
 0x92a   : > { %2984 = vrot.lane.b32.xlu1 %v23345_v34, %s23223_s10 }
 0x92e   : > { %1720 = vrot.lane.b32.xlu1 %v23507_v53, %s23223_s10 }
 0x92f   : > { %2832 = vrot.lane.b32.xlu0 %v23332_v28, %s23223_s10 }
 0x932   : > { %2392 = vrot.lane.b32.xlu1 %v23575_v4, %s23221_s8 }
 0x933   : > { %1722 = vrot.lane.b32.xlu0 %v23505_v50, %s23223_s10 }
 0x937   : > { %2394 = vrot.lane.b32.xlu0 %v23577_v6, %s23221_s8 }
 0x99d   : > { %v2738_v62 = vpop.xlane.xlu1 %2737 }
 0x99e   : > { %22852 = vrcp.f32 %v2738_v62  ;;  %v2741_v36 = vpop.xlane.xlu0 %2740 }
 0x99f   : > { %22854 = vrcp.f32 %v2741_v36 }
 0x9a2   : > { %v2744_v34 = vpop.xlane.xlu1 %2743 }
 0x9a3   : > { %22856 = vrcp.f32 %v2744_v34 }
 0x9a6   : > { %v2747_v63 = vpop.xlane.xlu0 %2746  ;;  %v2909_v53 = vpop.permute.xlu1 %2908 }
 0x9a7   : > { %22858 = vrcp.f32 %v2747_v63 }
 0x9a8   : > { %v22853_v0 = vpop.eup %22852 }
 0x9a9   : > { %v22855_v28 = vpop.eup %22854  ;;  %v2749_v1 = vmul.f32 %v22853_v0, %v22845_v30  ;;  %v1060_v30 = vadd.f32 %v23435_v39, %v23349_v37 }
 0x9aa   : > { %v2833_v2 = vpop.permute.xlu0 %2832  ;;  %v2751_v4 = vmul.f32 %v22855_v28, %v22847_v52  ;;  %v2985_v5 = vpop.permute.xlu1 %2984 }
 0x9ab   : > { %20890 = vmatmul.mubr.msk.f32.vlgmr.msra.gmra.mrb[32].mxu0 %vm711_vm4, %v2749_v1  ;;  %20893 = vmatpush3.msra.mxu1 %v2833_v2 }
 0x9ac   : > { %20898 = vmatpush3.msra.mxu0 %v2909_v53  ;;  %20895 = vmatmul.mubr.msk.f32.vlgmr.msra.gmra.mrb[30].mxu1 %vm711_vm4, %v2751_v4 }
 0x9ad   : > { %v22857_v50 = vpop.eup %22856  ;;  %20902 = vmatprep.subr.mxu1 %v23216_v12  ;;  %20899 = vmatprep.mubr.msk.f32.mxu0 %vm23215_vm0, %v23216_v12 }
 0x9ae   : > { %20903 = vmatpush3.msra.mxu1 %v2985_v5  ;;  %v2753_v6 = vmul.f32 %v22857_v50, %v22849_v58  ;;  %20904 = vmatprep.mubr.msk.f32.mxu1 %vm23215_vm0, %v23216_v12  ;;  %v1721_v45 = vpop.permute.xlu1 %1720  ;;  %v1723_v46 = vpop.permute.xlu0 %1722  ;;  %v1062_v50 = vadd.f32 %v23442_v51, %v23349_v37 }
 0x9af   : > { %22360 = vmatprep.subr.bf16.mxu0 %v22359_v15  ;;  %22376 = vmatprep.subr.bf16.mxu1 %v22375_v35  ;;  %v1732_v48 = vadd.f32 %v1721_v45, %v23349_v37 }
 0x9b0   : > { %20900 = vmatmul.mubr.msk.f32.vlgmr.msra.gmra.mrb[34].mxu0 %vm711_vm4, %v2753_v6  ;;  %v1063_v6 = vadd.f32 %v23439_v43, %v23349_v37 }
 0x9b1   : > { %v22859_v7 = vpop.eup %22858  ;;  %22362 = vmatpush3.bf16.msra.mxu0 %v22359_v15  ;;  %v3080_v58 = vsel %vm411_vm3, %v1060_v30, %v1732_v48 }
 0x9b2   : > { %v2755_v9 = vmul.f32 %v22859_v7, %v22851_v60  ;;  %22364 = vmatprep.subr.bf16.mxu0 %v22363_v17  ;;  %v2395_v47 = vpop.permute.xlu0 %2394 }
 0x9b3   : > { %v2405_v52 = vadd.f32 %v2395_v47, %v23349_v37 }
 0x9b4   : > { %20905 = vmatmul.mubr.msk.f32.vlgmr.msra.gmra.mrb[32].mxu1 %vm711_vm4, %v2755_v9 }
 0x9b5   : > { %22366 = vmatpush3.bf16.msra.mxu0 %v22363_v17  ;;  %22378 = vmatpush3.bf16.msra.mxu1 %v22375_v35  ;;  %v23199_v35 = vld [vmem:[%s23301_s18 + $0x10] sm:$0xff] }
 0x9b6   : > { %22368 = vmatprep.subr.bf16.mxu0 %v22367_v20  ;;  %22380 = vmatprep.subr.bf16.mxu1 %v22379_v42 }
 0x9b9   : > { %22370 = vmatpush3.bf16.msra.mxu0 %v22367_v20  ;;  %22382 = vmatpush3.bf16.msra.mxu1 %v22379_v42  ;;  %v3203_v20 = vld [vmem:[%s26230_s2 + $0x40] sm:$0xff] }
 0x9ba   : > { %22372 = vmatprep.subr.bf16.mxu0 %v22371_v23 }
 0x9bd   : > { %22374 = vmatpush3.bf16.msra.mxu0 %v22371_v23  ;;  %v22391_v23 = vpack.c.bf16 %v3204_v22, %v3203_v20 }
 0x9bf   : > { %22392 = vmatprep.subr.bf16.mxu0 %v22391_v23 }
 0xa7e   : > { %v2828_v24 = vpop.f32.mrb[32].mxu0 }
 0xa7f   : > { %3064 = vrot.lane.b32.xlu1 %v2828_v24, %s23219_s6  ;;  %v20891_v25 = vpop.f32.mrb[33].mxu0  ;;  %v2904_v26 = vpop.f32.mrb[30].mxu1  ;;  %v3222_v24 = vld [vmem:[%s26229_s1 + $0x58] sm:$0xff] }
 0xa80   : > { %3066 = vrot.lane.b32.xlu0 %v2904_v26, %s23219_s6  ;;  %v20896_v27 = vpop.f32.mrb[31].mxu1  ;;  %v3223_v25 = vld [vmem:[%s26229_s1 + $0x60] sm:$0xff]  ;;  %v3205_v26 = vld [vmem:[%s26230_s2 + $0x50] sm:$0xff] }
 0xa81   : > { %v22387_v27 = vpack.c.bf16 %v3223_v25, %v3222_v24  ;;  %v22395_v31 = vpack.c.bf16 %v3206_v29, %v3205_v26 }
 0xa83   : > { %1724 = vrot.lane.b32.xlu1 %v23509_v55, %s23223_s10  ;;  %v2980_v33 = vpop.f32.mrb[34].mxu0 }
 0xa84   : > { %1726 = vrot.lane.b32.xlu0 %v23511_v57, %s23223_s10  ;;  %v20901_v40 = vpop.f32.mrb[35].mxu0  ;;  %v23196_v57 = vld [vmem:[%s26231_s3] ss:$0 sm:$0xff] }
 0xa87   : > { %2396 = vrot.lane.b32.xlu1 %v23579_v8, %s23221_s8  ;;  %v3056_v44 = vpop.f32.mrb[32].mxu1  ;;  %v2393_v8 = vpop.permute.xlu1 %2392 }
 0xa88   : > { %2398 = vrot.lane.b32.xlu0 %v23581_v10, %s23221_s8  ;;  %v20906_v55 = vpop.f32.mrb[33].mxu1  ;;  %v1733_v10 = vadd.f32 %v1723_v46, %v23349_v37  ;;  %v2404_v49 = vadd.f32 %v2393_v8, %v23349_v37 }
 0xa8a   : > { %v3081_v61 = vsel %vm411_vm3, %v1061_v54, %v1733_v10  ;;  %v3085_v36 = vsel %vm3084_vm5, %v3080_v58, %v2404_v49 }
 0xa8b   : > { %3068 = vrot.lane.b32.xlu1 %v2980_v33, %s23219_s6  ;;  %v3086_v39 = vsel %vm3084_vm5, %v3081_v61, %v2405_v52  ;;  %v23198_v33 = vld [vmem:[%s23301_s18 + $0x8] sm:$0xff] }
 0xa8c   : > { %3070 = vrot.lane.b32.xlu0 %v3056_v44, %s23219_s6 }
 0xa8f   : > { %3095 = vrot.lane.b32.xlu1 %v23196_v57, %s23217_s30 }
 0xaf1   : > { %v3065_v56 = vpop.permute.xlu1 %3064 }
 0xaf2   : > { %v3076_v59 = vadd.f32 %v3065_v56, %v23349_v37  ;;  %v3067_v60 = vpop.permute.xlu0 %3066 }
 0xaf3   : > { %v3077_v62 = vadd.f32 %v3067_v60, %v23349_v37 }
 0xaf4   : > { %v23684_v34 = vsel %vm3089_vm6, %v3085_v36, %v3076_v59  ;;  %v19668_v36 = vld [vmem:[%s26231_s3 + $0x7] ss:$0 sm:$0xff] }
 0xaf5   : > { %20923 = vmatprep.mubr.msk.f32.mxu0 %vm337_vm2, %v23684_v34  ;;  %v1725_v41 = vpop.permute.xlu1 %1724  ;;  %v23689_v63 = vsel %vm3089_vm6, %v3086_v39, %v3077_v62 }
 0xaf6   : > { %v1727_v53 = vpop.permute.xlu0 %1726  ;;  %20924 = vmatmul.mubr.msk.f32.vlgmr.msra.gmra.mrb[36].mxu0 %vm337_vm2, %v23689_v63  ;;  %v1734_v28 = vadd.f32 %v1725_v41, %v23349_v37 }
 0xaf7   : > { %v1735_v2 = vadd.f32 %v1727_v53, %v23349_v37  ;;  %22394 = vmatpush3.bf16.msra.mxu0 %v22391_v23 }
 0xaf8   : > { %v3082_v9 = vsel %vm411_vm3, %v1062_v50, %v1734_v28  ;;  %22396 = vmatprep.subr.bf16.mxu0 %v22395_v31 }
 0xaf9   : > { %v2397_v0 = vpop.permute.xlu1 %2396  ;;  %v3083_v14 = vsel %vm411_vm3, %v1063_v6, %v1735_v2 }
 0xafa   : > { %v2399_v1 = vpop.permute.xlu0 %2398  ;;  %v2406_v4 = vadd.f32 %v2397_v0, %v23349_v37 }
 0xafb   : > { %v2407_v5 = vadd.f32 %v2399_v1, %v23349_v37  ;;  %22398 = vmatpush3.bf16.msra.mxu0 %v22395_v31 }
 0xafc   : > { %v3087_v16 = vsel %vm3084_vm5, %v3082_v9, %v2406_v4  ;;  %20959 = vmatprep.subr.mxu0 %v3207_v32 }
 0xafd   : > { %v3069_v7 = vpop.permute.xlu1 %3068  ;;  %v3088_v51 = vsel %vm3084_vm5, %v3083_v14, %v2407_v5 }
 0xafe   : > { %v3078_v11 = vadd.f32 %v3069_v7, %v23349_v37  ;;  %v3071_v13 = vpop.permute.xlu0 %3070 }
 0xaff   : > { %v3079_v15 = vadd.f32 %v3071_v13, %v23349_v37  ;;  %v3221_v37 = vld [vmem:[%s26229_s1 + $0x50] sm:$0xff]  ;;  %20960 = vmatpush3.msra.mxu0 %v3207_v32 }
 0xb00   : > { %v3092_v17 = vsel %vm3089_vm6, %v3087_v16, %v3078_v11  ;;  %v22383_v21 = vpack.c.bf16 %v3221_v37, %v3220_v19  ;;  %20977 = vmatprep.subr.mxu0 %v23216_v12 }
 0xb01   : > { %20926 = vmatprep.mubr.msk.f32.mxu0 %vm337_vm2, %v3092_v17  ;;  %v3093_v43 = vsel %vm3089_vm6, %v3088_v51, %v3079_v15  ;;  %v3096_v40 = vpop.permute.xlu1 %3095 }
 0xb02   : > { %20927 = vmatmul.mubr.msk.f32.gmra.mrb[38].mxu0 %vm337_vm2, %v3093_v43  ;;  %22384 = vmatprep.subr.bf16.mxu1 %v22383_v21 }
 0xb03   : > { %20961 = vmatprep.mubr.msk.f32.mxu0 %vm235_vm1, %v23197_v18  ;;  %22386 = vmatpush3.bf16.msra.mxu1 %v22383_v21 }
 0xb04   : > { %22388 = vmatprep.subr.bf16.mxu1 %v22387_v27 }
 0xb06   : > { %20962 = vmatmul.mubr.msk.f32.vlgmr.msra.gmra.mrb[40].mxu0 %vm235_vm1, %v23198_v33 }
 0xb07   : > { %22390 = vmatpush3.bf16.msra.mxu1 %v22387_v27  ;;  %20964 = vmatprep.mubr.msk.f32.mxu0 %vm235_vm1, %v23199_v35 }
 0xb08   : > { %20967 = vmatprep.subr.mxu1 %v23216_v12 }
 0xb0a   : > { %20965 = vmatmul.mubr.msk.f32.gmra.mrb[42].mxu0 %vm235_vm1, %v23200_v38 }
 0xb0b   : > { %20979 = vmatprep.mubr.msk.f32.mxu0 %vm23215_vm0, %v23216_v12 }
 0xbc9   : > { %v20925_v42 = vpop.f32.mrb[36].mxu0 }
 0xbca   : > { %v3182_v44 = vadd.f32 %v20925_v42, %v3096_v40  ;;  %v3176_v55 = vpop.f32.mrb[37].mxu0 }
 0xbcb   : > { %v3177_v57 = vadd.f32 %v3176_v55, %v3096_v40 }
 0xbcc   : > { %v3196_v45 = vmax.f32 %v3182_v44, 0.0 }
 0xbcd   : > { %v3195_v46 = vmax.f32 %v3177_v57, 0.0 }
 0xbce   : > { %v3200_v47 = vadd.f32 %v3196_v45, %v23689_v63 }
 0xbcf   : > { %v3199_v8 = vadd.f32 %v3195_v46, %v23684_v34  ;;  %v19673_v34 = vld [vmem:[%s26231_s3 + $0x1] ss:$0 sm:$0xff] }
 0xbd1   : > { %20945 = vmatprep.mubr.msk.f32.mxu1 %vm337_vm2, %v3199_v8 }
 0xbd2   : > { %20946 = vmatmul.mubr.msk.f32.vlgmr.msra.gmra.mrb[34].mxu1 %vm337_vm2, %v3200_v47 }
 0xbd5   : > { %v20928_v48 = vpop.f32.mrb[38].mxu0 }
 0xbd6   : > { %v3192_v10 = vadd.f32 %v20928_v48, %v3096_v40  ;;  %v3186_v49 = vpop.f32.mrb[39].mxu0 }
 0xbd7   : > { %v3187_v30 = vadd.f32 %v3186_v49, %v3096_v40 }
 0xbd8   : > { %v3198_v52 = vmax.f32 %v3192_v10, 0.0 }
 0xbd9   : > { %v3197_v54 = vmax.f32 %v3187_v30, 0.0  ;;  %v20963_v59 = vpop.f32.mrb[40].mxu0 }
 0xbda   : > { %v3202_v58 = vadd.f32 %v3198_v52, %v3093_v43  ;;  %v3397_v60 = vpop.f32.mrb[41].mxu0  ;;  %v23779_v28 = vadd.f32 %v20963_v59, %v19673_v34 }
 0xbdb   : > { %v3201_v56 = vadd.f32 %v3197_v54, %v3092_v17  ;;  %v23766_v53 = vadd.f32 %v19673_v34, %v3397_v60 }
 0xbdd   : > { %20948 = vmatprep.mubr.msk.f32.mxu1 %vm337_vm2, %v3201_v56  ;;  %v20966_v61 = vpop.f32.mrb[42].mxu0 }
 0xbde   : > { %20949 = vmatmul.mubr.msk.f32.gmra.mrb[36].mxu1 %vm337_vm2, %v3202_v58  ;;  %v3407_v62 = vpop.f32.mrb[43].mxu0  ;;  %v23790_v5 = vadd.f32 %v20966_v61, %v19673_v34 }
 0xbdf   : > { %20969 = vmatprep.mubr.msk.f32.mxu1 %vm23215_vm0, %v23216_v12  ;;  %v23794_v6 = vadd.f32 %v19673_v34, %v3407_v62 }
 0xca5   : > { %v20947_v39 = vpop.f32.mrb[34].mxu1 }
 0xca6   : > { %v3308_v41 = vpop.f32.mrb[35].mxu1  ;;  %v23771_v0 = vadd.f32 %v20947_v39, %v19668_v36 }
 0xca7   : > { %v23764_v63 = vadd.f32 %v19668_v36, %v3308_v41 }
 0xca9   : > { %20968 = vmatpush3.xpose.msk.msra.mxu1 %vm411_vm3, %v23764_v63 }
 0xcaa   : > { %20972 = vmatprep.subr.mxu1 %v23216_v12 }
 0xcac   : > { %20970 = vmatmul.mubr.msk.f32.vlgmr.msra.gmra.mrb[38].mxu1 %vm411_vm3, %v23766_v53 }
 0xcad   : > { %20973 = vmatpush3.xpose.msk.msra.mxu1 %vm411_vm3, %v23771_v0  ;;  %20974 = vmatprep.mubr.msk.f32.mxu1 %vm23215_vm0, %v23216_v12 }
 0xcae   : > { %20982 = vmatprep.subr.mxu1 %v23216_v12 }
 0xcb0   : > { %20975 = vmatmul.mubr.msk.f32.vlgmr.msra.gmra.mrb[40].mxu1 %vm411_vm3, %v23779_v28 }
 0xcb1   : > { %v20950_v1 = vpop.f32.mrb[36].mxu1  ;;  %20984 = vmatprep.mubr.msk.f32.mxu1 %vm23215_vm0, %v23216_v12 }
 0xcb2   : > { %v23786_v2 = vadd.f32 %v20950_v1, %v19668_v36  ;;  %v3318_v4 = vpop.f32.mrb[37].mxu1 }
 0xcb3   : > { %v23788_v50 = vadd.f32 %v19668_v36, %v3318_v4 }
 0xcb4   : > { %20983 = vmatpush3.xpose.msk.msra.mxu1 %vm411_vm3, %v23786_v2 }
 0xcb5   : > { %20978 = vmatpush3.xpose.msk.msra.mxu0 %vm411_vm3, %v23788_v50  ;;  %20992 = vmatprep.subr.mxu1 %v23216_v12 }
 0xcb6   : > { %20987 = vmatprep.subr.mxu0 %v23216_v12 }
 0xcb7   : > { %20985 = vmatmul.mubr.msk.f32.vlgmr.msra.gmra.mrb[42].mxu1 %vm411_vm3, %v23790_v5 }
 0xcb8   : > { %20980 = vmatmul.mubr.msk.f32.vlgmr.msra.gmra.mrb[44].mxu0 %vm411_vm3, %v23794_v6  ;;  %20994 = vmatprep.mubr.msk.f32.mxu1 %vm23215_vm0, %v23216_v12 }
 0xcb9   : > { %20989 = vmatprep.mubr.msk.f32.mxu0 %vm23215_vm0, %v23216_v12 }
 0xd7f   : > { %v3488_v7 = vpop.f32.mrb[38].mxu1 }
 0xd80   : > { %v3720_v9 = vmul.f32 0.125, %v3488_v7  ;;  %v20971_v11 = vpop.f32.mrb[39].mxu1 }
 0xd82   : > { %v3724_v13 = vsel %vm711_vm4, %v3720_v9, -inf }
 0xd83   : > { %3725 = vmax.xlane.f32.xlu0 %v3724_v13  ;;  %v3564_v14 = vpop.f32.mrb[40].mxu1 }
 0xd84   : > { %v3721_v15 = vmul.f32 0.125, %v3564_v14  ;;  %v20976_v16 = vpop.f32.mrb[41].mxu1 }
 0xd86   : > { %v3727_v17 = vsel %vm711_vm4, %v3721_v15, -inf }
 0xd87   : > { %3728 = vmax.xlane.f32.xlu1 %v3727_v17 }
 0xd8a   : > { %v3716_v51 = vpop.f32.mrb[42].mxu1 }
 0xd8b   : > { %v3640_v43 = vpop.f32.mrb[44].mxu0  ;;  %v20986_v18 = vpop.f32.mrb[43].mxu1  ;;  %v3723_v37 = vmul.f32 0.125, %v3716_v51 }
 0xd8c   : > { %v3722_v19 = vmul.f32 0.125, %v3640_v43  ;;  %v20981_v20 = vpop.f32.mrb[45].mxu0 }
 0xd8d   : > { %v3733_v22 = vsel %vm711_vm4, %v3723_v37, -inf }
 0xd8e   : > { %v3730_v21 = vsel %vm711_vm4, %v3722_v19, -inf }
 0xd8f   : > { %3731 = vmax.xlane.f32.xlu0 %v3730_v21 }
 0xd93   : > { %3734 = vmax.xlane.f32.xlu0 %v3733_v22 }
 0xd98   : > { %3844 = vrot.lane.b32.xlu1 %v23771_v0, %s23217_s30 }
 0xd9c   : > { %3920 = vrot.lane.b32.xlu1 %v23788_v50, %s23217_s30 }
 0xda0   : > { %3996 = vrot.lane.b32.xlu1 %v23786_v2, %s23217_s30 }
 0xda4   : > { %4156 = vrot.lane.b32.xlu1 %v23771_v0, %s23218_s5 }
 0xda9   : > { %3768 = vrot.lane.b32.xlu0 %v23764_v63, %s23217_s30 }
 0xdad   : > { %4078 = vrot.lane.b32.xlu0 %v23764_v63, %s23218_s5 }
 0xe10   : > { %v3726_v23 = vpop.xlane.xlu0 %3725 }
 0xe11   : > { %v3736_v24 = vsub.f32 %v3720_v9, %v3726_v23 }
 0xe13   : > { %v3740_v25 = vmul.f32 1.442695, %v3736_v24 }
 0xe14   : > { %v3729_v26 = vpop.xlane.xlu1 %3728 }
 0xe15   : > { %22860 = vpow2.f32 %v3740_v25  ;;  %v3737_v27 = vsub.f32 %v3721_v15, %v3729_v26 }
 0xe17   : > { %v3742_v29 = vmul.f32 1.442695, %v3737_v27 }
 0xe18   : > { %v3845_v31 = vpop.permute.xlu1 %3844 }
 0xe19   : > { %22862 = vpow2.f32 %v3742_v29  ;;  %20993 = vmatpush3.msra.mxu1 %v3845_v31 }
 0xe1a   : > { %21002 = vmatprep.subr.mxu1 %v23216_v12 }
 0xe1c   : > { %v3732_v32 = vpop.xlane.xlu0 %3731  ;;  %v3921_v49 = vpop.permute.xlu1 %3920 }
 0xe1d   : > { %v3738_v33 = vsub.f32 %v3722_v19, %v3732_v32 }
 0xe1f   : > { %v22861_v35 = vpop.eup %22860  ;;  %v3744_v38 = vmul.f32 1.442695, %v3738_v33 }
 0xe20   : > { %v3735_v40 = vpop.xlane.xlu0 %3734  ;;  %v3748_v42 = vsel %vm711_vm4, %v22861_v35, 0.0  ;;  %v3997_v30 = vpop.permute.xlu1 %3996 }
 0xe21   : > { %22864 = vpow2.f32 %v3744_v38  ;;  %3749 = vadd.xlane.f32.xlu0 %v3748_v42  ;;  %v3739_v8 = vsub.f32 %v3723_v37, %v3735_v40 }
 0xe23   : > { %v22863_v44 = vpop.eup %22862  ;;  %v3746_v47 = vmul.f32 1.442695, %v3739_v8 }
 0xe24   : > { %v3769_v55 = vpop.permute.xlu0 %3768  ;;  %v3751_v57 = vsel %vm711_vm4, %v22863_v44, 0.0  ;;  %v4157_v54 = vpop.permute.xlu1 %4156 }
 0xe25   : > { %3752 = vadd.xlane.f32.xlu1 %v3751_v57  ;;  %20988 = vmatpush3.msra.mxu0 %v3769_v55  ;;  %22866 = vpow2.f32 %v3746_v47 }
 0xe26   : > { %20997 = vmatprep.subr.mxu0 %v23216_v12 }
 0xe28   : > { %v4079_v52 = vpop.permute.xlu0 %4078 }
 0xe2b   : > { %v22865_v45 = vpop.eup %22864 }
 0xe2c   : > { %v3754_v46 = vsel %vm711_vm4, %v22865_v45, 0.0 }
 0xe2d   : > { %3755 = vadd.xlane.f32.xlu0 %v3754_v46 }
 0xe2f   : > { %v22867_v48 = vpop.eup %22866 }
 0xe30   : > { %v3757_v10 = vsel %vm711_vm4, %v22867_v48, 0.0 }
 0xe36   : > { %4154 = vrot.lane.b32.xlu1 %v23779_v28, %s23218_s5 }
 0xe43   : > { %4076 = vrot.lane.b32.xlu0 %v23766_v53, %s23218_s5 }
 0xe47   : > { %4234 = vrot.lane.b32.xlu0 %v23788_v50, %s23218_s5 }
 0xe4b   : > { %4232 = vrot.lane.b32.xlu0 %v23794_v6, %s23218_s5 }
 0xe5a   : > { %3758 = vadd.xlane.f32.xlu1 %v3757_v10 }
 0xe6b   : > { %4312 = vrot.lane.b32.xlu1 %v23786_v2, %s23218_s5 }
 0xe6f   : > { %4310 = vrot.lane.b32.xlu1 %v23790_v5, %s23218_s5 }
 0xeae   : > { %v3750_v56 = vpop.xlane.xlu0 %3749 }
 0xeaf   : > { %22868 = vrcp.f32 %v3750_v56 }
 0xeb2   : > { %v3753_v58 = vpop.xlane.xlu1 %3752 }
 0xeb3   : > { %22870 = vrcp.f32 %v3753_v58 }
 0xeb6   : > { %v4155_v7 = vpop.permute.xlu1 %4154 }
 0xeb9   : > { %v22869_v59 = vpop.eup %22868 }
 0xeba   : > { %v3756_v60 = vpop.xlane.xlu0 %3755  ;;  %v3761_v61 = vmul.f32 %v22869_v59, %v22861_v35 }
 0xebb   : > { %22872 = vrcp.f32 %v3756_v60 }
 0xebc   : > { %20990 = vmatmul.mubr.msk.f32.vlgmr.msra.gmra.mrb[46].mxu0 %vm711_vm4, %v3761_v61 }
 0xebd   : > { %v22871_v62 = vpop.eup %22870  ;;  %20998 = vmatpush3.msra.mxu0 %v3921_v49  ;;  %20999 = vmatprep.mubr.msk.f32.mxu0 %vm23215_vm0, %v23216_v12 }
 0xebe   : > { %v3763_v36 = vmul.f32 %v22871_v62, %v22863_v44  ;;  %21007 = vmatprep.subr.mxu0 %v23216_v12  ;;  %v4077_v39 = vpop.permute.xlu0 %4076 }
 0xec0   : > { %20995 = vmatmul.mubr.msk.f32.vlgmr.msra.gmra.mrb[44].mxu1 %vm711_vm4, %v3763_v36 }
 0xec1   : > { %21003 = vmatpush3.msra.mxu1 %v3997_v30  ;;  %21004 = vmatprep.mubr.msk.f32.mxu1 %vm23215_vm0, %v23216_v12 }
 0xec2   : > { %21012 = vmatprep.subr.mxu1 %v23216_v12  ;;  %v4235_v1 = vpop.permute.xlu0 %4234 }
 0xec5   : > { %v22873_v34 = vpop.eup %22872 }
 0xec6   : > { %v3765_v41 = vmul.f32 %v22873_v34, %v22865_v45  ;;  %v4233_v4 = vpop.permute.xlu0 %4232 }
 0xec8   : > { %21000 = vmatmul.mubr.msk.f32.vlgmr.msra.gmra.mrb[48].mxu0 %vm711_vm4, %v3765_v41 }
 0xec9   : > { %21008 = vmatpush3.xpose.msk.msra.mxu0 %vm411_vm3, %v4079_v52  ;;  %21009 = vmatprep.mubr.msk.f32.mxu0 %vm23215_vm0, %v23216_v12 }
 0xeca   : > { %21017 = vmatprep.subr.mxu0 %v23216_v12 }
 0xecc   : > { %21010 = vmatmul.mubr.msk.f32.vlgmr.msra.gmra.mrb[50].mxu0 %vm411_vm3, %v4077_v39 }
 0xecd   : > { %21018 = vmatpush3.xpose.msk.msra.mxu0 %vm411_vm3, %v4235_v1  ;;  %21019 = vmatprep.mubr.msk.f32.mxu0 %vm23215_vm0, %v23216_v12 }
 0xece   : > { %21027 = vmatprep.subr.mxu0 %v23216_v12 }
 0xed0   : > { %21020 = vmatmul.mubr.msk.f32.vlgmr.msra.gmra.mrb[52].mxu0 %vm411_vm3, %v4233_v4 }
 0xed1   : > { %21029 = vmatprep.mubr.msk.f32.mxu0 %vm23215_vm0, %v23216_v12 }
 0xee7   : > { %v3759_v9 = vpop.xlane.xlu1 %3758 }
 0xee8   : > { %22874 = vrcp.f32 %v3759_v9 }
 0xeeb   : > { %v4313_v14 = vpop.permute.xlu1 %4312 }
 0xeef   : > { %v4311_v15 = vpop.permute.xlu1 %4310 }
 0xef2   : > { %v22875_v11 = vpop.eup %22874 }
 0xef3   : > { %v3767_v13 = vmul.f32 %v22875_v11, %v22867_v48 }
 0xef5   : > { %21005 = vmatmul.mubr.msk.f32.vlgmr.msra.gmra.mrb[46].mxu1 %vm711_vm4, %v3767_v13 }
 0xef6   : > { %21013 = vmatpush3.xpose.msk.msra.mxu1 %vm411_vm3, %v4157_v54  ;;  %21014 = vmatprep.mubr.msk.f32.mxu1 %vm23215_vm0, %v23216_v12 }
 0xef7   : > { %21022 = vmatprep.subr.mxu1 %v23216_v12 }
 0xef9   : > { %21015 = vmatmul.mubr.msk.f32.vlgmr.msra.gmra.mrb[48].mxu1 %vm411_vm3, %v4155_v7 }
 0xefa   : > { %21023 = vmatpush3.xpose.msk.msra.mxu1 %vm411_vm3, %v4313_v14  ;;  %21024 = vmatprep.mubr.msk.f32.mxu1 %vm23215_vm0, %v23216_v12 }
 0xefb   : > { %21032 = vmatprep.subr.mxu1 %v23216_v12 }
 0xefd   : > { %21025 = vmatmul.mubr.msk.f32.vlgmr.msra.gmra.mrb[50].mxu1 %vm411_vm3, %v4311_v15 }
 0xefe   : > { %21034 = vmatprep.mubr.msk.f32.mxu1 %vm23215_vm0, %v23216_v12 }
 0xf8f   : > { %v23876_v16 = vpop.f32.mrb[46].mxu0 }
 0xf90   : > { %v20991_v17 = vpop.f32.mrb[47].mxu0 }
 0xf93   : > { %v23878_v51 = vpop.f32.mrb[44].mxu1 }
 0xf94   : > { %v20996_v43 = vpop.f32.mrb[45].mxu1 }
 0xf9b   : > { %v23880_v18 = vpop.f32.mrb[48].mxu0 }
 0xf9c   : > { %v21001_v19 = vpop.f32.mrb[49].mxu0 }
 0xf9f   : > { %v4150_v37 = vpop.f32.mrb[50].mxu0 }
 0xfa0   : > { %v4388_v20 = vmul.f32 0.125, %v4150_v37  ;;  %v21011_v21 = vpop.f32.mrb[51].mxu0 }
 0xfa2   : > { %v4392_v22 = vsel %vm711_vm4, %v4388_v20, -inf }
 0xfa3   : > { %4393 = vmax.xlane.f32.xlu0 %v4392_v22  ;;  %v4306_v23 = vpop.f32.mrb[52].mxu0 }
 0xfa4   : > { %v4390_v24 = vmul.f32 0.125, %v4306_v23  ;;  %v21021_v25 = vpop.f32.mrb[53].mxu0 }
 0xfa6   : > { %v4398_v26 = vsel %vm711_vm4, %v4390_v24, -inf }
 0xfa7   : > { %4399 = vmax.xlane.f32.xlu0 %v4398_v26 }
 0xfc8   : > { %v23884_v27 = vpop.f32.mrb[46].mxu1 }
 0xfc9   : > { %v21006_v29 = vpop.f32.mrb[47].mxu1 }
 0xfcc   : > { %v4228_v31 = vpop.f32.mrb[48].mxu1 }
 0xfcd   : > { %v4389_v32 = vmul.f32 0.125, %v4228_v31  ;;  %v21016_v33 = vpop.f32.mrb[49].mxu1 }
 0xfcf   : > { %v4395_v35 = vsel %vm711_vm4, %v4389_v32, -inf }
 0xfd0   : > { %4396 = vmax.xlane.f32.xlu1 %v4395_v35  ;;  %v4384_v38 = vpop.f32.mrb[50].mxu1 }
 0xfd1   : > { %v4391_v40 = vmul.f32 0.125, %v4384_v38  ;;  %v21026_v42 = vpop.f32.mrb[51].mxu1 }
 0xfd3   : > { %v4401_v44 = vsel %vm711_vm4, %v4391_v40, -inf }
 0xfd4   : > { %4402 = vmax.xlane.f32.xlu0 %v4401_v44 }
 0xfe1   : > { %4512 = vrot.lane.b32.xlu1 %v23771_v0, %s23219_s6 }
 0xfe5   : > { %4588 = vrot.lane.b32.xlu1 %v23788_v50, %s23219_s6 }
 0xfe9   : > { %4664 = vrot.lane.b32.xlu1 %v23786_v2, %s23219_s6 }
 0xfea   : > { %4436 = vrot.lane.b32.xlu0 %v23764_v63, %s23219_s6 }
 0xfed   : > { %4840 = vrot.lane.b32.xlu1 %v23771_v0, %s23220_s7 }
 0xfee   : > { %4762 = vrot.lane.b32.xlu0 %v23764_v63, %s23220_s7 }
0x1030   : > { %v4394_v55 = vpop.xlane.xlu0 %4393 }
0x1031   : > { %v4404_v57 = vsub.f32 %v4388_v20, %v4394_v55 }
0x1033   : > { %v4408_v45 = vmul.f32 1.442695, %v4404_v57 }
0x1034   : > { %v4400_v46 = vpop.xlane.xlu0 %4399 }
0x1035   : > { %22876 = vpow2.f32 %v4408_v45  ;;  %v4406_v8 = vsub.f32 %v4390_v24, %v4400_v46 }
0x1037   : > { %v4412_v47 = vmul.f32 1.442695, %v4406_v8 }
0x1039   : > { %22878 = vpow2.f32 %v4412_v47 }
0x103f   : > { %v22877_v48 = vpop.eup %22876 }
0x1040   : > { %v4416_v10 = vsel %vm711_vm4, %v22877_v48, 0.0 }
0x1041   : > { %4417 = vadd.xlane.f32.xlu0 %v4416_v10 }
0x1043   : > { %v22879_v49 = vpop.eup %22878 }
0x1044   : > { %v4422_v30 = vsel %vm711_vm4, %v22879_v49, 0.0 }
0x1045   : > { %4423 = vadd.xlane.f32.xlu0 %v4422_v30 }
0x105b   : > { %4760 = vrot.lane.b32.xlu0 %v23766_v53, %s23220_s7 }
0x105d   : > { %v4397_v52 = vpop.xlane.xlu1 %4396 }
0x105e   : > { %v4405_v54 = vsub.f32 %v4389_v32, %v4397_v52 }
0x105f   : > { %4918 = vrot.lane.b32.xlu0 %v23788_v50, %s23220_s7 }
0x1060   : > { %v4410_v56 = vmul.f32 1.442695, %v4405_v54 }
0x1061   : > { %v4513_v58 = vpop.permute.xlu1 %4512  ;;  %v4403_v59 = vpop.xlane.xlu0 %4402 }
0x1062   : > { %22880 = vpow2.f32 %v4410_v56  ;;  %21033 = vmatpush3.msra.mxu1 %v4513_v58  ;;  %v4407_v36 = vsub.f32 %v4391_v40, %v4403_v59 }
0x1063   : > { %4916 = vrot.lane.b32.xlu0 %v23794_v6, %s23220_s7  ;;  %21042 = vmatprep.subr.mxu1 %v23216_v12 }
0x1064   : > { %v4414_v39 = vmul.f32 1.442695, %v4407_v36 }
0x1065   : > { %v4437_v60 = vpop.permute.xlu0 %4436  ;;  %v4589_v13 = vpop.permute.xlu1 %4588 }
0x1066   : > { %21028 = vmatpush3.msra.mxu0 %v4437_v60  ;;  %22882 = vpow2.f32 %v4414_v39 }
0x1067   : > { %21037 = vmatprep.subr.mxu0 %v23216_v12 }
0x1069   : > { %v4763_v1 = vpop.permute.xlu0 %4762  ;;  %v4665_v37 = vpop.permute.xlu1 %4664 }
0x106c   : > { %v22881_v61 = vpop.eup %22880 }
0x106d   : > { %v4419_v62 = vsel %vm711_vm4, %v22881_v61, 0.0  ;;  %v4841_v20 = vpop.permute.xlu1 %4840 }
0x106e   : > { %4420 = vadd.xlane.f32.xlu1 %v4419_v62 }
0x1070   : > { %v22883_v34 = vpop.eup %22882 }
0x1071   : > { %v4425_v41 = vsel %vm711_vm4, %v22883_v34, 0.0 }
0x107f   : > { %4838 = vrot.lane.b32.xlu1 %v23779_v28, %s23220_s7 }
0x10a3   : > { %4426 = vadd.xlane.f32.xlu1 %v4425_v41 }
0x10b4   : > { %4996 = vrot.lane.b32.xlu1 %v23786_v2, %s23220_s7 }
0x10b8   : > { %4994 = vrot.lane.b32.xlu1 %v23790_v5, %s23220_s7 }
0x10ce   : > { %v4418_v4 = vpop.xlane.xlu0 %4417 }
0x10cf   : > { %22884 = vrcp.f32 %v4418_v4 }
0x10d2   : > { %v4424_v7 = vpop.xlane.xlu0 %4423 }
0x10d3   : > { %22886 = vrcp.f32 %v4424_v7 }
0x10d6   : > { %v4761_v15 = vpop.permute.xlu0 %4760 }
0x10d9   : > { %v22885_v9 = vpop.eup %22884 }
0x10da   : > { %v4429_v11 = vmul.f32 %v22885_v9, %v22877_v48  ;;  %v4919_v43 = vpop.permute.xlu0 %4918 }
0x10dc   : > { %21030 = vmatmul.mubr.msk.f32.vlgmr.msra.gmra.mrb[54].mxu0 %vm711_vm4, %v4429_v11 }
0x10dd   : > { %v22887_v14 = vpop.eup %22886  ;;  %21038 = vmatpush3.msra.mxu0 %v4589_v13  ;;  %21039 = vmatprep.mubr.msk.f32.mxu0 %vm23215_vm0, %v23216_v12 }
0x10de   : > { %v4433_v17 = vmul.f32 %v22887_v14, %v22879_v49  ;;  %21047 = vmatprep.subr.mxu0 %v23216_v12  ;;  %v4917_v19 = vpop.permute.xlu0 %4916 }
0x10e0   : > { %21040 = vmatmul.mubr.msk.f32.vlgmr.msra.gmra.mrb[56].mxu0 %vm711_vm4, %v4433_v17 }
0x10e1   : > { %21049 = vmatprep.mubr.msk.f32.mxu0 %vm23215_vm0, %v23216_v12 }
0x10e4   : > { %21048 = vmatpush3.xpose.msk.msra.mxu0 %vm411_vm3, %v4763_v1 }
0x10e5   : > { %21057 = vmatprep.subr.mxu0 %v23216_v12 }
0x10e7   : > { %21050 = vmatmul.mubr.msk.f32.vlgmr.msra.gmra.mrb[58].mxu0 %vm411_vm3, %v4761_v15 }
0x10e8   : > { %21058 = vmatpush3.xpose.msk.msra.mxu0 %vm411_vm3, %v4919_v43  ;;  %21059 = vmatprep.mubr.msk.f32.mxu0 %vm23215_vm0, %v23216_v12 }
0x10e9   : > { %21067 = vmatprep.subr.mxu0 %v23216_v12 }
0x10eb   : > { %21060 = vmatmul.mubr.msk.f32.vlgmr.msra.gmra.mrb[60].mxu0 %vm411_vm3, %v4917_v19 }
0x10ec   : > { %21069 = vmatprep.mubr.msk.f32.mxu0 %vm23215_vm0, %v23216_v12 }
0x10fb   : > { %v4421_v21 = vpop.xlane.xlu1 %4420 }
0x10fc   : > { %22888 = vrcp.f32 %v4421_v21 }
0x10ff   : > { %v4839_v24 = vpop.permute.xlu1 %4838 }
0x1106   : > { %v22889_v22 = vpop.eup %22888 }
0x1107   : > { %v4431_v23 = vmul.f32 %v22889_v22, %v22881_v61 }
0x1109   : > { %21035 = vmatmul.mubr.msk.f32.vlgmr.msra.gmra.mrb[52].mxu1 %vm711_vm4, %v4431_v23 }
0x110a   : > { %21043 = vmatpush3.msra.mxu1 %v4665_v37  ;;  %21044 = vmatprep.mubr.msk.f32.mxu1 %vm23215_vm0, %v23216_v12 }
0x110b   : > { %21052 = vmatprep.subr.mxu1 %v23216_v12 }
0x1130   : > { %v4427_v25 = vpop.xlane.xlu1 %4426 }
0x1131   : > { %22890 = vrcp.f32 %v4427_v25 }
0x1134   : > { %v4997_v31 = vpop.permute.xlu1 %4996 }
0x1138   : > { %v4995_v32 = vpop.permute.xlu1 %4994 }
0x113b   : > { %v22891_v26 = vpop.eup %22890 }
0x113c   : > { %v4435_v29 = vmul.f32 %v22891_v26, %v22883_v34 }
0x113e   : > { %21045 = vmatmul.mubr.msk.f32.vlgmr.msra.gmra.mrb[54].mxu1 %vm711_vm4, %v4435_v29 }
0x113f   : > { %21053 = vmatpush3.xpose.msk.msra.mxu1 %vm411_vm3, %v4841_v20  ;;  %21054 = vmatprep.mubr.msk.f32.mxu1 %vm23215_vm0, %v23216_v12 }
0x1140   : > { %21062 = vmatprep.subr.mxu1 %v23216_v12 }
0x1142   : > { %21055 = vmatmul.mubr.msk.f32.vlgmr.msra.gmra.mrb[56].mxu1 %vm411_vm3, %v4839_v24 }
0x1143   : > { %21063 = vmatpush3.xpose.msk.msra.mxu1 %vm411_vm3, %v4997_v31  ;;  %21064 = vmatprep.mubr.msk.f32.mxu1 %vm23215_vm0, %v23216_v12 }
0x1144   : > { %21072 = vmatprep.subr.mxu1 %v23216_v12 }
0x1146   : > { %21065 = vmatmul.mubr.msk.f32.vlgmr.msra.gmra.mrb[58].mxu1 %vm411_vm3, %v4995_v32 }
0x1147   : > { %21074 = vmatprep.mubr.msk.f32.mxu1 %vm23215_vm0, %v23216_v12 }
0x11af   : > { %v23952_v33 = vpop.f32.mrb[54].mxu0 }
0x11b0   : > { %v21031_v35 = vpop.f32.mrb[55].mxu0 }
0x11b3   : > { %v23954_v38 = vpop.f32.mrb[56].mxu0 }
0x11b4   : > { %v21041_v40 = vpop.f32.mrb[57].mxu0 }
0x11ba   : > { %v4834_v42 = vpop.f32.mrb[58].mxu0 }
0x11bb   : > { %v5072_v44 = vmul.f32 0.125, %v4834_v42  ;;  %v21051_v55 = vpop.f32.mrb[59].mxu0 }
0x11bd   : > { %v5076_v57 = vsel %vm711_vm4, %v5072_v44, -inf }
0x11be   : > { %5077 = vmax.xlane.f32.xlu0 %v5076_v57  ;;  %v4990_v45 = vpop.f32.mrb[60].mxu0 }
0x11bf   : > { %v5074_v46 = vmul.f32 0.125, %v4990_v45  ;;  %v21061_v8 = vpop.f32.mrb[61].mxu0 }
0x11c1   : > { %v5082_v47 = vsel %vm711_vm4, %v5074_v46, -inf }
0x11c2   : > { %5083 = vmax.xlane.f32.xlu0 %v5082_v47 }
0x11dc   : > { %v23958_v48 = vpop.f32.mrb[52].mxu1 }
0x11dd   : > { %v21036_v10 = vpop.f32.mrb[53].mxu1 }
0x1211   : > { %v23960_v49 = vpop.f32.mrb[54].mxu1 }
0x1212   : > { %v21046_v30 = vpop.f32.mrb[55].mxu1 }
0x1215   : > { %v4912_v52 = vpop.f32.mrb[56].mxu1 }
0x1216   : > { %v5073_v54 = vmul.f32 0.125, %v4912_v52  ;;  %v21056_v56 = vpop.f32.mrb[57].mxu1 }
0x1218   : > { %v5079_v58 = vsel %vm711_vm4, %v5073_v54, -inf }
0x1219   : > { %5080 = vmax.xlane.f32.xlu1 %v5079_v58  ;;  %v5068_v59 = vpop.f32.mrb[58].mxu1 }
0x121a   : > { %v5075_v60 = vmul.f32 0.125, %v5068_v59  ;;  %v21066_v61 = vpop.f32.mrb[59].mxu1 }
0x121c   : > { %v5085_v62 = vsel %vm711_vm4, %v5075_v60, -inf }
0x121d   : > { %5086 = vmax.xlane.f32.xlu0 %v5085_v62 }
0x122a   : > { %5196 = vrot.lane.b32.xlu1 %v23771_v0, %s23221_s8 }
0x122e   : > { %5272 = vrot.lane.b32.xlu1 %v23788_v50, %s23221_s8 }
0x1232   : > { %5348 = vrot.lane.b32.xlu1 %v23786_v2, %s23221_s8 }
0x1233   : > { %5120 = vrot.lane.b32.xlu0 %v23764_v63, %s23221_s8 }
0x1236   : > { %5524 = vrot.lane.b32.xlu1 %v23771_v0, %s23222_s9 }
0x124b   : > { %v5078_v36 = vpop.xlane.xlu0 %5077 }
0x124c   : > { %v5088_v39 = vsub.f32 %v5072_v44, %v5078_v36 }
0x124e   : > { %v5092_v34 = vmul.f32 1.442695, %v5088_v39 }
0x124f   : > { %v5084_v4 = vpop.xlane.xlu0 %5083 }
0x1250   : > { %22892 = vpow2.f32 %v5092_v34  ;;  %v5090_v7 = vsub.f32 %v5074_v46, %v5084_v4 }
0x1252   : > { %v5096_v9 = vmul.f32 1.442695, %v5090_v7 }
0x1254   : > { %22894 = vpow2.f32 %v5096_v9 }
0x125a   : > { %v22893_v41 = vpop.eup %22892 }
0x125b   : > { %v5100_v1 = vsel %vm711_vm4, %v22893_v41, 0.0 }
0x125c   : > { %5101 = vadd.xlane.f32.xlu0 %v5100_v1 }
0x125e   : > { %v22895_v11 = vpop.eup %22894 }
0x125f   : > { %v5106_v13 = vsel %vm711_vm4, %v22895_v11, 0.0 }
0x1272   : > { %5446 = vrot.lane.b32.xlu0 %v23764_v63, %s23222_s9 }
0x1291   : > { %5107 = vadd.xlane.f32.xlu0 %v5106_v13 }
0x12a6   : > { %v5081_v14 = vpop.xlane.xlu1 %5080 }
0x12a7   : > { %v5089_v15 = vsub.f32 %v5073_v54, %v5081_v14  ;;  %5444 = vrot.lane.b32.xlu0 %v23766_v53, %s23222_s9 }
0x12a9   : > { %v5094_v17 = vmul.f32 1.442695, %v5089_v15 }
0x12aa   : > { %v5197_v43 = vpop.permute.xlu1 %5196  ;;  %v5087_v19 = vpop.xlane.xlu0 %5086 }
0x12ab   : > { %22896 = vpow2.f32 %v5094_v17  ;;  %5602 = vrot.lane.b32.xlu0 %v23788_v50, %s23222_s9  ;;  %21073 = vmatpush3.msra.mxu1 %v5197_v43  ;;  %v5091_v22 = vsub.f32 %v5075_v60, %v5087_v19 }
0x12ac   : > { %21082 = vmatprep.subr.mxu1 %v23216_v12 }
0x12ad   : > { %v5098_v23 = vmul.f32 1.442695, %v5091_v22 }
0x12ae   : > { %v5121_v37 = vpop.permute.xlu0 %5120  ;;  %v5273_v32 = vpop.permute.xlu1 %5272 }
0x12af   : > { %5600 = vrot.lane.b32.xlu0 %v23794_v6, %s23222_s9  ;;  %21068 = vmatpush3.msra.mxu0 %v5121_v37  ;;  %22898 = vpow2.f32 %v5098_v23 }
0x12b0   : > { %21077 = vmatprep.subr.mxu0 %v23216_v12 }
0x12b2   : > { %v5349_v46 = vpop.permute.xlu1 %5348 }
0x12b5   : > { %v22897_v20 = vpop.eup %22896 }
0x12b6   : > { %v5103_v21 = vsel %vm711_vm4, %v22897_v20, 0.0  ;;  %v5525_v8 = vpop.permute.xlu1 %5524 }
0x12b7   : > { %5104 = vadd.xlane.f32.xlu1 %v5103_v21 }
0x12b9   : > { %v22899_v24 = vpop.eup %22898 }
0x12ba   : > { %v5109_v26 = vsel %vm711_vm4, %v22899_v24, 0.0 }
0x12c8   : > { %5522 = vrot.lane.b32.xlu1 %v23779_v28, %s23222_s9 }
0x12e9   : > { %v5102_v25 = vpop.xlane.xlu0 %5101 }
0x12ea   : > { %22900 = vrcp.f32 %v5102_v25 }
0x12ec   : > { %5110 = vadd.xlane.f32.xlu1 %v5109_v26 }
0x12ed   : > { %v5447_v35 = vpop.permute.xlu0 %5446 }
0x12f4   : > { %v22901_v29 = vpop.eup %22900 }
0x12f5   : > { %v5113_v31 = vmul.f32 %v22901_v29, %v22893_v41 }
0x12f7   : > { %21070 = vmatmul.mubr.msk.f32.vlgmr.msra.gmra.mrb[62].mxu0 %vm711_vm4, %v5113_v31 }
0x12f8   : > { %21078 = vmatpush3.msra.mxu0 %v5273_v32  ;;  %21079 = vmatprep.mubr.msk.f32.mxu0 %vm23215_vm0, %v23216_v12 }
0x12f9   : > { %21087 = vmatprep.subr.mxu0 %v23216_v12 }
0x12fd   : > { %5680 = vrot.lane.b32.xlu1 %v23786_v2, %s23222_s9 }
0x1301   : > { %5678 = vrot.lane.b32.xlu1 %v23790_v5, %s23222_s9 }
0x131e   : > { %v5108_v40 = vpop.xlane.xlu0 %5107 }
0x131f   : > { %22902 = vrcp.f32 %v5108_v40 }
0x1322   : > { %v5445_v42 = vpop.permute.xlu0 %5444 }
0x1326   : > { %v5603_v57 = vpop.permute.xlu0 %5602 }
0x1329   : > { %v22903_v44 = vpop.eup %22902 }
0x132a   : > { %v5117_v55 = vmul.f32 %v22903_v44, %v22895_v11  ;;  %v5601_v45 = vpop.permute.xlu0 %5600 }
0x132c   : > { %21080 = vmatmul.mubr.msk.f32.vlgmr.msra.gmra.mrb[64].mxu0 %vm711_vm4, %v5117_v55 }
0x132d   : > { %21088 = vmatpush3.xpose.msk.msra.mxu0 %vm411_vm3, %v5447_v35  ;;  %21089 = vmatprep.mubr.msk.f32.mxu0 %vm23215_vm0, %v23216_v12 }
0x132e   : > { %21097 = vmatprep.subr.mxu0 %v23216_v12 }
0x1330   : > { %21090 = vmatmul.mubr.msk.f32.vlgmr.msra.gmra.mrb[66].mxu0 %vm411_vm3, %v5445_v42 }
0x1331   : > { %21098 = vmatpush3.xpose.msk.msra.mxu0 %vm411_vm3, %v5603_v57  ;;  %21099 = vmatprep.mubr.msk.f32.mxu0 %vm23215_vm0, %v23216_v12 }
0x1332   : > { %21107 = vmatprep.subr.mxu0 %v23216_v12 }
0x1334   : > { %21100 = vmatmul.mubr.msk.f32.vlgmr.msra.gmra.mrb[68].mxu0 %vm411_vm3, %v5601_v45 }
0x1335   : > { %21109 = vmatprep.mubr.msk.f32.mxu0 %vm23215_vm0, %v23216_v12 }
0x1344   : > { %v5105_v47 = vpop.xlane.xlu1 %5104 }
0x1345   : > { %22904 = vrcp.f32 %v5105_v47 }
0x1348   : > { %v5523_v52 = vpop.permute.xlu1 %5522 }
0x134f   : > { %v22905_v10 = vpop.eup %22904 }
0x1350   : > { %v5115_v30 = vmul.f32 %v22905_v10, %v22897_v20 }
0x1352   : > { %21075 = vmatmul.mubr.msk.f32.vlgmr.msra.gmra.mrb[60].mxu1 %vm711_vm4, %v5115_v30 }
0x1353   : > { %21083 = vmatpush3.msra.mxu1 %v5349_v46  ;;  %21084 = vmatprep.mubr.msk.f32.mxu1 %vm23215_vm0, %v23216_v12 }
0x1354   : > { %21092 = vmatprep.subr.mxu1 %v23216_v12 }
0x1379   : > { %v5111_v54 = vpop.xlane.xlu1 %5110 }
0x137a   : > { %22906 = vrcp.f32 %v5111_v54 }
0x137d   : > { %v5681_v59 = vpop.permute.xlu1 %5680 }
0x1381   : > { %v5679_v60 = vpop.permute.xlu1 %5678 }
0x1384   : > { %v22907_v56 = vpop.eup %22906 }
0x1385   : > { %v5119_v58 = vmul.f32 %v22907_v56, %v22899_v24 }
0x1387   : > { %21085 = vmatmul.mubr.msk.f32.vlgmr.msra.gmra.mrb[62].mxu1 %vm711_vm4, %v5119_v58 }
0x1388   : > { %21093 = vmatpush3.xpose.msk.msra.mxu1 %vm411_vm3, %v5525_v8  ;;  %21094 = vmatprep.mubr.msk.f32.mxu1 %vm23215_vm0, %v23216_v12 }
0x1389   : > { %21102 = vmatprep.subr.mxu1 %v23216_v12 }
0x138b   : > { %21095 = vmatmul.mubr.msk.f32.vlgmr.msra.gmra.mrb[64].mxu1 %vm411_vm3, %v5523_v52 }
0x138c   : > { %21103 = vmatpush3.xpose.msk.msra.mxu1 %vm411_vm3, %v5681_v59  ;;  %21104 = vmatprep.mubr.msk.f32.mxu1 %vm23215_vm0, %v23216_v12 }
0x138d   : > { %21112 = vmatprep.subr.mxu1 %v23216_v12 }
0x138f   : > { %21105 = vmatmul.mubr.msk.f32.vlgmr.msra.gmra.mrb[66].mxu1 %vm411_vm3, %v5679_v60 }
0x1390   : > { %21114 = vmatprep.mubr.msk.f32.mxu1 %vm23215_vm0, %v23216_v12 }
0x13ca   : > { %v5192_v61 = vpop.f32.mrb[62].mxu0 }
0x13cb   : > { %v21071_v62 = vpop.f32.mrb[63].mxu0 }
0x13ff   : > { %v24028_v36 = vpop.f32.mrb[64].mxu0 }
0x1400   : > { %v21081_v39 = vpop.f32.mrb[65].mxu0 }
0x1403   : > { %v5518_v34 = vpop.f32.mrb[66].mxu0 }
0x1404   : > { %v5756_v41 = vmul.f32 0.125, %v5518_v34  ;;  %v21091_v1 = vpop.f32.mrb[67].mxu0 }
0x1406   : > { %v5760_v4 = vsel %vm711_vm4, %v5756_v41, -inf }
0x1407   : > { %5761 = vmax.xlane.f32.xlu0 %v5760_v4  ;;  %v5674_v7 = vpop.f32.mrb[68].mxu0 }
0x1408   : > { %v5758_v9 = vmul.f32 0.125, %v5674_v7  ;;  %v21101_v11 = vpop.f32.mrb[69].mxu0 }
0x140a   : > { %v5766_v13 = vsel %vm711_vm4, %v5758_v9, -inf }
0x140b   : > { %5767 = vmax.xlane.f32.xlu0 %v5766_v13  ;;  %v3208_v13 = vld [vmem:[%s26230_s2 + $0x1a8] sm:$0xff] }
0x1425   : > { %v5268_v14 = vpop.f32.mrb[60].mxu1 }
0x1426   : > { %v21076_v15 = vpop.f32.mrb[61].mxu1 }
0x1427   : > { %v3210_v15 = vld [vmem:[%s26230_s2 + $0x1b8] sm:$0xff] }
0x145a   : > { %v24032_v17 = vpop.f32.mrb[62].mxu1 }
0x145b   : > { %v21086_v43 = vpop.f32.mrb[63].mxu1 }
0x145e   : > { %v5596_v19 = vpop.f32.mrb[64].mxu1 }
0x145f   : > { %v5757_v37 = vmul.f32 0.125, %v5596_v19  ;;  %v21096_v20 = vpop.f32.mrb[65].mxu1 }
0x1461   : > { %v5763_v21 = vsel %vm711_vm4, %v5757_v37, -inf }
0x1462   : > { %5764 = vmax.xlane.f32.xlu1 %v5763_v21  ;;  %v5752_v22 = vpop.f32.mrb[66].mxu1  ;;  %v3214_v21 = vld [vmem:[%s26230_s2 + $0x1d8] sm:$0xff] }
0x1463   : > { %v5759_v23 = vmul.f32 0.125, %v5752_v22  ;;  %v21106_v24 = vpop.f32.mrb[67].mxu1  ;;  %v3215_v22 = vld [vmem:[%s26230_s2 + $0x1e0] sm:$0xff] }
0x1465   : > { %v5769_v25 = vsel %vm711_vm4, %v5759_v23, -inf }
0x1466   : > { %5770 = vmax.xlane.f32.xlu0 %v5769_v25 }
0x1494   : > { %v5762_v26 = vpop.xlane.xlu0 %5761 }
0x1495   : > { %v5772_v29 = vsub.f32 %v5756_v41, %v5762_v26 }
0x1497   : > { %v5776_v31 = vmul.f32 1.442695, %v5772_v29 }
0x1498   : > { %v5768_v32 = vpop.xlane.xlu0 %5767 }
0x1499   : > { %22908 = vpow2.f32 %v5776_v31  ;;  %v5774_v35 = vsub.f32 %v5758_v9, %v5768_v32  ;;  %v23201_v31 = vld [vmem:[%s26231_s3 + $0x1] ss:$0 sm:$0xff] }
0x149b   : > { %v5780_v40 = vmul.f32 1.442695, %v5774_v35 }
0x149d   : > { %22910 = vpow2.f32 %v5780_v40 }
0x14a3   : > { %v22909_v42 = vpop.eup %22908 }
0x14a4   : > { %v5784_v44 = vsel %vm711_vm4, %v22909_v42, 0.0 }
0x14a5   : > { %5785 = vadd.xlane.f32.xlu0 %v5784_v44  ;;  %v4072_v44 = vadd.f32 %v23876_v16, %v23766_v53  ;;  %v6266_v16 = vld [vmem:[%s26229_s1 + $0x70] sm:$0xff] }
0x14a7   : > { %v22911_v55 = vpop.eup %22910 }
0x14a8   : > { %v5790_v57 = vsel %vm711_vm4, %v22911_v55, 0.0 }
0x14a9   : > { %5791 = vadd.xlane.f32.xlu0 %v5790_v57 }
0x14bf   : > { %5804 = vrot.lane.b32.xlu0 %v23764_v63, %s23223_s10 }
0x14c3   : > { %4744 = vrot.lane.b32.xlu0 %v23952_v33, %s23223_s10 }
0x14c7   : > { %5428 = vrot.lane.b32.xlu0 %v5192_v61, %s23221_s8 }
0x14ef   : > { %v5765_v45 = vpop.xlane.xlu1 %5764 }
0x14f0   : > { %v5773_v46 = vsub.f32 %v5757_v37, %v5765_v45  ;;  %v3213_v37 = vld [vmem:[%s26230_s2 + $0x1d0] sm:$0xff] }
0x14f2   : > { %v5778_v8 = vmul.f32 1.442695, %v5773_v46 }
0x14f3   : > { %v5771_v63 = vpop.xlane.xlu0 %5770 }
0x14f4   : > { %22912 = vpow2.f32 %v5778_v8  ;;  %v5775_v30 = vsub.f32 %v5759_v23, %v5771_v63  ;;  %v22411_v23 = vpack.c.bf16 %v3215_v22, %v3214_v21  ;;  %v6252_v22 = vld [vmem:[%s26230_s2 + $0x80] sm:$0xff] }
0x14f6   : > { %v5782_v52 = vmul.f32 1.442695, %v5775_v30 }
0x14f8   : > { %22914 = vpow2.f32 %v5782_v52 }
0x14fe   : > { %v22913_v47 = vpop.eup %22912 }
0x14ff   : > { %v5787_v10 = vsel %vm711_vm4, %v22913_v47, 0.0 }
0x1500   : > { %5788 = vadd.xlane.f32.xlu1 %v5787_v10 }
0x1502   : > { %v22915_v54 = vpop.eup %22914 }
0x1503   : > { %v5793_v58 = vsel %vm711_vm4, %v22915_v54, 0.0 }
0x1511   : > { %5880 = vrot.lane.b32.xlu1 %v23771_v0, %s23223_s10 }
0x1515   : > { %5956 = vrot.lane.b32.xlu1 %v23788_v50, %s23223_s10 }
0x1532   : > { %v5786_v33 = vpop.xlane.xlu0 %5785 }
0x1533   : > { %22916 = vrcp.f32 %v5786_v33 }
0x1536   : > { %v5792_v56 = vpop.xlane.xlu0 %5791 }
0x1537   : > { %22918 = vrcp.f32 %v5792_v56 }
0x1539   : > { %5794 = vadd.xlane.f32.xlu1 %v5793_v58 }
0x153a   : > { %v5805_v59 = vpop.permute.xlu0 %5804 }
0x153b   : > { %21108 = vmatpush3.msra.mxu0 %v5805_v59 }
0x153c   : > { %21117 = vmatprep.subr.mxu0 %v23216_v12 }
0x153d   : > { %v22917_v60 = vpop.eup %22916 }
0x153e   : > { %v5797_v0 = vmul.f32 %v22917_v60, %v22909_v42  ;;  %v4745_v32 = vpop.permute.xlu0 %4744 }
0x153f   : > { %v4756_v40 = vadd.f32 %v4745_v32, %v23766_v53 }
0x1540   : > { %21110 = vmatmul.mubr.msk.f32.vlgmr.msra.gmra.mrb[70].mxu0 %vm711_vm4, %v5797_v0 }
0x1541   : > { %21119 = vmatprep.mubr.msk.f32.mxu0 %vm23215_vm0, %v23216_v12  ;;  %v22919_v62 = vpop.eup %22918  ;;  %v6128_v57 = vsel %vm411_vm3, %v4072_v44, %v4756_v40  ;;  %v6256_v40 = vld [vmem:[%s26230_s2 + $0xa0] sm:$0xff]  ;;  %v206_v44 = vld [vmem:[%s26230_s2 + $0x2f0] sm:$0xff] }
0x1542   : > { %v5801_v34 = vmul.f32 %v22919_v62, %v22911_v55  ;;  %v5429_v35 = vpop.permute.xlu0 %5428  ;;  %v4073_v62 = vadd.f32 %v23878_v51, %v23779_v28 }
0x1543   : > { %v5440_v42 = vadd.f32 %v5429_v35, %v23766_v53  ;;  %v6255_v35 = vld [vmem:[%s26230_s2 + $0x98] sm:$0xff] }
0x1545   : > { %v6132_v46 = vsel %vm3084_vm5, %v6128_v57, %v5440_v42  ;;  %v22441_v42 = vpack.c.bf16 %v6256_v40, %v6255_v35 }
0x154a   : > { %6032 = vrot.lane.b32.xlu1 %v23786_v2, %s23223_s10 }
0x154e   : > { %4746 = vrot.lane.b32.xlu1 %v23958_v48, %s23223_s10 }
0x1552   : > { %5430 = vrot.lane.b32.xlu1 %v5268_v14, %s23221_s8  ;;  %v3209_v14 = vld [vmem:[%s26230_s2 + $0x1b0] sm:$0xff] }
0x1553   : > { %v22399_v43 = vpack.c.bf16 %v3209_v14, %v3208_v13 }
0x158d   : > { %v5789_v50 = vpop.xlane.xlu1 %5788 }
0x158e   : > { %22920 = vrcp.f32 %v5789_v50  ;;  %v6249_v50 = vld [vmem:[%s26230_s2 + $0x68] sm:$0xff] }
0x1591   : > { %v5881_v61 = vpop.permute.xlu1 %5880 }
0x1592   : > { %21113 = vmatpush3.msra.mxu1 %v5881_v61  ;;  %v6250_v61 = vld [vmem:[%s26230_s2 + $0x70] sm:$0xff] }
0x1593   : > { %21122 = vmatprep.subr.mxu1 %v23216_v12 }
0x1595   : > { %v5957_v39 = vpop.permute.xlu1 %5956 }
0x1596   : > { %21118 = vmatpush3.msra.mxu0 %v5957_v39 }
0x1597   : > { %21120 = vmatmul.mubr.msk.f32.vlgmr.msra.gmra.mrb[72].mxu0 %vm711_vm4, %v5801_v34  ;;  %22400 = vmatprep.subr.bf16.mxu0 %v22399_v43  ;;  %v4074_v34 = vadd.f32 %v23880_v18, %v23794_v6 }
0x1598   : > { %v22921_v41 = vpop.eup %22920  ;;  %22402 = vmatpush3.bf16.msra.mxu0 %v22399_v43 }
0x1599   : > { %v5799_v2 = vmul.f32 %v22921_v41, %v22913_v47  ;;  %v6268_v47 = vld [vmem:[%s26229_s1 + $0x80] sm:$0xff] }
0x159b   : > { %21115 = vmatmul.mubr.msk.f32.vlgmr.msra.gmra.mrb[68].mxu1 %vm711_vm4, %v5799_v2 }
0x159c   : > { %21124 = vmatprep.mubr.msk.f32.mxu1 %vm23215_vm0, %v23216_v12 }
0x15c6   : > { %v5795_v48 = vpop.xlane.xlu1 %5794 }
0x15c7   : > { %22922 = vrcp.f32 %v5795_v48 }
0x15ca   : > { %v6033_v1 = vpop.permute.xlu1 %6032 }
0x15cb   : > { %21123 = vmatpush3.msra.mxu1 %v6033_v1 }
0x15ce   : > { %v4747_v33 = vpop.permute.xlu1 %4746 }
0x15cf   : > { %v4757_v58 = vadd.f32 %v4747_v33, %v23779_v28 }
0x15d1   : > { %v22923_v4 = vpop.eup %22922  ;;  %v6129_v48 = vsel %vm411_vm3, %v4073_v62, %v4757_v58 }
0x15d2   : > { %v5803_v7 = vmul.f32 %v22923_v4, %v22915_v54  ;;  %v5431_v56 = vpop.permute.xlu1 %5430  ;;  %v22432_v4 = vpack.c.bf16 %v6250_v61, %v6249_v50  ;;  %v19735_v50 = vld [vmem:[%s26231_s3 + $0x2] ss:$0 sm:$0xff] }
0x15d3   : > { %v5441_v60 = vadd.f32 %v5431_v56, %v23779_v28 }
0x15d4   : > { %21125 = vmatmul.mubr.msk.f32.vlgmr.msra.gmra.mrb[70].mxu1 %vm711_vm4, %v5803_v7 }
0x15d5   : > { %v6133_v7 = vsel %vm3084_vm5, %v6129_v48, %v5441_v60  ;;  %v19730_v60 = vld [vmem:[%s26231_s3 + $0x8] ss:$0 sm:$0xff] }
0x1613   : > { %v5876_v9 = vpop.f32.mrb[70].mxu0 }
0x1614   : > { %6112 = vrot.lane.b32.xlu0 %v5876_v9, %s23219_s6  ;;  %v21111_v11 = vpop.f32.mrb[71].mxu0 }
0x1618   : > { %4748 = vrot.lane.b32.xlu0 %v23954_v38, %s23223_s10  ;;  %v3211_v38 = vld [vmem:[%s26230_s2 + $0x1c0] sm:$0xff] }
0x1619   : > { %v22403_v19 = vpack.c.bf16 %v3211_v38, %v3210_v15  ;;  %v4075_v15 = vadd.f32 %v23884_v27, %v23790_v5  ;;  %v6270_v27 = vld [vmem:[%s26229_s1 + $0x90] sm:$0xff] }
0x161b   : > { %22404 = vmatprep.subr.bf16.mxu0 %v22403_v19 }
0x161c   : > { %5432 = vrot.lane.b32.xlu0 %v24028_v36, %s23221_s8  ;;  %v3212_v36 = vld [vmem:[%s26230_s2 + $0x1c8] sm:$0xff]  ;;  %22406 = vmatpush3.bf16.msra.mxu0 %v22403_v19 }
0x161d   : > { %v22407_v20 = vpack.c.bf16 %v3213_v37, %v3212_v36 }
0x161f   : > { %22408 = vmatprep.subr.bf16.mxu0 %v22407_v20 }
0x1620   : > { %22410 = vmatpush3.bf16.msra.mxu0 %v22407_v20  ;;  %v6269_v20 = vld [vmem:[%s26229_s1 + $0x88] sm:$0xff] }
0x1621   : > { %22412 = vmatprep.subr.bf16.mxu0 %v22411_v23  ;;  %v22423_v21 = vpack.c.bf16 %v6270_v27, %v6269_v20 }
0x1624   : > { %22414 = vmatpush3.bf16.msra.mxu0 %v22411_v23 }
0x1625   : > { %22431 = vmatprep.subr.bf16.mxu0 %v23214_v3 }
0x166a   : > { %v6028_v24 = vpop.f32.mrb[72].mxu0 }
0x166b   : > { %6116 = vrot.lane.b32.xlu0 %v6028_v24, %s23219_s6  ;;  %v21121_v25 = vpop.f32.mrb[73].mxu0  ;;  %v6271_v24 = vld [vmem:[%s26229_s1 + $0x98] sm:$0xff] }
0x166c   : > { %v6272_v25 = vld [vmem:[%s26229_s1 + $0xa0] sm:$0xff] }
0x166e   : > { %v5952_v26 = vpop.f32.mrb[68].mxu1 }
0x166f   : > { %6114 = vrot.lane.b32.xlu1 %v5952_v26, %s23219_s6  ;;  %v21116_v29 = vpop.f32.mrb[69].mxu1  ;;  %6141 = vrot.lane.b32.xlu0 %v23201_v31, %s23217_s30  ;;  %v6253_v26 = vld [vmem:[%s26230_s2 + $0x88] sm:$0xff]  ;;  %v6254_v31 = vld [vmem:[%s26230_s2 + $0x90] sm:$0xff] }
0x1670   : > { %v22427_v29 = vpack.c.bf16 %v6272_v25, %v6271_v24  ;;  %v22438_v32 = vpack.c.bf16 %v6254_v31, %v6253_v26 }
0x1673   : > { %4750 = vrot.lane.b32.xlu1 %v23960_v49, %s23223_s10 }
0x1677   : > { %5434 = vrot.lane.b32.xlu1 %v24032_v17, %s23221_s8  ;;  %v6265_v17 = vld [vmem:[%s26229_s1 + $0x68] sm:$0xff] }
0x1678   : > { %v22415_v8 = vpack.c.bf16 %v6266_v16, %v6265_v17 }
0x167a   : > { %22416 = vmatprep.subr.bf16.mxu1 %v22415_v8 }
0x167b   : > { %22418 = vmatpush3.bf16.msra.mxu1 %v22415_v8 }
0x1686   : > { %v6113_v55 = vpop.permute.xlu0 %6112 }
0x1687   : > { %v6124_v45 = vadd.f32 %v6113_v55, %v23766_v53  ;;  %v6267_v53 = vld [vmem:[%s26229_s1 + $0x78] sm:$0xff] }
0x1688   : > { %v22419_v10 = vpack.c.bf16 %v6268_v47, %v6267_v53 }
0x1689   : > { %v24112_v49 = vsel %vm3089_vm6, %v6132_v46, %v6124_v45 }
0x168a   : > { %21143 = vmatprep.mubr.msk.f32.mxu0 %vm337_vm2, %v24112_v49  ;;  %22420 = vmatprep.subr.bf16.mxu1 %v22419_v10  ;;  %v4749_v52 = vpop.permute.xlu0 %4748 }
0x168b   : > { %22422 = vmatpush3.bf16.msra.mxu1 %v22419_v10  ;;  %v4758_v0 = vadd.f32 %v4749_v52, %v23794_v6 }
0x168c   : > { %22424 = vmatprep.subr.bf16.mxu1 %v22423_v21 }
0x168d   : > { %v6130_v9 = vsel %vm411_vm3, %v4074_v34, %v4758_v0 }
0x168e   : > { %v5433_v54 = vpop.permute.xlu0 %5432 }
0x168f   : > { %v5442_v39 = vadd.f32 %v5433_v54, %v23794_v6  ;;  %22426 = vmatpush3.bf16.msra.mxu1 %v22423_v21 }
0x1690   : > { %22428 = vmatprep.subr.bf16.mxu1 %v22427_v29 }
0x1691   : > { %v6134_v51 = vsel %vm3084_vm5, %v6130_v9, %v5442_v39 }
0x1693   : > { %22430 = vmatpush3.bf16.msra.mxu1 %v22427_v29 }
0x1694   : > { %21190 = vmatprep.subr.mxu1 %v23216_v12 }
0x16a7   : > { %v6104_v63 = vpop.f32.mrb[70].mxu1 }
0x16a8   : > { %6118 = vrot.lane.b32.xlu1 %v6104_v63, %s23219_s6  ;;  %v21126_v30 = vpop.f32.mrb[71].mxu1 }
0x16dd   : > { %v6117_v59 = vpop.permute.xlu0 %6116 }
0x16de   : > { %v6126_v41 = vadd.f32 %v6117_v59, %v23794_v6 }
0x16e0   : > { %v6138_v18 = vsel %vm3089_vm6, %v6134_v51, %v6126_v41 }
0x16e1   : > { %v6115_v2 = vpop.permute.xlu1 %6114  ;;  %v6142_v55 = vpop.permute.xlu0 %6141 }
0x16e2   : > { %v6125_v1 = vadd.f32 %v6115_v2, %v23779_v28 }
0x16e4   : > { %v6137_v11 = vsel %vm3089_vm6, %v6133_v7, %v6125_v1 }
0x16e5   : > { %21144 = vmatmul.mubr.msk.f32.vlgmr.msra.gmra.mrb[74].mxu0 %vm337_vm2, %v6137_v11  ;;  %v4751_v6 = vpop.permute.xlu1 %4750 }
0x16e6   : > { %21146 = vmatprep.mubr.msk.f32.mxu0 %vm337_vm2, %v6138_v18  ;;  %22433 = vmatpush3.bf16.msra.mxu0 %v22432_v4  ;;  %v4759_v13 = vadd.f32 %v4751_v6, %v23790_v5 }
0x16e7   : > { %22434 = vmatprep.subr.bf16.mxu0 %v23214_v3 }
0x16e8   : > { %v6131_v38 = vsel %vm411_vm3, %v4075_v15, %v4759_v13 }
0x16e9   : > { %v5435_v28 = vpop.permute.xlu1 %5434 }
0x16ea   : > { %v5443_v14 = vadd.f32 %v5435_v28, %v23790_v5 }
0x16ec   : > { %v6135_v36 = vsel %vm3084_vm5, %v6131_v38, %v5443_v14 }
0x171a   : > { %v6119_v43 = vpop.permute.xlu1 %6118 }
0x171b   : > { %v6127_v19 = vadd.f32 %v6119_v43, %v23790_v5  ;;  %v6251_v5 = vld [vmem:[%s26230_s2 + $0x78] sm:$0xff] }
0x171c   : > { %v22435_v23 = vpack.c.bf16 %v6252_v22, %v6251_v5 }
0x171d   : > { %v6139_v37 = vsel %vm3089_vm6, %v6135_v36, %v6127_v19 }
0x171e   : > { %21147 = vmatmul.mubr.msk.f32.gmra.mrb[76].mxu0 %vm337_vm2, %v6139_v37 }
0x171f   : > { %21187 = vmatprep.mubr.msk.f32.mxu0 %vm23215_vm0, %v23216_v12  ;;  %22436 = vmatpush3.bf16.msra.mxu0 %v22435_v23 }
0x1720   : > { %22437 = vmatprep.subr.bf16.mxu0 %v23214_v3 }
0x1723   : > { %22439 = vmatpush3.bf16.msra.mxu0 %v22438_v32 }
0x1724   : > { %22440 = vmatprep.subr.bf16.mxu0 %v23214_v3 }
0x1727   : > { %22442 = vmatpush3.bf16.msra.mxu0 %v22441_v42 }
0x1728   : > { %21205 = vmatprep.subr.mxu0 %v23216_v12 }
0x172a   : > { %21188 = vmatmul.mubr.msk.f32.vlgmr.msra.gmra.mrb[78].mxu0 %vm337_vm2, %v206_v44 }
0x172b   : > { %21207 = vmatprep.mubr.msk.f32.mxu0 %vm23215_vm0, %v23216_v12 }
0x17b8   : > { %v21145_v57 = vpop.f32.mrb[74].mxu0 }
0x17b9   : > { %v6228_v45 = vadd.f32 %v21145_v57, %v6142_v55  ;;  %v6222_v46 = vpop.f32.mrb[75].mxu0 }
0x17ba   : > { %v6223_v17 = vadd.f32 %v6222_v46, %v6142_v55 }
0x17bb   : > { %v6242_v16 = vmax.f32 %v6228_v45, 0.0 }
0x17bc   : > { %v6241_v53 = vmax.f32 %v6223_v17, 0.0 }
0x17bd   : > { %v24208_v47 = vadd.f32 %v6242_v16, %v6137_v11 }
0x17be   : > { %v24206_v8 = vadd.f32 %v6241_v53, %v24112_v49 }
0x17c0   : > { %21165 = vmatprep.mubr.msk.f32.mxu1 %vm337_vm2, %v24206_v8 }
0x17c1   : > { %21166 = vmatmul.mubr.msk.f32.vlgmr.msra.gmra.mrb[72].mxu1 %vm337_vm2, %v24208_v47 }
0x17f1   : > { %v21148_v10 = vpop.f32.mrb[76].mxu0 }
0x17f2   : > { %v6238_v63 = vadd.f32 %v21148_v10, %v6142_v55  ;;  %v6232_v30 = vpop.f32.mrb[77].mxu0 }
0x17f3   : > { %v6233_v52 = vadd.f32 %v6232_v30, %v6142_v55 }
0x17f4   : > { %v6244_v33 = vmax.f32 %v6238_v63, 0.0 }
0x17f5   : > { %v6243_v54 = vmax.f32 %v6233_v52, 0.0 }
0x17f6   : > { %v24216_v58 = vadd.f32 %v6244_v33, %v6139_v37 }
0x17f7   : > { %v24214_v56 = vadd.f32 %v6243_v54, %v6138_v18 }
0x17f9   : > { %21168 = vmatprep.mubr.msk.f32.mxu1 %vm337_vm2, %v24214_v56 }
0x17fa   : > { %21169 = vmatmul.mubr.msk.f32.gmra.mrb[74].mxu1 %vm337_vm2, %v24216_v58 }
0x17fb   : > { %21192 = vmatprep.mubr.msk.f32.mxu1 %vm23215_vm0, %v23216_v12 }
0x17fd   : > { %v6449_v49 = vpop.f32.mrb[78].mxu0 }
0x17fe   : > { %v21189_v59 = vpop.f32.mrb[79].mxu0  ;;  %v24232_v39 = vadd.f32 %v19735_v50, %v6449_v49 }
0x1894   : > { %v21167_v0 = vpop.f32.mrb[72].mxu1 }
0x1895   : > { %v6357_v61 = vpop.f32.mrb[73].mxu1  ;;  %v24237_v34 = vadd.f32 %v21167_v0, %v19730_v60 }
0x1896   : > { %v24230_v62 = vadd.f32 %v19730_v60, %v6357_v61 }
0x1898   : > { %21191 = vmatpush3.xpose.msk.msra.mxu1 %vm411_vm3, %v24230_v62 }
0x1899   : > { %21195 = vmatprep.subr.mxu1 %v23216_v12 }
0x189b   : > { %21193 = vmatmul.mubr.msk.f32.vlgmr.msra.gmra.mrb[76].mxu1 %vm411_vm3, %v24232_v39 }
0x189c   : > { %21196 = vmatpush3.xpose.msk.msra.mxu1 %vm411_vm3, %v24237_v34  ;;  %21197 = vmatprep.mubr.msk.f32.mxu1 %vm23215_vm0, %v23216_v12 }
0x189d   : > { %21200 = vmatprep.subr.mxu1 %v23216_v12 }
0x189f   : > { %21198 = vmatmul.mubr.msk.f32.vlgmr.msra.gmra.mrb[78].mxu1 %vm411_vm3, %v24232_v39 }
0x18a0   : > { %21202 = vmatprep.mubr.msk.f32.mxu1 %vm23215_vm0, %v23216_v12 }
0x18cd   : > { %v21170_v41 = vpop.f32.mrb[74].mxu1 }
0x18ce   : > { %v24250_v2 = vadd.f32 %v21170_v41, %v19730_v60  ;;  %v6367_v48 = vpop.f32.mrb[75].mxu1 }
0x18cf   : > { %v24252_v1 = vadd.f32 %v19730_v60, %v6367_v48 }
0x18d0   : > { %21206 = vmatpush3.xpose.msk.msra.mxu0 %vm411_vm3, %v24250_v2 }
0x18d1   : > { %21201 = vmatpush3.xpose.msk.msra.mxu1 %vm411_vm3, %v24252_v1  ;;  %21215 = vmatprep.subr.mxu0 %v23216_v12 }
0x18d2   : > { %21210 = vmatprep.subr.mxu1 %v23216_v12 }
0x18d3   : > { %21208 = vmatmul.mubr.msk.f32.vlgmr.msra.gmra.mrb[80].mxu0 %vm411_vm3, %v24232_v39 }
0x18d4   : > { %21203 = vmatmul.mubr.msk.f32.vlgmr.msra.gmra.mrb[80].mxu1 %vm411_vm3, %v24232_v39  ;;  %21217 = vmatprep.mubr.msk.f32.mxu0 %vm23215_vm0, %v23216_v12 }
0x18d5   : > { %21212 = vmatprep.mubr.msk.f32.mxu1 %vm23215_vm0, %v23216_v12 }
0x196e   : > { %v6525_v4 = vpop.f32.mrb[76].mxu1 }
0x196f   : > { %v6748_v7 = vmul.f32 0.125, %v6525_v4  ;;  %v21194_v9 = vpop.f32.mrb[77].mxu1 }
0x1971   : > { %v6752_v11 = vsel %vm711_vm4, %v6748_v7, -inf }
0x1972   : > { %6753 = vmax.xlane.f32.xlu1 %v6752_v11  ;;  %v6598_v51 = vpop.f32.mrb[78].mxu1 }
0x1973   : > { %v6749_v18 = vmul.f32 0.125, %v6598_v51  ;;  %v21199_v6 = vpop.f32.mrb[79].mxu1 }
0x1975   : > { %v6755_v28 = vsel %vm711_vm4, %v6749_v18, -inf }
0x1976   : > { %6756 = vmax.xlane.f32.xlu0 %v6755_v28 }
0x1983   : > { %6796 = vrot.lane.b32.xlu1 %v24230_v62, %s23217_s30 }
0x19a6   : > { %v6744_v13 = vpop.f32.mrb[80].mxu0 }
0x19a7   : > { %v6671_v14 = vpop.f32.mrb[80].mxu1  ;;  %v21209_v15 = vpop.f32.mrb[81].mxu0  ;;  %v6751_v19 = vmul.f32 0.125, %v6744_v13 }
0x19a8   : > { %v6750_v43 = vmul.f32 0.125, %v6671_v14  ;;  %v21204_v38 = vpop.f32.mrb[81].mxu1 }
0x19a9   : > { %v6761_v37 = vsel %vm711_vm4, %v6751_v19, -inf }
0x19aa   : > { %v6758_v36 = vsel %vm711_vm4, %v6750_v43, -inf }
0x19ab   : > { %6759 = vmax.xlane.f32.xlu0 %v6758_v36 }
0x19af   : > { %6762 = vmax.xlane.f32.xlu0 %v6761_v37 }
0x19ff   : > { %v6754_v20 = vpop.xlane.xlu1 %6753 }
0x1a00   : > { %v6764_v27 = vsub.f32 %v6748_v7, %v6754_v20 }
0x1a02   : > { %v6768_v5 = vmul.f32 1.442695, %v6764_v27 }
0x1a03   : > { %v6797_v21 = vpop.permute.xlu1 %6796  ;;  %v6757_v24 = vpop.xlane.xlu0 %6756 }
0x1a04   : > { %22924 = vpow2.f32 %v6768_v5  ;;  %21211 = vmatpush3.msra.mxu1 %v6797_v21  ;;  %v6765_v26 = vsub.f32 %v6749_v18, %v6757_v24 }
0x1a05   : > { %21220 = vmatprep.subr.mxu1 %v23216_v12 }
0x1a06   : > { %v6770_v35 = vmul.f32 1.442695, %v6765_v26 }
0x1a0e   : > { %v22925_v22 = vpop.eup %22924 }
0x1a0f   : > { %v6776_v23 = vsel %vm711_vm4, %v22925_v22, 0.0 }
0x1a10   : > { %6777 = vadd.xlane.f32.xlu1 %v6776_v23 }
0x1a21   : > { %6948 = vrot.lane.b32.xlu1 %v24252_v1, %s23217_s30 }
0x1a25   : > { %7024 = vrot.lane.b32.xlu1 %v24250_v2, %s23217_s30 }
0x1a29   : > { %7106 = vrot.lane.b32.xlu1 %v24230_v62, %s23218_s5 }
0x1a2d   : > { %7104 = vrot.lane.b32.xlu1 %v24232_v39, %s23218_s5 }
0x1a38   : > { %v6760_v25 = vpop.xlane.xlu0 %6759 }
0x1a39   : > { %v6766_v29 = vsub.f32 %v6750_v43, %v6760_v25 }
0x1a3b   : > { %v6772_v40 = vmul.f32 1.442695, %v6766_v29 }
0x1a3c   : > { %v6763_v31 = vpop.xlane.xlu0 %6762 }
0x1a3d   : > { %v6767_v32 = vsub.f32 %v6751_v19, %v6763_v31 }
0x1a3f   : > { %v6774_v42 = vmul.f32 1.442695, %v6767_v32 }
0x1a41   : > { %22926 = vpow2.f32 %v6774_v42 }
0x1a42   : > { %22928 = vpow2.f32 %v6770_v35 }
0x1a43   : > { %22930 = vpow2.f32 %v6772_v40 }
0x1a4b   : > { %v22927_v44 = vpop.eup %22926 }
0x1a4c   : > { %v22929_v55 = vpop.eup %22928  ;;  %v6785_v57 = vsel %vm711_vm4, %v22927_v44, 0.0 }
0x1a4d   : > { %v22931_v45 = vpop.eup %22930  ;;  %6786 = vadd.xlane.f32.xlu0 %v6785_v57  ;;  %v6779_v17 = vsel %vm711_vm4, %v22929_v55, 0.0 }
0x1a4e   : > { %v6782_v46 = vsel %vm711_vm4, %v22931_v45, 0.0 }
0x1a51   : > { %6783 = vadd.xlane.f32.xlu1 %v6782_v46  ;;  %6780 = vadd.xlane.f32.xlu0 %v6779_v17 }
0x1a62   : > { %7330 = vrot.lane.b32.xlu1 %v24250_v2, %s23218_s5 }
0x1a67   : > { %6872 = vrot.lane.b32.xlu0 %v24237_v34, %s23217_s30 }
0x1a6b   : > { %7182 = vrot.lane.b32.xlu0 %v24237_v34, %s23218_s5 }
0x1a6f   : > { %7256 = vrot.lane.b32.xlu0 %v24252_v1, %s23218_s5 }
0x1a9d   : > { %v6778_v16 = vpop.xlane.xlu1 %6777 }
0x1a9e   : > { %22932 = vrcp.f32 %v6778_v16 }
0x1aa1   : > { %v6949_v63 = vpop.permute.xlu1 %6948 }
0x1aa5   : > { %v7025_v30 = vpop.permute.xlu1 %7024 }
0x1aa8   : > { %v22933_v53 = vpop.eup %22932 }
0x1aa9   : > { %v6789_v10 = vmul.f32 %v22933_v53, %v22925_v22  ;;  %v7107_v52 = vpop.permute.xlu1 %7106 }
0x1aab   : > { %21213 = vmatmul.mubr.msk.f32.vlgmr.msra.gmra.mrb[82].mxu1 %vm711_vm4, %v6789_v10 }
0x1aac   : > { %21221 = vmatpush3.msra.mxu1 %v6949_v63  ;;  %21222 = vmatprep.mubr.msk.f32.mxu1 %vm23215_vm0, %v23216_v12 }
0x1aad   : > { %21230 = vmatprep.subr.mxu1 %v23216_v12  ;;  %v7105_v33 = vpop.permute.xlu1 %7104 }
0x1ada   : > { %v6787_v54 = vpop.xlane.xlu0 %6786 }
0x1ade   : > { %v6784_v49 = vpop.xlane.xlu1 %6783  ;;  %v6781_v59 = vpop.xlane.xlu0 %6780 }
0x1adf   : > { %22934 = vrcp.f32 %v6784_v49 }
0x1ae0   : > { %22936 = vrcp.f32 %v6781_v59 }
0x1ae1   : > { %22938 = vrcp.f32 %v6787_v54 }
0x1ae2   : > { %v6873_v60 = vpop.permute.xlu0 %6872  ;;  %v7331_v11 = vpop.permute.xlu1 %7330 }
0x1ae3   : > { %21216 = vmatpush3.msra.mxu0 %v6873_v60 }
0x1ae4   : > { %21225 = vmatprep.subr.mxu0 %v23216_v12 }
0x1ae6   : > { %v7183_v61 = vpop.permute.xlu0 %7182 }
0x1ae9   : > { %v22935_v0 = vpop.eup %22934 }
0x1aea   : > { %v22937_v50 = vpop.eup %22936  ;;  %v6793_v41 = vmul.f32 %v22935_v0, %v22931_v45  ;;  %v7257_v9 = vpop.permute.xlu0 %7256 }
0x1aeb   : > { %v6791_v48 = vmul.f32 %v22937_v50, %v22929_v55  ;;  %v22939_v4 = vpop.eup %22938 }
0x1aec   : > { %21223 = vmatmul.mubr.msk.f32.vlgmr.msra.gmra.mrb[84].mxu1 %vm711_vm4, %v6793_v41  ;;  %v6795_v7 = vmul.f32 %v22939_v4, %v22927_v44 }
0x1aed   : > { %21218 = vmatmul.mubr.msk.f32.vlgmr.msra.gmra.mrb[82].mxu0 %vm711_vm4, %v6791_v48  ;;  %21231 = vmatpush3.xpose.msk.msra.mxu1 %vm411_vm3, %v7107_v52 }
0x1aee   : > { %21226 = vmatpush3.msra.mxu0 %v7025_v30  ;;  %21227 = vmatprep.mubr.msk.f32.mxu0 %vm23215_vm0, %v23216_v12 }
0x1aef   : > { %21232 = vmatprep.mubr.msk.f32.mxu1 %vm23215_vm0, %v23216_v12  ;;  %21240 = vmatprep.subr.mxu1 %v23216_v12 }
0x1af0   : > { %21233 = vmatmul.mubr.msk.f32.vlgmr.msra.gmra.mrb[86].mxu1 %vm411_vm3, %v7105_v33  ;;  %21235 = vmatprep.subr.mxu0 %v23216_v12 }
0x1af1   : > { %21228 = vmatmul.mubr.msk.f32.vlgmr.msra.gmra.mrb[84].mxu0 %vm711_vm4, %v6795_v7  ;;  %21241 = vmatpush3.xpose.msk.msra.mxu1 %vm411_vm3, %v7257_v9 }
0x1af2   : > { %21242 = vmatprep.mubr.msk.f32.mxu1 %vm23215_vm0, %v23216_v12  ;;  %21237 = vmatprep.mubr.msk.f32.mxu0 %vm23215_vm0, %v23216_v12 }
0x1af3   : > { %21250 = vmatprep.subr.mxu1 %v23216_v12 }
0x1af4   : > { %21243 = vmatmul.mubr.msk.f32.vlgmr.msra.gmra.mrb[88].mxu1 %vm411_vm3, %v7105_v33 }
0x1af5   : > { %21236 = vmatpush3.xpose.msk.msra.mxu0 %vm411_vm3, %v7183_v61  ;;  %21252 = vmatprep.mubr.msk.f32.mxu1 %vm23215_vm0, %v23216_v12 }
0x1af6   : > { %21245 = vmatprep.subr.mxu0 %v23216_v12 }
0x1af8   : > { %21238 = vmatmul.mubr.msk.f32.vlgmr.msra.gmra.mrb[86].mxu0 %vm411_vm3, %v7105_v33 }
0x1af9   : > { %21246 = vmatpush3.xpose.msk.msra.mxu0 %vm411_vm3, %v7331_v11  ;;  %21247 = vmatprep.mubr.msk.f32.mxu0 %vm23215_vm0, %v23216_v12 }
0x1afa   : > { %21255 = vmatprep.subr.mxu0 %v23216_v12 }
0x1afc   : > { %21248 = vmatmul.mubr.msk.f32.vlgmr.msra.gmra.mrb[88].mxu0 %vm411_vm3, %v7105_v33 }
0x1afd   : > { %21257 = vmatprep.mubr.msk.f32.mxu0 %vm23215_vm0, %v23216_v12 }
0x1b7e   : > { %v24330_v51 = vpop.f32.mrb[82].mxu1 }
0x1b7f   : > { %v21214_v18 = vpop.f32.mrb[83].mxu1 }
0x1bbf   : > { %v24332_v6 = vpop.f32.mrb[84].mxu1 }
0x1bc0   : > { %v24334_v28 = vpop.f32.mrb[82].mxu0  ;;  %v21224_v13 = vpop.f32.mrb[85].mxu1 }
0x1bc1   : > { %v21219_v14 = vpop.f32.mrb[83].mxu0 }
0x1bc3   : > { %v7178_v15 = vpop.f32.mrb[86].mxu1 }
0x1bc4   : > { %v24336_v43 = vpop.f32.mrb[84].mxu0  ;;  %v7404_v38 = vmul.f32 0.125, %v7178_v15  ;;  %v21234_v19 = vpop.f32.mrb[87].mxu1 }
0x1bc5   : > { %v21229_v36 = vpop.f32.mrb[85].mxu0 }
0x1bc6   : > { %v7408_v37 = vsel %vm711_vm4, %v7404_v38, -inf }
0x1bc7   : > { %7409 = vmax.xlane.f32.xlu0 %v7408_v37  ;;  %v7326_v20 = vpop.f32.mrb[88].mxu1 }
0x1bc8   : > { %v7406_v27 = vmul.f32 0.125, %v7326_v20  ;;  %v21244_v5 = vpop.f32.mrb[89].mxu1 }
0x1bca   : > { %v7414_v21 = vsel %vm711_vm4, %v7406_v27, -inf }
0x1bcb   : > { %v7252_v22 = vpop.f32.mrb[86].mxu0  ;;  %7415 = vmax.xlane.f32.xlu0 %v7414_v21 }
0x1bcc   : > { %v7405_v23 = vmul.f32 0.125, %v7252_v22  ;;  %v21239_v24 = vpop.f32.mrb[87].mxu0 }
0x1bce   : > { %v7411_v25 = vsel %vm711_vm4, %v7405_v23, -inf }
0x1bcf   : > { %7412 = vmax.xlane.f32.xlu1 %v7411_v25  ;;  %v7400_v26 = vpop.f32.mrb[88].mxu0 }
0x1bd0   : > { %v7407_v29 = vmul.f32 0.125, %v7400_v26  ;;  %v21249_v31 = vpop.f32.mrb[89].mxu0 }
0x1bd2   : > { %v7417_v32 = vsel %vm711_vm4, %v7407_v29, -inf }
0x1bd3   : > { %7418 = vmax.xlane.f32.xlu0 %v7417_v32 }
0x1be0   : > { %7528 = vrot.lane.b32.xlu1 %v24237_v34, %s23219_s6 }
0x1be4   : > { %7604 = vrot.lane.b32.xlu1 %v24252_v1, %s23219_s6 }
0x1be8   : > { %7680 = vrot.lane.b32.xlu1 %v24250_v2, %s23219_s6 }
0x1be9   : > { %7452 = vrot.lane.b32.xlu0 %v24230_v62, %s23219_s6 }
0x1bec   : > { %7854 = vrot.lane.b32.xlu1 %v24237_v34, %s23220_s7 }
0x1c54   : > { %v7410_v35 = vpop.xlane.xlu0 %7409 }
0x1c55   : > { %v7420_v40 = vsub.f32 %v7404_v38, %v7410_v35 }
0x1c57   : > { %v7424_v42 = vmul.f32 1.442695, %v7420_v40 }
0x1c58   : > { %v7416_v44 = vpop.xlane.xlu0 %7415 }
0x1c59   : > { %22940 = vpow2.f32 %v7424_v42  ;;  %v7422_v59 = vsub.f32 %v7406_v27, %v7416_v44 }
0x1c5b   : > { %v7428_v60 = vmul.f32 1.442695, %v7422_v59 }
0x1c5c   : > { %v7413_v55 = vpop.xlane.xlu1 %7412 }
0x1c5d   : > { %v7421_v57 = vsub.f32 %v7405_v23, %v7413_v55 }
0x1c5f   : > { %v7426_v45 = vmul.f32 1.442695, %v7421_v57 }
0x1c60   : > { %v7529_v46 = vpop.permute.xlu1 %7528  ;;  %v7419_v17 = vpop.xlane.xlu0 %7418 }
0x1c61   : > { %22942 = vpow2.f32 %v7426_v45  ;;  %v7423_v16 = vsub.f32 %v7407_v29, %v7419_v17  ;;  %21256 = vmatpush3.msra.mxu0 %v7529_v46 }
0x1c62   : > { %21265 = vmatprep.subr.mxu0 %v23216_v12 }
0x1c63   : > { %v22941_v53 = vpop.eup %22940  ;;  %v7430_v10 = vmul.f32 1.442695, %v7423_v16 }
0x1c64   : > { %v7453_v63 = vpop.permute.xlu0 %7452  ;;  %v7432_v30 = vsel %vm711_vm4, %v22941_v53, 0.0  ;;  %v7605_v61 = vpop.permute.xlu1 %7604 }
0x1c65   : > { %22944 = vpow2.f32 %v7430_v10  ;;  %21251 = vmatpush3.msra.mxu1 %v7453_v63  ;;  %7433 = vadd.xlane.f32.xlu0 %v7432_v30 }
0x1c66   : > { %21260 = vmatprep.subr.mxu1 %v23216_v12  ;;  %22946 = vpow2.f32 %v7428_v60 }
0x1c68   : > { %v7681_v41 = vpop.permute.xlu1 %7680 }
0x1c6b   : > { %v22943_v52 = vpop.eup %22942 }
0x1c6c   : > { %v7435_v33 = vsel %vm711_vm4, %v22943_v52, 0.0  ;;  %v7855_v4 = vpop.permute.xlu1 %7854 }
0x1c6d   : > { %7436 = vadd.xlane.f32.xlu1 %v7435_v33 }
0x1c6f   : > { %v22945_v54 = vpop.eup %22944 }
0x1c70   : > { %v7441_v49 = vsel %vm711_vm4, %v22945_v54, 0.0  ;;  %v22947_v0 = vpop.eup %22946 }
0x1c71   : > { %7442 = vadd.xlane.f32.xlu1 %v7441_v49  ;;  %v7438_v50 = vsel %vm711_vm4, %v22947_v0, 0.0 }
0x1c7b   : > { %7778 = vrot.lane.b32.xlu0 %v24230_v62, %s23220_s7 }
0x1c82   : > { %7928 = vrot.lane.b32.xlu1 %v24252_v1, %s23220_s7 }
0x1c9a   : > { %7439 = vadd.xlane.f32.xlu0 %v7438_v50 }
0x1cb0   : > { %7776 = vrot.lane.b32.xlu0 %v24232_v39, %s23220_s7 }
0x1cb4   : > { %8002 = vrot.lane.b32.xlu0 %v24250_v2, %s23220_s7 }
0x1cf2   : > { %v7434_v48 = vpop.xlane.xlu0 %7433 }
0x1cf3   : > { %22948 = vrcp.f32 %v7434_v48 }
0x1cf6   : > { %v7779_v19 = vpop.permute.xlu0 %7778 }
0x1cfa   : > { %v7437_v7 = vpop.xlane.xlu1 %7436 }
0x1cfb   : > { %22950 = vrcp.f32 %v7437_v7 }
0x1cfd   : > { %v22949_v9 = vpop.eup %22948 }
0x1cfe   : > { %v7443_v11 = vpop.xlane.xlu1 %7442  ;;  %v7445_v18 = vmul.f32 %v22949_v9, %v22941_v53 }
0x1cff   : > { %22952 = vrcp.f32 %v7443_v11 }
0x1d00   : > { %21253 = vmatmul.mubr.msk.f32.vlgmr.msra.gmra.mrb[90].mxu1 %vm711_vm4, %v7445_v18 }
0x1d01   : > { %21261 = vmatpush3.msra.mxu1 %v7605_v61  ;;  %21262 = vmatprep.mubr.msk.f32.mxu1 %vm23215_vm0, %v23216_v12 }
0x1d02   : > { %21270 = vmatprep.subr.mxu1 %v23216_v12  ;;  %v7929_v21 = vpop.permute.xlu1 %7928 }
0x1d05   : > { %v22951_v13 = vpop.eup %22950 }
0x1d06   : > { %v7447_v14 = vmul.f32 %v22951_v13, %v22943_v52 }
0x1d08   : > { %21258 = vmatmul.mubr.msk.f32.vlgmr.msra.gmra.mrb[90].mxu0 %vm711_vm4, %v7447_v14 }
0x1d09   : > { %v22953_v15 = vpop.eup %22952  ;;  %21266 = vmatpush3.msra.mxu0 %v7681_v41  ;;  %21267 = vmatprep.mubr.msk.f32.mxu0 %vm23215_vm0, %v23216_v12 }
0x1d0a   : > { %v7451_v38 = vmul.f32 %v22953_v15, %v22945_v54  ;;  %21275 = vmatprep.subr.mxu0 %v23216_v12 }
0x1d0c   : > { %21268 = vmatmul.mubr.msk.f32.vlgmr.msra.gmra.mrb[92].mxu0 %vm711_vm4, %v7451_v38 }
0x1d0d   : > { %21277 = vmatprep.mubr.msk.f32.mxu0 %vm23215_vm0, %v23216_v12 }
0x1d10   : > { %21276 = vmatpush3.xpose.msk.msra.mxu0 %vm411_vm3, %v7855_v4 }
0x1d11   : > { %21285 = vmatprep.subr.mxu0 %v23216_v12 }
0x1d27   : > { %v7440_v36 = vpop.xlane.xlu0 %7439 }
0x1d28   : > { %22954 = vrcp.f32 %v7440_v36 }
0x1d2b   : > { %v7777_v37 = vpop.permute.xlu0 %7776 }
0x1d2c   : > { %21278 = vmatmul.mubr.msk.f32.vlgmr.msra.gmra.mrb[94].mxu0 %vm411_vm3, %v7777_v37 }
0x1d2d   : > { %21287 = vmatprep.mubr.msk.f32.mxu0 %vm23215_vm0, %v23216_v12 }
0x1d2f   : > { %v8003_v20 = vpop.permute.xlu0 %8002 }
0x1d30   : > { %21286 = vmatpush3.xpose.msk.msra.mxu0 %vm411_vm3, %v8003_v20 }
0x1d31   : > { %21295 = vmatprep.subr.mxu0 %v23216_v12 }
0x1d32   : > { %v22955_v27 = vpop.eup %22954 }
0x1d33   : > { %21288 = vmatmul.mubr.msk.f32.vlgmr.msra.gmra.mrb[96].mxu0 %vm411_vm3, %v7777_v37  ;;  %v7449_v5 = vmul.f32 %v22955_v27, %v22947_v0 }
0x1d34   : > { %21297 = vmatprep.mubr.msk.f32.mxu0 %vm23215_vm0, %v23216_v12 }
0x1d35   : > { %21263 = vmatmul.mubr.msk.f32.vlgmr.msra.gmra.mrb[92].mxu1 %vm711_vm4, %v7449_v5 }
0x1d36   : > { %21271 = vmatpush3.xpose.msk.msra.mxu1 %vm411_vm3, %v7779_v19  ;;  %21272 = vmatprep.mubr.msk.f32.mxu1 %vm23215_vm0, %v23216_v12 }
0x1d37   : > { %21280 = vmatprep.subr.mxu1 %v23216_v12 }
0x1d39   : > { %21273 = vmatmul.mubr.msk.f32.vlgmr.msra.gmra.mrb[94].mxu1 %vm411_vm3, %v7777_v37 }
0x1d3a   : > { %21281 = vmatpush3.xpose.msk.msra.mxu1 %vm411_vm3, %v7929_v21  ;;  %21282 = vmatprep.mubr.msk.f32.mxu1 %vm23215_vm0, %v23216_v12 }
0x1d3b   : > { %21290 = vmatprep.subr.mxu1 %v23216_v12 }
0x1d3d   : > { %21283 = vmatmul.mubr.msk.f32.vlgmr.msra.gmra.mrb[96].mxu1 %vm411_vm3, %v7777_v37 }
0x1d3e   : > { %21292 = vmatprep.mubr.msk.f32.mxu1 %vm23215_vm0, %v23216_v12 }
0x1dd3   : > { %v24400_v22 = vpop.f32.mrb[90].mxu1 }
0x1dd4   : > { %v21254_v23 = vpop.f32.mrb[91].mxu1 }
0x1ddb   : > { %v24402_v24 = vpop.f32.mrb[90].mxu0 }
0x1ddc   : > { %v21259_v25 = vpop.f32.mrb[91].mxu0 }
0x1ddf   : > { %v24404_v26 = vpop.f32.mrb[92].mxu0 }
0x1de0   : > { %v21269_v29 = vpop.f32.mrb[93].mxu0 }
0x1dff   : > { %v7924_v31 = vpop.f32.mrb[94].mxu0 }
0x1e00   : > { %v8077_v32 = vmul.f32 0.125, %v7924_v31  ;;  %v21279_v35 = vpop.f32.mrb[95].mxu0 }
0x1e02   : > { %v8083_v40 = vsel %vm711_vm4, %v8077_v32, -inf }
0x1e03   : > { %8084 = vmax.xlane.f32.xlu0 %v8083_v40 }
0x1e06   : > { %v8072_v42 = vpop.f32.mrb[96].mxu0 }
0x1e07   : > { %v21289_v44 = vpop.f32.mrb[97].mxu0  ;;  %v8079_v30 = vmul.f32 0.125, %v8072_v42 }
0x1e08   : > { %v24407_v55 = vpop.f32.mrb[92].mxu1 }
0x1e09   : > { %v21264_v57 = vpop.f32.mrb[93].mxu1  ;;  %v8089_v33 = vsel %vm711_vm4, %v8079_v30, -inf }
0x1e0c   : > { %v7850_v45 = vpop.f32.mrb[94].mxu1 }
0x1e0d   : > { %v8076_v46 = vmul.f32 0.125, %v7850_v45  ;;  %v21274_v17 = vpop.f32.mrb[95].mxu1 }
0x1e0f   : > { %v8080_v16 = vsel %vm711_vm4, %v8076_v46, -inf }
0x1e10   : > { %8081 = vmax.xlane.f32.xlu1 %v8080_v16  ;;  %v7998_v53 = vpop.f32.mrb[96].mxu1 }
0x1e11   : > { %v8078_v10 = vmul.f32 0.125, %v7998_v53  ;;  %v21284_v63 = vpop.f32.mrb[97].mxu1 }
0x1e13   : > { %v8086_v52 = vsel %vm711_vm4, %v8078_v10, -inf }
0x1e14   : > { %8087 = vmax.xlane.f32.xlu0 %v8086_v52 }
0x1e18   : > { %8090 = vmax.xlane.f32.xlu0 %v8089_v33 }
0x1e21   : > { %8124 = vrot.lane.b32.xlu1 %v24230_v62, %s23221_s8 }
0x1e25   : > { %8276 = vrot.lane.b32.xlu1 %v24252_v1, %s23221_s8 }
0x1e29   : > { %8352 = vrot.lane.b32.xlu1 %v24250_v2, %s23221_s8 }
0x1e2d   : > { %8450 = vrot.lane.b32.xlu1 %v24230_v62, %s23222_s9 }
0x1e2e   : > { %8200 = vrot.lane.b32.xlu0 %v24237_v34, %s23221_s8 }
0x1e90   : > { %v8085_v54 = vpop.xlane.xlu0 %8084 }
0x1e91   : > { %v8093_v49 = vsub.f32 %v8077_v32, %v8085_v54 }
0x1e93   : > { %v8098_v59 = vmul.f32 1.442695, %v8093_v49 }
0x1e95   : > { %22956 = vpow2.f32 %v8098_v59 }
0x1e9d   : > { %v8082_v60 = vpop.xlane.xlu1 %8081 }
0x1e9e   : > { %v8092_v0 = vsub.f32 %v8076_v46, %v8082_v60 }
0x1e9f   : > { %v22957_v50 = vpop.eup %22956 }
0x1ea0   : > { %v8096_v61 = vmul.f32 1.442695, %v8092_v0  ;;  %v8107_v41 = vsel %vm711_vm4, %v22957_v50, 0.0 }
0x1ea1   : > { %v8125_v48 = vpop.permute.xlu1 %8124  ;;  %8108 = vadd.xlane.f32.xlu0 %v8107_v41  ;;  %v8088_v4 = vpop.xlane.xlu0 %8087 }
0x1ea2   : > { %22958 = vpow2.f32 %v8096_v61  ;;  %v8094_v7 = vsub.f32 %v8078_v10, %v8088_v4  ;;  %21291 = vmatpush3.msra.mxu1 %v8125_v48 }
0x1ea3   : > { %21300 = vmatprep.subr.mxu1 %v23216_v12 }
0x1ea4   : > { %v8100_v9 = vmul.f32 1.442695, %v8094_v7 }
0x1ea5   : > { %v8091_v11 = vpop.xlane.xlu0 %8090  ;;  %v8277_v27 = vpop.permute.xlu1 %8276 }
0x1ea6   : > { %22960 = vpow2.f32 %v8100_v9  ;;  %v8095_v18 = vsub.f32 %v8079_v30, %v8091_v11 }
0x1ea8   : > { %v8102_v13 = vmul.f32 1.442695, %v8095_v18 }
0x1ea9   : > { %v8201_v14 = vpop.permute.xlu0 %8200  ;;  %v8353_v21 = vpop.permute.xlu1 %8352 }
0x1eaa   : > { %22962 = vpow2.f32 %v8102_v13  ;;  %21296 = vmatpush3.msra.mxu0 %v8201_v14 }
0x1eab   : > { %21305 = vmatprep.subr.mxu0 %v23216_v12 }
0x1eac   : > { %v22959_v15 = vpop.eup %22958 }
0x1ead   : > { %v8104_v38 = vsel %vm711_vm4, %v22959_v15, 0.0  ;;  %v8451_v23 = vpop.permute.xlu1 %8450 }
0x1eae   : > { %8105 = vadd.xlane.f32.xlu1 %v8104_v38 }
0x1eb0   : > { %v22961_v19 = vpop.eup %22960 }
0x1eb1   : > { %v8110_v36 = vsel %vm711_vm4, %v22961_v19, 0.0 }
0x1eb2   : > { %8111 = vadd.xlane.f32.xlu1 %v8110_v36 }
0x1eb4   : > { %v22963_v37 = vpop.eup %22962 }
0x1eb5   : > { %v8113_v20 = vsel %vm711_vm4, %v22963_v37, 0.0 }
0x1eb6   : > { %8114 = vadd.xlane.f32.xlu0 %v8113_v20 }
0x1ec3   : > { %8448 = vrot.lane.b32.xlu1 %v24232_v39, %s23222_s9 }
0x1ec7   : > { %8674 = vrot.lane.b32.xlu1 %v24250_v2, %s23222_s9 }
0x1ecc   : > { %8526 = vrot.lane.b32.xlu0 %v24237_v34, %s23222_s9 }
0x1ed0   : > { %8600 = vrot.lane.b32.xlu0 %v24252_v1, %s23222_s9 }
0x1f2e   : > { %v8109_v5 = vpop.xlane.xlu0 %8108 }
0x1f2f   : > { %22964 = vrcp.f32 %v8109_v5 }
0x1f39   : > { %v22965_v25 = vpop.eup %22964 }
0x1f3a   : > { %v8119_v29 = vmul.f32 %v22965_v25, %v22957_v50 }
0x1f3b   : > { %v8106_v31 = vpop.xlane.xlu1 %8105 }
0x1f3c   : > { %22966 = vrcp.f32 %v8106_v31  ;;  %21298 = vmatmul.mubr.msk.f32.vlgmr.msra.gmra.mrb[98].mxu0 %vm711_vm4, %v8119_v29 }
0x1f3d   : > { %21306 = vmatpush3.msra.mxu0 %v8353_v21  ;;  %21307 = vmatprep.mubr.msk.f32.mxu0 %vm23215_vm0, %v23216_v12 }
0x1f3e   : > { %21315 = vmatprep.subr.mxu0 %v23216_v12 }
0x1f3f   : > { %v8112_v32 = vpop.xlane.xlu1 %8111 }
0x1f40   : > { %22968 = vrcp.f32 %v8112_v32 }
0x1f43   : > { %v8115_v35 = vpop.xlane.xlu0 %8114  ;;  %v8449_v17 = vpop.permute.xlu1 %8448 }
0x1f44   : > { %22970 = vrcp.f32 %v8115_v35 }
0x1f46   : > { %v22967_v40 = vpop.eup %22966 }
0x1f47   : > { %v8117_v42 = vmul.f32 %v22967_v40, %v22959_v15  ;;  %v8527_v46 = vpop.permute.xlu0 %8526  ;;  %v8675_v10 = vpop.permute.xlu1 %8674 }
0x1f49   : > { %21293 = vmatmul.mubr.msk.f32.vlgmr.msra.gmra.mrb[98].mxu1 %vm711_vm4, %v8117_v42 }
0x1f4a   : > { %v22969_v44 = vpop.eup %22968  ;;  %21301 = vmatpush3.msra.mxu1 %v8277_v27  ;;  %21302 = vmatprep.mubr.msk.f32.mxu1 %vm23215_vm0, %v23216_v12 }
0x1f4b   : > { %v8121_v57 = vmul.f32 %v22969_v44, %v22961_v19  ;;  %21310 = vmatprep.subr.mxu1 %v23216_v12  ;;  %v8601_v53 = vpop.permute.xlu0 %8600 }
0x1f4d   : > { %21303 = vmatmul.mubr.msk.f32.vlgmr.msra.gmra.mrb[100].mxu1 %vm711_vm4, %v8121_v57 }
0x1f4e   : > { %v22971_v45 = vpop.eup %22970  ;;  %21312 = vmatprep.mubr.msk.f32.mxu1 %vm23215_vm0, %v23216_v12 }
0x1f4f   : > { %v8123_v16 = vmul.f32 %v22971_v45, %v22963_v37 }
0x1f51   : > { %21311 = vmatpush3.xpose.msk.msra.mxu1 %vm411_vm3, %v8451_v23  ;;  %21308 = vmatmul.mubr.msk.f32.vlgmr.msra.gmra.mrb[100].mxu0 %vm711_vm4, %v8123_v16 }
0x1f52   : > { %21316 = vmatpush3.xpose.msk.msra.mxu0 %vm411_vm3, %v8527_v46  ;;  %21320 = vmatprep.subr.mxu1 %v23216_v12 }
0x1f53   : > { %21317 = vmatprep.mubr.msk.f32.mxu0 %vm23215_vm0, %v23216_v12  ;;  %21325 = vmatprep.subr.mxu0 %v23216_v12 }
0x1f54   : > { %21313 = vmatmul.mubr.msk.f32.vlgmr.msra.gmra.mrb[102].mxu1 %vm411_vm3, %v8449_v17 }
0x1f55   : > { %21321 = vmatpush3.xpose.msk.msra.mxu1 %vm411_vm3, %v8601_v53  ;;  %21318 = vmatmul.mubr.msk.f32.vlgmr.msra.gmra.mrb[102].mxu0 %vm411_vm3, %v8449_v17 }
0x1f56   : > { %21326 = vmatpush3.xpose.msk.msra.mxu0 %vm411_vm3, %v8675_v10  ;;  %21322 = vmatprep.mubr.msk.f32.mxu1 %vm23215_vm0, %v23216_v12 }
0x1f57   : > { %21327 = vmatprep.mubr.msk.f32.mxu0 %vm23215_vm0, %v23216_v12  ;;  %21335 = vmatprep.subr.mxu0 %v23216_v12 }
0x1f58   : > { %21323 = vmatmul.mubr.msk.f32.vlgmr.msra.gmra.mrb[104].mxu1 %vm411_vm3, %v8449_v17  ;;  %21330 = vmatprep.subr.mxu1 %v23216_v12 }
0x1f59   : > { %21328 = vmatmul.mubr.msk.f32.vlgmr.msra.gmra.mrb[104].mxu0 %vm411_vm3, %v8449_v17  ;;  %21332 = vmatprep.mubr.msk.f32.mxu1 %vm23215_vm0, %v23216_v12 }
0x1f5a   : > { %21337 = vmatprep.mubr.msk.f32.mxu0 %vm23215_vm0, %v23216_v12 }
0x200f   : > { %v24470_v63 = vpop.f32.mrb[98].mxu0 }
0x2010   : > { %v21299_v30 = vpop.f32.mrb[99].mxu0 }
0x201c   : > { %v8196_v52 = vpop.f32.mrb[98].mxu1 }
0x201d   : > { %v21294_v33 = vpop.f32.mrb[99].mxu1 }
0x2020   : > { %v24472_v54 = vpop.f32.mrb[100].mxu1 }
0x2021   : > { %v21304_v49 = vpop.f32.mrb[101].mxu1 }
0x2024   : > { %v24474_v59 = vpop.f32.mrb[100].mxu0 }
0x2025   : > { %v21309_v60 = vpop.f32.mrb[101].mxu0 }
0x2027   : > { %v8522_v0 = vpop.f32.mrb[102].mxu1 }
0x2028   : > { %v8748_v50 = vmul.f32 0.125, %v8522_v0  ;;  %v21314_v61 = vpop.f32.mrb[103].mxu1  ;;  %v8596_v41 = vpop.f32.mrb[102].mxu0 }
0x2029   : > { %v8749_v48 = vmul.f32 0.125, %v8596_v41  ;;  %v21319_v4 = vpop.f32.mrb[103].mxu0  ;;  %v6258_v61 = vld [vmem:[%s26230_s2 + $0x1f0] sm:$0xff]  ;;  %v6259_v41 = vld [vmem:[%s26230_s2 + $0x1f8] sm:$0xff] }
0x202a   : > { %v8752_v7 = vsel %vm711_vm4, %v8748_v50, -inf  ;;  %v6260_v4 = vld [vmem:[%s26230_s2 + $0x200] sm:$0xff] }
0x202b   : > { %8753 = vmax.xlane.f32.xlu0 %v8752_v7  ;;  %v8670_v9 = vpop.f32.mrb[104].mxu1  ;;  %v8755_v11 = vsel %vm711_vm4, %v8749_v48, -inf  ;;  %v22447_v7 = vpack.c.bf16 %v6260_v4, %v6259_v41  ;;  %v9246_v41 = vld [vmem:[%s26230_s2 + $0xd0] sm:$0xff] }
0x202c   : > { %v8750_v18 = vmul.f32 0.125, %v8670_v9  ;;  %v21324_v13 = vpop.f32.mrb[105].mxu1  ;;  %8756 = vmax.xlane.f32.xlu1 %v8755_v11  ;;  %v8744_v14 = vpop.f32.mrb[104].mxu0  ;;  %v6261_v9 = vld [vmem:[%s26230_s2 + $0x208] sm:$0xff]  ;;  %v6262_v11 = vld [vmem:[%s26230_s2 + $0x210] sm:$0xff] }
0x202d   : > { %v21329_v15 = vpop.f32.mrb[105].mxu0  ;;  %v8751_v38 = vmul.f32 0.125, %v8744_v14  ;;  %v6263_v13 = vld [vmem:[%s26230_s2 + $0x218] sm:$0xff]  ;;  %v6264_v14 = vld [vmem:[%s26230_s2 + $0x220] sm:$0xff] }
0x202e   : > { %v8758_v19 = vsel %vm711_vm4, %v8750_v18, -inf  ;;  %v22455_v15 = vpack.c.bf16 %v6264_v14, %v6263_v13  ;;  %v9248_v13 = vld [vmem:[%s26230_s2 + $0xe0] sm:$0xff] }
0x202f   : > { %8759 = vmax.xlane.f32.xlu0 %v8758_v19  ;;  %v8761_v36 = vsel %vm711_vm4, %v8751_v38, -inf  ;;  %v9242_v19 = vld [vmem:[%s26230_s2 + $0xb0] sm:$0xff] }
0x2033   : > { %8762 = vmax.xlane.f32.xlu0 %v8761_v36 }
0x20b8   : > { %v8754_v37 = vpop.xlane.xlu0 %8753 }
0x20b9   : > { %v8764_v20 = vsub.f32 %v8748_v50, %v8754_v37  ;;  %v8757_v27 = vpop.xlane.xlu1 %8756  ;;  %v6257_v50 = vld [vmem:[%s26230_s2 + $0x1e8] sm:$0xff] }
0x20ba   : > { %v8765_v5 = vsub.f32 %v8749_v48, %v8757_v27  ;;  %v22443_v48 = vpack.c.bf16 %v6258_v61, %v6257_v50  ;;  %v9245_v61 = vld [vmem:[%s26230_s2 + $0xc8] sm:$0xff] }
0x20bb   : > { %v8768_v21 = vmul.f32 1.442695, %v8764_v20 }
0x20bc   : > { %v8770_v23 = vmul.f32 1.442695, %v8765_v5  ;;  %v8760_v25 = vpop.xlane.xlu0 %8759 }
0x20bd   : > { %22972 = vpow2.f32 %v8768_v21  ;;  %v8766_v29 = vsub.f32 %v8750_v18, %v8760_v25  ;;  %v22451_v18 = vpack.c.bf16 %v6262_v11, %v6261_v9  ;;  %v23202_v25 = vld [vmem:[%s26231_s3 + $0x2] ss:$0 sm:$0xff]  ;;  %v22483_v9 = vpack.c.bf16 %v9246_v41, %v9245_v61 }
0x20be   : > { %22974 = vpow2.f32 %v8770_v23 }
0x20bf   : > { %v8772_v31 = vmul.f32 1.442695, %v8766_v29  ;;  %v9257_v29 = vld [vmem:[%s26229_s1 + $0xa8] sm:$0xff] }
0x20c0   : > { %v8763_v45 = vpop.xlane.xlu0 %8762 }
0x20c1   : > { %22976 = vpow2.f32 %v8772_v31  ;;  %v8767_v46 = vsub.f32 %v8751_v38, %v8763_v45  ;;  %v9241_v38 = vld [vmem:[%s26230_s2 + $0xa8] sm:$0xff] }
0x20c2   : > { %v22475_v37 = vpack.c.bf16 %v9242_v19, %v9241_v38 }
0x20c3   : > { %v8774_v17 = vmul.f32 1.442695, %v8767_v46 }
0x20c5   : > { %22978 = vpow2.f32 %v8774_v17 }
0x20c7   : > { %v22973_v32 = vpop.eup %22972 }
0x20c8   : > { %v22975_v35 = vpop.eup %22974  ;;  %v8776_v40 = vsel %vm711_vm4, %v22973_v32, 0.0 }
0x20c9   : > { %8777 = vadd.xlane.f32.xlu0 %v8776_v40  ;;  %v8779_v42 = vsel %vm711_vm4, %v22975_v35, 0.0 }
0x20ca   : > { %8780 = vadd.xlane.f32.xlu1 %v8779_v42 }
0x20cb   : > { %v22977_v44 = vpop.eup %22976 }
0x20cc   : > { %v8782_v57 = vsel %vm711_vm4, %v22977_v44, 0.0 }
0x20cd   : > { %8783 = vadd.xlane.f32.xlu0 %v8782_v57 }
0x20cf   : > { %v22979_v16 = vpop.eup %22978 }
0x20db   : > { %8872 = vrot.lane.b32.xlu1 %v24237_v34, %s23223_s10  ;;  %v8785_v34 = vsel %vm711_vm4, %v22979_v16, 0.0 }
0x20df   : > { %8948 = vrot.lane.b32.xlu1 %v24252_v1, %s23223_s10 }
0x20e3   : > { %8796 = vrot.lane.b32.xlu0 %v24230_v62, %s23223_s10 }
0x20e7   : > { %7760 = vrot.lane.b32.xlu0 %v24400_v22, %s23223_s10 }
0x20eb   : > { %8432 = vrot.lane.b32.xlu0 %v8196_v52, %s23221_s8 }
0x20ef   : > { %7764 = vrot.lane.b32.xlu0 %v24407_v55, %s23223_s10 }
0x2103   : > { %8786 = vadd.xlane.f32.xlu1 %v8785_v34 }
0x2114   : > { %9024 = vrot.lane.b32.xlu1 %v24250_v2, %s23223_s10 }
0x2118   : > { %7762 = vrot.lane.b32.xlu1 %v24402_v24, %s23223_s10 }
0x211c   : > { %8434 = vrot.lane.b32.xlu1 %v24470_v63, %s23221_s8 }
0x2120   : > { %7766 = vrot.lane.b32.xlu1 %v24404_v26, %s23223_s10 }
0x2156   : > { %v8778_v62 = vpop.xlane.xlu0 %8777 }
0x2157   : > { %22980 = vrcp.f32 %v8778_v62  ;;  %v8781_v1 = vpop.xlane.xlu1 %8780 }
0x2158   : > { %22982 = vrcp.f32 %v8781_v1 }
0x215a   : > { %v8784_v22 = vpop.xlane.xlu0 %8783 }
0x215b   : > { %22984 = vrcp.f32 %v8784_v22  ;;  %v8873_v55 = vpop.permute.xlu1 %8872  ;;  %v7100_v22 = vadd.f32 %v24330_v51, %v24232_v39 }
0x215c   : > { %21336 = vmatpush3.msra.mxu0 %v8873_v55 }
0x215d   : > { %21345 = vmatprep.subr.mxu0 %v23216_v12 }
0x215e   : > { %v8797_v2 = vpop.permute.xlu0 %8796 }
0x215f   : > { %21331 = vmatpush3.msra.mxu1 %v8797_v2  ;;  %v8949_v30 = vpop.permute.xlu1 %8948  ;;  %v7101_v2 = vadd.f32 %v24334_v28, %v24232_v39 }
0x2160   : > { %21340 = vmatprep.subr.mxu1 %v23216_v12 }
0x2161   : > { %v22981_v24 = vpop.eup %22980 }
0x2162   : > { %v22983_v53 = vpop.eup %22982  ;;  %v8789_v10 = vmul.f32 %v22981_v24, %v22973_v32 }
0x2163   : > { %v8791_v63 = vmul.f32 %v22983_v53, %v22975_v35  ;;  %v9260_v35 = vld [vmem:[%s26229_s1 + $0xc0] sm:$0xff]  ;;  %v9243_v53 = vld [vmem:[%s26230_s2 + $0xb8] sm:$0xff] }
0x2164   : > { %21333 = vmatmul.mubr.msk.f32.vlgmr.msra.gmra.mrb[106].mxu1 %vm711_vm4, %v8789_v10  ;;  %v9244_v10 = vld [vmem:[%s26230_s2 + $0xc0] sm:$0xff] }
0x2165   : > { %v22985_v26 = vpop.eup %22984  ;;  %21341 = vmatpush3.msra.mxu1 %v8949_v30  ;;  %21338 = vmatmul.mubr.msk.f32.vlgmr.msra.gmra.mrb[106].mxu0 %vm711_vm4, %v8791_v63 }
0x2166   : > { %21342 = vmatprep.mubr.msk.f32.mxu1 %vm23215_vm0, %v23216_v12  ;;  %v8793_v52 = vmul.f32 %v22985_v26, %v22977_v44  ;;  %21347 = vmatprep.mubr.msk.f32.mxu0 %vm23215_vm0, %v23216_v12  ;;  %v7761_v44 = vpop.permute.xlu0 %7760 }
0x2167   : > { %22444 = vmatprep.subr.bf16.mxu1 %v22443_v48 }
0x2168   : > { %21343 = vmatmul.mubr.msk.f32.vlgmr.msra.gmra.mrb[108].mxu1 %vm711_vm4, %v8793_v52 }
0x2169   : > { %22446 = vmatpush3.bf16.msra.mxu1 %v22443_v48 }
0x216a   : > { %22448 = vmatprep.subr.bf16.mxu1 %v22447_v7  ;;  %v8433_v45 = vpop.permute.xlu0 %8432 }
0x216b   : > { %v8444_v62 = vadd.f32 %v8433_v45, %v24232_v39 }
0x216d   : > { %22450 = vmatpush3.bf16.msra.mxu1 %v22447_v7  ;;  %v7102_v7 = vadd.f32 %v24332_v6, %v24232_v39 }
0x216e   : > { %22452 = vmatprep.subr.bf16.mxu1 %v22451_v18  ;;  %v7765_v17 = vpop.permute.xlu0 %7764 }
0x216f   : > { %v7774_v48 = vadd.f32 %v7765_v17, %v24232_v39 }
0x2171   : > { %22454 = vmatpush3.bf16.msra.mxu1 %v22451_v18  ;;  %v9247_v18 = vld [vmem:[%s26230_s2 + $0xd8] sm:$0xff]  ;;  %v9122_v14 = vsel %vm411_vm3, %v7102_v7, %v7774_v48 }
0x2172   : > { %22456 = vmatprep.subr.bf16.mxu1 %v22455_v15  ;;  %v22487_v19 = vpack.c.bf16 %v9248_v13, %v9247_v18 }
0x2175   : > { %22458 = vmatpush3.bf16.msra.mxu1 %v22455_v15 }
0x2176   : > { %22476 = vmatprep.subr.bf16.mxu1 %v22475_v37 }
0x2190   : > { %v8787_v33 = vpop.xlane.xlu1 %8786 }
0x2191   : > { %22986 = vrcp.f32 %v8787_v33 }
0x2194   : > { %v9025_v49 = vpop.permute.xlu1 %9024 }
0x2195   : > { %21346 = vmatpush3.msra.mxu0 %v9025_v49 }
0x2198   : > { %v7763_v57 = vpop.permute.xlu1 %7762 }
0x2199   : > { %v7773_v1 = vadd.f32 %v7763_v57, %v24232_v39 }
0x219b   : > { %v22987_v60 = vpop.eup %22986  ;;  %v9121_v51 = vsel %vm411_vm3, %v7101_v2, %v7773_v1 }
0x219c   : > { %v8795_v0 = vmul.f32 %v22987_v60, %v22979_v16  ;;  %v8435_v46 = vpop.permute.xlu1 %8434  ;;  %v7772_v16 = vadd.f32 %v7761_v44, %v24232_v39  ;;  %v22479_v60 = vpack.c.bf16 %v9244_v10, %v9243_v53  ;;  %v19789_v10 = vld [vmem:[%s26231_s3 + $0x9] ss:$0 sm:$0xff] }
0x219d   : > { %v8445_v55 = vadd.f32 %v8435_v46, %v24232_v39 }
0x219e   : > { %21348 = vmatmul.mubr.msk.f32.vlgmr.msra.gmra.mrb[108].mxu0 %vm711_vm4, %v8795_v0  ;;  %v9120_v63 = vsel %vm411_vm3, %v7100_v22, %v7772_v16 }
0x219f   : > { %v9124_v28 = vsel %vm3084_vm5, %v9120_v63, %v8444_v62  ;;  %v9125_v33 = vsel %vm3084_vm5, %v9121_v51, %v8445_v55 }
0x21a0   : > { %v7767_v34 = vpop.permute.xlu1 %7766 }
0x2237   : > { %v8868_v36 = vpop.f32.mrb[106].mxu1 }
0x2238   : > { %9104 = vrot.lane.b32.xlu0 %v8868_v36, %s23219_s6  ;;  %v21334_v20 = vpop.f32.mrb[107].mxu1  ;;  %v8944_v27 = vpop.f32.mrb[106].mxu0 }
0x2239   : > { %v21339_v5 = vpop.f32.mrb[107].mxu0  ;;  %9106 = vrot.lane.b32.xlu1 %v8944_v27, %s23219_s6  ;;  %v7103_v27 = vadd.f32 %v24336_v43, %v24232_v39 }
0x223b   : > { %v9020_v21 = vpop.f32.mrb[108].mxu1 }
0x223c   : > { %8436 = vrot.lane.b32.xlu0 %v24472_v54, %s23221_s8  ;;  %v21344_v23 = vpop.f32.mrb[109].mxu1  ;;  %v9258_v54 = vld [vmem:[%s26229_s1 + $0xb0] sm:$0xff] }
0x223d   : > { %8438 = vrot.lane.b32.xlu1 %v24474_v59, %s23221_s8  ;;  %v9259_v59 = vld [vmem:[%s26229_s1 + $0xb8] sm:$0xff]  ;;  %v22459_v32 = vpack.c.bf16 %v9258_v54, %v9257_v29 }
0x223e   : > { %v22463_v42 = vpack.c.bf16 %v9260_v35, %v9259_v59 }
0x223f   : > { %22460 = vmatprep.subr.bf16.mxu0 %v22459_v32 }
0x2240   : > { %9108 = vrot.lane.b32.xlu0 %v9020_v21, %s23219_s6  ;;  %22462 = vmatpush3.bf16.msra.mxu0 %v22459_v32 }
0x2241   : > { %22464 = vmatprep.subr.bf16.mxu0 %v22463_v42 }
0x2244   : > { %9133 = vrot.lane.b32.xlu0 %v23202_v25, %s23217_s30  ;;  %22466 = vmatpush3.bf16.msra.mxu0 %v22463_v42 }
0x2271   : > { %v9096_v31 = vpop.f32.mrb[108].mxu0 }
0x2272   : > { %9110 = vrot.lane.b32.xlu1 %v9096_v31, %s23219_s6  ;;  %v21349_v40 = vpop.f32.mrb[109].mxu0 }
0x22aa   : > { %v9105_v24 = vpop.permute.xlu0 %9104 }
0x22ab   : > { %v9116_v30 = vadd.f32 %v9105_v24, %v24232_v39  ;;  %v9107_v26 = vpop.permute.xlu1 %9106 }
0x22ac   : > { %v9117_v52 = vadd.f32 %v9107_v26, %v24232_v39  ;;  %v19794_v26 = vld [vmem:[%s26231_s3 + $0x3] ss:$0 sm:$0xff] }
0x22ad   : > { %v9128_v49 = vsel %vm3089_vm6, %v9124_v28, %v9116_v30 }
0x22ae   : > { %21366 = vmatprep.mubr.msk.f32.mxu1 %vm337_vm2, %v9128_v49  ;;  %v8437_v0 = vpop.permute.xlu0 %8436  ;;  %v9129_v50 = vsel %vm3089_vm6, %v9125_v33, %v9117_v52 }
0x22af   : > { %21367 = vmatmul.mubr.msk.f32.vlgmr.msra.gmra.mrb[110].mxu1 %vm337_vm2, %v9129_v50  ;;  %v8446_v4 = vadd.f32 %v8437_v0, %v24232_v39  ;;  %v8439_v36 = vpop.permute.xlu1 %8438 }
0x22b0   : > { %22478 = vmatpush3.bf16.msra.mxu1 %v22475_v37  ;;  %v7775_v37 = vadd.f32 %v7767_v34, %v24232_v39  ;;  %v8447_v20 = vadd.f32 %v8439_v36, %v24232_v39 }
0x22b1   : > { %22480 = vmatprep.subr.bf16.mxu1 %v22479_v60  ;;  %v9126_v38 = vsel %vm3084_vm5, %v9122_v14, %v8446_v4 }
0x22b2   : > { %v9109_v11 = vpop.permute.xlu0 %9108  ;;  %v9123_v21 = vsel %vm411_vm3, %v7103_v27, %v7775_v37 }
0x22b3   : > { %v9118_v15 = vadd.f32 %v9109_v11, %v24232_v39  ;;  %v9127_v25 = vsel %vm3084_vm5, %v9123_v21, %v8447_v20 }
0x22b4   : > { %22482 = vmatpush3.bf16.msra.mxu1 %v22479_v60 }
0x22b5   : > { %v9130_v6 = vsel %vm3089_vm6, %v9126_v38, %v9118_v15  ;;  %22484 = vmatprep.subr.bf16.mxu1 %v22483_v9 }
0x22b6   : > { %21369 = vmatprep.mubr.msk.f32.mxu1 %vm337_vm2, %v9130_v6  ;;  %v9134_v54 = vpop.permute.xlu0 %9133 }
0x22b8   : > { %22486 = vmatpush3.bf16.msra.mxu1 %v22483_v9 }
0x22b9   : > { %22488 = vmatprep.subr.bf16.mxu1 %v22487_v19 }
0x22bc   : > { %22490 = vmatpush3.bf16.msra.mxu1 %v22487_v19 }
0x22bd   : > { %21436 = vmatprep.subr.mxu1 %v23216_v12 }
0x22e4   : > { %v9111_v5 = vpop.permute.xlu1 %9110 }
0x22e5   : > { %v9119_v23 = vadd.f32 %v9111_v5, %v24232_v39  ;;  %v9261_v39 = vld [vmem:[%s26229_s1 + $0xc8] sm:$0xff] }
0x22e7   : > { %v9131_v29 = vsel %vm3089_vm6, %v9127_v25, %v9119_v23 }
0x22e8   : > { %21370 = vmatmul.mubr.msk.f32.gmra.mrb[112].mxu1 %vm337_vm2, %v9131_v29 }
0x22e9   : > { %21410 = vmatprep.mubr.msk.f32.mxu1 %vm337_vm2, %v24206_v8  ;;  %v9262_v8 = vld [vmem:[%s26229_s1 + $0xd0] sm:$0xff] }
0x22ea   : > { %v22467_v43 = vpack.c.bf16 %v9262_v8, %v9261_v39 }
0x22ec   : > { %21411 = vmatmul.mubr.msk.f32.vlgmr.msra.gmra.mrb[114].mxu1 %vm337_vm2, %v24208_v47  ;;  %22468 = vmatprep.subr.bf16.mxu0 %v22467_v43  ;;  %v9263_v47 = vld [vmem:[%s26229_s1 + $0xd8] sm:$0xff] }
0x22ed   : > { %21413 = vmatprep.mubr.msk.f32.mxu1 %vm337_vm2, %v24214_v56  ;;  %22470 = vmatpush3.bf16.msra.mxu0 %v22467_v43  ;;  %v9264_v56 = vld [vmem:[%s26229_s1 + $0xe0] sm:$0xff] }
0x22f0   : > { %21414 = vmatmul.mubr.msk.f32.gmra.mrb[116].mxu1 %vm337_vm2, %v24216_v58  ;;  %v22471_v58 = vpack.c.bf16 %v9264_v56, %v9263_v47 }
0x22f1   : > { %21438 = vmatprep.mubr.msk.f32.mxu1 %vm23215_vm0, %v23216_v12 }
0x22f2   : > { %22472 = vmatprep.subr.bf16.mxu0 %v22471_v58 }
0x22f3   : > { %22474 = vmatpush3.bf16.msra.mxu0 %v22471_v58 }
0x22f4   : > { %21416 = vmatprep.subr.mxu0 %v23216_v12 }
0x2382   : > { %v21368_v59 = vpop.f32.mrb[110].mxu1 }
0x2383   : > { %v9220_v31 = vadd.f32 %v21368_v59, %v9134_v54  ;;  %v9214_v32 = vpop.f32.mrb[111].mxu1 }
0x2384   : > { %v9215_v35 = vadd.f32 %v9214_v32, %v9134_v54 }
0x2385   : > { %v9234_v40 = vmax.f32 %v9220_v31, 0.0 }
0x2386   : > { %v9233_v42 = vmax.f32 %v9215_v35, 0.0 }
0x2387   : > { %v9238_v57 = vadd.f32 %v9234_v40, %v9129_v50 }
0x2388   : > { %v9237_v44 = vadd.f32 %v9233_v42, %v9128_v49 }
0x238a   : > { %21388 = vmatprep.mubr.msk.f32.mxu0 %vm337_vm2, %v9237_v44 }
0x238b   : > { %21389 = vmatmul.mubr.msk.f32.vlgmr.msra.gmra.mrb[110].mxu0 %vm337_vm2, %v9238_v57 }
0x23bb   : > { %v21371_v45 = vpop.f32.mrb[112].mxu1 }
0x23bc   : > { %v9230_v46 = vadd.f32 %v21371_v45, %v9134_v54  ;;  %v9224_v17 = vpop.f32.mrb[113].mxu1 }
0x23bd   : > { %v9225_v16 = vadd.f32 %v9224_v17, %v9134_v54 }
0x23be   : > { %v9236_v34 = vmax.f32 %v9230_v46, 0.0 }
0x23bf   : > { %v9235_v62 = vmax.f32 %v9225_v16, 0.0  ;;  %v21412_v1 = vpop.f32.mrb[114].mxu1 }
0x23c0   : > { %v9438_v22 = vpop.f32.mrb[115].mxu1  ;;  %v9240_v2 = vadd.f32 %v9236_v34, %v9131_v29  ;;  %v24672_v33 = vadd.f32 %v21412_v1, %v19794_v26 }
0x23c1   : > { %v9239_v55 = vadd.f32 %v9235_v62, %v9130_v6  ;;  %v24661_v52 = vadd.f32 %v19794_v26, %v9438_v22 }
0x23c3   : > { %21391 = vmatprep.mubr.msk.f32.mxu0 %vm337_vm2, %v9239_v55  ;;  %v21415_v24 = vpop.f32.mrb[116].mxu1 }
0x23c4   : > { %21392 = vmatmul.mubr.msk.f32.gmra.mrb[112].mxu0 %vm337_vm2, %v9240_v2  ;;  %v9448_v53 = vpop.f32.mrb[117].mxu1  ;;  %v24694_v41 = vadd.f32 %v21415_v24, %v19794_v26 }
0x23c5   : > { %21418 = vmatprep.mubr.msk.f32.mxu0 %vm23215_vm0, %v23216_v12  ;;  %v24683_v50 = vadd.f32 %v19794_v26, %v9448_v53 }
0x245e   : > { %v21390_v63 = vpop.f32.mrb[110].mxu0 }
0x245f   : > { %v9349_v30 = vpop.f32.mrb[111].mxu0  ;;  %v24664_v28 = vadd.f32 %v21390_v63, %v19789_v10 }
0x2460   : > { %v24657_v51 = vadd.f32 %v19789_v10, %v9349_v30 }
0x2462   : > { %21417 = vmatpush3.xpose.msk.msra.mxu0 %vm411_vm3, %v24657_v51 }
0x2463   : > { %21421 = vmatprep.subr.mxu0 %v23216_v12 }
0x2465   : > { %21419 = vmatmul.mubr.msk.f32.vlgmr.msra.gmra.mrb[114].mxu0 %vm411_vm3, %v24661_v52 }
0x2466   : > { %21422 = vmatpush3.xpose.msk.msra.mxu0 %vm411_vm3, %v24664_v28  ;;  %21423 = vmatprep.mubr.msk.f32.mxu0 %vm23215_vm0, %v23216_v12 }
0x2467   : > { %21426 = vmatprep.subr.mxu0 %v23216_v12 }
0x2469   : > { %21424 = vmatmul.mubr.msk.f32.vlgmr.msra.gmra.mrb[116].mxu0 %vm411_vm3, %v24672_v33 }
0x246a   : > { %21428 = vmatprep.mubr.msk.f32.mxu0 %vm23215_vm0, %v23216_v12 }
0x2497   : > { %v21393_v49 = vpop.f32.mrb[112].mxu0 }
0x2498   : > { %v9359_v60 = vpop.f32.mrb[113].mxu0  ;;  %v24686_v61 = vadd.f32 %v21393_v49, %v19789_v10 }
0x2499   : > { %v24679_v0 = vadd.f32 %v19789_v10, %v9359_v60 }
0x249b   : > { %21427 = vmatpush3.xpose.msk.msra.mxu0 %vm411_vm3, %v24679_v0 }
0x249c   : > { %21431 = vmatprep.subr.mxu0 %v23216_v12 }
0x249e   : > { %21429 = vmatmul.mubr.msk.f32.vlgmr.msra.gmra.mrb[118].mxu0 %vm411_vm3, %v24683_v50 }
0x249f   : > { %21432 = vmatpush3.xpose.msk.msra.mxu0 %vm411_vm3, %v24686_v61  ;;  %21433 = vmatprep.mubr.msk.f32.mxu0 %vm23215_vm0, %v23216_v12 }
0x24a0   : > { %21441 = vmatprep.subr.mxu0 %v23216_v12 }
0x24a2   : > { %21434 = vmatmul.mubr.msk.f32.vlgmr.msra.gmra.mrb[120].mxu0 %vm411_vm3, %v24694_v41 }
0x24a3   : > { %21443 = vmatprep.mubr.msk.f32.mxu0 %vm23215_vm0, %v23216_v12 }
0x2538   : > { %v9529_v48 = vpop.f32.mrb[114].mxu0 }
0x2539   : > { %v9761_v4 = vmul.f32 0.125, %v9529_v48  ;;  %v21420_v7 = vpop.f32.mrb[115].mxu0 }
0x253b   : > { %v9765_v9 = vsel %vm711_vm4, %v9761_v4, -inf }
0x253c   : > { %9766 = vmax.xlane.f32.xlu1 %v9765_v9  ;;  %v9605_v11 = vpop.f32.mrb[116].mxu0 }
0x253d   : > { %v9762_v18 = vmul.f32 0.125, %v9605_v11  ;;  %v21425_v13 = vpop.f32.mrb[117].mxu0 }
0x253f   : > { %v9768_v14 = vsel %vm711_vm4, %v9762_v18, -inf }
0x2540   : > { %9769 = vmax.xlane.f32.xlu0 %v9768_v14 }
0x254d   : > { %9809 = vrot.lane.b32.xlu1 %v24657_v51, %s23217_s30 }
0x2551   : > { %9961 = vrot.lane.b32.xlu1 %v24679_v0, %s23217_s30 }
0x2555   : > { %10037 = vrot.lane.b32.xlu1 %v24686_v61, %s23217_s30 }
0x2559   : > { %10119 = vrot.lane.b32.xlu1 %v24657_v51, %s23218_s5 }
0x255d   : > { %10117 = vrot.lane.b32.xlu1 %v24661_v52, %s23218_s5 }
0x2571   : > { %v9681_v15 = vpop.f32.mrb[118].mxu0 }
0x2572   : > { %v9763_v38 = vmul.f32 0.125, %v9681_v15  ;;  %v21430_v6 = vpop.f32.mrb[119].mxu0 }
0x2574   : > { %v9771_v19 = vsel %vm711_vm4, %v9763_v38, -inf }
0x2575   : > { %9772 = vmax.xlane.f32.xlu0 %v9771_v19  ;;  %v9757_v36 = vpop.f32.mrb[120].mxu0 }
0x2576   : > { %v9764_v37 = vmul.f32 0.125, %v9757_v36  ;;  %v21435_v20 = vpop.f32.mrb[121].mxu0 }
0x2578   : > { %v9774_v27 = vsel %vm711_vm4, %v9764_v37, -inf }
0x2579   : > { %9775 = vmax.xlane.f32.xlu0 %v9774_v27 }
0x258f   : > { %9885 = vrot.lane.b32.xlu0 %v24664_v28, %s23217_s30 }
0x2593   : > { %10197 = vrot.lane.b32.xlu0 %v24664_v28, %s23218_s5 }
0x25c9   : > { %v9767_v5 = vpop.xlane.xlu1 %9766 }
0x25ca   : > { %v9777_v21 = vsub.f32 %v9761_v4, %v9767_v5 }
0x25cc   : > { %v9781_v23 = vmul.f32 1.442695, %v9777_v21 }
0x25cd   : > { %v9810_v25 = vpop.permute.xlu1 %9809  ;;  %v9770_v29 = vpop.xlane.xlu0 %9769 }
0x25ce   : > { %22988 = vpow2.f32 %v9781_v23  ;;  %v9778_v39 = vsub.f32 %v9762_v18, %v9770_v29  ;;  %21437 = vmatpush3.msra.mxu1 %v9810_v25 }
0x25cf   : > { %21446 = vmatprep.subr.mxu1 %v23216_v12 }
0x25d0   : > { %v9783_v8 = vmul.f32 1.442695, %v9778_v39 }
0x25d1   : > { %v9962_v17 = vpop.permute.xlu1 %9961 }
0x25d2   : > { %22990 = vpow2.f32 %v9783_v8 }
0x25d5   : > { %v10038_v16 = vpop.permute.xlu1 %10037 }
0x25d8   : > { %v22989_v43 = vpop.eup %22988 }
0x25d9   : > { %v9789_v47 = vsel %vm711_vm4, %v22989_v43, 0.0  ;;  %v10120_v34 = vpop.permute.xlu1 %10119 }
0x25da   : > { %9790 = vadd.xlane.f32.xlu1 %v9789_v47 }
0x25dc   : > { %v22991_v56 = vpop.eup %22990 }
0x25dd   : > { %v9792_v58 = vsel %vm711_vm4, %v22991_v56, 0.0  ;;  %v10118_v62 = vpop.permute.xlu1 %10117 }
0x25de   : > { %9793 = vadd.xlane.f32.xlu0 %v9792_v58 }
0x2602   : > { %v9773_v54 = vpop.xlane.xlu0 %9772 }
0x2603   : > { %v9779_v59 = vsub.f32 %v9763_v38, %v9773_v54 }
0x2605   : > { %v9785_v31 = vmul.f32 1.442695, %v9779_v59 }
0x2606   : > { %v9776_v32 = vpop.xlane.xlu0 %9775 }
0x2607   : > { %22992 = vpow2.f32 %v9785_v31  ;;  %v9780_v35 = vsub.f32 %v9764_v37, %v9776_v32 }
0x2609   : > { %v9787_v40 = vmul.f32 1.442695, %v9780_v35 }
0x260a   : > { %v9886_v42 = vpop.permute.xlu0 %9885 }
0x260b   : > { %22994 = vpow2.f32 %v9787_v40  ;;  %21442 = vmatpush3.msra.mxu0 %v9886_v42 }
0x260c   : > { %21451 = vmatprep.subr.mxu0 %v23216_v12 }
0x260e   : > { %v10198_v1 = vpop.permute.xlu0 %10197 }
0x2611   : > { %v22993_v44 = vpop.eup %22992 }
0x2612   : > { %v9795_v57 = vsel %vm711_vm4, %v22993_v44, 0.0 }
0x2613   : > { %9796 = vadd.xlane.f32.xlu1 %v9795_v57 }
0x2615   : > { %v22995_v45 = vpop.eup %22994 }
0x2616   : > { %v9798_v46 = vsel %vm711_vm4, %v22995_v45, 0.0 }
0x2617   : > { %9799 = vadd.xlane.f32.xlu0 %v9798_v46 }
0x2624   : > { %10275 = vrot.lane.b32.xlu1 %v24679_v0, %s23218_s5 }
0x2628   : > { %10273 = vrot.lane.b32.xlu1 %v24683_v50, %s23218_s5 }
0x262d   : > { %10195 = vrot.lane.b32.xlu0 %v24672_v33, %s23218_s5 }
0x2631   : > { %10353 = vrot.lane.b32.xlu0 %v24686_v61, %s23218_s5 }
0x2635   : > { %10351 = vrot.lane.b32.xlu0 %v24694_v41, %s23218_s5 }
0x2667   : > { %v9791_v22 = vpop.xlane.xlu1 %9790 }
0x2668   : > { %22996 = vrcp.f32 %v9791_v22 }
0x266b   : > { %v9794_v55 = vpop.xlane.xlu0 %9793 }
0x266c   : > { %22998 = vrcp.f32 %v9794_v55 }
0x2672   : > { %v22997_v2 = vpop.eup %22996 }
0x2673   : > { %v9802_v24 = vmul.f32 %v22997_v2, %v22989_v43 }
0x2675   : > { %21439 = vmatmul.mubr.msk.f32.vlgmr.msra.gmra.mrb[118].mxu1 %vm711_vm4, %v9802_v24 }
0x2676   : > { %v22999_v53 = vpop.eup %22998  ;;  %21447 = vmatpush3.msra.mxu1 %v9962_v17  ;;  %21448 = vmatprep.mubr.msk.f32.mxu1 %vm23215_vm0, %v23216_v12 }
0x2677   : > { %v9804_v10 = vmul.f32 %v22999_v53, %v22991_v56  ;;  %21456 = vmatprep.subr.mxu1 %v23216_v12 }
0x2679   : > { %21444 = vmatmul.mubr.msk.f32.vlgmr.msra.gmra.mrb[122].mxu0 %vm711_vm4, %v9804_v10 }
0x267a   : > { %21452 = vmatpush3.msra.mxu0 %v10038_v16  ;;  %21453 = vmatprep.mubr.msk.f32.mxu0 %vm23215_vm0, %v23216_v12 }
0x267b   : > { %21461 = vmatprep.subr.mxu0 %v23216_v12 }
0x26a0   : > { %v9797_v63 = vpop.xlane.xlu1 %9796 }
0x26a1   : > { %23000 = vrcp.f32 %v9797_v63 }
0x26a4   : > { %v9800_v30 = vpop.xlane.xlu0 %9799  ;;  %v10276_v4 = vpop.permute.xlu1 %10275 }
0x26a5   : > { %23002 = vrcp.f32 %v9800_v30 }
0x26a8   : > { %v10196_v60 = vpop.permute.xlu0 %10195  ;;  %v10274_v11 = vpop.permute.xlu1 %10273 }
0x26ab   : > { %v23001_v26 = vpop.eup %23000 }
0x26ac   : > { %v9806_v49 = vmul.f32 %v23001_v26, %v22993_v44  ;;  %v10354_v9 = vpop.permute.xlu0 %10353 }
0x26ae   : > { %21449 = vmatmul.mubr.msk.f32.vlgmr.msra.gmra.mrb[120].mxu1 %vm711_vm4, %v9806_v49 }
0x26af   : > { %v23003_v48 = vpop.eup %23002  ;;  %21457 = vmatpush3.xpose.msk.msra.mxu1 %vm411_vm3, %v10120_v34  ;;  %21458 = vmatprep.mubr.msk.f32.mxu1 %vm23215_vm0, %v23216_v12 }
0x26b0   : > { %21466 = vmatprep.subr.mxu1 %v23216_v12  ;;  %v9808_v7 = vmul.f32 %v23003_v48, %v22995_v45  ;;  %v10352_v18 = vpop.permute.xlu0 %10351 }
0x26b2   : > { %21454 = vmatmul.mubr.msk.f32.vlgmr.msra.gmra.mrb[124].mxu0 %vm711_vm4, %v9808_v7  ;;  %21459 = vmatmul.mubr.msk.f32.vlgmr.msra.gmra.mrb[122].mxu1 %vm411_vm3, %v10118_v62 }
0x26b3   : > { %21462 = vmatpush3.xpose.msk.msra.mxu0 %vm411_vm3, %v10198_v1  ;;  %21467 = vmatpush3.xpose.msk.msra.mxu1 %vm411_vm3, %v10276_v4 }
0x26b4   : > { %21463 = vmatprep.mubr.msk.f32.mxu0 %vm23215_vm0, %v23216_v12  ;;  %21468 = vmatprep.mubr.msk.f32.mxu1 %vm23215_vm0, %v23216_v12 }
0x26b5   : > { %21471 = vmatprep.subr.mxu0 %v23216_v12  ;;  %21476 = vmatprep.subr.mxu1 %v23216_v12 }
0x26b6   : > { %21464 = vmatmul.mubr.msk.f32.vlgmr.msra.gmra.mrb[126].mxu0 %vm411_vm3, %v10196_v60  ;;  %21469 = vmatmul.mubr.msk.f32.vlgmr.msra.gmra.mrb[124].mxu1 %vm411_vm3, %v10274_v11 }
0x26b7   : > { %21472 = vmatpush3.xpose.msk.msra.mxu0 %vm411_vm3, %v10354_v9  ;;  %21473 = vmatprep.mubr.msk.f32.mxu0 %vm23215_vm0, %v23216_v12 }
0x26b8   : > { %21481 = vmatprep.subr.mxu0 %v23216_v12  ;;  %21478 = vmatprep.mubr.msk.f32.mxu1 %vm23215_vm0, %v23216_v12 }
0x26ba   : > { %21474 = vmatmul.mubr.msk.f32.vlgmr.msra.gmra.mrb[128].mxu0 %vm411_vm3, %v10352_v18 }
0x26bb   : > { %21483 = vmatprep.mubr.msk.f32.mxu0 %vm23215_vm0, %v23216_v12 }
0x2748   : > { %v24769_v13 = vpop.f32.mrb[118].mxu1 }
0x2749   : > { %v21440_v14 = vpop.f32.mrb[119].mxu1 }
0x274c   : > { %v24771_v15 = vpop.f32.mrb[122].mxu0 }
0x274d   : > { %v21445_v38 = vpop.f32.mrb[123].mxu0 }
0x2781   : > { %v24773_v6 = vpop.f32.mrb[120].mxu1 }
0x2782   : > { %v21450_v19 = vpop.f32.mrb[121].mxu1 }
0x2785   : > { %v24775_v36 = vpop.f32.mrb[124].mxu0  ;;  %v10191_v37 = vpop.f32.mrb[122].mxu1 }
0x2786   : > { %v10429_v20 = vmul.f32 0.125, %v10191_v37  ;;  %v21455_v27 = vpop.f32.mrb[125].mxu0  ;;  %v21460_v5 = vpop.f32.mrb[123].mxu1 }
0x2788   : > { %v10433_v21 = vsel %vm711_vm4, %v10429_v20, -inf }
0x2789   : > { %10434 = vmax.xlane.f32.xlu1 %v10433_v21  ;;  %v10269_v23 = vpop.f32.mrb[126].mxu0  ;;  %v10347_v25 = vpop.f32.mrb[124].mxu1 }
0x278a   : > { %v10430_v29 = vmul.f32 0.125, %v10269_v23  ;;  %v21465_v39 = vpop.f32.mrb[127].mxu0  ;;  %v21470_v8 = vpop.f32.mrb[125].mxu1  ;;  %v10431_v43 = vmul.f32 0.125, %v10347_v25 }
0x278c   : > { %v10436_v47 = vsel %vm711_vm4, %v10430_v29, -inf  ;;  %v10439_v59 = vsel %vm711_vm4, %v10431_v43, -inf }
0x278d   : > { %10437 = vmax.xlane.f32.xlu0 %v10436_v47  ;;  %v10425_v56 = vpop.f32.mrb[128].mxu0 }
0x278e   : > { %v21475_v58 = vpop.f32.mrb[129].mxu0  ;;  %v10432_v54 = vmul.f32 0.125, %v10425_v56 }
0x2790   : > { %v10442_v31 = vsel %vm711_vm4, %v10432_v54, -inf }
0x2791   : > { %10440 = vmax.xlane.f32.xlu0 %v10439_v59 }
0x2795   : > { %10443 = vmax.xlane.f32.xlu0 %v10442_v31 }
0x279a   : > { %10477 = vrot.lane.b32.xlu1 %v24657_v51, %s23219_s6 }
0x279e   : > { %10629 = vrot.lane.b32.xlu1 %v24679_v0, %s23219_s6 }
0x27a2   : > { %10705 = vrot.lane.b32.xlu1 %v24686_v61, %s23219_s6 }
0x27a6   : > { %10803 = vrot.lane.b32.xlu1 %v24657_v51, %s23220_s7 }
0x27aa   : > { %10801 = vrot.lane.b32.xlu1 %v24661_v52, %s23220_s7 }
0x27ab   : > { %10553 = vrot.lane.b32.xlu0 %v24664_v28, %s23219_s6 }
0x27af   : > { %10881 = vrot.lane.b32.xlu0 %v24664_v28, %s23220_s7 }
0x2816   : > { %v10435_v32 = vpop.xlane.xlu1 %10434 }
0x2817   : > { %v10445_v35 = vsub.f32 %v10429_v20, %v10435_v32 }
0x2819   : > { %v10449_v40 = vmul.f32 1.442695, %v10445_v35 }
0x281a   : > { %v10478_v42 = vpop.permute.xlu1 %10477  ;;  %v10438_v44 = vpop.xlane.xlu0 %10437 }
0x281b   : > { %23004 = vpow2.f32 %v10449_v40  ;;  %v10446_v57 = vsub.f32 %v10430_v29, %v10438_v44  ;;  %21477 = vmatpush3.msra.mxu1 %v10478_v42 }
0x281c   : > { %21486 = vmatprep.subr.mxu1 %v23216_v12 }
0x281d   : > { %v10451_v45 = vmul.f32 1.442695, %v10446_v57 }
0x281e   : > { %v10441_v46 = vpop.xlane.xlu0 %10440  ;;  %v10630_v49 = vpop.permute.xlu1 %10629 }
0x281f   : > { %23006 = vpow2.f32 %v10451_v45  ;;  %v10447_v17 = vsub.f32 %v10431_v43, %v10441_v46 }
0x2821   : > { %v10453_v16 = vmul.f32 1.442695, %v10447_v17 }
0x2822   : > { %v10444_v34 = vpop.xlane.xlu0 %10443  ;;  %v10706_v60 = vpop.permute.xlu1 %10705 }
0x2823   : > { %23008 = vpow2.f32 %v10453_v16  ;;  %v10448_v62 = vsub.f32 %v10432_v54, %v10444_v34 }
0x2825   : > { %v23005_v1 = vpop.eup %23004  ;;  %v10455_v22 = vmul.f32 1.442695, %v10448_v62 }
0x2826   : > { %v10554_v55 = vpop.permute.xlu0 %10553  ;;  %v10457_v2 = vsel %vm711_vm4, %v23005_v1, 0.0  ;;  %v10804_v48 = vpop.permute.xlu1 %10803 }
0x2827   : > { %23010 = vpow2.f32 %v10455_v22  ;;  %10458 = vadd.xlane.f32.xlu1 %v10457_v2  ;;  %21482 = vmatpush3.msra.mxu0 %v10554_v55 }
0x2828   : > { %21491 = vmatprep.subr.mxu0 %v23216_v12 }
0x2829   : > { %v23007_v24 = vpop.eup %23006 }
0x282a   : > { %v10460_v53 = vsel %vm711_vm4, %v23007_v24, 0.0  ;;  %v10802_v4 = vpop.permute.xlu1 %10801  ;;  %v10882_v7 = vpop.permute.xlu0 %10881 }
0x282b   : > { %10461 = vadd.xlane.f32.xlu0 %v10460_v53 }
0x282d   : > { %v23009_v10 = vpop.eup %23008 }
0x282e   : > { %v10463_v63 = vsel %vm711_vm4, %v23009_v10, 0.0 }
0x282f   : > { %10464 = vadd.xlane.f32.xlu1 %v10463_v63 }
0x2831   : > { %v23011_v30 = vpop.eup %23010 }
0x2832   : > { %v10466_v26 = vsel %vm711_vm4, %v23011_v30, 0.0 }
0x2833   : > { %10467 = vadd.xlane.f32.xlu0 %v10466_v26 }
0x2840   : > { %10959 = vrot.lane.b32.xlu1 %v24679_v0, %s23220_s7 }
0x2844   : > { %10957 = vrot.lane.b32.xlu1 %v24683_v50, %s23220_s7 }
0x2848   : > { %11161 = vrot.lane.b32.xlu1 %v24657_v51, %s23221_s8 }
0x2849   : > { %10879 = vrot.lane.b32.xlu0 %v24672_v33, %s23220_s7 }
0x284d   : > { %11037 = vrot.lane.b32.xlu0 %v24686_v61, %s23220_s7 }
0x2851   : > { %11035 = vrot.lane.b32.xlu0 %v24694_v41, %s23220_s7 }
0x28b4   : > { %v10459_v9 = vpop.xlane.xlu1 %10458 }
0x28b5   : > { %23012 = vrcp.f32 %v10459_v9 }
0x28b8   : > { %v10462_v11 = vpop.xlane.xlu0 %10461 }
0x28b9   : > { %23014 = vrcp.f32 %v10462_v11 }
0x28bc   : > { %v10465_v18 = vpop.xlane.xlu1 %10464 }
0x28bd   : > { %23016 = vrcp.f32 %v10465_v18 }
0x28bf   : > { %v23013_v14 = vpop.eup %23012 }
0x28c0   : > { %v10468_v38 = vpop.xlane.xlu0 %10467  ;;  %v10470_v19 = vmul.f32 %v23013_v14, %v23005_v1  ;;  %v10960_v27 = vpop.permute.xlu1 %10959 }
0x28c1   : > { %23018 = vrcp.f32 %v10468_v38 }
0x28c2   : > { %21479 = vmatmul.mubr.msk.f32.vlgmr.msra.gmra.mrb[126].mxu1 %vm711_vm4, %v10470_v19 }
0x28c3   : > { %v23015_v37 = vpop.eup %23014  ;;  %21487 = vmatpush3.msra.mxu1 %v10630_v49  ;;  %21488 = vmatprep.mubr.msk.f32.mxu1 %vm23215_vm0, %v23216_v12 }
0x28c4   : > { %v10472_v20 = vmul.f32 %v23015_v37, %v23007_v24  ;;  %21496 = vmatprep.subr.mxu1 %v23216_v12  ;;  %v10880_v23 = vpop.permute.xlu0 %10879  ;;  %v10958_v29 = vpop.permute.xlu1 %10957 }
0x28c6   : > { %21484 = vmatmul.mubr.msk.f32.vlgmr.msra.gmra.mrb[130].mxu0 %vm711_vm4, %v10472_v20 }
0x28c7   : > { %v23017_v5 = vpop.eup %23016  ;;  %21492 = vmatpush3.msra.mxu0 %v10706_v60  ;;  %21493 = vmatprep.mubr.msk.f32.mxu0 %vm23215_vm0, %v23216_v12 }
0x28c8   : > { %v10474_v21 = vmul.f32 %v23017_v5, %v23009_v10  ;;  %21501 = vmatprep.subr.mxu0 %v23216_v12  ;;  %v11038_v8 = vpop.permute.xlu0 %11037  ;;  %v11162_v43 = vpop.permute.xlu1 %11161 }
0x28ca   : > { %21489 = vmatmul.mubr.msk.f32.vlgmr.msra.gmra.mrb[128].mxu1 %vm711_vm4, %v10474_v21 }
0x28cb   : > { %v23019_v25 = vpop.eup %23018  ;;  %21497 = vmatpush3.xpose.msk.msra.mxu1 %vm411_vm3, %v10804_v48  ;;  %21498 = vmatprep.mubr.msk.f32.mxu1 %vm23215_vm0, %v23216_v12 }
0x28cc   : > { %21506 = vmatprep.subr.mxu1 %v23216_v12  ;;  %v10476_v39 = vmul.f32 %v23019_v25, %v23011_v30  ;;  %v11036_v47 = vpop.permute.xlu0 %11035 }
0x28ce   : > { %21494 = vmatmul.mubr.msk.f32.vlgmr.msra.gmra.mrb[132].mxu0 %vm711_vm4, %v10476_v39  ;;  %21499 = vmatmul.mubr.msk.f32.vlgmr.msra.gmra.mrb[130].mxu1 %vm411_vm3, %v10802_v4 }
0x28cf   : > { %21502 = vmatpush3.xpose.msk.msra.mxu0 %vm411_vm3, %v10882_v7  ;;  %21507 = vmatpush3.xpose.msk.msra.mxu1 %vm411_vm3, %v10960_v27 }
0x28d0   : > { %21503 = vmatprep.mubr.msk.f32.mxu0 %vm23215_vm0, %v23216_v12  ;;  %21508 = vmatprep.mubr.msk.f32.mxu1 %vm23215_vm0, %v23216_v12 }
0x28d1   : > { %21511 = vmatprep.subr.mxu0 %v23216_v12  ;;  %21516 = vmatprep.subr.mxu1 %v23216_v12 }
0x28d2   : > { %21504 = vmatmul.mubr.msk.f32.vlgmr.msra.gmra.mrb[134].mxu0 %vm411_vm3, %v10880_v23  ;;  %21509 = vmatmul.mubr.msk.f32.vlgmr.msra.gmra.mrb[132].mxu1 %vm411_vm3, %v10958_v29 }
0x28d3   : > { %21512 = vmatpush3.xpose.msk.msra.mxu0 %vm411_vm3, %v11038_v8  ;;  %21517 = vmatpush3.msra.mxu1 %v11162_v43 }
0x28d4   : > { %21513 = vmatprep.mubr.msk.f32.mxu0 %vm23215_vm0, %v23216_v12  ;;  %21521 = vmatprep.subr.mxu0 %v23216_v12 }
0x28d5   : > { %21518 = vmatprep.mubr.msk.f32.mxu1 %vm23215_vm0, %v23216_v12  ;;  %21526 = vmatprep.subr.mxu1 %v23216_v12 }
0x28d6   : > { %21514 = vmatmul.mubr.msk.f32.vlgmr.msra.gmra.mrb[136].mxu0 %vm411_vm3, %v11036_v47 }
0x28d7   : > { %21523 = vmatprep.mubr.msk.f32.mxu0 %vm23215_vm0, %v23216_v12 }
0x2995   : > { %v24848_v56 = vpop.f32.mrb[126].mxu1 }
0x2996   : > { %v21480_v58 = vpop.f32.mrb[127].mxu1 }
0x2999   : > { %v24850_v54 = vpop.f32.mrb[130].mxu0 }
0x299a   : > { %v21485_v59 = vpop.f32.mrb[131].mxu0 }
0x299d   : > { %v24852_v31 = vpop.f32.mrb[128].mxu1 }
0x299e   : > { %v21490_v32 = vpop.f32.mrb[129].mxu1 }
0x29a1   : > { %v24854_v35 = vpop.f32.mrb[132].mxu0  ;;  %v10875_v40 = vpop.f32.mrb[130].mxu1 }
0x29a2   : > { %v11113_v42 = vmul.f32 0.125, %v10875_v40  ;;  %v21495_v44 = vpop.f32.mrb[133].mxu0  ;;  %v21500_v57 = vpop.f32.mrb[131].mxu1 }
0x29a4   : > { %v11117_v45 = vsel %vm711_vm4, %v11113_v42, -inf }
0x29a5   : > { %11118 = vmax.xlane.f32.xlu1 %v11117_v45  ;;  %v10953_v46 = vpop.f32.mrb[134].mxu0  ;;  %v11031_v17 = vpop.f32.mrb[132].mxu1 }
0x29a6   : > { %v11114_v16 = vmul.f32 0.125, %v10953_v46  ;;  %v21505_v34 = vpop.f32.mrb[135].mxu0  ;;  %v21510_v62 = vpop.f32.mrb[133].mxu1  ;;  %v11115_v1 = vmul.f32 0.125, %v11031_v17 }
0x29a8   : > { %v11120_v22 = vsel %vm711_vm4, %v11114_v16, -inf  ;;  %v11123_v53 = vsel %vm711_vm4, %v11115_v1, -inf }
0x29a9   : > { %11121 = vmax.xlane.f32.xlu0 %v11120_v22  ;;  %v11109_v55 = vpop.f32.mrb[136].mxu0 }
0x29aa   : > { %v21515_v2 = vpop.f32.mrb[137].mxu0  ;;  %v11116_v24 = vmul.f32 0.125, %v11109_v55 }
0x29ac   : > { %v11126_v10 = vsel %vm711_vm4, %v11116_v24, -inf }
0x29ad   : > { %11124 = vmax.xlane.f32.xlu0 %v11123_v53 }
0x29b1   : > { %11127 = vmax.xlane.f32.xlu0 %v11126_v10 }
0x29b6   : > { %11313 = vrot.lane.b32.xlu1 %v24679_v0, %s23221_s8 }
0x29ba   : > { %11389 = vrot.lane.b32.xlu1 %v24686_v61, %s23221_s8 }
0x29be   : > { %11487 = vrot.lane.b32.xlu1 %v24657_v51, %s23222_s9 }
0x29c7   : > { %11237 = vrot.lane.b32.xlu0 %v24664_v28, %s23221_s8 }
0x2a32   : > { %v11119_v63 = vpop.xlane.xlu1 %11118 }
0x2a33   : > { %v11129_v30 = vsub.f32 %v11113_v42, %v11119_v63 }
0x2a35   : > { %v11133_v26 = vmul.f32 1.442695, %v11129_v30 }
0x2a36   : > { %v11122_v49 = vpop.xlane.xlu0 %11121  ;;  %v11314_v29 = vpop.permute.xlu1 %11313 }
0x2a37   : > { %23020 = vpow2.f32 %v11133_v26  ;;  %v11130_v60 = vsub.f32 %v11114_v16, %v11122_v49 }
0x2a39   : > { %v11135_v48 = vmul.f32 1.442695, %v11130_v60 }
0x2a3a   : > { %v11125_v4 = vpop.xlane.xlu0 %11124  ;;  %v11390_v39 = vpop.permute.xlu1 %11389 }
0x2a3b   : > { %23022 = vpow2.f32 %v11135_v48  ;;  %v11131_v19 = vsub.f32 %v11115_v1, %v11125_v4 }
0x2a3d   : > { %v11137_v37 = vmul.f32 1.442695, %v11131_v19 }
0x2a3e   : > { %v11128_v7 = vpop.xlane.xlu0 %11127  ;;  %v11488_v8 = vpop.permute.xlu1 %11487 }
0x2a3f   : > { %v11132_v20 = vsub.f32 %v11116_v24, %v11128_v7  ;;  %23024 = vpow2.f32 %v11137_v37 }
0x2a41   : > { %v23021_v9 = vpop.eup %23020  ;;  %v11139_v27 = vmul.f32 1.442695, %v11132_v20 }
0x2a42   : > { %v11238_v11 = vpop.permute.xlu0 %11237  ;;  %v11141_v18 = vsel %vm711_vm4, %v23021_v9, 0.0 }
0x2a43   : > { %11142 = vadd.xlane.f32.xlu1 %v11141_v18  ;;  %21522 = vmatpush3.msra.mxu0 %v11238_v11  ;;  %23026 = vpow2.f32 %v11139_v27 }
0x2a44   : > { %21531 = vmatprep.subr.mxu0 %v23216_v12 }
0x2a45   : > { %v23023_v14 = vpop.eup %23022 }
0x2a46   : > { %v11144_v38 = vsel %vm711_vm4, %v23023_v14, 0.0 }
0x2a47   : > { %11145 = vadd.xlane.f32.xlu0 %v11144_v38 }
0x2a49   : > { %v23025_v5 = vpop.eup %23024 }
0x2a4a   : > { %v11147_v21 = vsel %vm711_vm4, %v23025_v5, 0.0 }
0x2a4d   : > { %v23027_v23 = vpop.eup %23026 }
0x2a4e   : > { %v11150_v25 = vsel %vm711_vm4, %v23027_v23, 0.0 }
0x2a54   : > { %11485 = vrot.lane.b32.xlu1 %v24661_v52, %s23222_s9 }
0x2a5d   : > { %11565 = vrot.lane.b32.xlu0 %v24664_v28, %s23222_s9 }
0x2a78   : > { %11148 = vadd.xlane.f32.xlu1 %v11147_v21 }
0x2a7c   : > { %11151 = vadd.xlane.f32.xlu0 %v11150_v25 }
0x2a89   : > { %11643 = vrot.lane.b32.xlu1 %v24679_v0, %s23222_s9 }
0x2a8d   : > { %11641 = vrot.lane.b32.xlu1 %v24683_v50, %s23222_s9 }
0x2a92   : > { %11563 = vrot.lane.b32.xlu0 %v24672_v33, %s23222_s9 }
0x2a96   : > { %11721 = vrot.lane.b32.xlu0 %v24686_v61, %s23222_s9 }
0x2a9a   : > { %11719 = vrot.lane.b32.xlu0 %v24694_v41, %s23222_s9 }
0x2ad0   : > { %v11143_v43 = vpop.xlane.xlu1 %11142 }
0x2ad1   : > { %23028 = vrcp.f32 %v11143_v43 }
0x2ad4   : > { %v11146_v47 = vpop.xlane.xlu0 %11145  ;;  %v11486_v42 = vpop.permute.xlu1 %11485 }
0x2ad5   : > { %23030 = vrcp.f32 %v11146_v47 }
0x2ad8   : > { %v11566_v44 = vpop.permute.xlu0 %11565 }
0x2adb   : > { %v23029_v58 = vpop.eup %23028 }
0x2adc   : > { %v11154_v59 = vmul.f32 %v23029_v58, %v23021_v9 }
0x2ade   : > { %21519 = vmatmul.mubr.msk.f32.vlgmr.msra.gmra.mrb[134].mxu1 %vm711_vm4, %v11154_v59 }
0x2adf   : > { %v23031_v32 = vpop.eup %23030  ;;  %21527 = vmatpush3.msra.mxu1 %v11314_v29  ;;  %21528 = vmatprep.mubr.msk.f32.mxu1 %vm23215_vm0, %v23216_v12 }
0x2ae0   : > { %v11156_v40 = vmul.f32 %v23031_v32, %v23023_v14  ;;  %21536 = vmatprep.subr.mxu1 %v23216_v12 }
0x2ae2   : > { %21524 = vmatmul.mubr.msk.f32.vlgmr.msra.gmra.mrb[138].mxu0 %vm711_vm4, %v11156_v40 }
0x2ae3   : > { %21532 = vmatpush3.msra.mxu0 %v11390_v39  ;;  %21533 = vmatprep.mubr.msk.f32.mxu0 %vm23215_vm0, %v23216_v12 }
0x2ae4   : > { %21541 = vmatprep.subr.mxu0 %v23216_v12 }
0x2b05   : > { %v11149_v57 = vpop.xlane.xlu1 %11148 }
0x2b06   : > { %23032 = vrcp.f32 %v11149_v57 }
0x2b09   : > { %v11152_v45 = vpop.xlane.xlu0 %11151  ;;  %v11644_v62 = vpop.permute.xlu1 %11643 }
0x2b0a   : > { %23034 = vrcp.f32 %v11152_v45 }
0x2b0d   : > { %v11564_v16 = vpop.permute.xlu0 %11563  ;;  %v11642_v55 = vpop.permute.xlu1 %11641 }
0x2b10   : > { %v23033_v46 = vpop.eup %23032 }
0x2b11   : > { %v11158_v17 = vmul.f32 %v23033_v46, %v23025_v5  ;;  %v11722_v22 = vpop.permute.xlu0 %11721 }
0x2b13   : > { %21529 = vmatmul.mubr.msk.f32.vlgmr.msra.gmra.mrb[136].mxu1 %vm711_vm4, %v11158_v17 }
0x2b14   : > { %v23035_v34 = vpop.eup %23034  ;;  %21537 = vmatpush3.xpose.msk.msra.mxu1 %vm411_vm3, %v11488_v8  ;;  %21538 = vmatprep.mubr.msk.f32.mxu1 %vm23215_vm0, %v23216_v12 }
0x2b15   : > { %21546 = vmatprep.subr.mxu1 %v23216_v12  ;;  %v11160_v1 = vmul.f32 %v23035_v34, %v23027_v23  ;;  %v11720_v2 = vpop.permute.xlu0 %11719 }
0x2b17   : > { %21534 = vmatmul.mubr.msk.f32.vlgmr.msra.gmra.mrb[140].mxu0 %vm711_vm4, %v11160_v1  ;;  %21539 = vmatmul.mubr.msk.f32.vlgmr.msra.gmra.mrb[138].mxu1 %vm411_vm3, %v11486_v42 }
0x2b18   : > { %21542 = vmatpush3.xpose.msk.msra.mxu0 %vm411_vm3, %v11566_v44  ;;  %21547 = vmatpush3.xpose.msk.msra.mxu1 %vm411_vm3, %v11644_v62 }
0x2b19   : > { %21543 = vmatprep.mubr.msk.f32.mxu0 %vm23215_vm0, %v23216_v12  ;;  %21548 = vmatprep.mubr.msk.f32.mxu1 %vm23215_vm0, %v23216_v12 }
0x2b1a   : > { %21551 = vmatprep.subr.mxu0 %v23216_v12  ;;  %21556 = vmatprep.subr.mxu1 %v23216_v12 }
0x2b1b   : > { %21544 = vmatmul.mubr.msk.f32.vlgmr.msra.gmra.mrb[142].mxu0 %vm411_vm3, %v11564_v16  ;;  %21549 = vmatmul.mubr.msk.f32.vlgmr.msra.gmra.mrb[140].mxu1 %vm411_vm3, %v11642_v55 }
0x2b1c   : > { %21552 = vmatpush3.xpose.msk.msra.mxu0 %vm411_vm3, %v11722_v22  ;;  %21553 = vmatprep.mubr.msk.f32.mxu0 %vm23215_vm0, %v23216_v12 }
0x2b1d   : > { %21558 = vmatprep.mubr.msk.f32.mxu1 %vm23215_vm0, %v23216_v12  ;;  %21561 = vmatprep.subr.mxu0 %v23216_v12 }
0x2b1f   : > { %21554 = vmatmul.mubr.msk.f32.vlgmr.msra.gmra.mrb[144].mxu0 %vm411_vm3, %v11720_v2 }
0x2b20   : > { %21563 = vmatprep.mubr.msk.f32.mxu0 %vm23215_vm0, %v23216_v12 }
0x2bb1   : > { %v24921_v24 = vpop.f32.mrb[134].mxu1 }
0x2bb2   : > { %v21520_v53 = vpop.f32.mrb[135].mxu1 }
0x2bb5   : > { %v24923_v10 = vpop.f32.mrb[138].mxu0 }
0x2bb6   : > { %v21525_v63 = vpop.f32.mrb[139].mxu0 }
0x2be6   : > { %v24925_v30 = vpop.f32.mrb[136].mxu1 }
0x2be7   : > { %v21530_v26 = vpop.f32.mrb[137].mxu1 }
0x2bea   : > { %v24927_v49 = vpop.f32.mrb[140].mxu0  ;;  %v11559_v60 = vpop.f32.mrb[138].mxu1 }
0x2beb   : > { %v11797_v48 = vmul.f32 0.125, %v11559_v60  ;;  %v21535_v4 = vpop.f32.mrb[141].mxu0  ;;  %v21540_v7 = vpop.f32.mrb[139].mxu1 }
0x2bec   : > { %v9249_v7 = vld [vmem:[%s26230_s2 + $0x228] sm:$0xff] }
0x2bed   : > { %v11801_v9 = vsel %vm711_vm4, %v11797_v48, -inf }
0x2bee   : > { %11802 = vmax.xlane.f32.xlu1 %v11801_v9  ;;  %v11637_v11 = vpop.f32.mrb[142].mxu0  ;;  %v11715_v18 = vpop.f32.mrb[140].mxu1  ;;  %v9250_v9 = vld [vmem:[%s26230_s2 + $0x230] sm:$0xff] }
0x2bef   : > { %v11798_v14 = vmul.f32 0.125, %v11637_v11  ;;  %v21545_v38 = vpop.f32.mrb[143].mxu0  ;;  %v21550_v19 = vpop.f32.mrb[141].mxu1  ;;  %v11799_v37 = vmul.f32 0.125, %v11715_v18  ;;  %v9251_v11 = vld [vmem:[%s26230_s2 + $0x238] sm:$0xff]  ;;  %v22491_v18 = vpack.c.bf16 %v9250_v9, %v9249_v7 }
0x2bf0   : > { %v9253_v19 = vld [vmem:[%s26230_s2 + $0x248] sm:$0xff] }
0x2bf1   : > { %v11804_v20 = vsel %vm711_vm4, %v11798_v14, -inf  ;;  %v11807_v23 = vsel %vm711_vm4, %v11799_v37, -inf }
0x2bf2   : > { %11805 = vmax.xlane.f32.xlu0 %v11804_v20  ;;  %v11793_v27 = vpop.f32.mrb[144].mxu0 }
0x2bf3   : > { %v21555_v5 = vpop.f32.mrb[145].mxu0  ;;  %v11800_v21 = vmul.f32 0.125, %v11793_v27  ;;  %v9255_v27 = vld [vmem:[%s26230_s2 + $0x258] sm:$0xff] }
0x2bf4   : > { %v9256_v5 = vld [vmem:[%s26230_s2 + $0x260] sm:$0xff] }
0x2bf5   : > { %v11810_v25 = vsel %vm711_vm4, %v11800_v21, -inf }
0x2bf6   : > { %11808 = vmax.xlane.f32.xlu0 %v11807_v23 }
0x2bfa   : > { %11811 = vmax.xlane.f32.xlu0 %v11810_v25 }
0x2bff   : > { %11845 = vrot.lane.b32.xlu1 %v24657_v51, %s23223_s10 }
0x2c7b   : > { %v11803_v29 = vpop.xlane.xlu1 %11802 }
0x2c7c   : > { %v11813_v39 = vsub.f32 %v11797_v48, %v11803_v29 }
0x2c7e   : > { %v11817_v8 = vmul.f32 1.442695, %v11813_v39 }
0x2c7f   : > { %v11846_v43 = vpop.permute.xlu1 %11845  ;;  %v11806_v47 = vpop.xlane.xlu0 %11805 }
0x2c80   : > { %23036 = vpow2.f32 %v11817_v8  ;;  %v11814_v58 = vsub.f32 %v11798_v14, %v11806_v47  ;;  %21557 = vmatpush3.msra.mxu1 %v11846_v43  ;;  %v9252_v14 = vld [vmem:[%s26230_s2 + $0x240] sm:$0xff]  ;;  %v12306_v8 = vld [vmem:[%s26229_s1 + $0xe8] sm:$0xff]  ;;  %v12307_v43 = vld [vmem:[%s26229_s1 + $0xf0] sm:$0xff] }
0x2c81   : > { %21566 = vmatprep.subr.mxu1 %v23216_v12  ;;  %v22495_v38 = vpack.c.bf16 %v9252_v14, %v9251_v11  ;;  %v12308_v47 = vld [vmem:[%s26229_s1 + $0xf8] sm:$0xff] }
0x2c82   : > { %v11819_v59 = vmul.f32 1.442695, %v11814_v58 }
0x2c83   : > { %v11809_v32 = vpop.xlane.xlu0 %11808 }
0x2c84   : > { %23038 = vpow2.f32 %v11819_v59  ;;  %v11815_v40 = vsub.f32 %v11799_v37, %v11809_v32  ;;  %v9254_v37 = vld [vmem:[%s26230_s2 + $0x250] sm:$0xff]  ;;  %v22507_v59 = vpack.c.bf16 %v12307_v43, %v12306_v8  ;;  %v12294_v8 = vld [vmem:[%s26230_s2 + $0x108] sm:$0xff] }
0x2c85   : > { %v22499_v20 = vpack.c.bf16 %v9254_v37, %v9253_v19 }
0x2c86   : > { %v11821_v42 = vmul.f32 1.442695, %v11815_v40 }
0x2c87   : > { %v11812_v44 = vpop.xlane.xlu0 %11811 }
0x2c88   : > { %23040 = vpow2.f32 %v11821_v42  ;;  %v11816_v57 = vsub.f32 %v11800_v21, %v11812_v44  ;;  %v22503_v21 = vpack.c.bf16 %v9256_v5, %v9255_v27  ;;  %v12311_v5 = vld [vmem:[%s26229_s1 + $0x110] sm:$0xff] }
0x2c8a   : > { %v23037_v45 = vpop.eup %23036  ;;  %v11823_v51 = vmul.f32 1.442695, %v11816_v57 }
0x2c8b   : > { %v11825_v46 = vsel %vm711_vm4, %v23037_v45, 0.0 }
0x2c8c   : > { %23042 = vpow2.f32 %v11823_v51  ;;  %11826 = vadd.xlane.f32.xlu1 %v11825_v46 }
0x2c8e   : > { %v23039_v17 = vpop.eup %23038 }
0x2c8f   : > { %v11828_v16 = vsel %vm711_vm4, %v23039_v17, 0.0 }
0x2c90   : > { %11829 = vadd.xlane.f32.xlu0 %v11828_v16 }
0x2c92   : > { %v23041_v34 = vpop.eup %23040 }
0x2c93   : > { %v11831_v62 = vsel %vm711_vm4, %v23041_v34, 0.0 }
0x2c94   : > { %11832 = vadd.xlane.f32.xlu1 %v11831_v62 }
0x2c96   : > { %v23043_v1 = vpop.eup %23042 }
0x2c97   : > { %v11834_v22 = vsel %vm711_vm4, %v23043_v1, 0.0 }
0x2c98   : > { %11835 = vadd.xlane.f32.xlu0 %v11834_v22 }
0x2ca5   : > { %11997 = vrot.lane.b32.xlu1 %v24679_v0, %s23223_s10 }
0x2ca9   : > { %12073 = vrot.lane.b32.xlu1 %v24686_v61, %s23223_s10 }
0x2cad   : > { %10785 = vrot.lane.b32.xlu1 %v24848_v56, %s23223_s10 }
0x2cae   : > { %11921 = vrot.lane.b32.xlu0 %v24664_v28, %s23223_s10 }
0x2cb1   : > { %11469 = vrot.lane.b32.xlu1 %v24921_v24, %s23221_s8 }
0x2cb2   : > { %10787 = vrot.lane.b32.xlu0 %v24850_v54, %s23223_s10 }
0x2cb6   : > { %11471 = vrot.lane.b32.xlu0 %v24923_v10, %s23221_s8 }
0x2d19   : > { %v11827_v55 = vpop.xlane.xlu1 %11826 }
0x2d1a   : > { %23044 = vrcp.f32 %v11827_v55 }
0x2d1d   : > { %v11830_v0 = vpop.xlane.xlu0 %11829 }
0x2d1e   : > { %23046 = vrcp.f32 %v11830_v0  ;;  %v12290_v0 = vld [vmem:[%s26230_s2 + $0xe8] sm:$0xff] }
0x2d21   : > { %v11833_v61 = vpop.xlane.xlu1 %11832 }
0x2d22   : > { %23048 = vrcp.f32 %v11833_v61  ;;  %v10114_v61 = vadd.f32 %v24771_v15, %v24672_v33 }
0x2d24   : > { %v23045_v2 = vpop.eup %23044 }
0x2d25   : > { %v11998_v56 = vpop.permute.xlu1 %11997  ;;  %v11836_v53 = vpop.xlane.xlu0 %11835  ;;  %v11838_v63 = vmul.f32 %v23045_v2, %v23037_v45 }
0x2d26   : > { %23050 = vrcp.f32 %v11836_v53 }
0x2d27   : > { %21559 = vmatmul.mubr.msk.f32.vlgmr.msra.gmra.mrb[142].mxu1 %vm711_vm4, %v11838_v63 }
0x2d28   : > { %v23047_v28 = vpop.eup %23046  ;;  %21567 = vmatpush3.msra.mxu1 %v11998_v56  ;;  %21568 = vmatprep.mubr.msk.f32.mxu1 %vm23215_vm0, %v23216_v12 }
0x2d29   : > { %v11922_v54 = vpop.permute.xlu0 %11921  ;;  %v11840_v24 = vmul.f32 %v23047_v28, %v23039_v17  ;;  %v12074_v10 = vpop.permute.xlu1 %12073  ;;  %22492 = vmatprep.subr.bf16.mxu1 %v22491_v18 }
0x2d2a   : > { %21562 = vmatpush3.msra.mxu0 %v11922_v54 }
0x2d2b   : > { %21564 = vmatmul.mubr.msk.f32.vlgmr.msra.gmra.mrb[146].mxu0 %vm711_vm4, %v11840_v24  ;;  %21571 = vmatprep.subr.mxu0 %v23216_v12 }
0x2d2c   : > { %v23049_v26 = vpop.eup %23048  ;;  %21572 = vmatpush3.msra.mxu0 %v12074_v10  ;;  %21573 = vmatprep.mubr.msk.f32.mxu0 %vm23215_vm0, %v23216_v12 }
0x2d2d   : > { %v11842_v60 = vmul.f32 %v23049_v26, %v23041_v34  ;;  %22508 = vmatprep.subr.bf16.mxu0 %v22507_v59  ;;  %v10788_v57 = vpop.permute.xlu0 %10787 }
0x2d2e   : > { %v10798_v62 = vadd.f32 %v10788_v57, %v24672_v33 }
0x2d2f   : > { %21569 = vmatmul.mubr.msk.f32.vlgmr.msra.gmra.mrb[144].mxu1 %vm711_vm4, %v11842_v60 }
0x2d30   : > { %v23051_v48 = vpop.eup %23050  ;;  %22494 = vmatpush3.bf16.msra.mxu1 %v22491_v18  ;;  %v12170_v53 = vsel %vm411_vm3, %v10114_v61, %v10798_v62 }
0x2d31   : > { %v11844_v4 = vmul.f32 %v23051_v48, %v23043_v1  ;;  %22496 = vmatprep.subr.bf16.mxu1 %v22495_v38  ;;  %v11472_v17 = vpop.permute.xlu0 %11471 }
0x2d32   : > { %v11482_v22 = vadd.f32 %v11472_v17, %v24672_v33 }
0x2d33   : > { %21574 = vmatmul.mubr.msk.f32.vlgmr.msra.gmra.mrb[148].mxu0 %vm711_vm4, %v11844_v4 }
0x2d34   : > { %22498 = vmatpush3.bf16.msra.mxu1 %v22495_v38  ;;  %22510 = vmatpush3.bf16.msra.mxu0 %v22507_v59  ;;  %v12174_v54 = vsel %vm3084_vm5, %v12170_v53, %v11482_v22  ;;  %v10116_v38 = vadd.f32 %v24775_v36, %v24694_v41  ;;  %v12310_v36 = vld [vmem:[%s26229_s1 + $0x108] sm:$0xff]  ;;  %v12296_v59 = vld [vmem:[%s26230_s2 + $0x118] sm:$0xff] }
0x2d35   : > { %22500 = vmatprep.subr.bf16.mxu1 %v22499_v20 }
0x2d38   : > { %22502 = vmatpush3.bf16.msra.mxu1 %v22499_v20 }
0x2d39   : > { %22504 = vmatprep.subr.bf16.mxu1 %v22503_v21 }
0x2d3c   : > { %22506 = vmatpush3.bf16.msra.mxu1 %v22503_v21  ;;  %v22515_v21 = vpack.c.bf16 %v12311_v5, %v12310_v36 }
0x2d3d   : > { %22523 = vmatprep.subr.bf16.mxu1 %v23214_v3 }
0x2dfa   : > { %v11917_v23 = vpop.f32.mrb[142].mxu1 }
0x2dfb   : > { %v21560_v25 = vpop.f32.mrb[143].mxu1  ;;  %12153 = vrot.lane.b32.xlu1 %v11917_v23, %s23219_s6  ;;  %v12293_v23 = vld [vmem:[%s26230_s2 + $0x100] sm:$0xff] }
0x2dfe   : > { %v11993_v29 = vpop.f32.mrb[146].mxu0 }
0x2dff   : > { %10789 = vrot.lane.b32.xlu1 %v24852_v31, %s23223_s10  ;;  %12155 = vrot.lane.b32.xlu0 %v11993_v29, %s23219_s6  ;;  %v21565_v39 = vpop.f32.mrb[147].mxu0  ;;  %v12309_v31 = vld [vmem:[%s26229_s1 + $0x100] sm:$0xff]  ;;  %v12312_v29 = vld [vmem:[%s26229_s1 + $0x118] sm:$0xff] }
0x2e00   : > { %v22511_v40 = vpack.c.bf16 %v12309_v31, %v12308_v47  ;;  %v12313_v39 = vld [vmem:[%s26229_s1 + $0x120] sm:$0xff]  ;;  %v12295_v47 = vld [vmem:[%s26230_s2 + $0x110] sm:$0xff] }
0x2e01   : > { %v22519_v43 = vpack.c.bf16 %v12313_v39, %v12312_v29  ;;  %v12297_v31 = vld [vmem:[%s26230_s2 + $0x120] sm:$0xff] }
0x2e02   : > { %v12069_v58 = vpop.f32.mrb[144].mxu1  ;;  %22512 = vmatprep.subr.bf16.mxu0 %v22511_v40 }
0x2e03   : > { %11473 = vrot.lane.b32.xlu1 %v24925_v30, %s23221_s8  ;;  %v21570_v32 = vpop.f32.mrb[145].mxu1  ;;  %10791 = vrot.lane.b32.xlu0 %v24854_v35, %s23223_s10  ;;  %v23203_v30 = vld [vmem:[%s26231_s3 + $0x3] ss:$0 sm:$0xff]  ;;  %v10786_v35 = vpop.permute.xlu1 %10785 }
0x2e04   : > { %22514 = vmatpush3.bf16.msra.mxu0 %v22511_v40  ;;  %v10797_v51 = vadd.f32 %v10786_v35, %v24661_v52  ;;  %v22533_v32 = vpack.c.bf16 %v12297_v31, %v12296_v59  ;;  %v207_v40 = vld [vmem:[%s26230_s2 + $0x2f8] sm:$0x7] }
0x2e05   : > { %22516 = vmatprep.subr.bf16.mxu0 %v22515_v21 }
0x2e06   : > { %v12145_v42 = vpop.f32.mrb[148].mxu0 }
0x2e07   : > { %12157 = vrot.lane.b32.xlu1 %v12069_v58, %s23219_s6  ;;  %11475 = vrot.lane.b32.xlu0 %v24927_v49, %s23221_s8  ;;  %v21575_v44 = vpop.f32.mrb[149].mxu0  ;;  %v11470_v45 = vpop.permute.xlu1 %11469  ;;  %v10113_v49 = vadd.f32 %v24769_v13, %v24661_v52  ;;  %v12291_v13 = vld [vmem:[%s26230_s2 + $0xf0] sm:$0xff]  ;;  %v22530_v58 = vpack.c.bf16 %v12295_v47, %v12294_v8 }
0x2e08   : > { %v11481_v46 = vadd.f32 %v11470_v45, %v24661_v52  ;;  %v22524_v28 = vpack.c.bf16 %v12291_v13, %v12290_v0  ;;  %22518 = vmatpush3.bf16.msra.mxu0 %v22515_v21 }
0x2e09   : > { %v12169_v34 = vsel %vm411_vm3, %v10113_v49, %v10797_v51  ;;  %22520 = vmatprep.subr.bf16.mxu0 %v22519_v43 }
0x2e0a   : > { %v12173_v55 = vsel %vm3084_vm5, %v12169_v34, %v11481_v46 }
0x2e0b   : > { %12159 = vrot.lane.b32.xlu0 %v12145_v42, %s23219_s6  ;;  %12182 = vrot.lane.b32.xlu1 %v23203_v30, %s23217_s30 }
0x2e0c   : > { %22522 = vmatpush3.bf16.msra.mxu0 %v22519_v43 }
0x2e0d   : > { %21639 = vmatprep.subr.mxu0 %v23216_v12 }
0x2e6d   : > { %v12154_v16 = vpop.permute.xlu1 %12153 }
0x2e6e   : > { %v12165_v1 = vadd.f32 %v12154_v16, %v24661_v52 }
0x2e70   : > { %v25034_v2 = vsel %vm3089_vm6, %v12173_v55, %v12165_v1 }
0x2e71   : > { %21592 = vmatprep.mubr.msk.f32.mxu1 %vm337_vm2, %v25034_v2  ;;  %v10790_v52 = vpop.permute.xlu1 %10789  ;;  %v12156_v56 = vpop.permute.xlu0 %12155 }
0x2e72   : > { %v12166_v63 = vadd.f32 %v12156_v56, %v24672_v33  ;;  %v10799_v26 = vadd.f32 %v10790_v52, %v24683_v50  ;;  %v10115_v33 = vadd.f32 %v24773_v6, %v24683_v50  ;;  %v19856_v56 = vld [vmem:[%s26231_s3 + $0x4] ss:$0 sm:$0xff] }
0x2e74   : > { %v25042_v24 = vsel %vm3089_vm6, %v12174_v54, %v12166_v63  ;;  %v12171_v7 = vsel %vm411_vm3, %v10115_v33, %v10799_v26 }
0x2e75   : > { %v11474_v10 = vpop.permute.xlu1 %11473  ;;  %21593 = vmatmul.mubr.msk.f32.vlgmr.msra.gmra.mrb[146].mxu1 %vm337_vm2, %v25042_v24  ;;  %v10792_v15 = vpop.permute.xlu0 %10791 }
0x2e76   : > { %22525 = vmatpush3.bf16.msra.mxu1 %v22524_v28  ;;  %v11483_v60 = vadd.f32 %v11474_v10, %v24683_v50  ;;  %v10800_v9 = vadd.f32 %v10792_v15, %v24694_v41 }
0x2e77   : > { %22526 = vmatprep.subr.bf16.mxu1 %v23214_v3 }
0x2e78   : > { %v12175_v14 = vsel %vm3084_vm5, %v12171_v7, %v11483_v60  ;;  %v12172_v37 = vsel %vm411_vm3, %v10116_v38, %v10800_v9 }
0x2e79   : > { %v12158_v48 = vpop.permute.xlu1 %12157  ;;  %v11476_v4 = vpop.permute.xlu0 %11475 }
0x2e7a   : > { %v12167_v11 = vadd.f32 %v12158_v48, %v24683_v50  ;;  %v11484_v18 = vadd.f32 %v11476_v4, %v24694_v41 }
0x2e7c   : > { %v12179_v19 = vsel %vm3089_vm6, %v12175_v14, %v12167_v11  ;;  %v12176_v27 = vsel %vm3084_vm5, %v12172_v37, %v11484_v18 }
0x2e7d   : > { %21595 = vmatprep.mubr.msk.f32.mxu1 %vm337_vm2, %v12179_v19  ;;  %v12160_v6 = vpop.permute.xlu0 %12159  ;;  %v12183_v42 = vpop.permute.xlu1 %12182 }
0x2e7e   : > { %v12168_v20 = vadd.f32 %v12160_v6, %v24694_v41  ;;  %v12292_v41 = vld [vmem:[%s26230_s2 + $0xf8] sm:$0xff] }
0x2e7f   : > { %v22527_v25 = vpack.c.bf16 %v12293_v23, %v12292_v41 }
0x2e80   : > { %v12180_v50 = vsel %vm3089_vm6, %v12176_v27, %v12168_v20 }
0x2e81   : > { %21596 = vmatmul.mubr.msk.f32.gmra.mrb[148].mxu1 %vm337_vm2, %v12180_v50 }
0x2e82   : > { %21636 = vmatprep.mubr.msk.f32.mxu1 %vm23215_vm0, %v23216_v12  ;;  %22528 = vmatpush3.bf16.msra.mxu1 %v22527_v25 }
0x2e83   : > { %22529 = vmatprep.subr.bf16.mxu1 %v23214_v3 }
0x2e86   : > { %22531 = vmatpush3.bf16.msra.mxu1 %v22530_v58 }
0x2e87   : > { %22532 = vmatprep.subr.bf16.mxu1 %v23214_v3 }
0x2e8a   : > { %22534 = vmatpush3.bf16.msra.mxu1 %v22533_v32 }
0x2e8b   : > { %21654 = vmatprep.subr.mxu1 %v23216_v12 }
0x2e8d   : > { %21637 = vmatmul.mubr.msk.f32.vlgmr.msra.gmra.mrb[150].mxu1 %vm337_vm2, %v207_v40 }
0x2e8e   : > { %21656 = vmatprep.mubr.msk.f32.mxu1 %vm23215_vm0, %v23216_v12 }
0x2f48   : > { %v21594_v44 = vpop.f32.mrb[146].mxu1 }
0x2f49   : > { %v12269_v30 = vadd.f32 %v21594_v44, %v12183_v42  ;;  %v12263_v35 = vpop.f32.mrb[147].mxu1 }
0x2f4a   : > { %v12264_v57 = vadd.f32 %v12263_v35, %v12183_v42 }
0x2f4b   : > { %v12283_v45 = vmax.f32 %v12269_v30, 0.0 }
0x2f4c   : > { %v12282_v51 = vmax.f32 %v12264_v57, 0.0 }
0x2f4d   : > { %v12287_v49 = vadd.f32 %v12283_v45, %v25042_v24 }
0x2f4e   : > { %v12286_v46 = vadd.f32 %v12282_v51, %v25034_v2  ;;  %v19851_v2 = vld [vmem:[%s26231_s3 + $0xa] ss:$0 sm:$0xff] }
0x2f50   : > { %21614 = vmatprep.mubr.msk.f32.mxu0 %vm337_vm2, %v12286_v46 }
0x2f51   : > { %21615 = vmatmul.mubr.msk.f32.vlgmr.msra.gmra.mrb[150].mxu0 %vm337_vm2, %v12287_v49 }
0x2f54   : > { %v21597_v17 = vpop.f32.mrb[148].mxu1 }
0x2f55   : > { %v12279_v16 = vadd.f32 %v21597_v17, %v12183_v42  ;;  %v12273_v34 = vpop.f32.mrb[149].mxu1 }
0x2f56   : > { %v12274_v62 = vadd.f32 %v12273_v34, %v12183_v42 }
0x2f57   : > { %v12285_v1 = vmax.f32 %v12279_v16, 0.0 }
0x2f58   : > { %v12284_v22 = vmax.f32 %v12274_v62, 0.0 }
0x2f59   : > { %v12289_v0 = vadd.f32 %v12285_v1, %v12180_v50 }
0x2f5a   : > { %v12288_v55 = vadd.f32 %v12284_v22, %v12179_v19 }
0x2f5c   : > { %21617 = vmatprep.mubr.msk.f32.mxu0 %vm337_vm2, %v12288_v55 }
0x2f5d   : > { %21618 = vmatmul.mubr.msk.f32.gmra.mrb[152].mxu0 %vm337_vm2, %v12289_v0 }
0x2f5e   : > { %21641 = vmatprep.mubr.msk.f32.mxu0 %vm23215_vm0, %v23216_v12 }
0x2f60   : > { %v12490_v13 = vpop.f32.mrb[150].mxu1 }
0x2f61   : > { %v21638_v61 = vpop.f32.mrb[151].mxu1  ;;  %v25123_v28 = vadd.f32 %v19856_v56, %v12490_v13 }
0x3024   : > { %v21616_v52 = vpop.f32.mrb[150].mxu0 }
0x3025   : > { %v12398_v53 = vpop.f32.mrb[151].mxu0  ;;  %v25128_v54 = vadd.f32 %v21616_v52, %v19851_v2 }
0x3026   : > { %v25121_v63 = vadd.f32 %v19851_v2, %v12398_v53 }
0x3028   : > { %21640 = vmatpush3.xpose.msk.msra.mxu0 %vm411_vm3, %v25121_v63 }
0x3029   : > { %21644 = vmatprep.subr.mxu0 %v23216_v12 }
0x302b   : > { %21642 = vmatmul.mubr.msk.f32.vlgmr.msra.gmra.mrb[154].mxu0 %vm411_vm3, %v25123_v28 }
0x302c   : > { %21645 = vmatpush3.xpose.msk.msra.mxu0 %vm411_vm3, %v25128_v54  ;;  %21646 = vmatprep.mubr.msk.f32.mxu0 %vm23215_vm0, %v23216_v12 }
0x302d   : > { %21649 = vmatprep.subr.mxu0 %v23216_v12 }
0x302f   : > { %21647 = vmatmul.mubr.msk.f32.vlgmr.msra.gmra.mrb[156].mxu0 %vm411_vm3, %v25123_v28 }
0x3030   : > { %v21619_v24 = vpop.f32.mrb[152].mxu0  ;;  %21651 = vmatprep.mubr.msk.f32.mxu0 %vm23215_vm0, %v23216_v12 }
0x3031   : > { %v25141_v10 = vadd.f32 %v21619_v24, %v19851_v2  ;;  %v12408_v15 = vpop.f32.mrb[153].mxu0 }
0x3032   : > { %v25143_v26 = vadd.f32 %v19851_v2, %v12408_v15 }
0x3033   : > { %21655 = vmatpush3.xpose.msk.msra.mxu1 %vm411_vm3, %v25141_v10 }
0x3034   : > { %21650 = vmatpush3.xpose.msk.msra.mxu0 %vm411_vm3, %v25143_v26  ;;  %21664 = vmatprep.subr.mxu1 %v23216_v12 }
0x3035   : > { %21659 = vmatprep.subr.mxu0 %v23216_v12 }
0x3036   : > { %21657 = vmatmul.mubr.msk.f32.vlgmr.msra.gmra.mrb[152].mxu1 %vm411_vm3, %v25123_v28 }
0x3037   : > { %21652 = vmatmul.mubr.msk.f32.vlgmr.msra.gmra.mrb[158].mxu0 %vm411_vm3, %v25123_v28  ;;  %21666 = vmatprep.mubr.msk.f32.mxu1 %vm23215_vm0, %v23216_v12 }
0x3038   : > { %21661 = vmatprep.mubr.msk.f32.mxu0 %vm23215_vm0, %v23216_v12 }
0x30fe   : > { %v12566_v60 = vpop.f32.mrb[154].mxu0 }
0x30ff   : > { %v12789_v33 = vmul.f32 0.125, %v12566_v60  ;;  %v21643_v48 = vpop.f32.mrb[155].mxu0 }
0x3101   : > { %v12794_v4 = vsel %vm12793_vm7, %v12789_v33, -inf }
0x3102   : > { %12795 = vmax.xlane.f32.xlu0 %v12794_v4  ;;  %v12639_v7 = vpop.f32.mrb[156].mxu0 }
0x3103   : > { %v12790_v9 = vmul.f32 0.125, %v12639_v7  ;;  %v21648_v11 = vpop.f32.mrb[157].mxu0 }
0x3105   : > { %v12797_v18 = vsel %vm12793_vm7, %v12790_v9, -inf }
0x3106   : > { %12798 = vmax.xlane.f32.xlu1 %v12797_v18 }
0x3109   : > { %v12785_v14 = vpop.f32.mrb[152].mxu1 }
0x310a   : > { %v12792_v38 = vmul.f32 0.125, %v12785_v14  ;;  %v12712_v19 = vpop.f32.mrb[158].mxu0  ;;  %v21658_v6 = vpop.f32.mrb[153].mxu1 }
0x310b   : > { %v21653_v37 = vpop.f32.mrb[159].mxu0  ;;  %v12791_v20 = vmul.f32 0.125, %v12712_v19 }
0x310c   : > { %v12803_v27 = vsel %vm12793_vm7, %v12792_v38, -inf }
0x310d   : > { %12804 = vmax.xlane.f32.xlu0 %v12803_v27  ;;  %v12800_v50 = vsel %vm12793_vm7, %v12791_v20, -inf }
0x3111   : > { %12801 = vmax.xlane.f32.xlu0 %v12800_v50 }
0x3117   : > { %12914 = vrot.lane.b32.xlu1 %v25128_v54, %s23217_s30 }
0x311b   : > { %12990 = vrot.lane.b32.xlu1 %v25143_v26, %s23217_s30 }
0x311f   : > { %13066 = vrot.lane.b32.xlu1 %v25141_v10, %s23217_s30 }
0x3127   : > { %12838 = vrot.lane.b32.xlu0 %v25121_v63, %s23217_s30 }
0x318f   : > { %v12796_v36 = vpop.xlane.xlu0 %12795 }
0x3190   : > { %v12806_v5 = vsub.f32 %v12789_v33, %v12796_v36 }
0x3192   : > { %v12810_v41 = vmul.f32 1.442695, %v12806_v5 }
0x3193   : > { %v12799_v21 = vpop.xlane.xlu1 %12798 }
0x3194   : > { %23052 = vpow2.f32 %v12810_v41  ;;  %v12807_v25 = vsub.f32 %v12790_v9, %v12799_v21 }
0x3196   : > { %v12812_v8 = vmul.f32 1.442695, %v12807_v25 }
0x3197   : > { %v12915_v23 = vpop.permute.xlu1 %12914 }
0x3198   : > { %21665 = vmatpush3.msra.mxu1 %v12915_v23 }
0x3199   : > { %21674 = vmatprep.subr.mxu1 %v23216_v12 }
0x319a   : > { %v12805_v29 = vpop.xlane.xlu0 %12804 }
0x319b   : > { %v12809_v39 = vsub.f32 %v12792_v38, %v12805_v29  ;;  %v12991_v46 = vpop.permute.xlu1 %12990 }
0x319d   : > { %v12816_v43 = vmul.f32 1.442695, %v12809_v39 }
0x319e   : > { %v23053_v47 = vpop.eup %23052  ;;  %v12802_v58 = vpop.xlane.xlu0 %12801 }
0x319f   : > { %23054 = vpow2.f32 %v12816_v43  ;;  %v12818_v59 = vsel %vm12793_vm7, %v23053_v47, 0.0  ;;  %v12808_v30 = vsub.f32 %v12791_v20, %v12802_v58  ;;  %v13067_v49 = vpop.permute.xlu1 %13066 }
0x31a0   : > { %12819 = vadd.xlane.f32.xlu0 %v12818_v59  ;;  %23056 = vpow2.f32 %v12812_v8 }
0x31a1   : > { %v12814_v35 = vmul.f32 1.442695, %v12808_v30 }
0x31a2   : > { %v12839_v31 = vpop.permute.xlu0 %12838 }
0x31a3   : > { %21660 = vmatpush3.msra.mxu0 %v12839_v31  ;;  %23058 = vpow2.f32 %v12814_v35 }
0x31a4   : > { %21669 = vmatprep.subr.mxu0 %v23216_v12 }
0x31a9   : > { %v23055_v32 = vpop.eup %23054 }
0x31aa   : > { %v12827_v40 = vsel %vm12793_vm7, %v23055_v32, 0.0  ;;  %v23057_v42 = vpop.eup %23056 }
0x31ab   : > { %12828 = vadd.xlane.f32.xlu1 %v12827_v40  ;;  %v12821_v44 = vsel %vm12793_vm7, %v23057_v42, 0.0 }
0x31ad   : > { %v23059_v57 = vpop.eup %23058 }
0x31ae   : > { %v12824_v45 = vsel %vm12793_vm7, %v23059_v57, 0.0 }
0x31af   : > { %12822 = vadd.xlane.f32.xlu1 %v12821_v44 }
0x31b6   : > { %13148 = vrot.lane.b32.xlu0 %v25121_v63, %s23218_s5 }
0x31c0   : > { %13224 = vrot.lane.b32.xlu1 %v25128_v54, %s23218_s5 }
0x31c4   : > { %13298 = vrot.lane.b32.xlu1 %v25143_v26, %s23218_s5 }
0x31d5   : > { %12825 = vadd.xlane.f32.xlu0 %v12824_v45 }
0x31eb   : > { %13146 = vrot.lane.b32.xlu0 %v25123_v28, %s23218_s5 }
0x31ef   : > { %13372 = vrot.lane.b32.xlu0 %v25141_v10, %s23218_s5 }
0x322d   : > { %v12820_v51 = vpop.xlane.xlu0 %12819 }
0x322e   : > { %23060 = vrcp.f32 %v12820_v51 }
0x3231   : > { %v13149_v61 = vpop.permute.xlu0 %13148 }
0x3238   : > { %v23061_v17 = vpop.eup %23060  ;;  %v12829_v16 = vpop.xlane.xlu1 %12828 }
0x3239   : > { %v12831_v34 = vmul.f32 %v23061_v17, %v23053_v47 }
0x323b   : > { %21662 = vmatmul.mubr.msk.f32.vlgmr.msra.gmra.mrb[160].mxu0 %vm711_vm4, %v12831_v34 }
0x323c   : > { %21670 = vmatpush3.msra.mxu0 %v12991_v46  ;;  %v12823_v62 = vpop.xlane.xlu1 %12822  ;;  %21671 = vmatprep.mubr.msk.f32.mxu0 %vm23215_vm0, %v23216_v12 }
0x323d   : > { %23062 = vrcp.f32 %v12823_v62  ;;  %21679 = vmatprep.subr.mxu0 %v23216_v12 }
0x323e   : > { %23064 = vrcp.f32 %v12829_v16 }
0x3240   : > { %v13225_v13 = vpop.permute.xlu1 %13224 }
0x3244   : > { %v13299_v15 = vpop.permute.xlu1 %13298 }
0x3247   : > { %v23063_v1 = vpop.eup %23062 }
0x3248   : > { %v12833_v22 = vmul.f32 %v23063_v1, %v23057_v42  ;;  %v23065_v55 = vpop.eup %23064 }
0x3249   : > { %v12837_v0 = vmul.f32 %v23065_v55, %v23055_v32 }
0x324a   : > { %21667 = vmatmul.mubr.msk.f32.vlgmr.msra.gmra.mrb[154].mxu1 %vm711_vm4, %v12833_v22 }
0x324b   : > { %21675 = vmatpush3.msra.mxu1 %v13067_v49  ;;  %21676 = vmatprep.mubr.msk.f32.mxu1 %vm23215_vm0, %v23216_v12 }
0x324c   : > { %21684 = vmatprep.subr.mxu1 %v23216_v12 }
0x324e   : > { %21677 = vmatmul.mubr.msk.f32.vlgmr.msra.gmra.mrb[156].mxu1 %vm711_vm4, %v12837_v0 }
0x324f   : > { %21686 = vmatprep.mubr.msk.f32.mxu1 %vm23215_vm0, %v23216_v12 }
0x3252   : > { %21685 = vmatpush3.xpose.msk.msra.mxu1 %vm411_vm3, %v13225_v13 }
0x3253   : > { %21694 = vmatprep.subr.mxu1 %v23216_v12 }
0x3262   : > { %v12826_v2 = vpop.xlane.xlu0 %12825 }
0x3263   : > { %23066 = vrcp.f32 %v12826_v2 }
0x3266   : > { %v13147_v52 = vpop.permute.xlu0 %13146 }
0x3267   : > { %21687 = vmatmul.mubr.msk.f32.vlgmr.msra.gmra.mrb[158].mxu1 %vm411_vm3, %v13147_v52 }
0x3268   : > { %21696 = vmatprep.mubr.msk.f32.mxu1 %vm23215_vm0, %v23216_v12 }
0x326a   : > { %v13373_v56 = vpop.permute.xlu0 %13372 }
0x326b   : > { %21695 = vmatpush3.xpose.msk.msra.mxu1 %vm411_vm3, %v13373_v56 }
0x326c   : > { %21704 = vmatprep.subr.mxu1 %v23216_v12 }
0x326d   : > { %v23067_v53 = vpop.eup %23066 }
0x326e   : > { %21697 = vmatmul.mubr.msk.f32.vlgmr.msra.gmra.mrb[160].mxu1 %vm411_vm3, %v13147_v52  ;;  %v12835_v24 = vmul.f32 %v23067_v53, %v23059_v57 }
0x326f   : > { %21706 = vmatprep.mubr.msk.f32.mxu1 %vm23215_vm0, %v23216_v12 }
0x3270   : > { %21672 = vmatmul.mubr.msk.f32.vlgmr.msra.gmra.mrb[162].mxu0 %vm711_vm4, %v12835_v24 }
0x3271   : > { %21680 = vmatpush3.xpose.msk.msra.mxu0 %vm411_vm3, %v13149_v61  ;;  %21681 = vmatprep.mubr.msk.f32.mxu0 %vm23215_vm0, %v23216_v12 }
0x3272   : > { %21689 = vmatprep.subr.mxu0 %v23216_v12 }
0x3274   : > { %21682 = vmatmul.mubr.msk.f32.vlgmr.msra.gmra.mrb[164].mxu0 %vm411_vm3, %v13147_v52 }
0x3275   : > { %21690 = vmatpush3.xpose.msk.msra.mxu0 %vm411_vm3, %v13299_v15  ;;  %21691 = vmatprep.mubr.msk.f32.mxu0 %vm23215_vm0, %v23216_v12 }
0x3276   : > { %21699 = vmatprep.subr.mxu0 %v23216_v12 }
0x3278   : > { %21692 = vmatmul.mubr.msk.f32.vlgmr.msra.gmra.mrb[166].mxu0 %vm411_vm3, %v13147_v52 }
0x3279   : > { %21701 = vmatprep.mubr.msk.f32.mxu0 %vm23215_vm0, %v23216_v12 }
0x330e   : > { %v25221_v60 = vpop.f32.mrb[160].mxu0 }
0x330f   : > { %v21663_v33 = vpop.f32.mrb[161].mxu0 }
0x331d   : > { %v25223_v48 = vpop.f32.mrb[154].mxu1 }
0x331e   : > { %v21668_v4 = vpop.f32.mrb[155].mxu1 }
0x3321   : > { %v25225_v7 = vpop.f32.mrb[156].mxu1 }
0x3322   : > { %v21678_v9 = vpop.f32.mrb[157].mxu1 }
0x333a   : > { %v13294_v11 = vpop.f32.mrb[158].mxu1 }
0x333b   : > { %v13447_v18 = vmul.f32 0.125, %v13294_v11  ;;  %v21688_v14 = vpop.f32.mrb[159].mxu1 }
0x333d   : > { %v13453_v38 = vsel %vm12793_vm7, %v13447_v18, -inf }
0x333e   : > { %13454 = vmax.xlane.f32.xlu0 %v13453_v38 }
0x3341   : > { %v13442_v19 = vpop.f32.mrb[160].mxu1 }
0x3342   : > { %v21698_v6 = vpop.f32.mrb[161].mxu1  ;;  %v13449_v25 = vmul.f32 0.125, %v13442_v19 }
0x3343   : > { %v25228_v37 = vpop.f32.mrb[162].mxu0 }
0x3344   : > { %v21673_v20 = vpop.f32.mrb[163].mxu0  ;;  %v13459_v39 = vsel %vm12793_vm7, %v13449_v25, -inf }
0x3347   : > { %v13220_v27 = vpop.f32.mrb[164].mxu0 }
0x3348   : > { %v13446_v50 = vmul.f32 0.125, %v13220_v27  ;;  %v21683_v36 = vpop.f32.mrb[165].mxu0 }
0x334a   : > { %v13450_v5 = vsel %vm12793_vm7, %v13446_v50, -inf }
0x334b   : > { %13451 = vmax.xlane.f32.xlu1 %v13450_v5  ;;  %v13368_v41 = vpop.f32.mrb[166].mxu0 }
0x334c   : > { %v13448_v21 = vmul.f32 0.125, %v13368_v41  ;;  %v21693_v23 = vpop.f32.mrb[167].mxu0 }
0x334e   : > { %v13456_v29 = vsel %vm12793_vm7, %v13448_v21, -inf }
0x334f   : > { %13457 = vmax.xlane.f32.xlu0 %v13456_v29 }
0x3353   : > { %13460 = vmax.xlane.f32.xlu0 %v13459_v39 }
0x335c   : > { %13494 = vrot.lane.b32.xlu1 %v25121_v63, %s23219_s6 }
0x3360   : > { %13646 = vrot.lane.b32.xlu1 %v25143_v26, %s23219_s6 }
0x3364   : > { %13722 = vrot.lane.b32.xlu1 %v25141_v10, %s23219_s6 }
0x3368   : > { %13820 = vrot.lane.b32.xlu1 %v25121_v63, %s23220_s7 }
0x3369   : > { %13570 = vrot.lane.b32.xlu0 %v25128_v54, %s23219_s6 }
0x33cb   : > { %v13455_v8 = vpop.xlane.xlu0 %13454 }
0x33cc   : > { %v13463_v43 = vsub.f32 %v13447_v18, %v13455_v8 }
0x33ce   : > { %v13468_v47 = vmul.f32 1.442695, %v13463_v43 }
0x33d0   : > { %23068 = vpow2.f32 %v13468_v47 }
0x33d8   : > { %v13452_v58 = vpop.xlane.xlu1 %13451 }
0x33d9   : > { %v13462_v59 = vsub.f32 %v13446_v50, %v13452_v58 }
0x33da   : > { %v23069_v31 = vpop.eup %23068 }
0x33db   : > { %v13466_v32 = vmul.f32 1.442695, %v13462_v59  ;;  %v13477_v40 = vsel %vm12793_vm7, %v23069_v31, 0.0 }
0x33dc   : > { %v13495_v42 = vpop.permute.xlu1 %13494  ;;  %13478 = vadd.xlane.f32.xlu0 %v13477_v40  ;;  %v13458_v44 = vpop.xlane.xlu0 %13457 }
0x33dd   : > { %23070 = vpow2.f32 %v13466_v32  ;;  %v13464_v30 = vsub.f32 %v13448_v21, %v13458_v44  ;;  %21700 = vmatpush3.msra.mxu0 %v13495_v42 }
0x33de   : > { %21709 = vmatprep.subr.mxu0 %v23216_v12 }
0x33df   : > { %v13470_v35 = vmul.f32 1.442695, %v13464_v30 }
0x33e0   : > { %v13461_v57 = vpop.xlane.xlu0 %13460  ;;  %v13647_v22 = vpop.permute.xlu1 %13646 }
0x33e1   : > { %23072 = vpow2.f32 %v13470_v35  ;;  %v13465_v45 = vsub.f32 %v13449_v25, %v13461_v57 }
0x33e3   : > { %v13472_v51 = vmul.f32 1.442695, %v13465_v45 }
0x33e4   : > { %v13571_v46 = vpop.permute.xlu0 %13570  ;;  %v13723_v0 = vpop.permute.xlu1 %13722 }
0x33e5   : > { %23074 = vpow2.f32 %v13472_v51  ;;  %21705 = vmatpush3.msra.mxu1 %v13571_v46 }
0x33e6   : > { %21714 = vmatprep.subr.mxu1 %v23216_v12 }
0x33e7   : > { %v23071_v49 = vpop.eup %23070 }
0x33e8   : > { %v13474_v17 = vsel %vm12793_vm7, %v23071_v49, 0.0  ;;  %v13821_v13 = vpop.permute.xlu1 %13820 }
0x33e9   : > { %13475 = vadd.xlane.f32.xlu1 %v13474_v17 }
0x33eb   : > { %v23073_v16 = vpop.eup %23072 }
0x33ec   : > { %v13480_v34 = vsel %vm12793_vm7, %v23073_v16, 0.0 }
0x33ed   : > { %13481 = vadd.xlane.f32.xlu1 %v13480_v34 }
0x33ef   : > { %v23075_v62 = vpop.eup %23074 }
0x33f0   : > { %v13483_v1 = vsel %vm12793_vm7, %v23075_v62, 0.0 }
0x33f1   : > { %13484 = vadd.xlane.f32.xlu0 %v13483_v1 }
0x33fe   : > { %13818 = vrot.lane.b32.xlu1 %v25123_v28, %s23220_s7 }
0x3402   : > { %14044 = vrot.lane.b32.xlu1 %v25141_v10, %s23220_s7 }
0x3407   : > { %13896 = vrot.lane.b32.xlu0 %v25128_v54, %s23220_s7 }
0x340b   : > { %13970 = vrot.lane.b32.xlu0 %v25143_v26, %s23220_s7 }
0x3469   : > { %v13479_v55 = vpop.xlane.xlu0 %13478 }
0x346a   : > { %23076 = vrcp.f32 %v13479_v55 }
0x3474   : > { %v23077_v61 = vpop.eup %23076 }
0x3475   : > { %v13489_v2 = vmul.f32 %v23077_v61, %v23069_v31 }
0x3476   : > { %v13476_v52 = vpop.xlane.xlu1 %13475 }
0x3477   : > { %23078 = vrcp.f32 %v13476_v52  ;;  %21707 = vmatmul.mubr.msk.f32.vlgmr.msra.gmra.mrb[162].mxu1 %vm711_vm4, %v13489_v2 }
0x3478   : > { %21715 = vmatpush3.msra.mxu1 %v13723_v0  ;;  %21716 = vmatprep.mubr.msk.f32.mxu1 %vm23215_vm0, %v23216_v12 }
0x3479   : > { %21724 = vmatprep.subr.mxu1 %v23216_v12 }
0x347a   : > { %v13482_v56 = vpop.xlane.xlu1 %13481 }
0x347b   : > { %23080 = vrcp.f32 %v13482_v56 }
0x347e   : > { %v13485_v53 = vpop.xlane.xlu0 %13484  ;;  %v13819_v18 = vpop.permute.xlu1 %13818 }
0x347f   : > { %23082 = vrcp.f32 %v13485_v53 }
0x3481   : > { %v23079_v24 = vpop.eup %23078 }
0x3482   : > { %v13487_v15 = vmul.f32 %v23079_v24, %v23071_v49  ;;  %v13897_v11 = vpop.permute.xlu0 %13896  ;;  %v14045_v19 = vpop.permute.xlu1 %14044 }
0x3484   : > { %21702 = vmatmul.mubr.msk.f32.vlgmr.msra.gmra.mrb[168].mxu0 %vm711_vm4, %v13487_v15 }
0x3485   : > { %v23081_v33 = vpop.eup %23080  ;;  %21710 = vmatpush3.msra.mxu0 %v13647_v22  ;;  %21711 = vmatprep.mubr.msk.f32.mxu0 %vm23215_vm0, %v23216_v12 }
0x3486   : > { %v13491_v4 = vmul.f32 %v23081_v33, %v23073_v16  ;;  %21719 = vmatprep.subr.mxu0 %v23216_v12  ;;  %v13971_v38 = vpop.permute.xlu0 %13970 }
0x3488   : > { %21712 = vmatmul.mubr.msk.f32.vlgmr.msra.gmra.mrb[170].mxu0 %vm711_vm4, %v13491_v4 }
0x3489   : > { %v23083_v9 = vpop.eup %23082  ;;  %21721 = vmatprep.mubr.msk.f32.mxu0 %vm23215_vm0, %v23216_v12 }
0x348a   : > { %v13493_v14 = vmul.f32 %v23083_v9, %v23075_v62 }
0x348c   : > { %21720 = vmatpush3.xpose.msk.msra.mxu0 %vm411_vm3, %v13821_v13  ;;  %21717 = vmatmul.mubr.msk.f32.vlgmr.msra.gmra.mrb[164].mxu1 %vm711_vm4, %v13493_v14 }
0x348d   : > { %21725 = vmatpush3.xpose.msk.msra.mxu1 %vm411_vm3, %v13897_v11  ;;  %21729 = vmatprep.subr.mxu0 %v23216_v12 }
0x348e   : > { %21726 = vmatprep.mubr.msk.f32.mxu1 %vm23215_vm0, %v23216_v12  ;;  %21734 = vmatprep.subr.mxu1 %v23216_v12 }
0x348f   : > { %21722 = vmatmul.mubr.msk.f32.vlgmr.msra.gmra.mrb[172].mxu0 %vm411_vm3, %v13819_v18 }
0x3490   : > { %21730 = vmatpush3.xpose.msk.msra.mxu0 %vm411_vm3, %v13971_v38  ;;  %21727 = vmatmul.mubr.msk.f32.vlgmr.msra.gmra.mrb[166].mxu1 %vm411_vm3, %v13819_v18 }
0x3491   : > { %21735 = vmatpush3.xpose.msk.msra.mxu1 %vm411_vm3, %v14045_v19  ;;  %21731 = vmatprep.mubr.msk.f32.mxu0 %vm23215_vm0, %v23216_v12 }
0x3492   : > { %21736 = vmatprep.mubr.msk.f32.mxu1 %vm23215_vm0, %v23216_v12  ;;  %21744 = vmatprep.subr.mxu1 %v23216_v12 }
0x3493   : > { %21732 = vmatmul.mubr.msk.f32.vlgmr.msra.gmra.mrb[174].mxu0 %vm411_vm3, %v13819_v18  ;;  %21739 = vmatprep.subr.mxu0 %v23216_v12 }
0x3494   : > { %21737 = vmatmul.mubr.msk.f32.vlgmr.msra.gmra.mrb[168].mxu1 %vm411_vm3, %v13819_v18  ;;  %21741 = vmatprep.mubr.msk.f32.mxu0 %vm23215_vm0, %v23216_v12 }
0x3495   : > { %21746 = vmatprep.mubr.msk.f32.mxu1 %vm23215_vm0, %v23216_v12 }
0x354a   : > { %v25291_v6 = vpop.f32.mrb[162].mxu1 }
0x354b   : > { %v21708_v20 = vpop.f32.mrb[163].mxu1 }
0x3557   : > { %v25293_v27 = vpop.f32.mrb[168].mxu0 }
0x3558   : > { %v21703_v50 = vpop.f32.mrb[169].mxu0 }
0x355b   : > { %v25295_v36 = vpop.f32.mrb[170].mxu0 }
0x355c   : > { %v21713_v5 = vpop.f32.mrb[171].mxu0 }
0x355f   : > { %v25297_v41 = vpop.f32.mrb[164].mxu1 }
0x3560   : > { %v21718_v21 = vpop.f32.mrb[165].mxu1 }
0x3562   : > { %v13892_v23 = vpop.f32.mrb[172].mxu0 }
0x3563   : > { %v14118_v25 = vmul.f32 0.125, %v13892_v23  ;;  %v21723_v29 = vpop.f32.mrb[173].mxu0  ;;  %v13966_v39 = vpop.f32.mrb[166].mxu1 }
0x3564   : > { %v14119_v8 = vmul.f32 0.125, %v13966_v39  ;;  %v21728_v43 = vpop.f32.mrb[167].mxu1 }
0x3565   : > { %v14122_v47 = vsel %vm12793_vm7, %v14118_v25, -inf }
0x3566   : > { %14123 = vmax.xlane.f32.xlu0 %v14122_v47  ;;  %v14040_v58 = vpop.f32.mrb[174].mxu0  ;;  %v14125_v59 = vsel %vm12793_vm7, %v14119_v8, -inf }
0x3567   : > { %v14120_v31 = vmul.f32 0.125, %v14040_v58  ;;  %v21733_v32 = vpop.f32.mrb[175].mxu0  ;;  %14126 = vmax.xlane.f32.xlu1 %v14125_v59  ;;  %v14114_v40 = vpop.f32.mrb[168].mxu1 }
0x3568   : > { %v21738_v42 = vpop.f32.mrb[169].mxu1  ;;  %v14121_v44 = vmul.f32 0.125, %v14114_v40 }
0x3569   : > { %v14128_v30 = vsel %vm12793_vm7, %v14120_v31, -inf }
0x356a   : > { %14129 = vmax.xlane.f32.xlu0 %v14128_v30  ;;  %v14131_v35 = vsel %vm12793_vm7, %v14121_v44, -inf }
0x356e   : > { %14132 = vmax.xlane.f32.xlu0 %v14131_v35 }
0x3578   : > { %14242 = vrot.lane.b32.xlu1 %v25128_v54, %s23221_s8 }
0x357c   : > { %14318 = vrot.lane.b32.xlu1 %v25143_v26, %s23221_s8 }
0x3580   : > { %14394 = vrot.lane.b32.xlu1 %v25141_v10, %s23221_s8 }
0x3584   : > { %14166 = vrot.lane.b32.xlu0 %v25121_v63, %s23221_s8 }
0x35f3   : > { %v14124_v57 = vpop.xlane.xlu0 %14123 }
0x35f4   : > { %v14134_v45 = vsub.f32 %v14118_v25, %v14124_v57  ;;  %v14127_v51 = vpop.xlane.xlu1 %14126 }
0x35f5   : > { %v14135_v46 = vsub.f32 %v14119_v8, %v14127_v51 }
0x35f6   : > { %v14138_v49 = vmul.f32 1.442695, %v14134_v45 }
0x35f7   : > { %v14140_v17 = vmul.f32 1.442695, %v14135_v46  ;;  %v14130_v16 = vpop.xlane.xlu0 %14129 }
0x35f8   : > { %23084 = vpow2.f32 %v14138_v49  ;;  %v14243_v34 = vpop.permute.xlu1 %14242  ;;  %v14136_v53 = vsub.f32 %v14120_v31, %v14130_v16 }
0x35f9   : > { %23086 = vpow2.f32 %v14140_v17  ;;  %21745 = vmatpush3.msra.mxu1 %v14243_v34 }
0x35fa   : > { %21754 = vmatprep.subr.mxu1 %v23216_v12  ;;  %v14142_v24 = vmul.f32 1.442695, %v14136_v53 }
0x35fb   : > { %v14133_v62 = vpop.xlane.xlu0 %14132 }
0x35fc   : > { %v14137_v1 = vsub.f32 %v14121_v44, %v14133_v62  ;;  %v14319_v4 = vpop.permute.xlu1 %14318 }
0x35fe   : > { %v14144_v22 = vmul.f32 1.442695, %v14137_v1 }
0x35ff   : > { %v14167_v55 = vpop.permute.xlu0 %14166 }
0x3600   : > { %23088 = vpow2.f32 %v14144_v22  ;;  %21740 = vmatpush3.msra.mxu0 %v14167_v55  ;;  %v14395_v9 = vpop.permute.xlu1 %14394 }
0x3601   : > { %21749 = vmatprep.subr.mxu0 %v23216_v12  ;;  %23090 = vpow2.f32 %v14142_v24 }
0x3602   : > { %v23085_v0 = vpop.eup %23084 }
0x3603   : > { %v23087_v13 = vpop.eup %23086  ;;  %v14146_v61 = vsel %vm12793_vm7, %v23085_v0, 0.0 }
0x3604   : > { %14147 = vadd.xlane.f32.xlu0 %v14146_v61  ;;  %v14149_v2 = vsel %vm12793_vm7, %v23087_v13, 0.0 }
0x3605   : > { %14150 = vadd.xlane.f32.xlu1 %v14149_v2 }
0x360a   : > { %v23089_v52 = vpop.eup %23088 }
0x360b   : > { %v14155_v56 = vsel %vm12793_vm7, %v23089_v52, 0.0  ;;  %v23091_v15 = vpop.eup %23090 }
0x360c   : > { %14156 = vadd.xlane.f32.xlu1 %v14155_v56  ;;  %v14152_v33 = vsel %vm12793_vm7, %v23091_v15, 0.0 }
0x361a   : > { %14492 = vrot.lane.b32.xlu0 %v25121_v63, %s23222_s9 }
0x361d   : > { %14568 = vrot.lane.b32.xlu1 %v25128_v54, %s23222_s9 }
0x3621   : > { %14642 = vrot.lane.b32.xlu1 %v25143_v26, %s23222_s9 }
0x3639   : > { %14153 = vadd.xlane.f32.xlu0 %v14152_v33 }
0x364f   : > { %14490 = vrot.lane.b32.xlu0 %v25123_v28, %s23222_s9 }
0x3653   : > { %14716 = vrot.lane.b32.xlu0 %v25141_v10, %s23222_s9 }
0x3691   : > { %v14148_v11 = vpop.xlane.xlu0 %14147 }
0x3692   : > { %23092 = vrcp.f32 %v14148_v11  ;;  %v14151_v18 = vpop.xlane.xlu1 %14150 }
0x3693   : > { %23094 = vrcp.f32 %v14151_v18 }
0x3695   : > { %v14493_v25 = vpop.permute.xlu0 %14492 }
0x3699   : > { %v14157_v14 = vpop.xlane.xlu1 %14156 }
0x369a   : > { %23096 = vrcp.f32 %v14157_v14 }
0x369c   : > { %v23093_v38 = vpop.eup %23092 }
0x369d   : > { %v23095_v19 = vpop.eup %23094  ;;  %v14159_v20 = vmul.f32 %v23093_v38, %v23085_v0  ;;  %v14569_v23 = vpop.permute.xlu1 %14568 }
0x369e   : > { %v14161_v50 = vmul.f32 %v23095_v19, %v23087_v13 }
0x369f   : > { %21742 = vmatmul.mubr.msk.f32.vlgmr.msra.gmra.mrb[176].mxu0 %vm711_vm4, %v14159_v20 }
0x36a0   : > { %21750 = vmatpush3.msra.mxu0 %v14319_v4  ;;  %21747 = vmatmul.mubr.msk.f32.vlgmr.msra.gmra.mrb[170].mxu1 %vm711_vm4, %v14161_v50 }
0x36a1   : > { %21755 = vmatpush3.msra.mxu1 %v14395_v9  ;;  %21756 = vmatprep.mubr.msk.f32.mxu1 %vm23215_vm0, %v23216_v12  ;;  %v14643_v58 = vpop.permute.xlu1 %14642 }
0x36a2   : > { %21764 = vmatprep.subr.mxu1 %v23216_v12  ;;  %21751 = vmatprep.mubr.msk.f32.mxu0 %vm23215_vm0, %v23216_v12 }
0x36a3   : > { %21759 = vmatprep.subr.mxu0 %v23216_v12 }
0x36a4   : > { %v23097_v5 = vpop.eup %23096 }
0x36a5   : > { %v14165_v21 = vmul.f32 %v23097_v5, %v23089_v52 }
0x36a7   : > { %21757 = vmatmul.mubr.msk.f32.vlgmr.msra.gmra.mrb[172].mxu1 %vm711_vm4, %v14165_v21 }
0x36a8   : > { %21765 = vmatpush3.xpose.msk.msra.mxu1 %vm411_vm3, %v14569_v23  ;;  %21766 = vmatprep.mubr.msk.f32.mxu1 %vm23215_vm0, %v23216_v12 }
0x36a9   : > { %21774 = vmatprep.subr.mxu1 %v23216_v12 }
0x36c6   : > { %v14154_v29 = vpop.xlane.xlu0 %14153 }
0x36c7   : > { %23098 = vrcp.f32 %v14154_v29 }
0x36ca   : > { %v14491_v39 = vpop.permute.xlu0 %14490 }
0x36cb   : > { %21767 = vmatmul.mubr.msk.f32.vlgmr.msra.gmra.mrb[174].mxu1 %vm411_vm3, %v14491_v39 }
0x36cc   : > { %21776 = vmatprep.mubr.msk.f32.mxu1 %vm23215_vm0, %v23216_v12 }
0x36ce   : > { %v14717_v8 = vpop.permute.xlu0 %14716 }
0x36cf   : > { %21775 = vmatpush3.xpose.msk.msra.mxu1 %vm411_vm3, %v14717_v8 }
0x36d0   : > { %21784 = vmatprep.subr.mxu1 %v23216_v12 }
0x36d1   : > { %v23099_v43 = vpop.eup %23098 }
0x36d2   : > { %21777 = vmatmul.mubr.msk.f32.vlgmr.msra.gmra.mrb[176].mxu1 %vm411_vm3, %v14491_v39  ;;  %v14163_v47 = vmul.f32 %v23099_v43, %v23091_v15 }
0x36d3   : > { %21786 = vmatprep.mubr.msk.f32.mxu1 %vm23215_vm0, %v23216_v12 }
0x36d4   : > { %21752 = vmatmul.mubr.msk.f32.vlgmr.msra.gmra.mrb[178].mxu0 %vm711_vm4, %v14163_v47 }
0x36d5   : > { %21760 = vmatpush3.xpose.msk.msra.mxu0 %vm411_vm3, %v14493_v25  ;;  %21761 = vmatprep.mubr.msk.f32.mxu0 %vm23215_vm0, %v23216_v12 }
0x36d6   : > { %21769 = vmatprep.subr.mxu0 %v23216_v12 }
0x36d8   : > { %21762 = vmatmul.mubr.msk.f32.vlgmr.msra.gmra.mrb[180].mxu0 %vm411_vm3, %v14491_v39 }
0x36d9   : > { %21770 = vmatpush3.xpose.msk.msra.mxu0 %vm411_vm3, %v14643_v58  ;;  %21771 = vmatprep.mubr.msk.f32.mxu0 %vm23215_vm0, %v23216_v12 }
0x36da   : > { %21779 = vmatprep.subr.mxu0 %v23216_v12 }
0x36dc   : > { %21772 = vmatmul.mubr.msk.f32.vlgmr.msra.gmra.mrb[182].mxu0 %vm411_vm3, %v14491_v39 }
0x36dd   : > { %21781 = vmatprep.mubr.msk.f32.mxu0 %vm23215_vm0, %v23216_v12 }
0x3772   : > { %v25361_v59 = vpop.f32.mrb[176].mxu0 }
0x3773   : > { %v21743_v31 = vpop.f32.mrb[177].mxu0  ;;  %v25363_v32 = vpop.f32.mrb[170].mxu1 }
0x3774   : > { %v21748_v40 = vpop.f32.mrb[171].mxu1 }
0x377a   : > { %v25365_v42 = vpop.f32.mrb[172].mxu1 }
0x377b   : > { %v21758_v44 = vpop.f32.mrb[173].mxu1 }
0x379e   : > { %v14638_v30 = vpop.f32.mrb[174].mxu1 }
0x379f   : > { %v14791_v35 = vmul.f32 0.125, %v14638_v30  ;;  %v21768_v57 = vpop.f32.mrb[175].mxu1  ;;  %v12298_v30 = vld [vmem:[%s26230_s2 + $0x268] sm:$0xff] }
0x37a0   : > { %v12300_v57 = vld [vmem:[%s26230_s2 + $0x278] sm:$0xff] }
0x37a1   : > { %v14797_v45 = vsel %vm12793_vm7, %v14791_v35, -inf }
0x37a2   : > { %14798 = vmax.xlane.f32.xlu0 %v14797_v45 }
0x37a5   : > { %v14786_v51 = vpop.f32.mrb[176].mxu1 }
0x37a6   : > { %v21778_v46 = vpop.f32.mrb[177].mxu1  ;;  %v14793_v13 = vmul.f32 0.125, %v14786_v51  ;;  %v12301_v51 = vld [vmem:[%s26230_s2 + $0x280] sm:$0xff] }
0x37a7   : > { %v25368_v49 = vpop.f32.mrb[178].mxu0  ;;  %v25425_v46 = vpack.c.bf16 %v12301_v51, %v12300_v57 }
0x37a8   : > { %v21753_v17 = vpop.f32.mrb[179].mxu0  ;;  %v14803_v2 = vsel %vm12793_vm7, %v14793_v13, -inf }
0x37a9   : > { %v12302_v17 = vld [vmem:[%s26230_s2 + $0x288] sm:$0xff] }
0x37ab   : > { %v14564_v16 = vpop.f32.mrb[180].mxu0 }
0x37ac   : > { %v14790_v34 = vmul.f32 0.125, %v14564_v16  ;;  %v21763_v62 = vpop.f32.mrb[181].mxu0  ;;  %v12303_v16 = vld [vmem:[%s26230_s2 + $0x290] sm:$0xff] }
0x37ad   : > { %v12304_v62 = vld [vmem:[%s26230_s2 + $0x298] sm:$0xff] }
0x37ae   : > { %v14794_v1 = vsel %vm12793_vm7, %v14790_v34, -inf }
0x37af   : > { %14795 = vmax.xlane.f32.xlu1 %v14794_v1  ;;  %v14712_v22 = vpop.f32.mrb[182].mxu0  ;;  %v12305_v1 = vld [vmem:[%s26230_s2 + $0x2a0] sm:$0xff] }
0x37b0   : > { %v14792_v55 = vmul.f32 0.125, %v14712_v22  ;;  %v21773_v0 = vpop.f32.mrb[183].mxu0  ;;  %v25449_v22 = vpack.c.bf16 %v12305_v1, %v12304_v62  ;;  %v15501_v62 = vld [vmem:[%s26229_s1 + $0x160] sm:$0xff] }
0x37b2   : > { %v14800_v61 = vsel %vm12793_vm7, %v14792_v55, -inf }
0x37b3   : > { %14801 = vmax.xlane.f32.xlu0 %v14800_v61 }
0x37b7   : > { %14804 = vmax.xlane.f32.xlu0 %v14803_v2 }
0x37c0   : > { %14838 = vrot.lane.b32.xlu1 %v25121_v63, %s23223_s10 }
0x382f   : > { %v14799_v52 = vpop.xlane.xlu0 %14798 }
0x3830   : > { %v14807_v56 = vsub.f32 %v14791_v35, %v14799_v52  ;;  %v12299_v35 = vld [vmem:[%s26230_s2 + $0x270] sm:$0xff] }
0x3831   : > { %v25418_v45 = vpack.c.bf16 %v12299_v35, %v12298_v30 }
0x3832   : > { %v14812_v53 = vmul.f32 1.442695, %v14807_v56 }
0x3834   : > { %23100 = vpow2.f32 %v14812_v53 }
0x383c   : > { %v14796_v24 = vpop.xlane.xlu1 %14795 }
0x383d   : > { %v14806_v15 = vsub.f32 %v14790_v34, %v14796_v24  ;;  %v25437_v34 = vpack.c.bf16 %v12303_v16, %v12302_v17  ;;  %v15499_v17 = vld [vmem:[%s26229_s1 + $0x150] sm:$0xff] }
0x383e   : > { %v23101_v33 = vpop.eup %23100 }
0x383f   : > { %v14810_v4 = vmul.f32 1.442695, %v14806_v15  ;;  %v14821_v9 = vsel %vm12793_vm7, %v23101_v33, 0.0 }
0x3840   : > { %v14839_v11 = vpop.permute.xlu1 %14838  ;;  %14822 = vadd.xlane.f32.xlu0 %v14821_v9  ;;  %v14802_v18 = vpop.xlane.xlu0 %14801 }
0x3841   : > { %23102 = vpow2.f32 %v14810_v4  ;;  %v14808_v14 = vsub.f32 %v14792_v55, %v14802_v18  ;;  %21780 = vmatpush3.msra.mxu0 %v14839_v11  ;;  %v13142_v11 = vadd.f32 %v25221_v60, %v25123_v28  ;;  %v13143_v18 = vadd.f32 %v25223_v48, %v25123_v28 }
0x3842   : > { %21789 = vmatprep.subr.mxu0 %v23216_v12 }
0x3843   : > { %v14814_v38 = vmul.f32 1.442695, %v14808_v14 }
0x3844   : > { %v14805_v63 = vpop.xlane.xlu0 %14804 }
0x3845   : > { %23104 = vpow2.f32 %v14814_v38  ;;  %v14809_v19 = vsub.f32 %v14793_v13, %v14805_v63 }
0x3847   : > { %v14816_v20 = vmul.f32 1.442695, %v14809_v19 }
0x3849   : > { %23106 = vpow2.f32 %v14816_v20 }
0x384b   : > { %v23103_v50 = vpop.eup %23102 }
0x384c   : > { %v14818_v5 = vsel %vm12793_vm7, %v23103_v50, 0.0 }
0x384d   : > { %14819 = vadd.xlane.f32.xlu1 %v14818_v5 }
0x384f   : > { %v23105_v21 = vpop.eup %23104 }
0x3850   : > { %v14824_v23 = vsel %vm12793_vm7, %v23105_v21, 0.0 }
0x3851   : > { %14825 = vadd.xlane.f32.xlu1 %v14824_v23 }
0x3853   : > { %v23107_v25 = vpop.eup %23106 }
0x3854   : > { %v14827_v29 = vsel %vm12793_vm7, %v23107_v25, 0.0 }
0x3855   : > { %14828 = vadd.xlane.f32.xlu0 %v14827_v29 }
0x3862   : > { %14990 = vrot.lane.b32.xlu1 %v25143_v26, %s23223_s10 }
0x3866   : > { %15066 = vrot.lane.b32.xlu1 %v25141_v10, %s23223_s10 }
0x386a   : > { %13802 = vrot.lane.b32.xlu1 %v25293_v27, %s23223_s10 }
0x386b   : > { %14914 = vrot.lane.b32.xlu0 %v25128_v54, %s23223_s10 }
0x386e   : > { %14474 = vrot.lane.b32.xlu1 %v25361_v59, %s23221_s8 }
0x386f   : > { %13804 = vrot.lane.b32.xlu0 %v25291_v6, %s23223_s10 }
0x3873   : > { %14476 = vrot.lane.b32.xlu0 %v25363_v32, %s23221_s8 }
0x38cd   : > { %v14823_v39 = vpop.xlane.xlu0 %14822 }
0x38ce   : > { %23108 = vrcp.f32 %v14823_v39 }
0x38d8   : > { %v23109_v27 = vpop.eup %23108 }
0x38d9   : > { %v14833_v59 = vmul.f32 %v23109_v27, %v23101_v33 }
0x38da   : > { %v14820_v26 = vpop.xlane.xlu1 %14819 }
0x38db   : > { %23110 = vrcp.f32 %v14820_v26 }
0x38de   : > { %v14826_v10 = vpop.xlane.xlu1 %14825 }
0x38df   : > { %23112 = vrcp.f32 %v14826_v10 }
0x38e2   : > { %v14829_v8 = vpop.xlane.xlu0 %14828  ;;  %v14991_v43 = vpop.permute.xlu1 %14990 }
0x38e3   : > { %23114 = vrcp.f32 %v14829_v8 }
0x38e5   : > { %v23111_v54 = vpop.eup %23110 }
0x38e6   : > { %v14915_v47 = vpop.permute.xlu0 %14914  ;;  %v14831_v58 = vmul.f32 %v23111_v54, %v23103_v50  ;;  %v15067_v31 = vpop.permute.xlu1 %15066 }
0x38e7   : > { %21785 = vmatpush3.msra.mxu1 %v14915_v47  ;;  %v15494_v47 = vld [vmem:[%s26229_s1 + $0x128] sm:$0xff] }
0x38e8   : > { %21782 = vmatmul.mubr.msk.f32.vlgmr.msra.gmra.mrb[184].mxu0 %vm711_vm4, %v14831_v58  ;;  %21787 = vmatmul.mubr.msk.f32.vlgmr.msra.gmra.mrb[178].mxu1 %vm711_vm4, %v14833_v59  ;;  %v15495_v58 = vld [vmem:[%s26229_s1 + $0x130] sm:$0xff]  ;;  %v13145_v59 = vadd.f32 %v25225_v7, %v25123_v28 }
0x38e9   : > { %v23113_v6 = vpop.eup %23112  ;;  %21790 = vmatpush3.msra.mxu0 %v14991_v43  ;;  %21794 = vmatprep.subr.mxu1 %v23216_v12  ;;  %v22584_v30 = vpack.c.bf16 %v15495_v58, %v15494_v47 }
0x38ea   : > { %21795 = vmatpush3.msra.mxu1 %v15067_v31  ;;  %21791 = vmatprep.mubr.msk.f32.mxu0 %vm23215_vm0, %v23216_v12  ;;  %v14835_v32 = vmul.f32 %v23113_v6, %v23105_v21  ;;  %v13805_v24 = vpop.permute.xlu0 %13804  ;;  %v13144_v6 = vadd.f32 %v25228_v37, %v25123_v28  ;;  %v15497_v37 = vld [vmem:[%s26229_s1 + $0x140] sm:$0xff] }
0x38eb   : > { %21796 = vmatprep.mubr.msk.f32.mxu1 %vm23215_vm0, %v23216_v12  ;;  %22535 = vmatprep.subr.bf16.mxu0 %v23214_v3  ;;  %v13815_v4 = vadd.f32 %v13805_v24, %v25123_v28 }
0x38ec   : > { %21792 = vmatmul.mubr.msk.f32.vlgmr.msra.gmra.mrb[186].mxu0 %vm711_vm4, %v14835_v32  ;;  %22547 = vmatprep.subr.bf16.mxu1 %v23214_v3 }
0x38ed   : > { %v23115_v40 = vpop.eup %23114  ;;  %21815 = vmatprep.mubr.msk.f32.mxu0 %vm23215_vm0, %v23216_v12  ;;  %22537 = vmatpush3.bf16.msra.mxu0 %v25418_v45  ;;  %v15163_v19 = vsel %vm411_vm3, %v13143_v18, %v13815_v4 }
0x38ee   : > { %v14837_v44 = vmul.f32 %v23115_v40, %v23107_v25  ;;  %22538 = vmatprep.subr.bf16.mxu0 %v23214_v3  ;;  %v14477_v33 = vpop.permute.xlu0 %14476 }
0x38ef   : > { %v14487_v9 = vadd.f32 %v14477_v33, %v25123_v28 }
0x38f0   : > { %21797 = vmatmul.mubr.msk.f32.vlgmr.msra.gmra.mrb[180].mxu1 %vm711_vm4, %v14837_v44 }
0x38f1   : > { %21834 = vmatprep.mubr.msk.f32.mxu1 %vm23215_vm0, %v23216_v12  ;;  %22549 = vmatpush3.bf16.msra.mxu1 %v25418_v45  ;;  %v15167_v21 = vsel %vm3084_vm5, %v15163_v19, %v14487_v9  ;;  %v15478_v9 = vld [vmem:[%s26230_s2 + $0x128] sm:$0xff] }
0x38f2   : > { %22550 = vmatprep.subr.bf16.mxu1 %v23214_v3  ;;  %22540 = vmatpush3.bf16.msra.mxu0 %v25425_v46 }
0x38f3   : > { %22541 = vmatprep.subr.bf16.mxu0 %v23214_v3 }
0x38f5   : > { %22552 = vmatpush3.bf16.msra.mxu1 %v25425_v46 }
0x38f6   : > { %22553 = vmatprep.subr.bf16.mxu1 %v23214_v3  ;;  %22543 = vmatpush3.bf16.msra.mxu0 %v25437_v34 }
0x38f7   : > { %22544 = vmatprep.subr.bf16.mxu0 %v23214_v3 }
0x38f9   : > { %22555 = vmatpush3.bf16.msra.mxu1 %v25437_v34 }
0x38fa   : > { %22556 = vmatprep.subr.bf16.mxu1 %v23214_v3  ;;  %22546 = vmatpush3.bf16.msra.mxu0 %v25449_v22 }
0x38fb   : > { %22559 = vmatprep.subr.bf16.mxu0 %v23214_v3 }
0x38fd   : > { %22558 = vmatpush3.bf16.msra.mxu1 %v25449_v22 }
0x38fe   : > { %22571 = vmatprep.subr.bf16.mxu1 %v23214_v3 }
0x39bb   : > { %v14910_v55 = vpop.f32.mrb[184].mxu0  ;;  %v14986_v0 = vpop.f32.mrb[178].mxu1 }
0x39bc   : > { %15148 = vrot.lane.b32.xlu0 %v14986_v0, %s23219_s6  ;;  %v21788_v13 = vpop.f32.mrb[179].mxu1  ;;  %15146 = vrot.lane.b32.xlu1 %v14910_v55, %s23219_s6  ;;  %v21783_v61 = vpop.f32.mrb[185].mxu0 }
0x39bf   : > { %v15062_v2 = vpop.f32.mrb[186].mxu0 }
0x39c0   : > { %13808 = vrot.lane.b32.xlu0 %v25297_v41, %s23223_s10  ;;  %13806 = vrot.lane.b32.xlu1 %v25295_v36, %s23223_s10  ;;  %v21793_v52 = vpop.f32.mrb[187].mxu0  ;;  %v23204_v41 = vld [vmem:[%s26231_s3 + $0x4] ss:$0 sm:$0xff]  ;;  %v13803_v36 = vpop.permute.xlu1 %13802 }
0x39c3   : > { %v15138_v56 = vpop.f32.mrb[180].mxu1 }
0x39c4   : > { %14480 = vrot.lane.b32.xlu0 %v25365_v42, %s23221_s8  ;;  %v21798_v53 = vpop.f32.mrb[181].mxu1  ;;  %14478 = vrot.lane.b32.xlu1 %v25368_v49, %s23221_s8  ;;  %v14475_v15 = vpop.permute.xlu1 %14474  ;;  %v13814_v42 = vadd.f32 %v13803_v36, %v25123_v28 }
0x39c5   : > { %v14486_v49 = vadd.f32 %v14475_v15, %v25123_v28 }
0x39c6   : > { %v15162_v63 = vsel %vm411_vm3, %v13142_v11, %v13814_v42  ;;  %v15479_v11 = vld [vmem:[%s26230_s2 + $0x130] sm:$0xff] }
0x39c7   : > { %v15166_v5 = vsel %vm3084_vm5, %v15162_v63, %v14486_v49 }
0x39c8   : > { %15152 = vrot.lane.b32.xlu0 %v15138_v56, %s23219_s6  ;;  %15150 = vrot.lane.b32.xlu1 %v15062_v2, %s23219_s6 }
0x39cc   : > { %15175 = vrot.lane.b32.xlu1 %v23204_v41, %s23217_s30 }
0x3a2e   : > { %v15149_v14 = vpop.permute.xlu0 %15148  ;;  %v15147_v38 = vpop.permute.xlu1 %15146 }
0x3a2f   : > { %v15159_v20 = vadd.f32 %v15149_v14, %v25123_v28  ;;  %v15158_v50 = vadd.f32 %v15147_v38, %v25123_v28  ;;  %v22632_v38 = vpack.c.bf16 %v15479_v11, %v15478_v9 }
0x3a31   : > { %v25488_v23 = vsel %vm3089_vm6, %v15167_v21, %v15159_v20  ;;  %v25491_v60 = vsel %vm3089_vm6, %v15166_v5, %v15158_v50  ;;  %v15480_v20 = vld [vmem:[%s26230_s2 + $0x138] sm:$0xff]  ;;  %v15481_v50 = vld [vmem:[%s26230_s2 + $0x140] sm:$0xff]  ;;  %v15482_v21 = vld [vmem:[%s26230_s2 + $0x148] sm:$0xff] }
0x3a32   : > { %21835 = vmatmul.mubr.msk.f32.vlgmr.msra.gmra.mrb[182].mxu1 %vm337_vm2, %v25488_v23  ;;  %v13809_v48 = vpop.permute.xlu0 %13808  ;;  %21816 = vmatmul.mubr.msk.f32.vlgmr.msra.gmra.mrb[188].mxu0 %vm337_vm2, %v25491_v60  ;;  %v13807_v25 = vpop.permute.xlu1 %13806  ;;  %v22635_v5 = vpack.c.bf16 %v15481_v50, %v15480_v20 }
0x3a33   : > { %22573 = vmatpush3.bf16.msra.mxu1 %v25418_v45  ;;  %22561 = vmatpush3.bf16.msra.mxu0 %v25418_v45  ;;  %v13817_v8 = vadd.f32 %v13809_v48, %v25123_v28  ;;  %v13816_v27 = vadd.f32 %v13807_v25, %v25123_v28  ;;  %v15484_v48 = vld [vmem:[%s26230_s2 + $0x158] sm:$0xff]  ;;  %v15485_v25 = vld [vmem:[%s26230_s2 + $0x160] sm:$0xff] }
0x3a34   : > { %22562 = vmatprep.subr.bf16.mxu0 %v23214_v3  ;;  %22574 = vmatprep.subr.bf16.mxu1 %v23214_v3 }
0x3a35   : > { %21853 = vmatprep.mubr.msk.f32.mxu0 %vm23215_vm0, %v23216_v12  ;;  %21872 = vmatprep.mubr.msk.f32.mxu1 %vm23215_vm0, %v23216_v12  ;;  %v15165_v40 = vsel %vm411_vm3, %v13145_v59, %v13817_v8  ;;  %v15164_v44 = vsel %vm411_vm3, %v13144_v6, %v13816_v27 }
0x3a36   : > { %v14481_v29 = vpop.permute.xlu0 %14480  ;;  %v14479_v39 = vpop.permute.xlu1 %14478 }
0x3a37   : > { %22576 = vmatpush3.bf16.msra.mxu1 %v25425_v46  ;;  %22564 = vmatpush3.bf16.msra.mxu0 %v25425_v46  ;;  %v14489_v43 = vadd.f32 %v14481_v29, %v25123_v28  ;;  %v14488_v54 = vadd.f32 %v14479_v39, %v25123_v28  ;;  %v15498_v46 = vld [vmem:[%s26229_s1 + $0x148] sm:$0xff]  ;;  %v22641_v29 = vpack.c.bf16 %v15485_v25, %v15484_v48 }
0x3a38   : > { %22565 = vmatprep.subr.bf16.mxu0 %v23214_v3  ;;  %22577 = vmatprep.subr.bf16.mxu1 %v23214_v3  ;;  %v22590_v16 = vpack.c.bf16 %v15499_v17, %v15498_v46  ;;  %v19910_v39 = vld [vmem:[%s26231_s3 + $0xb] ss:$0 sm:$0xff] }
0x3a39   : > { %v15169_v35 = vsel %vm3084_vm5, %v15165_v40, %v14489_v43  ;;  %v15168_v7 = vsel %vm3084_vm5, %v15164_v44, %v14488_v54 }
0x3a3a   : > { %v15153_v26 = vpop.permute.xlu0 %15152  ;;  %v15151_v10 = vpop.permute.xlu1 %15150 }
0x3a3b   : > { %22579 = vmatpush3.bf16.msra.mxu1 %v25437_v34  ;;  %22567 = vmatpush3.bf16.msra.mxu0 %v25437_v34  ;;  %v15161_v31 = vadd.f32 %v15153_v26, %v25123_v28  ;;  %v15160_v32 = vadd.f32 %v15151_v10, %v25123_v28  ;;  %v15496_v28 = vld [vmem:[%s26229_s1 + $0x138] sm:$0xff] }
0x3a3c   : > { %22568 = vmatprep.subr.bf16.mxu0 %v23214_v3  ;;  %22580 = vmatprep.subr.bf16.mxu1 %v23214_v3  ;;  %v22587_v51 = vpack.c.bf16 %v15497_v37, %v15496_v28  ;;  %v15500_v34 = vld [vmem:[%s26229_s1 + $0x158] sm:$0xff] }
0x3a3d   : > { %v25544_v57 = vsel %vm3089_vm6, %v15169_v35, %v15161_v31  ;;  %v25547_v45 = vsel %vm3089_vm6, %v15168_v7, %v15160_v32  ;;  %v22593_v1 = vpack.c.bf16 %v15501_v62, %v15500_v34  ;;  %v19915_v31 = vld [vmem:[%s26231_s3 + $0x5] ss:$0 sm:$0xff] }
0x3a3f   : > { %22570 = vmatpush3.bf16.msra.mxu0 %v25449_v22  ;;  %22582 = vmatpush3.bf16.msra.mxu1 %v25449_v22  ;;  %v15176_v22 = vpop.permute.xlu1 %15175 }
0x3a40   : > { %22583 = vmatprep.subr.bf16.mxu0 %v23214_v3  ;;  %22595 = vmatprep.subr.bf16.mxu1 %v23214_v3 }
0x3a42   : > { %21854 = vmatmul.mubr.msk.f32.vlgmr.msra.gmra.mrb[190].mxu0 %vm337_vm2, %v25547_v45  ;;  %21873 = vmatmul.mubr.msk.f32.vlgmr.msra.gmra.mrb[184].mxu1 %vm337_vm2, %v25544_v57 }
0x3a43   : > { %22585 = vmatpush3.bf16.msra.mxu0 %v22584_v30  ;;  %22597 = vmatpush3.bf16.msra.mxu1 %v22584_v30 }
0x3a44   : > { %22586 = vmatprep.subr.bf16.mxu0 %v23214_v3  ;;  %22598 = vmatprep.subr.bf16.mxu1 %v23214_v3 }
0x3a45   : > { %21891 = vmatprep.mubr.msk.f32.mxu0 %vm23215_vm0, %v23216_v12  ;;  %21910 = vmatprep.mubr.msk.f32.mxu1 %vm23215_vm0, %v23216_v12 }
0x3a47   : > { %22588 = vmatpush3.bf16.msra.mxu0 %v22587_v51  ;;  %22600 = vmatpush3.bf16.msra.mxu1 %v22587_v51 }
0x3a48   : > { %22589 = vmatprep.subr.bf16.mxu0 %v23214_v3  ;;  %22601 = vmatprep.subr.bf16.mxu1 %v23214_v3 }
0x3a4b   : > { %22591 = vmatpush3.bf16.msra.mxu0 %v22590_v16  ;;  %22603 = vmatpush3.bf16.msra.mxu1 %v22590_v16 }
0x3a4c   : > { %22592 = vmatprep.subr.bf16.mxu0 %v23214_v3  ;;  %22604 = vmatprep.subr.bf16.mxu1 %v23214_v3 }
0x3a4f   : > { %22594 = vmatpush3.bf16.msra.mxu0 %v22593_v1  ;;  %22606 = vmatpush3.bf16.msra.mxu1 %v22593_v1 }
0x3a50   : > { %22607 = vmatprep.subr.bf16.mxu0 %v23214_v3  ;;  %22619 = vmatprep.subr.bf16.mxu1 %v23214_v3 }
0x3b05   : > { %v15320_v55 = vpop.f32.mrb[182].mxu1  ;;  %v15247_v0 = vpop.f32.mrb[188].mxu0 }
0x3b06   : > { %v15321_v13 = vadd.f32 %v15320_v55, %v15176_v22  ;;  %v15248_v61 = vadd.f32 %v15247_v0, %v15176_v22  ;;  %v21817_v2 = vpop.f32.mrb[189].mxu0  ;;  %v21836_v52 = vpop.f32.mrb[183].mxu1 }
0x3b08   : > { %v15471_v56 = vmax.f32 %v15321_v13, 0.0  ;;  %v15470_v53 = vmax.f32 %v15248_v61, 0.0 }
0x3b0a   : > { %v25578_v41 = vadd.f32 %v15471_v56, %v25488_v23  ;;  %v25581_v36 = vadd.f32 %v15470_v53, %v25491_v60  ;;  %v15483_v23 = vld [vmem:[%s26230_s2 + $0x150] sm:$0xff] }
0x3b0b   : > { %v22638_v60 = vpack.c.bf16 %v15483_v23, %v15482_v21 }
0x3b0c   : > { %21892 = vmatmul.mubr.msk.f32.vlgmr.msra.gmra.mrb[192].mxu0 %vm337_vm2, %v25581_v36  ;;  %21911 = vmatmul.mubr.msk.f32.vlgmr.msra.gmra.mrb[186].mxu1 %vm337_vm2, %v25578_v41 }
0x3b0d   : > { %22609 = vmatpush3.bf16.msra.mxu0 %v22584_v30  ;;  %22621 = vmatpush3.bf16.msra.mxu1 %v22584_v30 }
0x3b0e   : > { %22610 = vmatprep.subr.bf16.mxu0 %v23214_v3  ;;  %22622 = vmatprep.subr.bf16.mxu1 %v23214_v3 }
0x3b0f   : > { %21929 = vmatprep.mubr.msk.f32.mxu0 %vm23215_vm0, %v23216_v12  ;;  %21948 = vmatprep.mubr.msk.f32.mxu1 %vm23215_vm0, %v23216_v12 }
0x3b11   : > { %22612 = vmatpush3.bf16.msra.mxu0 %v22587_v51  ;;  %22624 = vmatpush3.bf16.msra.mxu1 %v22587_v51 }
0x3b12   : > { %22613 = vmatprep.subr.bf16.mxu0 %v23214_v3  ;;  %22625 = vmatprep.subr.bf16.mxu1 %v23214_v3 }
0x3b15   : > { %v15393_v24 = vpop.f32.mrb[190].mxu0  ;;  %v15466_v15 = vpop.f32.mrb[184].mxu1  ;;  %22615 = vmatpush3.bf16.msra.mxu0 %v22590_v16  ;;  %22627 = vmatpush3.bf16.msra.mxu1 %v22590_v16 }
0x3b16   : > { %v15394_v33 = vadd.f32 %v15393_v24, %v15176_v22  ;;  %v15467_v42 = vadd.f32 %v15466_v15, %v15176_v22  ;;  %v21855_v4 = vpop.f32.mrb[191].mxu0  ;;  %v21874_v49 = vpop.f32.mrb[185].mxu1  ;;  %22616 = vmatprep.subr.bf16.mxu0 %v23214_v3  ;;  %22628 = vmatprep.subr.bf16.mxu1 %v23214_v3 }
0x3b18   : > { %v15472_v18 = vmax.f32 %v15394_v33, 0.0  ;;  %v15473_v14 = vmax.f32 %v15467_v42, 0.0 }
0x3b19   : > { %22618 = vmatpush3.bf16.msra.mxu0 %v22593_v1  ;;  %22630 = vmatpush3.bf16.msra.mxu1 %v22593_v1 }
0x3b1a   : > { %v15476_v63 = vadd.f32 %v15472_v18, %v25547_v45  ;;  %v15477_v19 = vadd.f32 %v15473_v14, %v25544_v57  ;;  %22631 = vmatprep.subr.bf16.mxu0 %v23214_v3  ;;  %22643 = vmatprep.subr.bf16.mxu1 %v23214_v3 }
0x3b1c   : > { %21930 = vmatmul.mubr.msk.f32.vlgmr.msra.gmra.mrb[194].mxu0 %vm337_vm2, %v15476_v63  ;;  %21949 = vmatmul.mubr.msk.f32.vlgmr.msra.gmra.mrb[188].mxu1 %vm337_vm2, %v15477_v19 }
0x3b1d   : > { %22633 = vmatpush3.bf16.msra.mxu0 %v22632_v38  ;;  %22645 = vmatpush3.bf16.msra.mxu1 %v22632_v38 }
0x3b1e   : > { %22634 = vmatprep.subr.bf16.mxu0 %v23214_v3  ;;  %22646 = vmatprep.subr.bf16.mxu1 %v23214_v3 }
0x3b1f   : > { %21967 = vmatprep.mubr.msk.f32.mxu0 %vm23215_vm0, %v23216_v12  ;;  %21986 = vmatprep.mubr.msk.f32.mxu1 %vm23215_vm0, %v23216_v12 }
0x3b21   : > { %22636 = vmatpush3.bf16.msra.mxu0 %v22635_v5  ;;  %22648 = vmatpush3.bf16.msra.mxu1 %v22635_v5 }
0x3b22   : > { %22637 = vmatprep.subr.bf16.mxu0 %v23214_v3  ;;  %22649 = vmatprep.subr.bf16.mxu1 %v23214_v3 }
0x3b25   : > { %22639 = vmatpush3.bf16.msra.mxu0 %v22638_v60  ;;  %22651 = vmatpush3.bf16.msra.mxu1 %v22638_v60 }
0x3b26   : > { %22640 = vmatprep.subr.bf16.mxu0 %v23214_v3  ;;  %22652 = vmatprep.subr.bf16.mxu1 %v23214_v3 }
0x3b29   : > { %22642 = vmatpush3.bf16.msra.mxu0 %v22641_v29  ;;  %22654 = vmatpush3.bf16.msra.mxu1 %v22641_v29 }
0x3b2a   : > { %22655 = vmatprep.subr.bf16.mxu0 %v23214_v3  ;;  %22667 = vmatprep.subr.bf16.mxu1 %v23214_v3 }
0x3b2c   : > { %21968 = vmatmul.mubr.msk.f32.vlgmr.msra.gmra.mrb[196].mxu0 %vm337_vm2, %v25581_v36  ;;  %21987 = vmatmul.mubr.msk.f32.vlgmr.msra.gmra.mrb[190].mxu1 %vm337_vm2, %v25578_v41 }
0x3b2d   : > { %22657 = vmatpush3.bf16.msra.mxu0 %v22632_v38  ;;  %22669 = vmatpush3.bf16.msra.mxu1 %v22632_v38 }
0x3b2e   : > { %22658 = vmatprep.subr.bf16.mxu0 %v23214_v3  ;;  %22670 = vmatprep.subr.bf16.mxu1 %v23214_v3 }
0x3b2f   : > { %22005 = vmatprep.mubr.msk.f32.mxu0 %vm23215_vm0, %v23216_v12  ;;  %22024 = vmatprep.mubr.msk.f32.mxu1 %vm23215_vm0, %v23216_v12 }
0x3b31   : > { %22660 = vmatpush3.bf16.msra.mxu0 %v22635_v5  ;;  %22672 = vmatpush3.bf16.msra.mxu1 %v22635_v5 }
0x3b32   : > { %22661 = vmatprep.subr.bf16.mxu0 %v23214_v3  ;;  %22673 = vmatprep.subr.bf16.mxu1 %v23214_v3 }
0x3b35   : > { %22663 = vmatpush3.bf16.msra.mxu0 %v22638_v60  ;;  %22675 = vmatpush3.bf16.msra.mxu1 %v22638_v60 }
0x3b36   : > { %22664 = vmatprep.subr.bf16.mxu0 %v23214_v3  ;;  %22676 = vmatprep.subr.bf16.mxu1 %v23214_v3 }
0x3b39   : > { %22666 = vmatpush3.bf16.msra.mxu0 %v22641_v29  ;;  %22678 = vmatpush3.bf16.msra.mxu1 %v22641_v29 }
0x3b3a   : > { %22027 = vmatprep.subr.mxu0 %v23216_v12  ;;  %22032 = vmatprep.subr.mxu1 %v23216_v12 }
0x3b3c   : > { %22006 = vmatmul.mubr.msk.f32.vlgmr.msra.gmra.mrb[198].mxu0 %vm337_vm2, %v15476_v63  ;;  %22025 = vmatmul.mubr.msk.f32.vlgmr.msra.gmra.mrb[192].mxu1 %vm337_vm2, %v15477_v19 }
0x3b3d   : > { %22029 = vmatprep.mubr.msk.f32.mxu0 %vm23215_vm0, %v23216_v12  ;;  %22034 = vmatprep.mubr.msk.f32.mxu1 %vm23215_vm0, %v23216_v12 }
0x3bdf   : > { %v15577_v26 = vpop.f32.mrb[192].mxu0  ;;  %v15650_v10 = vpop.f32.mrb[186].mxu1 }
0x3be0   : > { %v25664_v8 = vadd.f32 %v19910_v39, %v15577_v26  ;;  %v25666_v27 = vadd.f32 %v19910_v39, %v15650_v10  ;;  %v21893_v43 = vpop.f32.mrb[193].mxu0  ;;  %v21912_v54 = vpop.f32.mrb[187].mxu1 }
0x3be2   : > { %22028 = vmatpush3.xpose.msk.msra.mxu0 %vm411_vm3, %v25664_v8  ;;  %22033 = vmatpush3.xpose.msk.msra.mxu1 %vm411_vm3, %v25666_v27 }
0x3be3   : > { %22037 = vmatprep.subr.mxu0 %v23216_v12  ;;  %22042 = vmatprep.subr.mxu1 %v23216_v12 }
0x3bef   : > { %v15723_v47 = vpop.f32.mrb[194].mxu0  ;;  %v15796_v58 = vpop.f32.mrb[188].mxu1 }
0x3bf0   : > { %v21931_v59 = vpop.f32.mrb[195].mxu0  ;;  %v21950_v6 = vpop.f32.mrb[189].mxu1  ;;  %v25681_v28 = vadd.f32 %v19910_v39, %v15723_v47  ;;  %v25683_v37 = vadd.f32 %v19910_v39, %v15796_v58 }
0x3bff   : > { %v15870_v32 = vpop.f32.mrb[196].mxu0  ;;  %v15940_v40 = vpop.f32.mrb[190].mxu1 }
0x3c00   : > { %v25677_v44 = vadd.f32 %v19915_v31, %v15870_v32  ;;  %v25679_v30 = vadd.f32 %v19915_v31, %v15940_v40  ;;  %v21969_v35 = vpop.f32.mrb[197].mxu0  ;;  %v21988_v7 = vpop.f32.mrb[191].mxu1 }
0x3c02   : > { %22030 = vmatmul.mubr.msk.f32.vlgmr.msra.gmra.mrb[200].mxu0 %vm411_vm3, %v25677_v44  ;;  %22035 = vmatmul.mubr.msk.f32.vlgmr.msra.gmra.mrb[194].mxu1 %vm411_vm3, %v25679_v30 }
0x3c03   : > { %22038 = vmatpush3.xpose.msk.msra.mxu0 %vm411_vm3, %v25681_v28  ;;  %22043 = vmatpush3.xpose.msk.msra.mxu1 %vm411_vm3, %v25683_v37 }
0x3c04   : > { %22039 = vmatprep.mubr.msk.f32.mxu0 %vm23215_vm0, %v23216_v12  ;;  %22044 = vmatprep.mubr.msk.f32.mxu1 %vm23215_vm0, %v23216_v12 }
0x3c05   : > { %22052 = vmatprep.subr.mxu1 %v23216_v12  ;;  %22047 = vmatprep.subr.mxu0 %v23216_v12 }
0x3c0f   : > { %v16010_v57 = vpop.f32.mrb[198].mxu0  ;;  %v16080_v45 = vpop.f32.mrb[192].mxu1 }
0x3c10   : > { %v25699_v51 = vadd.f32 %v19915_v31, %v16010_v57  ;;  %v25701_v46 = vadd.f32 %v19915_v31, %v16080_v45  ;;  %v22007_v17 = vpop.f32.mrb[199].mxu0  ;;  %v22026_v16 = vpop.f32.mrb[193].mxu1 }
0x3c12   : > { %22040 = vmatmul.mubr.msk.f32.vlgmr.msra.gmra.mrb[202].mxu0 %vm411_vm3, %v25699_v51  ;;  %22045 = vmatmul.mubr.msk.f32.vlgmr.msra.gmra.mrb[196].mxu1 %vm411_vm3, %v25701_v46 }
0x3c13   : > { %22049 = vmatprep.mubr.msk.f32.mxu0 %vm23215_vm0, %v23216_v12  ;;  %22054 = vmatprep.mubr.msk.f32.mxu1 %vm23215_vm0, %v23216_v12 }
0x3cd5   : > { %v16156_v34 = vpop.f32.mrb[200].mxu0  ;;  %v16232_v62 = vpop.f32.mrb[194].mxu1 }
0x3cd6   : > { %v16388_v1 = vmul.f32 0.125, %v16156_v34  ;;  %v16389_v22 = vmul.f32 0.125, %v16232_v62  ;;  %v22031_v55 = vpop.f32.mrb[201].mxu0  ;;  %v22036_v0 = vpop.f32.mrb[195].mxu1 }
0x3cd8   : > { %v16396_v13 = vsel %vm16392_vm8, %v16389_v22, -inf  ;;  %v16393_v61 = vsel %vm16392_vm8, %v16388_v1, -inf }
0x3cd9   : > { %16397 = vmax.xlane.f32.xlu1 %v16396_v13  ;;  %16394 = vmax.xlane.f32.xlu0 %v16393_v61 }
0x3ce5   : > { %v16308_v2 = vpop.f32.mrb[202].mxu0  ;;  %v16384_v52 = vpop.f32.mrb[196].mxu1 }
0x3ce6   : > { %v16390_v56 = vmul.f32 0.125, %v16308_v2  ;;  %v22041_v53 = vpop.f32.mrb[203].mxu0  ;;  %v22046_v41 = vpop.f32.mrb[197].mxu1  ;;  %v16391_v36 = vmul.f32 0.125, %v16384_v52 }
0x3ce8   : > { %v16399_v24 = vsel %vm16392_vm8, %v16390_v56, -inf  ;;  %v16402_v15 = vsel %vm16392_vm8, %v16391_v36, -inf }
0x3ce9   : > { %16400 = vmax.xlane.f32.xlu0 %v16399_v24 }
0x3cea   : > { %16516 = vrot.lane.b32.xlu1 %v25666_v27, %s23217_s30 }
0x3ced   : > { %16403 = vmax.xlane.f32.xlu0 %v16402_v15 }
0x3cee   : > { %16593 = vrot.lane.b32.xlu1 %v25681_v28, %s23217_s30 }
0x3cf2   : > { %16670 = vrot.lane.b32.xlu1 %v25683_v37, %s23217_s30 }
0x3cf6   : > { %16831 = vrot.lane.b32.xlu1 %v25666_v27, %s23218_s5 }
0x3d03   : > { %16437 = vrot.lane.b32.xlu0 %v25664_v8, %s23217_s30 }
0x3d07   : > { %16753 = vrot.lane.b32.xlu0 %v25664_v8, %s23218_s5 }
0x3d66   : > { %v16398_v33 = vpop.xlane.xlu1 %16397  ;;  %v16395_v42 = vpop.xlane.xlu0 %16394 }
0x3d67   : > { %v16406_v4 = vsub.f32 %v16389_v22, %v16398_v33  ;;  %v16405_v49 = vsub.f32 %v16388_v1, %v16395_v42 }
0x3d69   : > { %v16411_v9 = vmul.f32 1.442695, %v16406_v4  ;;  %v16409_v11 = vmul.f32 1.442695, %v16405_v49 }
0x3d6a   : > { %v16517_v18 = vpop.permute.xlu1 %16516 }
0x3d6b   : > { %23116 = vpow2.f32 %v16411_v9  ;;  %22053 = vmatpush3.msk.msra.mxu1 %vm16443_vm9, %v16517_v18 }
0x3d6c   : > { %23118 = vpow2.f32 %v16409_v11  ;;  %22062 = vmatprep.subr.mxu1 %v23216_v12 }
0x3d6e   : > { %v16594_v10 = vpop.permute.xlu1 %16593 }
0x3d72   : > { %v16671_v43 = vpop.permute.xlu1 %16670 }
0x3d75   : > { %v23117_v14 = vpop.eup %23116 }
0x3d76   : > { %v23119_v38 = vpop.eup %23118  ;;  %v16401_v63 = vpop.xlane.xlu0 %16400  ;;  %v16420_v19 = vsel %vm16392_vm8, %v23117_v14, 0.0 }
0x3d77   : > { %v16407_v20 = vsub.f32 %v16390_v56, %v16401_v63  ;;  %16421 = vadd.xlane.f32.xlu1 %v16420_v19  ;;  %v16417_v50 = vsel %vm16392_vm8, %v23119_v38, 0.0  ;;  %v16832_v54 = vpop.permute.xlu1 %16831 }
0x3d78   : > { %16418 = vadd.xlane.f32.xlu0 %v16417_v50 }
0x3d79   : > { %v16413_v5 = vmul.f32 1.442695, %v16407_v20 }
0x3d7a   : > { %v16404_v21 = vpop.xlane.xlu0 %16403 }
0x3d7b   : > { %23120 = vpow2.f32 %v16413_v5  ;;  %v16408_v25 = vsub.f32 %v16391_v36, %v16404_v21 }
0x3d7d   : > { %v16415_v29 = vmul.f32 1.442695, %v16408_v25 }
0x3d7e   : > { %v16438_v23 = vpop.permute.xlu0 %16437 }
0x3d7f   : > { %22048 = vmatpush3.msk.msra.mxu0 %vm16443_vm9, %v16438_v23  ;;  %23122 = vpow2.f32 %v16415_v29 }
0x3d80   : > { %22057 = vmatprep.subr.mxu0 %v23216_v12 }
0x3d82   : > { %v16754_v47 = vpop.permute.xlu0 %16753 }
0x3d85   : > { %v23121_v60 = vpop.eup %23120 }
0x3d86   : > { %v16423_v48 = vsel %vm16392_vm8, %v23121_v60, 0.0 }
0x3d87   : > { %16424 = vadd.xlane.f32.xlu0 %v16423_v48 }
0x3d88   : > { %16829 = vrot.lane.b32.xlu1 %v25679_v30, %s23218_s5 }
0x3d89   : > { %v23123_v39 = vpop.eup %23122 }
0x3d8a   : > { %v16426_v26 = vsel %vm16392_vm8, %v23123_v39, 0.0 }
0x3d9d   : > { %16751 = vrot.lane.b32.xlu0 %v25677_v44, %s23218_s5 }
0x3da1   : > { %16909 = vrot.lane.b32.xlu0 %v25681_v28, %s23218_s5 }
0x3da5   : > { %16907 = vrot.lane.b32.xlu0 %v25699_v51, %s23218_s5 }
0x3dac   : > { %16427 = vadd.xlane.f32.xlu1 %v16426_v26 }
0x3dbd   : > { %16987 = vrot.lane.b32.xlu1 %v25683_v37, %s23218_s5 }
0x3dc1   : > { %16985 = vrot.lane.b32.xlu1 %v25701_v46, %s23218_s5 }
0x3e04   : > { %v16422_v58 = vpop.xlane.xlu1 %16421 }
0x3e05   : > { %23124 = vrcp.f32 %v16422_v58  ;;  %v16419_v59 = vpop.xlane.xlu0 %16418 }
0x3e06   : > { %23126 = vrcp.f32 %v16419_v59 }
0x3e08   : > { %v16830_v34 = vpop.permute.xlu1 %16829 }
0x3e0f   : > { %v23125_v6 = vpop.eup %23124 }
0x3e10   : > { %v23127_v31 = vpop.eup %23126  ;;  %v16432_v32 = vmul.f32 %v23125_v6, %v23117_v14 }
0x3e11   : > { %v16430_v40 = vmul.f32 %v23127_v31, %v23119_v38 }
0x3e12   : > { %22055 = vmatmul.mubr.msk.f32.vlgmr.msra.gmra.mrb[198].mxu1 %vm16439_vm10, %v16432_v32 }
0x3e13   : > { %22050 = vmatmul.mubr.msk.f32.vlgmr.msra.gmra.mrb[204].mxu0 %vm16439_vm10, %v16430_v40  ;;  %22063 = vmatpush3.msk.msra.mxu1 %vm16443_vm9, %v16671_v43 }
0x3e14   : > { %22058 = vmatpush3.msk.msra.mxu0 %vm16443_vm9, %v16594_v10  ;;  %v16425_v35 = vpop.xlane.xlu0 %16424  ;;  %22059 = vmatprep.mubr.msk.f32.mxu0 %vm23215_vm0, %v23216_v12 }
0x3e15   : > { %23128 = vrcp.f32 %v16425_v35  ;;  %22067 = vmatprep.subr.mxu0 %v23216_v12  ;;  %22064 = vmatprep.mubr.msk.f32.mxu1 %vm23215_vm0, %v23216_v12 }
0x3e16   : > { %22072 = vmatprep.subr.mxu1 %v23216_v12 }
0x3e18   : > { %v16752_v7 = vpop.permute.xlu0 %16751 }
0x3e1c   : > { %v16910_v17 = vpop.permute.xlu0 %16909 }
0x3e1f   : > { %v23129_v57 = vpop.eup %23128 }
0x3e20   : > { %v16434_v45 = vmul.f32 %v23129_v57, %v23121_v60  ;;  %v16908_v16 = vpop.permute.xlu0 %16907 }
0x3e22   : > { %22060 = vmatmul.mubr.msk.f32.vlgmr.msra.gmra.mrb[206].mxu0 %vm16439_vm10, %v16434_v45 }
0x3e23   : > { %22068 = vmatpush3.xpose.msk.msra.mxu0 %vm411_vm3, %v16754_v47  ;;  %22069 = vmatprep.mubr.msk.f32.mxu0 %vm23215_vm0, %v23216_v12 }
0x3e24   : > { %22077 = vmatprep.subr.mxu0 %v23216_v12 }
0x3e26   : > { %22070 = vmatmul.mubr.msk.f32.vlgmr.msra.gmra.mrb[208].mxu0 %vm411_vm3, %v16752_v7 }
0x3e27   : > { %22078 = vmatpush3.xpose.msk.msra.mxu0 %vm411_vm3, %v16910_v17  ;;  %22079 = vmatprep.mubr.msk.f32.mxu0 %vm23215_vm0, %v23216_v12 }
0x3e28   : > { %22087 = vmatprep.subr.mxu0 %v23216_v12 }
0x3e2a   : > { %22080 = vmatmul.mubr.msk.f32.vlgmr.msra.gmra.mrb[210].mxu0 %vm411_vm3, %v16908_v16 }
0x3e2b   : > { %22089 = vmatprep.mubr.msk.f32.mxu0 %vm23215_vm0, %v23216_v12 }
0x3e39   : > { %v16428_v62 = vpop.xlane.xlu1 %16427 }
0x3e3a   : > { %23130 = vrcp.f32 %v16428_v62 }
0x3e3d   : > { %v16988_v55 = vpop.permute.xlu1 %16987 }
0x3e41   : > { %v16986_v0 = vpop.permute.xlu1 %16985 }
0x3e44   : > { %v23131_v1 = vpop.eup %23130 }
0x3e45   : > { %v16436_v22 = vmul.f32 %v23131_v1, %v23123_v39 }
0x3e47   : > { %22065 = vmatmul.mubr.msk.f32.vlgmr.msra.gmra.mrb[200].mxu1 %vm16439_vm10, %v16436_v22 }
0x3e48   : > { %22073 = vmatpush3.xpose.msk.msra.mxu1 %vm411_vm3, %v16832_v54  ;;  %22074 = vmatprep.mubr.msk.f32.mxu1 %vm23215_vm0, %v23216_v12 }
0x3e49   : > { %22082 = vmatprep.subr.mxu1 %v23216_v12 }
0x3e4b   : > { %22075 = vmatmul.mubr.msk.f32.vlgmr.msra.gmra.mrb[202].mxu1 %vm411_vm3, %v16830_v34 }
0x3e4c   : > { %22083 = vmatpush3.xpose.msk.msra.mxu1 %vm411_vm3, %v16988_v55  ;;  %22084 = vmatprep.mubr.msk.f32.mxu1 %vm23215_vm0, %v23216_v12 }
0x3e4d   : > { %22092 = vmatprep.subr.mxu1 %v23216_v12 }
0x3e4f   : > { %22085 = vmatmul.mubr.msk.f32.vlgmr.msra.gmra.mrb[204].mxu1 %vm411_vm3, %v16986_v0 }
0x3e50   : > { %22094 = vmatprep.mubr.msk.f32.mxu1 %vm23215_vm0, %v23216_v12 }
0x3ee5   : > { %v25783_v13 = vpop.f32.mrb[198].mxu1 }
0x3ee6   : > { %v25785_v61 = vpop.f32.mrb[204].mxu0  ;;  %v22056_v2 = vpop.f32.mrb[199].mxu1 }
0x3ee7   : > { %v22051_v52 = vpop.f32.mrb[205].mxu0 }
0x3ef5   : > { %v25787_v56 = vpop.f32.mrb[206].mxu0 }
0x3ef6   : > { %v22061_v53 = vpop.f32.mrb[207].mxu0 }
0x3ef9   : > { %v16825_v41 = vpop.f32.mrb[208].mxu0 }
0x3efa   : > { %v17063_v36 = vmul.f32 0.125, %v16825_v41  ;;  %v22071_v24 = vpop.f32.mrb[209].mxu0 }
0x3efc   : > { %v17067_v15 = vsel %vm16392_vm8, %v17063_v36, -inf }
0x3efd   : > { %17068 = vmax.xlane.f32.xlu0 %v17067_v15  ;;  %v16981_v33 = vpop.f32.mrb[210].mxu0 }
0x3efe   : > { %v17065_v42 = vmul.f32 0.125, %v16981_v33  ;;  %v22081_v4 = vpop.f32.mrb[211].mxu0 }
0x3f00   : > { %v17073_v49 = vsel %vm16392_vm8, %v17065_v42, -inf }
0x3f01   : > { %17074 = vmax.xlane.f32.xlu0 %v17073_v49 }
0x3f1a   : > { %v25791_v9 = vpop.f32.mrb[200].mxu1 }
0x3f1b   : > { %v22066_v11 = vpop.f32.mrb[201].mxu1 }
0x3f1e   : > { %v16903_v18 = vpop.f32.mrb[202].mxu1 }
0x3f1f   : > { %v17064_v14 = vmul.f32 0.125, %v16903_v18  ;;  %v22076_v38 = vpop.f32.mrb[203].mxu1 }
0x3f21   : > { %v17070_v63 = vsel %vm16392_vm8, %v17064_v14, -inf }
0x3f22   : > { %17071 = vmax.xlane.f32.xlu1 %v17070_v63  ;;  %v17059_v19 = vpop.f32.mrb[204].mxu1 }
0x3f23   : > { %v17066_v20 = vmul.f32 0.125, %v17059_v19  ;;  %v22086_v50 = vpop.f32.mrb[205].mxu1 }
0x3f25   : > { %v17076_v5 = vsel %vm16392_vm8, %v17066_v20, -inf }
0x3f26   : > { %17077 = vmax.xlane.f32.xlu0 %v17076_v5 }
0x3f33   : > { %17188 = vrot.lane.b32.xlu1 %v25666_v27, %s23219_s6 }
0x3f37   : > { %17265 = vrot.lane.b32.xlu1 %v25681_v28, %s23219_s6 }
0x3f3b   : > { %17342 = vrot.lane.b32.xlu1 %v25683_v37, %s23219_s6 }
0x3f3c   : > { %17111 = vrot.lane.b32.xlu0 %v25664_v8, %s23219_s6 }
0x3f3f   : > { %17519 = vrot.lane.b32.xlu1 %v25666_v27, %s23220_s7 }
0x3f40   : > { %17441 = vrot.lane.b32.xlu0 %v25664_v8, %s23220_s7 }
0x3f8a   : > { %v17069_v21 = vpop.xlane.xlu0 %17068 }
0x3f8b   : > { %v17079_v23 = vsub.f32 %v17063_v36, %v17069_v21 }
0x3f8d   : > { %v17083_v60 = vmul.f32 1.442695, %v17079_v23 }
0x3f8e   : > { %v17075_v48 = vpop.xlane.xlu0 %17074 }
0x3f8f   : > { %23132 = vpow2.f32 %v17083_v60  ;;  %v17081_v25 = vsub.f32 %v17065_v42, %v17075_v48 }
0x3f91   : > { %v17087_v29 = vmul.f32 1.442695, %v17081_v25 }
0x3f93   : > { %23134 = vpow2.f32 %v17087_v29 }
0x3f99   : > { %v23133_v39 = vpop.eup %23132 }
0x3f9a   : > { %v17091_v26 = vsel %vm16392_vm8, %v23133_v39, 0.0 }
0x3f9b   : > { %17092 = vadd.xlane.f32.xlu0 %v17091_v26 }
0x3f9d   : > { %v23135_v10 = vpop.eup %23134 }
0x3f9e   : > { %v17097_v43 = vsel %vm16392_vm8, %v23135_v10, 0.0 }
0x3f9f   : > { %17098 = vadd.xlane.f32.xlu0 %v17097_v43 }
0x3faf   : > { %v17072_v54 = vpop.xlane.xlu1 %17071 }
0x3fb0   : > { %v17080_v47 = vsub.f32 %v17064_v14, %v17072_v54 }
0x3fb2   : > { %v17085_v58 = vmul.f32 1.442695, %v17080_v47 }
0x3fb3   : > { %v17189_v59 = vpop.permute.xlu1 %17188  ;;  %v17078_v6 = vpop.xlane.xlu0 %17077 }
0x3fb4   : > { %23136 = vpow2.f32 %v17085_v58  ;;  %22093 = vmatpush3.msk.msra.mxu1 %vm16443_vm9, %v17189_v59  ;;  %v17082_v35 = vsub.f32 %v17066_v20, %v17078_v6 }
0x3fb5   : > { %17439 = vrot.lane.b32.xlu0 %v25677_v44, %s23220_s7  ;;  %22102 = vmatprep.subr.mxu1 %v23216_v12 }
0x3fb6   : > { %v17089_v7 = vmul.f32 1.442695, %v17082_v35 }
0x3fb7   : > { %v17112_v31 = vpop.permute.xlu0 %17111  ;;  %v17266_v22 = vpop.permute.xlu1 %17265 }
0x3fb8   : > { %22088 = vmatpush3.msk.msra.mxu0 %vm16443_vm9, %v17112_v31  ;;  %23138 = vpow2.f32 %v17089_v7 }
0x3fb9   : > { %17597 = vrot.lane.b32.xlu0 %v25681_v28, %s23220_s7  ;;  %22097 = vmatprep.subr.mxu0 %v23216_v12 }
0x3fbb   : > { %v17442_v17 = vpop.permute.xlu0 %17441  ;;  %v17343_v53 = vpop.permute.xlu1 %17342 }
0x3fbd   : > { %17595 = vrot.lane.b32.xlu0 %v25699_v51, %s23220_s7 }
0x3fbe   : > { %v23137_v32 = vpop.eup %23136 }
0x3fbf   : > { %v17094_v40 = vsel %vm16392_vm8, %v23137_v32, 0.0  ;;  %v17520_v36 = vpop.permute.xlu1 %17519 }
0x3fc0   : > { %17095 = vadd.xlane.f32.xlu1 %v17094_v40 }
0x3fc2   : > { %v23139_v57 = vpop.eup %23138 }
0x3fc3   : > { %v17100_v45 = vsel %vm16392_vm8, %v23139_v57, 0.0 }
0x3fd1   : > { %17517 = vrot.lane.b32.xlu1 %v25679_v30, %s23220_s7 }
0x3ff5   : > { %17101 = vadd.xlane.f32.xlu1 %v17100_v45 }
0x4006   : > { %17675 = vrot.lane.b32.xlu1 %v25683_v37, %s23220_s7 }
0x400a   : > { %17673 = vrot.lane.b32.xlu1 %v25701_v46, %s23220_s7 }
0x4028   : > { %v17093_v16 = vpop.xlane.xlu0 %17092 }
0x4029   : > { %23140 = vrcp.f32 %v17093_v16 }
0x402c   : > { %v17099_v34 = vpop.xlane.xlu0 %17098 }
0x402d   : > { %23142 = vrcp.f32 %v17099_v34 }
0x4030   : > { %v17440_v2 = vpop.permute.xlu0 %17439 }
0x4033   : > { %v23141_v62 = vpop.eup %23140 }
0x4034   : > { %v17104_v1 = vmul.f32 %v23141_v62, %v23133_v39  ;;  %v17598_v52 = vpop.permute.xlu0 %17597 }
0x4036   : > { %22090 = vmatmul.mubr.msk.f32.vlgmr.msra.gmra.mrb[212].mxu0 %vm16439_vm10, %v17104_v1 }
0x4037   : > { %v23143_v55 = vpop.eup %23142  ;;  %22098 = vmatpush3.msk.msra.mxu0 %vm16443_vm9, %v17266_v22  ;;  %22099 = vmatprep.mubr.msk.f32.mxu0 %vm23215_vm0, %v23216_v12 }
0x4038   : > { %v17108_v0 = vmul.f32 %v23143_v55, %v23135_v10  ;;  %22107 = vmatprep.subr.mxu0 %v23216_v12  ;;  %v17596_v41 = vpop.permute.xlu0 %17595 }
0x403a   : > { %22100 = vmatmul.mubr.msk.f32.vlgmr.msra.gmra.mrb[214].mxu0 %vm16439_vm10, %v17108_v0 }
0x403b   : > { %22109 = vmatprep.mubr.msk.f32.mxu0 %vm23215_vm0, %v23216_v12 }
0x403e   : > { %22108 = vmatpush3.xpose.msk.msra.mxu0 %vm411_vm3, %v17442_v17 }
0x403f   : > { %22117 = vmatprep.subr.mxu0 %v23216_v12 }
0x4041   : > { %22110 = vmatmul.mubr.msk.f32.vlgmr.msra.gmra.mrb[216].mxu0 %vm411_vm3, %v17440_v2 }
0x4042   : > { %22118 = vmatpush3.xpose.msk.msra.mxu0 %vm411_vm3, %v17598_v52  ;;  %22119 = vmatprep.mubr.msk.f32.mxu0 %vm23215_vm0, %v23216_v12 }
0x4043   : > { %22127 = vmatprep.subr.mxu0 %v23216_v12 }
0x4045   : > { %22120 = vmatmul.mubr.msk.f32.vlgmr.msra.gmra.mrb[218].mxu0 %vm411_vm3, %v17596_v41 }
0x4046   : > { %22129 = vmatprep.mubr.msk.f32.mxu0 %vm23215_vm0, %v23216_v12 }
0x404d   : > { %v17096_v24 = vpop.xlane.xlu1 %17095 }
0x404e   : > { %23144 = vrcp.f32 %v17096_v24 }
0x4051   : > { %v17518_v42 = vpop.permute.xlu1 %17517 }
0x4058   : > { %v23145_v15 = vpop.eup %23144 }
0x4059   : > { %v17106_v33 = vmul.f32 %v23145_v15, %v23137_v32 }
0x405b   : > { %22095 = vmatmul.mubr.msk.f32.vlgmr.msra.gmra.mrb[206].mxu1 %vm16439_vm10, %v17106_v33 }
0x405c   : > { %22103 = vmatpush3.msk.msra.mxu1 %vm16443_vm9, %v17343_v53  ;;  %22104 = vmatprep.mubr.msk.f32.mxu1 %vm23215_vm0, %v23216_v12 }
0x405d   : > { %22112 = vmatprep.subr.mxu1 %v23216_v12 }
0x4082   : > { %v17102_v4 = vpop.xlane.xlu1 %17101 }
0x4083   : > { %23146 = vrcp.f32 %v17102_v4 }
0x4086   : > { %v17676_v18 = vpop.permute.xlu1 %17675 }
0x408a   : > { %v17674_v14 = vpop.permute.xlu1 %17673 }
0x408d   : > { %v23147_v49 = vpop.eup %23146 }
0x408e   : > { %v17110_v11 = vmul.f32 %v23147_v49, %v23139_v57 }
0x4090   : > { %22105 = vmatmul.mubr.msk.f32.vlgmr.msra.gmra.mrb[208].mxu1 %vm16439_vm10, %v17110_v11 }
0x4091   : > { %22113 = vmatpush3.xpose.msk.msra.mxu1 %vm411_vm3, %v17520_v36  ;;  %22114 = vmatprep.mubr.msk.f32.mxu1 %vm23215_vm0, %v23216_v12 }
0x4092   : > { %22122 = vmatprep.subr.mxu1 %v23216_v12 }
0x4094   : > { %22115 = vmatmul.mubr.msk.f32.vlgmr.msra.gmra.mrb[210].mxu1 %vm411_vm3, %v17518_v42 }
0x4095   : > { %22123 = vmatpush3.xpose.msk.msra.mxu1 %vm411_vm3, %v17676_v18  ;;  %22124 = vmatprep.mubr.msk.f32.mxu1 %vm23215_vm0, %v23216_v12 }
0x4096   : > { %22132 = vmatprep.subr.mxu1 %v23216_v12 }
0x4098   : > { %22125 = vmatmul.mubr.msk.f32.vlgmr.msra.gmra.mrb[212].mxu1 %vm411_vm3, %v17674_v14 }
0x4099   : > { %22134 = vmatprep.mubr.msk.f32.mxu1 %vm23215_vm0, %v23216_v12 }
0x4109   : > { %v25863_v38 = vpop.f32.mrb[212].mxu0 }
0x410a   : > { %v22091_v63 = vpop.f32.mrb[213].mxu0 }
0x410d   : > { %v25865_v19 = vpop.f32.mrb[214].mxu0 }
0x410e   : > { %v22101_v20 = vpop.f32.mrb[215].mxu0 }
0x4114   : > { %v17513_v50 = vpop.f32.mrb[216].mxu0 }
0x4115   : > { %v17751_v5 = vmul.f32 0.125, %v17513_v50  ;;  %v22111_v21 = vpop.f32.mrb[217].mxu0 }
0x4117   : > { %v17755_v23 = vsel %vm16392_vm8, %v17751_v5, -inf }
0x4118   : > { %17756 = vmax.xlane.f32.xlu0 %v17755_v23  ;;  %v17669_v60 = vpop.f32.mrb[218].mxu0 }
0x4119   : > { %v17753_v48 = vmul.f32 0.125, %v17669_v60  ;;  %v22121_v25 = vpop.f32.mrb[219].mxu0 }
0x411b   : > { %v17761_v29 = vsel %vm16392_vm8, %v17753_v48, -inf }
0x411c   : > { %17762 = vmax.xlane.f32.xlu0 %v17761_v29 }
0x412e   : > { %v25869_v39 = vpop.f32.mrb[206].mxu1 }
0x412f   : > { %v22096_v26 = vpop.f32.mrb[207].mxu1 }
0x4163   : > { %v25871_v10 = vpop.f32.mrb[208].mxu1 }
0x4164   : > { %v22106_v43 = vpop.f32.mrb[209].mxu1 }
0x4167   : > { %v17591_v54 = vpop.f32.mrb[210].mxu1 }
0x4168   : > { %v17752_v47 = vmul.f32 0.125, %v17591_v54  ;;  %v22116_v58 = vpop.f32.mrb[211].mxu1 }
0x416a   : > { %v17758_v59 = vsel %vm16392_vm8, %v17752_v47, -inf }
0x416b   : > { %17759 = vmax.xlane.f32.xlu1 %v17758_v59  ;;  %v17747_v6 = vpop.f32.mrb[212].mxu1 }
0x416c   : > { %v17754_v31 = vmul.f32 0.125, %v17747_v6  ;;  %v22126_v32 = vpop.f32.mrb[213].mxu1 }
0x416e   : > { %v17764_v40 = vsel %vm16392_vm8, %v17754_v31, -inf }
0x416f   : > { %17765 = vmax.xlane.f32.xlu0 %v17764_v40 }
0x417c   : > { %17876 = vrot.lane.b32.xlu1 %v25666_v27, %s23221_s8 }
0x4180   : > { %17953 = vrot.lane.b32.xlu1 %v25681_v28, %s23221_s8 }
0x4184   : > { %18030 = vrot.lane.b32.xlu1 %v25683_v37, %s23221_s8 }
0x4185   : > { %17799 = vrot.lane.b32.xlu0 %v25664_v8, %s23221_s8 }
0x4188   : > { %18207 = vrot.lane.b32.xlu1 %v25666_v27, %s23222_s9 }
0x41a5   : > { %v17757_v35 = vpop.xlane.xlu0 %17756 }
0x41a6   : > { %v17767_v7 = vsub.f32 %v17751_v5, %v17757_v35 }
0x41a8   : > { %v17771_v57 = vmul.f32 1.442695, %v17767_v7 }
0x41a9   : > { %v17763_v16 = vpop.xlane.xlu0 %17762 }
0x41aa   : > { %23148 = vpow2.f32 %v17771_v57  ;;  %v17769_v34 = vsub.f32 %v17753_v48, %v17763_v16 }
0x41ac   : > { %v17775_v62 = vmul.f32 1.442695, %v17769_v34 }
0x41ae   : > { %23150 = vpow2.f32 %v17775_v62 }
0x41b4   : > { %v23149_v45 = vpop.eup %23148 }
0x41b5   : > { %v17779_v17 = vsel %vm16392_vm8, %v23149_v45, 0.0 }
0x41b6   : > { %17780 = vadd.xlane.f32.xlu0 %v17779_v17 }
0x41b8   : > { %v23151_v1 = vpop.eup %23150 }
0x41b9   : > { %v17785_v22 = vsel %vm16392_vm8, %v23151_v1, 0.0 }
0x41cc   : > { %18129 = vrot.lane.b32.xlu0 %v25664_v8, %s23222_s9 }
0x41eb   : > { %17786 = vadd.xlane.f32.xlu0 %v17785_v22 }
0x41f8   : > { %v17760_v55 = vpop.xlane.xlu1 %17759 }
0x41f9   : > { %v17768_v0 = vsub.f32 %v17752_v47, %v17760_v55 }
0x41fb   : > { %v17773_v2 = vmul.f32 1.442695, %v17768_v0 }
0x41fc   : > { %v17877_v52 = vpop.permute.xlu1 %17876  ;;  %v17766_v53 = vpop.xlane.xlu0 %17765 }
0x41fd   : > { %23152 = vpow2.f32 %v17773_v2  ;;  %v17770_v41 = vsub.f32 %v17754_v31, %v17766_v53  ;;  %22133 = vmatpush3.msk.msra.mxu1 %vm16443_vm9, %v17877_v52 }
0x41fe   : > { %22142 = vmatprep.subr.mxu1 %v23216_v12 }
0x41ff   : > { %v17777_v36 = vmul.f32 1.442695, %v17770_v41 }
0x4200   : > { %v17800_v24 = vpop.permute.xlu0 %17799  ;;  %v17954_v14 = vpop.permute.xlu1 %17953 }
0x4201   : > { %23154 = vpow2.f32 %v17777_v36  ;;  %18127 = vrot.lane.b32.xlu0 %v25677_v44, %s23222_s9  ;;  %22128 = vmatpush3.msk.msra.mxu0 %vm16443_vm9, %v17800_v24 }
0x4202   : > { %22137 = vmatprep.subr.mxu0 %v23216_v12 }
0x4204   : > { %v18031_v60 = vpop.permute.xlu1 %18030 }
0x4205   : > { %18285 = vrot.lane.b32.xlu0 %v25681_v28, %s23222_s9 }
0x4207   : > { %v23153_v15 = vpop.eup %23152 }
0x4208   : > { %v17782_v33 = vsel %vm16392_vm8, %v23153_v15, 0.0  ;;  %v18208_v25 = vpop.permute.xlu1 %18207 }
0x4209   : > { %18283 = vrot.lane.b32.xlu0 %v25699_v51, %s23222_s9  ;;  %17783 = vadd.xlane.f32.xlu1 %v17782_v33 }
0x420b   : > { %v23155_v42 = vpop.eup %23154 }
0x420c   : > { %v17788_v4 = vsel %vm16392_vm8, %v23155_v42, 0.0 }
0x420d   : > { %17789 = vadd.xlane.f32.xlu1 %v17788_v4 }
0x421e   : > { %18205 = vrot.lane.b32.xlu1 %v25679_v30, %s23222_s9 }
0x4222   : > { %18363 = vrot.lane.b32.xlu1 %v25683_v37, %s23222_s9 }
0x4226   : > { %18361 = vrot.lane.b32.xlu1 %v25701_v46, %s23222_s9 }
0x4243   : > { %v17781_v49 = vpop.xlane.xlu0 %17780 }
0x4244   : > { %23156 = vrcp.f32 %v17781_v49 }
0x4247   : > { %v18130_v63 = vpop.permute.xlu0 %18129 }
0x424e   : > { %v23157_v11 = vpop.eup %23156 }
0x424f   : > { %v17792_v18 = vmul.f32 %v23157_v11, %v23149_v45 }
0x4251   : > { %22130 = vmatmul.mubr.msk.f32.vlgmr.msra.gmra.mrb[220].mxu0 %vm16439_vm10, %v17792_v18 }
0x4252   : > { %22138 = vmatpush3.msk.msra.mxu0 %vm16443_vm9, %v17954_v14  ;;  %22139 = vmatprep.mubr.msk.f32.mxu0 %vm23215_vm0, %v23216_v12 }
0x4253   : > { %22147 = vmatprep.subr.mxu0 %v23216_v12 }
0x4278   : > { %v17787_v20 = vpop.xlane.xlu0 %17786 }
0x4279   : > { %23158 = vrcp.f32 %v17787_v20 }
0x427c   : > { %v18128_v50 = vpop.permute.xlu0 %18127 }
0x4280   : > { %v18286_v23 = vpop.permute.xlu0 %18285 }
0x4283   : > { %v23159_v5 = vpop.eup %23158 }
0x4284   : > { %v17796_v21 = vmul.f32 %v23159_v5, %v23151_v1  ;;  %v18284_v48 = vpop.permute.xlu0 %18283 }
0x4286   : > { %22140 = vmatmul.mubr.msk.f32.vlgmr.msra.gmra.mrb[222].mxu0 %vm16439_vm10, %v17796_v21 }
0x4287   : > { %22148 = vmatpush3.xpose.msk.msra.mxu0 %vm411_vm3, %v18130_v63  ;;  %22149 = vmatprep.mubr.msk.f32.mxu0 %vm23215_vm0, %v23216_v12 }
0x4288   : > { %22157 = vmatprep.subr.mxu0 %v23216_v12 }
0x428a   : > { %22150 = vmatmul.mubr.msk.f32.vlgmr.msra.gmra.mrb[224].mxu0 %vm411_vm3, %v18128_v50 }
0x428b   : > { %22158 = vmatpush3.xpose.msk.msra.mxu0 %vm411_vm3, %v18286_v23  ;;  %22159 = vmatprep.mubr.msk.f32.mxu0 %vm23215_vm0, %v23216_v12 }
0x428c   : > { %22167 = vmatprep.subr.mxu0 %v23216_v12 }
0x428e   : > { %22160 = vmatmul.mubr.msk.f32.vlgmr.msra.gmra.mrb[226].mxu0 %vm411_vm3, %v18284_v48 }
0x428f   : > { %22169 = vmatprep.mubr.msk.f32.mxu0 %vm23215_vm0, %v23216_v12 }
0x4296   : > { %v17784_v29 = vpop.xlane.xlu1 %17783 }
0x4297   : > { %23160 = vrcp.f32 %v17784_v29 }
0x429a   : > { %v17790_v26 = vpop.xlane.xlu1 %17789 }
0x429b   : > { %23162 = vrcp.f32 %v17790_v26 }
0x429e   : > { %v18206_v59 = vpop.permute.xlu1 %18205 }
0x42a1   : > { %v23161_v43 = vpop.eup %23160 }
0x42a2   : > { %v17794_v54 = vmul.f32 %v23161_v43, %v23153_v15  ;;  %v18364_v6 = vpop.permute.xlu1 %18363 }
0x42a4   : > { %22135 = vmatmul.mubr.msk.f32.vlgmr.msra.gmra.mrb[214].mxu1 %vm16439_vm10, %v17794_v54 }
0x42a5   : > { %v23163_v47 = vpop.eup %23162  ;;  %22143 = vmatpush3.msk.msra.mxu1 %vm16443_vm9, %v18031_v60  ;;  %22144 = vmatprep.mubr.msk.f32.mxu1 %vm23215_vm0, %v23216_v12 }
0x42a6   : > { %v17798_v58 = vmul.f32 %v23163_v47, %v23155_v42  ;;  %22152 = vmatprep.subr.mxu1 %v23216_v12  ;;  %v18362_v31 = vpop.permute.xlu1 %18361 }
0x42a8   : > { %22145 = vmatmul.mubr.msk.f32.vlgmr.msra.gmra.mrb[216].mxu1 %vm16439_vm10, %v17798_v58 }
0x42a9   : > { %22154 = vmatprep.mubr.msk.f32.mxu1 %vm23215_vm0, %v23216_v12 }
0x42ac   : > { %22153 = vmatpush3.xpose.msk.msra.mxu1 %vm411_vm3, %v18208_v25 }
0x42ad   : > { %22162 = vmatprep.subr.mxu1 %v23216_v12 }
0x42af   : > { %22155 = vmatmul.mubr.msk.f32.vlgmr.msra.gmra.mrb[218].mxu1 %vm411_vm3, %v18206_v59 }
0x42b0   : > { %22163 = vmatpush3.xpose.msk.msra.mxu1 %vm411_vm3, %v18364_v6  ;;  %22164 = vmatprep.mubr.msk.f32.mxu1 %vm23215_vm0, %v23216_v12 }
0x42b1   : > { %22172 = vmatprep.subr.mxu1 %v23216_v12 }
0x42b3   : > { %22165 = vmatmul.mubr.msk.f32.vlgmr.msra.gmra.mrb[220].mxu1 %vm411_vm3, %v18362_v31 }
0x42b4   : > { %22174 = vmatprep.mubr.msk.f32.mxu1 %vm23215_vm0, %v23216_v12 }
0x4324   : > { %v17872_v32 = vpop.f32.mrb[220].mxu0 }
0x4325   : > { %v22131_v40 = vpop.f32.mrb[221].mxu0 }
0x4359   : > { %v25943_v35 = vpop.f32.mrb[222].mxu0 }
0x435a   : > { %v22141_v7 = vpop.f32.mrb[223].mxu0 }
0x435d   : > { %v18201_v57 = vpop.f32.mrb[224].mxu0 }
0x435e   : > { %v18439_v45 = vmul.f32 0.125, %v18201_v57  ;;  %v22151_v17 = vpop.f32.mrb[225].mxu0 }
0x4360   : > { %v18443_v16 = vsel %vm16392_vm8, %v18439_v45, -inf }
0x4361   : > { %18444 = vmax.xlane.f32.xlu0 %v18443_v16  ;;  %v18357_v34 = vpop.f32.mrb[226].mxu0 }
0x4362   : > { %v18441_v62 = vmul.f32 0.125, %v18357_v34  ;;  %v22161_v1 = vpop.f32.mrb[227].mxu0 }
0x4363   : > { %v15487_v1 = vld [vmem:[%s26230_s2 + $0x2b0] sm:$0xff] }
0x4364   : > { %v18449_v22 = vsel %vm16392_vm8, %v18441_v62, -inf }
0x4365   : > { %18450 = vmax.xlane.f32.xlu0 %v18449_v22  ;;  %v15488_v22 = vld [vmem:[%s26230_s2 + $0x2b8] sm:$0xff] }
0x4377   : > { %v17949_v55 = vpop.f32.mrb[214].mxu1 }
0x4378   : > { %v22136_v0 = vpop.f32.mrb[215].mxu1 }
0x4379   : > { %v15489_v0 = vld [vmem:[%s26230_s2 + $0x2c0] sm:$0xff] }
0x437b   : > { %v25947_v2 = vpop.f32.mrb[216].mxu1 }
0x437c   : > { %v22146_v52 = vpop.f32.mrb[217].mxu1 }
0x437d   : > { %v26004_v52 = vpack.c.bf16 %v15489_v0, %v15488_v22  ;;  %v19137_v22 = vld [vmem:[%s26229_s1 + $0x198] sm:$0xff] }
0x4382   : > { %v18279_v53 = vpop.f32.mrb[218].mxu1 }
0x4383   : > { %v18440_v41 = vmul.f32 0.125, %v18279_v53  ;;  %v22156_v36 = vpop.f32.mrb[219].mxu1  ;;  %v15490_v53 = vld [vmem:[%s26230_s2 + $0x2c8] sm:$0xff] }
0x4385   : > { %v18446_v24 = vsel %vm16392_vm8, %v18440_v41, -inf }
0x4386   : > { %18447 = vmax.xlane.f32.xlu1 %v18446_v24  ;;  %v18435_v15 = vpop.f32.mrb[220].mxu1  ;;  %v15492_v24 = vld [vmem:[%s26230_s2 + $0x2d8] sm:$0xff] }
0x4387   : > { %v18442_v33 = vmul.f32 0.125, %v18435_v15  ;;  %v22166_v42 = vpop.f32.mrb[221].mxu1  ;;  %v15493_v15 = vld [vmem:[%s26230_s2 + $0x2e0] sm:$0xff] }
0x4389   : > { %v18452_v4 = vsel %vm16392_vm8, %v18442_v33, -inf }
0x438a   : > { %18453 = vmax.xlane.f32.xlu0 %v18452_v4 }
0x43ee   : > { %v18445_v49 = vpop.xlane.xlu0 %18444 }
0x43ef   : > { %v18455_v11 = vsub.f32 %v18439_v45, %v18445_v49 }
0x43f1   : > { %v18459_v18 = vmul.f32 1.442695, %v18455_v11 }
0x43f2   : > { %v18451_v14 = vpop.xlane.xlu0 %18450 }
0x43f3   : > { %23164 = vpow2.f32 %v18459_v18  ;;  %v18457_v63 = vsub.f32 %v18441_v62, %v18451_v14  ;;  %v15486_v62 = vld [vmem:[%s26230_s2 + $0x2a8] sm:$0xff] }
0x43f5   : > { %v18463_v20 = vmul.f32 1.442695, %v18457_v63  ;;  %v23205_v63 = vld [vmem:[%s26231_s3 + $0x5] ss:$0 sm:$0xff] }
0x43f7   : > { %23166 = vpow2.f32 %v18463_v20 }
0x43fd   : > { %v23165_v50 = vpop.eup %23164 }
0x43fe   : > { %v18467_v5 = vsel %vm16392_vm8, %v23165_v50, 0.0 }
0x43ff   : > { %18468 = vadd.xlane.f32.xlu0 %v18467_v5 }
0x4401   : > { %v23167_v21 = vpop.eup %23166 }
0x4402   : > { %v18473_v23 = vsel %vm16392_vm8, %v23167_v21, 0.0 }
0x4403   : > { %18474 = vadd.xlane.f32.xlu0 %v18473_v23  ;;  %v16747_v23 = vadd.f32 %v25785_v61, %v25677_v44 }
0x4413   : > { %v18448_v60 = vpop.xlane.xlu1 %18447 }
0x4414   : > { %v18456_v48 = vsub.f32 %v18440_v41, %v18448_v60  ;;  %v15491_v41 = vld [vmem:[%s26230_s2 + $0x2d0] sm:$0xff] }
0x4415   : > { %v26016_v36 = vpack.c.bf16 %v15491_v41, %v15490_v53  ;;  %v16750_v41 = vadd.f32 %v25791_v9, %v25701_v46 }
0x4416   : > { %v18461_v25 = vmul.f32 1.442695, %v18456_v48 }
0x4417   : > { %v18454_v43 = vpop.xlane.xlu0 %18453 }
0x4418   : > { %23168 = vpow2.f32 %v18461_v25  ;;  %v18458_v54 = vsub.f32 %v18442_v33, %v18454_v43  ;;  %v26031_v33 = vpack.c.bf16 %v15493_v15, %v15492_v24 }
0x4419   : > { %18487 = vrot.lane.b32.xlu0 %v25664_v8, %s23223_s10 }
0x441a   : > { %v18465_v47 = vmul.f32 1.442695, %v18458_v54  ;;  %v19131_v54 = vld [vmem:[%s26229_s1 + $0x168] sm:$0xff] }
0x441c   : > { %23170 = vpow2.f32 %v18465_v47  ;;  %v19132_v47 = vld [vmem:[%s26229_s1 + $0x170] sm:$0xff] }
0x441d   : > { %17423 = vrot.lane.b32.xlu0 %v25863_v38, %s23223_s10 }
0x4421   : > { %18111 = vrot.lane.b32.xlu0 %v17872_v32, %s23221_s8 }
0x4422   : > { %v23169_v29 = vpop.eup %23168 }
0x4423   : > { %v18470_v26 = vsel %vm16392_vm8, %v23169_v29, 0.0 }
0x4424   : > { %18471 = vadd.xlane.f32.xlu1 %v18470_v26 }
0x4426   : > { %v23171_v8 = vpop.eup %23170 }
0x4427   : > { %v18476_v58 = vsel %vm16392_vm8, %v23171_v8, 0.0 }
0x4435   : > { %18564 = vrot.lane.b32.xlu1 %v25666_v27, %s23223_s10 }
0x4439   : > { %18641 = vrot.lane.b32.xlu1 %v25681_v28, %s23223_s10 }
0x445d   : > { %18477 = vadd.xlane.f32.xlu1 %v18476_v58 }
0x446e   : > { %18718 = vrot.lane.b32.xlu1 %v25683_v37, %s23223_s10 }
0x4472   : > { %17425 = vrot.lane.b32.xlu1 %v25869_v39, %s23223_s10 }
0x4476   : > { %18113 = vrot.lane.b32.xlu1 %v17949_v55, %s23221_s8  ;;  %v25998_v55 = vpack.c.bf16 %v15487_v1, %v15486_v62 }
0x448c   : > { %v18469_v27 = vpop.xlane.xlu0 %18468 }
0x448d   : > { %23172 = vrcp.f32 %v18469_v27 }
0x4490   : > { %v18475_v38 = vpop.xlane.xlu0 %18474 }
0x4491   : > { %23174 = vrcp.f32 %v18475_v38 }
0x4494   : > { %v18488_v28 = vpop.permute.xlu0 %18487 }
0x4495   : > { %22168 = vmatpush3.msk.msra.mxu0 %vm16443_vm9, %v18488_v28 }
0x4496   : > { %22177 = vmatprep.subr.mxu0 %v23216_v12 }
0x4497   : > { %v23173_v59 = vpop.eup %23172 }
0x4498   : > { %v18480_v6 = vmul.f32 %v23173_v59, %v23165_v50  ;;  %v17424_v20 = vpop.permute.xlu0 %17423 }
0x4499   : > { %v17435_v5 = vadd.f32 %v17424_v20, %v25677_v44 }
0x449a   : > { %22170 = vmatmul.mubr.msk.f32.vlgmr.msra.gmra.mrb[228].mxu0 %vm16439_vm10, %v18480_v6  ;;  %v26088_v6 = vpack.c.bf16 %v19132_v47, %v19131_v54 }
0x449b   : > { %22179 = vmatprep.mubr.msk.f32.mxu0 %vm23215_vm0, %v23216_v12  ;;  %v23175_v31 = vpop.eup %23174  ;;  %v18815_v48 = vsel %vm411_vm3, %v16747_v23, %v17435_v5 }
0x449c   : > { %v18484_v32 = vmul.f32 %v23175_v31, %v23167_v21  ;;  %v18112_v50 = vpop.permute.xlu0 %18111  ;;  %v16748_v31 = vadd.f32 %v25783_v13, %v25679_v30 }
0x449d   : > { %v18123_v21 = vadd.f32 %v18112_v50, %v25677_v44 }
0x44b1   : > { %v18472_v37 = vpop.xlane.xlu1 %18471 }
0x44b2   : > { %23176 = vrcp.f32 %v18472_v37 }
0x44b5   : > { %v18565_v39 = vpop.permute.xlu1 %18564 }
0x44b6   : > { %22173 = vmatpush3.msk.msra.mxu1 %vm16443_vm9, %v18565_v39 }
0x44b7   : > { %22182 = vmatprep.subr.mxu1 %v23216_v12 }
0x44b9   : > { %v18642_v40 = vpop.permute.xlu1 %18641 }
0x44ba   : > { %22178 = vmatpush3.msk.msra.mxu0 %vm16443_vm9, %v18642_v40 }
0x44bb   : > { %22180 = vmatmul.mubr.msk.f32.vlgmr.msra.gmra.mrb[230].mxu0 %vm16439_vm10, %v18484_v32  ;;  %22679 = vmatprep.subr.bf16.mxu0 %v23214_v3 }
0x44bc   : > { %v23177_v7 = vpop.eup %23176  ;;  %22203 = vmatprep.mubr.msk.f32.mxu0 %vm23215_vm0, %v23216_v12  ;;  %22681 = vmatpush3.bf16.msra.mxu0 %v25998_v55 }
0x44bd   : > { %v18482_v57 = vmul.f32 %v23177_v7, %v23169_v29  ;;  %22682 = vmatprep.subr.bf16.mxu0 %v23214_v3 }
0x44bf   : > { %22175 = vmatmul.mubr.msk.f32.vlgmr.msra.gmra.mrb[222].mxu1 %vm16439_vm10, %v18482_v57 }
0x44c0   : > { %22184 = vmatprep.mubr.msk.f32.mxu1 %vm23215_vm0, %v23216_v12  ;;  %22684 = vmatpush3.bf16.msra.mxu0 %v26004_v52 }
0x44c1   : > { %22685 = vmatprep.subr.bf16.mxu0 %v23214_v3 }
0x44c4   : > { %22687 = vmatpush3.bf16.msra.mxu0 %v26016_v36 }
0x44c5   : > { %22688 = vmatprep.subr.bf16.mxu0 %v23214_v3 }
0x44c8   : > { %22690 = vmatpush3.bf16.msra.mxu0 %v26031_v33 }
0x44c9   : > { %22703 = vmatprep.subr.bf16.mxu0 %v23214_v3 }
0x44ea   : > { %v18478_v45 = vpop.xlane.xlu1 %18477 }
0x44eb   : > { %23178 = vrcp.f32 %v18478_v45 }
0x44ee   : > { %v18719_v17 = vpop.permute.xlu1 %18718 }
0x44ef   : > { %22183 = vmatpush3.msk.msra.mxu1 %vm16443_vm9, %v18719_v17 }
0x44f0   : > { %22691 = vmatprep.subr.bf16.mxu1 %v23214_v3 }
0x44f2   : > { %v17426_v61 = vpop.permute.xlu1 %17425 }
0x44f3   : > { %v17436_v38 = vadd.f32 %v17426_v61, %v25679_v30  ;;  %v23224_v61 = vmov 60  }
0x44f4   : > { %22794 = vset.pattern.permute.xlu1 %v23224_v61  ;;  %22795 = vset.pattern.permute.xlu0 %v23224_v61 }
0x44f5   : > { %v23179_v16 = vpop.eup %23178  ;;  %v18816_v7 = vsel %vm411_vm3, %v16748_v31, %v17436_v38 }
0x44f6   : > { %v18486_v34 = vmul.f32 %v23179_v16, %v23171_v8  ;;  %v16749_v8 = vadd.f32 %v25787_v56, %v25699_v51  ;;  %v18114_v58 = vpop.permute.xlu1 %18113  ;;  %v19133_v56 = vld [vmem:[%s26229_s1 + $0x178] sm:$0xff]  ;;  %v19135_v16 = vld [vmem:[%s26229_s1 + $0x188] sm:$0xff] }
0x44f7   : > { %v18124_v37 = vadd.f32 %v18114_v58, %v25679_v30 }
0x44f8   : > { %22185 = vmatmul.mubr.msk.f32.vlgmr.msra.gmra.mrb[224].mxu1 %vm16439_vm10, %v18486_v34 }
0x44f9   : > { %22222 = vmatprep.mubr.msk.f32.mxu1 %vm23215_vm0, %v23216_v12  ;;  %22693 = vmatpush3.bf16.msra.mxu1 %v25998_v55  ;;  %v18820_v13 = vsel %vm3084_vm5, %v18816_v7, %v18124_v37 }
0x44fa   : > { %22694 = vmatprep.subr.bf16.mxu1 %v23214_v3 }
0x44fd   : > { %22696 = vmatpush3.bf16.msra.mxu1 %v26004_v52 }
0x44fe   : > { %22697 = vmatprep.subr.bf16.mxu1 %v23214_v3 }
0x4501   : > { %22699 = vmatpush3.bf16.msra.mxu1 %v26016_v36 }
0x4502   : > { %22700 = vmatprep.subr.bf16.mxu1 %v23214_v3 }
0x4505   : > { %22702 = vmatpush3.bf16.msra.mxu1 %v26031_v33 }
0x4506   : > { %22715 = vmatprep.subr.bf16.mxu1 %v23214_v3 }
0x456d   : > { %v18560_v42 = vpop.f32.mrb[228].mxu0 }
0x456e   : > { %18799 = vrot.lane.b32.xlu0 %v18560_v42, %s23219_s6  ;;  %v22171_v4 = vpop.f32.mrb[229].mxu0 }
0x4572   : > { %17427 = vrot.lane.b32.xlu0 %v25865_v19, %s23223_s10 }
0x4576   : > { %18115 = vrot.lane.b32.xlu0 %v25943_v35, %s23221_s8 }
0x458e   : > { %v18714_v49 = vpop.f32.mrb[230].mxu0 }
0x458f   : > { %18803 = vrot.lane.b32.xlu0 %v18714_v49, %s23219_s6  ;;  %v22181_v11 = vpop.f32.mrb[231].mxu0 }
0x4592   : > { %v18637_v18 = vpop.f32.mrb[222].mxu1 }
0x4593   : > { %v22176_v14 = vpop.f32.mrb[223].mxu1  ;;  %18801 = vrot.lane.b32.xlu1 %v18637_v18, %s23219_s6  ;;  %18828 = vrot.lane.b32.xlu0 %v23205_v63, %s23217_s30 }
0x4597   : > { %17429 = vrot.lane.b32.xlu1 %v25871_v10, %s23223_s10 }
0x459b   : > { %18117 = vrot.lane.b32.xlu1 %v25947_v2, %s23221_s8  ;;  %v18819_v2 = vsel %vm3084_vm5, %v18815_v48, %v18123_v21 }
0x45cb   : > { %v18791_v19 = vpop.f32.mrb[224].mxu1 }
0x45cc   : > { %18805 = vrot.lane.b32.xlu1 %v18791_v19, %s23219_s6  ;;  %v22186_v35 = vpop.f32.mrb[225].mxu1 }
0x45e0   : > { %v18800_v60 = vpop.permute.xlu0 %18799 }
0x45e1   : > { %v18811_v10 = vadd.f32 %v18800_v60, %v25677_v44 }
0x45e3   : > { %v26061_v25 = vsel %vm3089_vm6, %v18819_v2, %v18811_v10 }
0x45e4   : > { %22204 = vmatmul.mubr.msk.f32.vlgmr.msra.gmra.mrb[232].mxu0 %vm337_vm2, %v26061_v25  ;;  %v17428_v44 = vpop.permute.xlu0 %17427 }
0x45e5   : > { %22705 = vmatpush3.bf16.msra.mxu0 %v25998_v55  ;;  %22241 = vmatprep.mubr.msk.f32.mxu0 %vm23215_vm0, %v23216_v12  ;;  %v17437_v26 = vadd.f32 %v17428_v44, %v25699_v51 }
0x45e6   : > { %22706 = vmatprep.subr.bf16.mxu0 %v23214_v3 }
0x45e7   : > { %v18817_v28 = vsel %vm411_vm3, %v16749_v8, %v17437_v26 }
0x45e8   : > { %v18116_v29 = vpop.permute.xlu0 %18115 }
0x45e9   : > { %22708 = vmatpush3.bf16.msra.mxu0 %v26004_v52  ;;  %v18125_v43 = vadd.f32 %v18116_v29, %v25699_v51 }
0x45ea   : > { %22709 = vmatprep.subr.bf16.mxu0 %v23214_v3 }
0x45eb   : > { %v18821_v39 = vsel %vm3084_vm5, %v18817_v28, %v18125_v43 }
0x45ed   : > { %22711 = vmatpush3.bf16.msra.mxu0 %v26016_v36 }
0x45ee   : > { %22712 = vmatprep.subr.bf16.mxu0 %v23214_v3 }
0x45f1   : > { %22714 = vmatpush3.bf16.msra.mxu0 %v26031_v33 }
0x45f2   : > { %22727 = vmatprep.subr.bf16.mxu0 %v23214_v3 }
0x4601   : > { %v18804_v27 = vpop.permute.xlu0 %18803 }
0x4602   : > { %v18813_v59 = vadd.f32 %v18804_v27, %v25699_v51  ;;  %v19134_v51 = vld [vmem:[%s26229_s1 + $0x180] sm:$0xff] }
0x4603   : > { %v26112_v45 = vpack.c.bf16 %v19134_v51, %v19133_v56 }
0x4604   : > { %v26095_v32 = vsel %vm3089_vm6, %v18821_v39, %v18813_v59 }
0x4605   : > { %v18802_v40 = vpop.permute.xlu1 %18801  ;;  %22242 = vmatmul.mubr.msk.f32.vlgmr.msra.gmra.mrb[234].mxu0 %vm337_vm2, %v26095_v32 }
0x4606   : > { %v18812_v57 = vadd.f32 %v18802_v40, %v25679_v30  ;;  %22729 = vmatpush3.bf16.msra.mxu0 %v26088_v6  ;;  %22279 = vmatprep.mubr.msk.f32.mxu0 %vm23215_vm0, %v23216_v12  ;;  %v19136_v30 = vld [vmem:[%s26229_s1 + $0x190] sm:$0xff] }
0x4607   : > { %22730 = vmatprep.subr.bf16.mxu0 %v23214_v3  ;;  %v26130_v34 = vpack.c.bf16 %v19136_v30, %v19135_v16 }
0x4608   : > { %v26115_v17 = vsel %vm3089_vm6, %v18820_v13, %v18812_v57 }
0x4609   : > { %22223 = vmatmul.mubr.msk.f32.vlgmr.msra.gmra.mrb[226].mxu1 %vm337_vm2, %v26115_v17  ;;  %v17430_v62 = vpop.permute.xlu1 %17429 }
0x460a   : > { %22717 = vmatpush3.bf16.msra.mxu1 %v25998_v55  ;;  %22260 = vmatprep.mubr.msk.f32.mxu1 %vm23215_vm0, %v23216_v12  ;;  %v19138_v55 = vld [vmem:[%s26229_s1 + $0x1a0] sm:$0xff] }
0x460b   : > { %22718 = vmatprep.subr.bf16.mxu1 %v23214_v3  ;;  %22732 = vmatpush3.bf16.msra.mxu0 %v26112_v45  ;;  %v22737_v0 = vpack.c.bf16 %v19138_v55, %v19137_v22 }
0x460c   : > { %22733 = vmatprep.subr.bf16.mxu0 %v23214_v3 }
0x460d   : > { %v18118_v1 = vpop.permute.xlu1 %18117 }
0x460e   : > { %22720 = vmatpush3.bf16.msra.mxu1 %v26004_v52  ;;  %v17438_v52 = vadd.f32 %v17430_v62, %v25701_v46  ;;  %v18126_v53 = vadd.f32 %v18118_v1, %v25701_v46 }
0x460f   : > { %22721 = vmatprep.subr.bf16.mxu1 %v23214_v3  ;;  %22735 = vmatpush3.bf16.msra.mxu0 %v26130_v34 }
0x4610   : > { %22736 = vmatprep.subr.bf16.mxu0 %v23214_v3  ;;  %v18818_v24 = vsel %vm411_vm3, %v16750_v41, %v17438_v52 }
0x4612   : > { %22723 = vmatpush3.bf16.msra.mxu1 %v26016_v36 }
0x4613   : > { %22724 = vmatprep.subr.bf16.mxu1 %v23214_v3  ;;  %22738 = vmatpush3.bf16.msra.mxu0 %v22737_v0 }
0x4614   : > { %22751 = vmatprep.subr.bf16.mxu0 %v23214_v3 }
0x4616   : > { %22726 = vmatpush3.bf16.msra.mxu1 %v26031_v33  ;;  %v18822_v33 = vsel %vm3084_vm5, %v18818_v24, %v18126_v53 }
0x4617   : > { %22739 = vmatprep.subr.bf16.mxu1 %v23214_v3 }
0x463e   : > { %v18806_v36 = vpop.permute.xlu1 %18805 }
0x463f   : > { %v18814_v15 = vadd.f32 %v18806_v36, %v25701_v46  ;;  %v18829_v46 = vpop.permute.xlu0 %18828 }
0x4641   : > { %v18826_v42 = vsel %vm3089_vm6, %v18822_v33, %v18814_v15 }
0x4642   : > { %22261 = vmatmul.mubr.msk.f32.vlgmr.msra.gmra.mrb[228].mxu1 %vm337_vm2, %v18826_v42 }
0x4643   : > { %22741 = vmatpush3.bf16.msra.mxu1 %v26088_v6  ;;  %22298 = vmatprep.mubr.msk.f32.mxu1 %vm23215_vm0, %v23216_v12 }
0x4644   : > { %22742 = vmatprep.subr.bf16.mxu1 %v23214_v3 }
0x4647   : > { %22744 = vmatpush3.bf16.msra.mxu1 %v26112_v45 }
0x4648   : > { %22745 = vmatprep.subr.bf16.mxu1 %v23214_v3 }
0x464b   : > { %22747 = vmatpush3.bf16.msra.mxu1 %v26130_v34 }
0x464c   : > { %22748 = vmatprep.subr.bf16.mxu1 %v23214_v3 }
0x464f   : > { %22750 = vmatpush3.bf16.msra.mxu1 %v22737_v0 }
0x4650   : > { %22763 = vmatprep.subr.bf16.mxu1 %v23214_v3 }
0x46b7   : > { %v18900_v9 = vpop.f32.mrb[232].mxu0 }
0x46b8   : > { %v18901_v4 = vadd.f32 %v18900_v9, %v18829_v46  ;;  %v22205_v49 = vpop.f32.mrb[233].mxu0 }
0x46ba   : > { %v19123_v11 = vmax.f32 %v18901_v4, 0.0 }
0x46bc   : > { %v19127_v18 = vadd.f32 %v19123_v11, %v26061_v25 }
0x46be   : > { %22280 = vmatmul.mubr.msk.f32.vlgmr.msra.gmra.mrb[236].mxu0 %vm337_vm2, %v19127_v18 }
0x46bf   : > { %22753 = vmatpush3.bf16.msra.mxu0 %v26088_v6  ;;  %22317 = vmatprep.mubr.msk.f32.mxu0 %vm23215_vm0, %v23216_v12 }
0x46c0   : > { %22754 = vmatprep.subr.bf16.mxu0 %v23214_v3 }
0x46c3   : > { %22756 = vmatpush3.bf16.msra.mxu0 %v26112_v45 }
0x46c4   : > { %22757 = vmatprep.subr.bf16.mxu0 %v23214_v3 }
0x46c7   : > { %22759 = vmatpush3.bf16.msra.mxu0 %v26130_v34 }
0x46c8   : > { %22760 = vmatprep.subr.bf16.mxu0 %v23214_v3 }
0x46cb   : > { %22762 = vmatpush3.bf16.msra.mxu0 %v22737_v0 }
0x46d8   : > { %v19046_v14 = vpop.f32.mrb[234].mxu0 }
0x46d9   : > { %v19047_v63 = vadd.f32 %v19046_v14, %v18829_v46  ;;  %v22243_v19 = vpop.f32.mrb[235].mxu0 }
0x46db   : > { %v19125_v35 = vmax.f32 %v19047_v63, 0.0 }
0x46dc   : > { %v18973_v20 = vpop.f32.mrb[226].mxu1 }
0x46dd   : > { %v19129_v50 = vadd.f32 %v19125_v35, %v26095_v32  ;;  %v18974_v5 = vadd.f32 %v18973_v20, %v18829_v46  ;;  %v22224_v21 = vpop.f32.mrb[227].mxu1 }
0x46df   : > { %v19124_v23 = vmax.f32 %v18974_v5, 0.0  ;;  %22318 = vmatmul.mubr.msk.f32.vlgmr.msra.gmra.mrb[238].mxu0 %vm337_vm2, %v19129_v50 }
0x46e1   : > { %v19128_v60 = vadd.f32 %v19124_v23, %v26115_v17 }
0x46e3   : > { %22299 = vmatmul.mubr.msk.f32.vlgmr.msra.gmra.mrb[230].mxu1 %vm337_vm2, %v19128_v60 }
0x46e4   : > { %22765 = vmatpush3.bf16.msra.mxu1 %v26088_v6  ;;  %22336 = vmatprep.mubr.msk.f32.mxu1 %vm23215_vm0, %v23216_v12  ;;  %v26192_v12 = vld [vmem:[%s26231_s3 + $0xc] ss:$0 sm:$0xff] }
0x46e5   : > { %22766 = vmatprep.subr.bf16.mxu1 %v23214_v3 }
0x46e8   : > { %22768 = vmatpush3.bf16.msra.mxu1 %v26112_v45 }
0x46e9   : > { %22769 = vmatprep.subr.bf16.mxu1 %v23214_v3 }
0x46ec   : > { %22771 = vmatpush3.bf16.msra.mxu1 %v26130_v34 }
0x46ed   : > { %22772 = vmatprep.subr.bf16.mxu1 %v23214_v3 }
0x46f0   : > { %22774 = vmatpush3.bf16.msra.mxu1 %v22737_v0 }
0x4715   : > { %v19119_v48 = vpop.f32.mrb[228].mxu1 }
0x4716   : > { %v19120_v10 = vadd.f32 %v19119_v48, %v18829_v46  ;;  %v22262_v2 = vpop.f32.mrb[229].mxu1 }
0x4718   : > { %v19126_v25 = vmax.f32 %v19120_v10, 0.0 }
0x471a   : > { %v19130_v44 = vadd.f32 %v19126_v25, %v18826_v42 }
0x471c   : > { %22337 = vmatmul.mubr.msk.f32.vlgmr.msra.gmra.mrb[232].mxu1 %vm337_vm2, %v19130_v44 }
0x4791   : > { %v19213_v29 = vpop.f32.mrb[236].mxu0 }
0x4792   : > { %v26195_v3 = vadd.f32 %v26192_v12, %v19213_v29  ;;  %v22281_v26 = vpop.f32.mrb[237].mxu0 }
0x4794   : > { %v19437_v43 = vsel %vm19436_vm11, %v26195_v3, -inf }
0x4795   : > { %v19438_v54 = vrot.slane %v19437_v43, 4 }
0x4797   : > { %v19439_v47 = vmax.f32 %v19437_v43, %v19438_v54 }
0x4799   : > { %v19440_v8 = vrot.slane %v19439_v47, 2 }
0x479b   : > { %v19441_v58 = vmax.f32 %v19439_v47, %v19440_v8 }
0x479d   : > { %v19442_v27 = vrot.slane %v19441_v58, 1 }
0x479f   : > { %v19443_v38 = vmax.f32 %v19441_v58, %v19442_v27 }
0x47a1   : > { %v19465_v28 = vsub.f32 %v26195_v3, %v19443_v38 }
0x47a3   : > { %v19469_v59 = vmul.f32 1.442695, %v19465_v28 }
0x47a5   : > { %23180 = vpow2.f32 %v19469_v59 }
0x47af   : > { %v23181_v6 = vpop.eup %23180 }
0x47b0   : > { %v19477_v37 = vsel %vm19436_vm11, %v23181_v6, 0.0 }
0x47b1   : > { %v19478_v39 = vrot.slane %v19477_v37, 4 }
0x47b2   : > { %v19359_v31 = vpop.f32.mrb[238].mxu0 }
0x47b3   : > { %v19479_v32 = vadd.f32 %v19478_v39, %v19477_v37  ;;  %v26202_v56 = vadd.f32 %v26192_v12, %v19359_v31  ;;  %v22319_v51 = vpop.f32.mrb[239].mxu0 }
0x47b5   : > { %v19480_v40 = vrot.slane %v19479_v32, 2  ;;  %v19451_v7 = vsel %vm19436_vm11, %v26202_v56, -inf }
0x47b6   : > { %v19452_v57 = vrot.slane %v19451_v7, 4  ;;  %v19286_v13 = vpop.f32.mrb[230].mxu1 }
0x47b7   : > { %v19481_v45 = vadd.f32 %v19480_v40, %v19479_v32  ;;  %v26207_v17 = vadd.f32 %v26192_v12, %v19286_v13  ;;  %v22300_v16 = vpop.f32.mrb[231].mxu1 }
0x47b8   : > { %v19453_v30 = vmax.f32 %v19451_v7, %v19452_v57 }
0x47b9   : > { %v19444_v34 = vsel %vm19436_vm11, %v26207_v17, -inf  ;;  %v19482_v62 = vrot.slane %v19481_v45, 1 }
0x47ba   : > { %v19454_v1 = vrot.slane %v19453_v30, 2  ;;  %v19445_v22 = vrot.slane %v19444_v34, 4 }
0x47bb   : > { %v19483_v55 = vadd.f32 %v19482_v62, %v19481_v45 }
0x47bc   : > { %v19455_v0 = vmax.f32 %v19453_v30, %v19454_v1  ;;  %v19446_v52 = vmax.f32 %v19444_v34, %v19445_v22  ;;  %v19513_v34 = vlaneseq }
0x47bd   : > { %23182 = vrcp.f32 %v19483_v55 }
0x47be   : > { %v19456_v53 = vrot.slane %v19455_v0, 1  ;;  %v19447_v41 = vrot.slane %v19446_v52, 2  ;;  %v19514_v62 = vand.u32 127, %v19513_v34 }
0x47c0   : > { %v19457_v36 = vmax.f32 %v19455_v0, %v19456_v53  ;;  %v19448_v24 = vmax.f32 %v19446_v52, %v19447_v41  ;;  %vm19515_vm12 = vcmp.eq.s32.totalorder %v19514_v62, 60 }
0x47c2   : > { %v19467_v15 = vsub.f32 %v26202_v56, %v19457_v36  ;;  %v19449_v33 = vrot.slane %v19448_v24, 1 }
0x47c4   : > { %v19473_v42 = vmul.f32 1.442695, %v19467_v15  ;;  %v19450_v46 = vmax.f32 %v19448_v24, %v19449_v33 }
0x47c6   : > { %23184 = vpow2.f32 %v19473_v42  ;;  %v19466_v9 = vsub.f32 %v26207_v17, %v19450_v46 }
0x47c7   : > { %v23183_v4 = vpop.eup %23182 }
0x47c8   : > { %v19471_v49 = vmul.f32 1.442695, %v19466_v9  ;;  %v19506_v11 = vmul.f32 %v23183_v4, %v23181_v6 }
0x47ca   : > { %23186 = vpow2.f32 %v19471_v49  ;;  %19518 = vperm.xlu1 %22794, %v19506_v11  }
0x47d0   : > { %v23185_v18 = vpop.eup %23184 }
0x47d1   : > { %v19491_v14 = vsel %vm19436_vm11, %v23185_v18, 0.0 }
0x47d2   : > { %v19492_v63 = vrot.slane %v19491_v14, 4 }
0x47d4   : > { %v23187_v19 = vpop.eup %23186  ;;  %v19493_v35 = vadd.f32 %v19492_v63, %v19491_v14 }
0x47d5   : > { %v19484_v20 = vsel %vm19436_vm11, %v23187_v19, 0.0 }
0x47d6   : > { %v19494_v50 = vrot.slane %v19493_v35, 2  ;;  %v19485_v5 = vrot.slane %v19484_v20, 4 }
0x47d8   : > { %v19495_v21 = vadd.f32 %v19494_v50, %v19493_v35  ;;  %v19486_v23 = vadd.f32 %v19485_v5, %v19484_v20 }
0x47da   : > { %v19487_v60 = vrot.slane %v19486_v23, 2  ;;  %v19496_v48 = vrot.slane %v19495_v21, 1 }
0x47dc   : > { %v19488_v10 = vadd.f32 %v19487_v60, %v19486_v23  ;;  %v19497_v2 = vadd.f32 %v19496_v48, %v19495_v21 }
0x47de   : > { %23188 = vrcp.f32 %v19497_v2  ;;  %v19489_v25 = vrot.slane %v19488_v10, 1 }
0x47e0   : > { %v19490_v44 = vadd.f32 %v19489_v25, %v19488_v10 }
0x47e2   : > { %23190 = vrcp.f32 %v19490_v44 }
0x47e8   : > { %v23189_v61 = vpop.eup %23188 }
0x47e9   : > { %v19510_v29 = vmul.f32 %v23189_v61, %v23185_v18 }
0x47eb   : > { %19528 = vperm.xlu1 %22794, %v19510_v29  }
0x47ec   : > { %v23191_v26 = vpop.eup %23190 }
0x47ed   : > { %v19508_v43 = vmul.f32 %v23191_v26, %v23187_v19 }
0x47ef   : > { %19523 = vperm.xlu0 %22795, %v19508_v43   ;;  %v19432_v54 = vpop.f32.mrb[232].mxu1 }
0x47f0   : > { %v19433_v47 = vadd.f32 %v26192_v12, %v19432_v54  ;;  %v22338_v8 = vpop.f32.mrb[233].mxu1 }
0x47f2   : > { %v19458_v58 = vsel %vm19436_vm11, %v19433_v47, -inf }
0x47f3   : > { %v19459_v27 = vrot.slane %v19458_v58, 4 }
0x47f5   : > { %v19460_v38 = vmax.f32 %v19458_v58, %v19459_v27 }
0x47f7   : > { %v19461_v28 = vrot.slane %v19460_v38, 2 }
0x47f9   : > { %v19462_v59 = vmax.f32 %v19460_v38, %v19461_v28 }
0x47fb   : > { %v19463_v6 = vrot.slane %v19462_v59, 1 }
0x47fd   : > { %v19464_v37 = vmax.f32 %v19462_v59, %v19463_v6 }
0x47ff   : > { %v19468_v39 = vsub.f32 %v19433_v47, %v19464_v37 }
0x4801   : > { %v19475_v31 = vmul.f32 1.442695, %v19468_v39 }
0x4803   : > { %23192 = vpow2.f32 %v19475_v31 }
0x480d   : > { %v23193_v32 = vpop.eup %23192 }
0x480e   : > { %v19498_v51 = vsel %vm19436_vm11, %v23193_v32, 0.0 }
0x480f   : > { %v19499_v40 = vrot.slane %v19498_v51, 4 }
0x4811   : > { %v19500_v7 = vadd.f32 %v19499_v40, %v19498_v51 }
0x4813   : > { %v19501_v57 = vrot.slane %v19500_v7, 2 }
0x4815   : > { %v19502_v12 = vadd.f32 %v19501_v57, %v19500_v7 }
0x4817   : > { %v19503_v13 = vrot.slane %v19502_v12, 1 }
0x4819   : > { %v19504_v45 = vadd.f32 %v19503_v13, %v19502_v12 }
0x481b   : > { %23194 = vrcp.f32 %v19504_v45 }
0x4825   : > { %v23195_v16 = vpop.eup %23194 }
0x4826   : > { %v19512_v30 = vmul.f32 %v23195_v16, %v23193_v32 }
0x4828   : > { %19533 = vperm.xlu1 %22794, %v19512_v30  }
0x4849   : > { %v19519_v1 = vpop.permute.xlu1 %19518 }
0x484a   : > { %v19536_v22 = vsel %vm19515_vm12, %v19519_v1, %v26195_v3 }
0x484b   : > { %19540 = vst [vmem:[%s199_s24] sm:$0x7] %v19536_v22 }
0x486a   : > { %v19529_v55 = vpop.permute.xlu1 %19528 }
0x486b   : > { %v19538_v53 = vsel %vm19515_vm12, %v19529_v55, %v26202_v56 }
0x486c   : > { %19542 = vst [vmem:[%s199_s24 + $0x8] sm:$0x7] %v19538_v53 }
0x486e   : > { %v19524_v0 = vpop.permute.xlu0 %19523 }
0x486f   : > { %v19537_v52 = vsel %vm19515_vm12, %v19524_v0, %v26207_v17 }
0x4870   : > { %19541 = vst [vmem:[%s199_s24 + $0x4] sm:$0x7] %v19537_v52 }
0x48a7   : > { %v19534_v41 = vpop.permute.xlu1 %19533 }
0x48a8   : > { %v19539_v36 = vsel %vm19515_vm12, %v19534_v41, %v19433_v47 }
0x48a9   : > { %19543 = vst [vmem:[%s199_s24 + $0xc] sm:$0x7] %v19539_v36 }
0x48aa PF: > { %s14_s15 = sadd.s32 1, %s23212_s15  }
0x48ab   : > { %p11_p4 = scmp.ge.s32.totalorder %s14_s15, 4  }
0x48ad   :  { %13 = sbr.rel (!%p11_p4) target bundleno = 1 (0x1), region = 66 }

</bundles_post_ra>
